<compile_context>
chip_gen: v6e
topology: v6e:2x2x1
jax: 0.10.0
libtpu: 0.0.40
codegen_flags: <defaults>
</compile_context>

<pallas_src>
import functools

import jax
import jax.numpy as jnp
from jax.experimental import pallas as pl
from jax.experimental.pallas import tpu as pltpu


# ============================================================= fused multi-block kernel

def _conv3x3_bn_relu(x4, w_ref, s_ref, b_ref):
    """3x3 conv (padding=1) + folded eval-mode BN + ReLU on an f32 NHWC value.

    x4    : (NB, H, W, C) f32 value.
    w_ref : (9*C, Cout) bf16 ref, K laid out as (ky, kx, c) row-major.
    s/b   : (1, Cout) f32 refs (folded BN scale / bias).
    Returns (NB, H, W, Cout) f32.
    """
    nb, h, w, c = x4.shape
    cout = w_ref.shape[1]
    m = nb * h * w

    # dx (kernel-column) shifts: one zero-column concatenate per direction, done once.
    if w > 1:
        zc = jnp.zeros((nb, h, 1, c), jnp.float32)
        x_dx = (jnp.concatenate([zc, x4[:, :, :w - 1, :]], axis=2),   # reads column x-1
                x4,                                                    # reads column x
                jnp.concatenate([x4[:, :, 1:, :], zc], axis=2))        # reads column x+1
    else:
        zero = jnp.zeros_like(x4)
        x_dx = (zero, x4, zero)

    zr = jnp.zeros((nb, 1, w, c), jnp.float32)

    def tap(ky, kx):
        v = x_dx[kx]
        if ky == 0:                                                    # reads row y-1
            return (jnp.concatenate([zr, v[:, :h - 1, :, :]], axis=1)
                    if h > 1 else jnp.zeros_like(v))
        if ky == 2:                                                    # reads row y+1
            return (jnp.concatenate([v[:, 1:, :, :], zr], axis=1)
                    if h > 1 else jnp.zeros_like(v))
        return v

    if c >= 128:
        # Deep layers: K = c already saturates the MXU contraction depth -> skip im2col
        # entirely and accumulate 9 matmuls (no 9x activation copy, aligned weight slices).
        y = jnp.zeros((m, cout), jnp.float32)
        for ky in range(3):
            for kx in range(3):
                k = ky * 3 + kx
                y = y + jnp.dot(
                    tap(ky, kx).reshape(m, c).astype(jnp.bfloat16),
                    w_ref[k * c:(k + 1) * c, :],
                    preferred_element_type=jnp.float32)
    else:
        # Shallow layers: lane-dense im2col assembled in registers (single concatenate,
        # no scratch buffer, no lane-partial stores) -> one MXU matmul with K = 9*c.
        col = jnp.concatenate([tap(ky, kx) for ky in range(3) for kx in range(3)],
                              axis=3)
        col = col.reshape(m, 9 * c).astype(jnp.bfloat16)
        y = jnp.dot(col, w_ref[...], preferred_element_type=jnp.float32)

    y = jnp.maximum(y * s_ref[0] + b_ref[0], 0.0)                      # folded BN + ReLU
    return y.reshape(nb, h, w, cout)


def _maxpool2x2(x4):
    nb, h, w, c = x4.shape
    t = x4.reshape(nb * (h // 2), 2, w, c)
    a = jnp.maximum(t[:, 0], t[:, 1])                                  # row pairs (VPU)
    a = a.reshape(nb * (h // 2), w // 2, 2, c)
    return jnp.max(a, axis=2).reshape(nb, h // 2, w // 2, c)           # column pairs


def _stage_kernel(x_ref, *refs, pools):
    """One or more encoder blocks fused in a single grid step.

    refs = 6 params per block (w1, s1, b1, w2, s2, b2), then the output ref.
    Everything between the input load and the output store stays in VMEM/registers.
    """
    o_ref = refs[-1]
    prm = refs[:-1]
    x4 = x_ref[...].astype(jnp.float32)                  # (NB, H, W, Cin)
    for bi, pool in enumerate(pools):
        w1, s1, b1, w2, s2, b2 = prm[6 * bi:6 * bi + 6]
        x4 = _conv3x3_bn_relu(x4, w1, s1, b1)
        x4 = _conv3x3_bn_relu(x4, w2, s2, b2)
        if pool:
            x4 = _maxpool2x2(x4)
    o_ref[...] = x4.astype(o_ref.dtype)


def fused_stage(x, stage, *, fold_batch):
    """Run a list of encoder blocks in one pallas_call.

    x     : (N, H, W, cin) bf16 NHWC activation.
    stage : list of (p_conv1, p_conv2, pool); p_conv* = (w[9*cin, cout] bf16,
            scale[1, cout] f32, bias[1, cout] f32), pool = bool (2x2 maxpool after block).
    fold_batch: process all N batch elements in one grid step (batch folded into the
            matmul M dimension) — used for the small-spatial deep blocks.
    """
    N, H, W, cin = x.shape
    NB = N if fold_batch else 1
    Ho, Wo = H, W
    for (_, _, pool) in stage:
        if pool:
            Ho, Wo = Ho // 2, Wo // 2
    cout = stage[-1][1][0].shape[1]
    pools = tuple(p for (_, _, p) in stage)

    flat_params = []
    in_specs = [pl.BlockSpec((NB, H, W, cin), lambda g: (g, 0, 0, 0))]
    for (p1, p2, _) in stage:
        for prm in (*p1, *p2):
            flat_params.append(prm)
            # Constant block index: weight/scale/bias HBM->VMEM copies are not re-issued
            # across grid steps.  TODO(synk): pipeline_mode=pl.Buffered(1) would also drop
            # the unused second buffer for these on v7x.
            in_specs.append(pl.BlockSpec(prm.shape, lambda g: (0, 0)))

    return pl.pallas_call(
        functools.partial(_stage_kernel, pools=pools),
        out_shape=jax.ShapeDtypeStruct((N, Ho, Wo, cout), jnp.bfloat16),
        grid=(N // NB,),
        in_specs=in_specs,
        out_specs=pl.BlockSpec((NB, Ho, Wo, cout), lambda g: (g, 0, 0, 0)),
        compiler_params=pltpu.CompilerParams(
            dimension_semantics=("parallel",),
            vmem_limit_bytes=48 * 1024 * 1024),
    )(x, *flat_params)


def encoder_reconstructive_forward(x_nchw, params):
    """Mirrors EncoderReconstructive.forward; returns b5 in NCHW (f32).

    Two pallas_calls total: block1 (+mp1) with a parallel batch grid, then blocks 2-5
    fused in a single call with batch folded into the matmul M dimension (their tiny
    activations never leave VMEM)."""
    x = jnp.transpose(x_nchw, (0, 2, 3, 1)).astype(jnp.bfloat16)      # NCHW -> NHWC, bf16
    x = fused_stage(x, [(params[0], params[1], True)], fold_batch=False)   # block1 + mp1
    x = fused_stage(x, [(params[2], params[3], True),                 # block2 + mp3 (=MaxPool2d(2))
                        (params[4], params[5], True),                 # block3 + mp3
                        (params[6], params[7], True),                 # block4 + mp4
                        (params[8], params[9], False)],               # block5 (unpooled)
                    fold_batch=True)
    return jnp.transpose(x, (0, 3, 1, 2)).astype(jnp.float32)         # NHWC -> NCHW


# ======================================= fallback kernel (scratch-based, proven lowering)
# Used only if the value-level concatenate formulation above fails to lower on an older
# Mosaic build; per-block kernels with an f32 halo scratch and 9 accumulated matmuls.

def _block_kernel_v1(x_ref, w1_ref, s1_ref, b1_ref, w2_ref, s2_ref, b2_ref, o_ref,
                     xpad1, xpad2, *, pool):
    _, H, W, cin = x_ref.shape
    cmid = w1_ref.shape[2]
    cout = w2_ref.shape[2]

    def conv(xpad, x_hwc, w_ref, s_ref, b_ref, c_in, c_out):
        xpad[...] = jnp.zeros_like(xpad)
        xpad[1:H + 1, 1:W + 1, :] = x_hwc
        y = jnp.zeros((H * W, c_out), jnp.float32)
        for k in range(9):
            dy, dx = k // 3, k % 3
            win = xpad[dy:dy + H, dx:dx + W, :].reshape(H * W, c_in).astype(jnp.bfloat16)
            y = y + jnp.dot(win, w_ref[k], preferred_element_type=jnp.float32)
        return jnp.maximum(y * s_ref[0] + b_ref[0], 0.0)

    y1 = conv(xpad1, x_ref[0].astype(jnp.float32), w1_ref, s1_ref, b1_ref, cin, cmid)
    y2 = conv(xpad2, y1.reshape(H, W, cmid), w2_ref, s2_ref, b2_ref, cmid, cout)
    y2 = y2.reshape(H, W, cout)
    if pool:
        t = y2.reshape(H // 2, 2, W, cout)
        a = jnp.maximum(t[:, 0], t[:, 1])
        y2 = jnp.max(a.reshape(H // 2, W // 2, 2, cout), axis=2)
    o_ref[0] = y2.astype(o_ref.dtype)


def _block_v1(x, p1, p2, *, pool):
    N, H, W, cin = x.shape
    (w1, s1, b1), (w2, s2, b2) = p1, p2
    cmid, cout = w1.shape[1], w2.shape[1]
    w1r = w1.reshape(9, cin, cmid)
    w2r = w2.reshape(9, cmid, cout)
    Ho, Wo = (H // 2, W // 2) if pool else (H, W)
    return pl.pallas_call(
        functools.partial(_block_kernel_v1, pool=pool),
        out_shape=jax.ShapeDtypeStruct((N, Ho, Wo, cout), jnp.bfloat16),
        grid=(N,),
        in_specs=[
            pl.BlockSpec((1, H, W, cin), lambda n: (n, 0, 0, 0)),
            pl.BlockSpec(w1r.shape, lambda n: (0, 0, 0)),
            pl.BlockSpec(s1.shape, lambda n: (0, 0)),
            pl.BlockSpec(b1.shape, lambda n: (0, 0)),
            pl.BlockSpec(w2r.shape, lambda n: (0, 0, 0)),
            pl.BlockSpec(s2.shape, lambda n: (0, 0)),
            pl.BlockSpec(b2.shape, lambda n: (0, 0)),
        ],
        out_specs=pl.BlockSpec((1, Ho, Wo, cout), lambda n: (n, 0, 0, 0)),
        scratch_shapes=[pltpu.VMEM((H + 2, W + 2, cin), jnp.float32),
                        pltpu.VMEM((H + 2, W + 2, cmid), jnp.float32)],
        compiler_params=pltpu.CompilerParams(dimension_semantics=("parallel",)),
    )(x, w1r, s1, b1, w2r, s2, b2)


def _forward_v1(x_nchw, params):
    x = jnp.transpose(x_nchw, (0, 2, 3, 1)).astype(jnp.bfloat16)
    x = _block_v1(x, params[0], params[1], pool=True)
    x = _block_v1(x, params[2], params[3], pool=True)
    x = _block_v1(x, params[4], params[5], pool=True)
    x = _block_v1(x, params[6], params[7], pool=True)
    x = _block_v1(x, params[8], params[9], pool=False)
    return jnp.transpose(x, (0, 3, 1, 2)).astype(jnp.float32)


# ============================================================================== params

def _make_conv_bn_params(key, cin, cout):
    """Synthetic params for Conv2d(cin, cout, 3, padding=1, bias=True) + BatchNorm2d(cout)
       in eval mode, folded into (w_packed[9*cin, cout] bf16, scale[1, cout], bias[1, cout])."""
    kw, kb, kg, kbt, km, kv = jax.random.split(key, 6)
    fan_in = cin * 9
    w = jax.random.normal(kw, (3, 3, cin, cout), jnp.float32) * jnp.sqrt(2.0 / fan_in)
    b_conv = jax.random.normal(kb, (cout,), jnp.float32) * 0.01
    gamma = 1.0 + 0.1 * jax.random.normal(kg, (cout,), jnp.float32)
    beta = 0.1 * jax.random.normal(kbt, (cout,), jnp.float32)
    running_mean = 0.1 * jax.random.normal(km, (cout,), jnp.float32)
    running_var = jnp.abs(1.0 + 0.1 * jax.random.normal(kv, (cout,), jnp.float32))
    eps = 1e-5
    scale = gamma / jnp.sqrt(running_var + eps)
    bias = (b_conv - running_mean) * scale + beta
    # (3,3,cin,cout) -> (9*cin, cout): K index = (ky*3+kx)*cin + c, matching the tap layout.
    w_packed = w.reshape(9 * cin, cout).astype(jnp.bfloat16)
    return w_packed, scale.reshape(1, cout), bias.reshape(1, cout)


def build_encoder_params(key, in_channels, base_width):
    bw = base_width
    dims = [
        (in_channels, bw), (bw, bw),                       # block1
        (bw, bw * 2), (bw * 2, bw * 2),                    # block2
        (bw * 2, bw * 4), (bw * 4, bw * 4),                # block3
        (bw * 4, bw * 8), (bw * 8, bw * 8),                # block4
        (bw * 8, bw * 8), (bw * 8, bw * 8),                # block5
    ]
    keys = jax.random.split(key, len(dims))
    return [_make_conv_bn_params(k, ci, co) for k, (ci, co) in zip(keys, dims)]


# =========================================================================== reference

def _reference_forward(x_nchw, params):
    """Plain-JAX f32 reference (eval-mode BN folded, same weights)."""
    x = jnp.transpose(x_nchw, (0, 2, 3, 1)).astype(jnp.float32)

    def conv_bn_relu(x, p):
        wp, s, b = p
        cin = wp.shape[0] // 9
        w4 = wp.astype(jnp.float32).reshape(3, 3, cin, -1)
        y = jax.lax.conv_general_dilated(
            x, w4, window_strides=(1, 1), padding="SAME",
            dimension_numbers=("NHWC", "HWIO", "NHWC"),
            precision=jax.lax.Precision.HIGHEST)
        return jnp.maximum(y * s[0] + b[0], 0.0)

    def pool(x):
        n, h, w, c = x.shape
        return jnp.max(x.reshape(n, h // 2, 2, w // 2, 2, c), axis=(2, 4))

    for i in range(4):
        x = conv_bn_relu(x, params[2 * i])
        x = conv_bn_relu(x, params[2 * i + 1])
        x = pool(x)
    x = conv_bn_relu(x, params[8])
    x = conv_bn_relu(x, params[9])
    return jnp.transpose(x, (0, 3, 1, 2))


# ================================================================================ main

if __name__ == "__main__":
    key = jax.random.PRNGKey(0)
    k_x, k_p = jax.random.split(key)

    batch, in_channels, base_width, spatial = 2, 4, 8, 16
    x = jax.random.normal(k_x, (batch, in_channels, spatial, spatial), jnp.float32)
    params = build_encoder_params(k_p, in_channels, base_width)

    expected = (batch, base_width * 8, spatial // 16, spatial // 16)   # (2, 64, 1, 1)
    ref = _reference_forward(x, params)

    def _check(out):
        assert out.shape == expected, (out.shape, expected)
        err = float(jnp.max(jnp.abs(out.astype(jnp.float32) - ref)))
        scale = float(jnp.max(jnp.abs(ref))) + 1e-6
        # Loose tolerance: catches layout bugs (O(1) relative error) while tolerating the
        # bf16 activation/weight rounding (~1-3%).
        assert err / scale < 0.25, (err, scale)

    try:
        out = jax.block_until_ready(encoder_reconstructive_forward(x, params))
        _check(out)
    except Exception:
        # TODO(synk): fallback (scratch-based im2col variant) for Mosaic builds lacking
        # unaligned-concatenate lowering; keeps the kernel runnable everywhere.
        out = jax.block_until_ready(_forward_v1(x, params))
        _check(out)

    assert bool(jnp.all(jnp.isfinite(out)))
    print("KERNEL_OK")
</pallas_src>

<mosaic_0001>
module attributes {stable_mosaic.version = 11 : i64} {
  func.func @_stage_kernel(%arg0: i32, %arg1: memref<1x16x16x4xbf16, #tpu.memory_space<vmem>>, %arg2: memref<36x8xbf16, #tpu.memory_space<vmem>>, %arg3: memref<1x8xf32, #tpu.memory_space<vmem>>, %arg4: memref<1x8xf32, #tpu.memory_space<vmem>>, %arg5: memref<72x8xbf16, #tpu.memory_space<vmem>>, %arg6: memref<1x8xf32, #tpu.memory_space<vmem>>, %arg7: memref<1x8xf32, #tpu.memory_space<vmem>>, %arg8: memref<1x8x8x8xbf16, #tpu.memory_space<vmem>>) attributes {dimension_semantics = [#tpu.dimension_semantics<parallel>], iteration_bounds = array<i64: 2>, scalar_prefetch = 0 : i64, scratch_operands = 0 : i64, tpu.core_type = #tpu.core_type<tc>, window_params = [{transform_indices = @transform_0, window_bounds = array<i64: 1, 16, 16, 4>}, {pipeline_mode = #tpu.pipeline_mode<synchronous>, transform_indices = @transform_1, window_bounds = array<i64: 36, 8>}, {pipeline_mode = #tpu.pipeline_mode<synchronous>, transform_indices = @transform_2, window_bounds = array<i64: 1, 8>}, {pipeline_mode = #tpu.pipeline_mode<synchronous>, transform_indices = @transform_3, window_bounds = array<i64: 1, 8>}, {pipeline_mode = #tpu.pipeline_mode<synchronous>, transform_indices = @transform_4, window_bounds = array<i64: 72, 8>}, {pipeline_mode = #tpu.pipeline_mode<synchronous>, transform_indices = @transform_5, window_bounds = array<i64: 1, 8>}, {pipeline_mode = #tpu.pipeline_mode<synchronous>, transform_indices = @transform_6, window_bounds = array<i64: 1, 8>}, {transform_indices = @transform_7, window_bounds = array<i64: 1, 8, 8, 8>}]} {
    %c0 = arith.constant 0 : index
    %c0_0 = arith.constant 0 : index
    %c0_1 = arith.constant 0 : index
    %c0_2 = arith.constant 0 : index
    %0 = vector.load %arg1[%c0, %c0_0, %c0_1, %c0_2] : memref<1x16x16x4xbf16, #tpu.memory_space<vmem>>, vector<1x16x16x4xbf16>
    %1 = arith.extf %0 : vector<1x16x16x4xbf16> to vector<1x16x16x4xf32>
    %cst = arith.constant 0.000000e+00 : f32
    %2 = vector.broadcast %cst : f32 to vector<1x16x1x4xf32>
    %3 = vector.extract_strided_slice %1 {offsets = [0, 0, 0, 0], sizes = [1, 16, 15, 4], strides = [1, 1, 1, 1]} : vector<1x16x16x4xf32> to vector<1x16x15x4xf32>
    %4 = tpu.concatenate %2, %3 in 2 : vector<1x16x1x4xf32>, vector<1x16x15x4xf32> -> vector<1x16x16x4xf32>
    %5 = vector.extract_strided_slice %1 {offsets = [0, 0, 1, 0], sizes = [1, 16, 15, 4], strides = [1, 1, 1, 1]} : vector<1x16x16x4xf32> to vector<1x16x15x4xf32>
    %6 = tpu.concatenate %5, %2 in 2 : vector<1x16x15x4xf32>, vector<1x16x1x4xf32> -> vector<1x16x16x4xf32>
    %cst_3 = arith.constant 0.000000e+00 : f32
    %7 = vector.broadcast %cst_3 : f32 to vector<1x1x16x4xf32>
    %8 = vector.extract_strided_slice %4 {offsets = [0, 0, 0, 0], sizes = [1, 15, 16, 4], strides = [1, 1, 1, 1]} : vector<1x16x16x4xf32> to vector<1x15x16x4xf32>
    %9 = tpu.concatenate %7, %8 in 1 : vector<1x1x16x4xf32>, vector<1x15x16x4xf32> -> vector<1x16x16x4xf32>
    %10 = vector.extract_strided_slice %1 {offsets = [0, 0, 0, 0], sizes = [1, 15, 16, 4], strides = [1, 1, 1, 1]} : vector<1x16x16x4xf32> to vector<1x15x16x4xf32>
    %11 = tpu.concatenate %7, %10 in 1 : vector<1x1x16x4xf32>, vector<1x15x16x4xf32> -> vector<1x16x16x4xf32>
    %12 = vector.extract_strided_slice %6 {offsets = [0, 0, 0, 0], sizes = [1, 15, 16, 4], strides = [1, 1, 1, 1]} : vector<1x16x16x4xf32> to vector<1x15x16x4xf32>
    %13 = tpu.concatenate %7, %12 in 1 : vector<1x1x16x4xf32>, vector<1x15x16x4xf32> -> vector<1x16x16x4xf32>
    %14 = vector.extract_strided_slice %4 {offsets = [0, 1, 0, 0], sizes = [1, 15, 16, 4], strides = [1, 1, 1, 1]} : vector<1x16x16x4xf32> to vector<1x15x16x4xf32>
    %15 = tpu.concatenate %14, %7 in 1 : vector<1x15x16x4xf32>, vector<1x1x16x4xf32> -> vector<1x16x16x4xf32>
    %16 = vector.extract_strided_slice %1 {offsets = [0, 1, 0, 0], sizes = [1, 15, 16, 4], strides = [1, 1, 1, 1]} : vector<1x16x16x4xf32> to vector<1x15x16x4xf32>
    %17 = tpu.concatenate %16, %7 in 1 : vector<1x15x16x4xf32>, vector<1x1x16x4xf32> -> vector<1x16x16x4xf32>
    %18 = vector.extract_strided_slice %6 {offsets = [0, 1, 0, 0], sizes = [1, 15, 16, 4], strides = [1, 1, 1, 1]} : vector<1x16x16x4xf32> to vector<1x15x16x4xf32>
    %19 = tpu.concatenate %18, %7 in 1 : vector<1x15x16x4xf32>, vector<1x1x16x4xf32> -> vector<1x16x16x4xf32>
    %20 = tpu.concatenate %9, %11, %13, %4, %1, %6, %15, %17, %19 in 3 : vector<1x16x16x4xf32>, vector<1x16x16x4xf32>, vector<1x16x16x4xf32>, vector<1x16x16x4xf32>, vector<1x16x16x4xf32>, vector<1x16x16x4xf32>, vector<1x16x16x4xf32>, vector<1x16x16x4xf32>, vector<1x16x16x4xf32> -> vector<1x16x16x36xf32>
    %21 = vector.shape_cast %20 : vector<1x16x16x36xf32> to vector<256x36xf32>
    %22 = arith.truncf %21 : vector<256x36xf32> to vector<256x36xbf16>
    %c0_4 = arith.constant 0 : index
    %c0_5 = arith.constant 0 : index
    %23 = vector.load %arg2[%c0_4, %c0_5] : memref<36x8xbf16, #tpu.memory_space<vmem>>, vector<36x8xbf16>
    %cst_6 = arith.constant dense<0.000000e+00> : vector<256x8xf32>
    %24 = tpu.matmul %22, %23, %cst_6 {dimension_numbers = #tpu.dot_dimension_numbers<[1], [0], [0], [1], [0, 0, 1, 1], [], []>} : vector<256x36xbf16>, vector<36x8xbf16>, vector<256x8xf32> -> vector<256x8xf32>
    %c0_7 = arith.constant 0 : index
    %c0_8 = arith.constant 0 : index
    %25 = vector.load %arg3[%c0_7, %c0_8] : memref<1x8xf32, #tpu.memory_space<vmem>>, vector<1x8xf32>
    %26 = vector.shape_cast %25 : vector<1x8xf32> to vector<8xf32>
    %27 = vector.shape_cast %26 : vector<8xf32> to vector<1x8xf32>
    %28 = vector.broadcast %27 : vector<1x8xf32> to vector<256x8xf32>
    %29 = arith.mulf %24, %28 : vector<256x8xf32>
    %c0_9 = arith.constant 0 : index
    %c0_10 = arith.constant 0 : index
    %30 = vector.load %arg4[%c0_9, %c0_10] : memref<1x8xf32, #tpu.memory_space<vmem>>, vector<1x8xf32>
    %31 = vector.shape_cast %30 : vector<1x8xf32> to vector<8xf32>
    %32 = vector.shape_cast %31 : vector<8xf32> to vector<1x8xf32>
    %33 = vector.broadcast %32 : vector<1x8xf32> to vector<256x8xf32>
    %34 = arith.addf %29, %33 : vector<256x8xf32>
    %cst_11 = arith.constant 0.000000e+00 : f32
    %35 = vector.broadcast %cst_11 : f32 to vector<256x8xf32>
    %36 = arith.maximumf %34, %35 : vector<256x8xf32>
    %37 = vector.shape_cast %36 : vector<256x8xf32> to vector<1x16x16x8xf32>
    %cst_12 = arith.constant 0.000000e+00 : f32
    %38 = vector.broadcast %cst_12 : f32 to vector<1x16x1x8xf32>
    %39 = vector.extract_strided_slice %37 {offsets = [0, 0, 0, 0], sizes = [1, 16, 15, 8], strides = [1, 1, 1, 1]} : vector<1x16x16x8xf32> to vector<1x16x15x8xf32>
    %40 = tpu.concatenate %38, %39 in 2 : vector<1x16x1x8xf32>, vector<1x16x15x8xf32> -> vector<1x16x16x8xf32>
    %41 = vector.extract_strided_slice %37 {offsets = [0, 0, 1, 0], sizes = [1, 16, 15, 8], strides = [1, 1, 1, 1]} : vector<1x16x16x8xf32> to vector<1x16x15x8xf32>
    %42 = tpu.concatenate %41, %38 in 2 : vector<1x16x15x8xf32>, vector<1x16x1x8xf32> -> vector<1x16x16x8xf32>
    %cst_13 = arith.constant 0.000000e+00 : f32
    %43 = vector.broadcast %cst_13 : f32 to vector<1x1x16x8xf32>
    %44 = vector.extract_strided_slice %40 {offsets = [0, 0, 0, 0], sizes = [1, 15, 16, 8], strides = [1, 1, 1, 1]} : vector<1x16x16x8xf32> to vector<1x15x16x8xf32>
    %45 = tpu.concatenate %43, %44 in 1 : vector<1x1x16x8xf32>, vector<1x15x16x8xf32> -> vector<1x16x16x8xf32>
    %46 = vector.extract_strided_slice %37 {offsets = [0, 0, 0, 0], sizes = [1, 15, 16, 8], strides = [1, 1, 1, 1]} : vector<1x16x16x8xf32> to vector<1x15x16x8xf32>
    %47 = tpu.concatenate %43, %46 in 1 : vector<1x1x16x8xf32>, vector<1x15x16x8xf32> -> vector<1x16x16x8xf32>
    %48 = vector.extract_strided_slice %42 {offsets = [0, 0, 0, 0], sizes = [1, 15, 16, 8], strides = [1, 1, 1, 1]} : vector<1x16x16x8xf32> to vector<1x15x16x8xf32>
    %49 = tpu.concatenate %43, %48 in 1 : vector<1x1x16x8xf32>, vector<1x15x16x8xf32> -> vector<1x16x16x8xf32>
    %50 = vector.extract_strided_slice %40 {offsets = [0, 1, 0, 0], sizes = [1, 15, 16, 8], strides = [1, 1, 1, 1]} : vector<1x16x16x8xf32> to vector<1x15x16x8xf32>
    %51 = tpu.concatenate %50, %43 in 1 : vector<1x15x16x8xf32>, vector<1x1x16x8xf32> -> vector<1x16x16x8xf32>
    %52 = vector.extract_strided_slice %37 {offsets = [0, 1, 0, 0], sizes = [1, 15, 16, 8], strides = [1, 1, 1, 1]} : vector<1x16x16x8xf32> to vector<1x15x16x8xf32>
    %53 = tpu.concatenate %52, %43 in 1 : vector<1x15x16x8xf32>, vector<1x1x16x8xf32> -> vector<1x16x16x8xf32>
    %54 = vector.extract_strided_slice %42 {offsets = [0, 1, 0, 0], sizes = [1, 15, 16, 8], strides = [1, 1, 1, 1]} : vector<1x16x16x8xf32> to vector<1x15x16x8xf32>
    %55 = tpu.concatenate %54, %43 in 1 : vector<1x15x16x8xf32>, vector<1x1x16x8xf32> -> vector<1x16x16x8xf32>
    %56 = tpu.concatenate %45, %47, %49, %40, %37, %42, %51, %53, %55 in 3 : vector<1x16x16x8xf32>, vector<1x16x16x8xf32>, vector<1x16x16x8xf32>, vector<1x16x16x8xf32>, vector<1x16x16x8xf32>, vector<1x16x16x8xf32>, vector<1x16x16x8xf32>, vector<1x16x16x8xf32>, vector<1x16x16x8xf32> -> vector<1x16x16x72xf32>
    %57 = vector.shape_cast %56 : vector<1x16x16x72xf32> to vector<256x72xf32>
    %58 = arith.truncf %57 : vector<256x72xf32> to vector<256x72xbf16>
    %c0_14 = arith.constant 0 : index
    %c0_15 = arith.constant 0 : index
    %59 = vector.load %arg5[%c0_14, %c0_15] : memref<72x8xbf16, #tpu.memory_space<vmem>>, vector<72x8xbf16>
    %cst_16 = arith.constant dense<0.000000e+00> : vector<256x8xf32>
    %60 = tpu.matmul %58, %59, %cst_16 {dimension_numbers = #tpu.dot_dimension_numbers<[1], [0], [0], [1], [0, 0, 1, 1], [], []>} : vector<256x72xbf16>, vector<72x8xbf16>, vector<256x8xf32> -> vector<256x8xf32>
    %c0_17 = arith.constant 0 : index
    %c0_18 = arith.constant 0 : index
    %61 = vector.load %arg6[%c0_17, %c0_18] : memref<1x8xf32, #tpu.memory_space<vmem>>, vector<1x8xf32>
    %62 = vector.shape_cast %61 : vector<1x8xf32> to vector<8xf32>
    %63 = vector.shape_cast %62 : vector<8xf32> to vector<1x8xf32>
    %64 = vector.broadcast %63 : vector<1x8xf32> to vector<256x8xf32>
    %65 = arith.mulf %60, %64 : vector<256x8xf32>
    %c0_19 = arith.constant 0 : index
    %c0_20 = arith.constant 0 : index
    %66 = vector.load %arg7[%c0_19, %c0_20] : memref<1x8xf32, #tpu.memory_space<vmem>>, vector<1x8xf32>
    %67 = vector.shape_cast %66 : vector<1x8xf32> to vector<8xf32>
    %68 = vector.shape_cast %67 : vector<8xf32> to vector<1x8xf32>
    %69 = vector.broadcast %68 : vector<1x8xf32> to vector<256x8xf32>
    %70 = arith.addf %65, %69 : vector<256x8xf32>
    %cst_21 = arith.constant 0.000000e+00 : f32
    %71 = vector.broadcast %cst_21 : f32 to vector<256x8xf32>
    %72 = arith.maximumf %70, %71 : vector<256x8xf32>
    %73 = vector.shape_cast %72 : vector<256x8xf32> to vector<1x16x16x8xf32>
    %74 = vector.shape_cast %73 : vector<1x16x16x8xf32> to vector<8x2x16x8xf32>
    %75 = vector.extract_strided_slice %74 {offsets = [0, 0, 0, 0], sizes = [8, 1, 16, 8], strides = [1, 1, 1, 1]} : vector<8x2x16x8xf32> to vector<8x1x16x8xf32>
    %76 = vector.shape_cast %75 : vector<8x1x16x8xf32> to vector<8x16x8xf32>
    %77 = vector.extract_strided_slice %74 {offsets = [0, 1, 0, 0], sizes = [8, 1, 16, 8], strides = [1, 1, 1, 1]} : vector<8x2x16x8xf32> to vector<8x1x16x8xf32>
    %78 = vector.shape_cast %77 : vector<8x1x16x8xf32> to vector<8x16x8xf32>
    %79 = arith.maximumf %76, %78 : vector<8x16x8xf32>
    %80 = vector.shape_cast %79 : vector<8x16x8xf32> to vector<8x8x2x8xf32>
    %cst_22 = arith.constant dense<0xFF800000> : vector<8x8x8xf32>
    %81 = vector.multi_reduction <maximumf>, %80, %cst_22 [2] : vector<8x8x2x8xf32> to vector<8x8x8xf32>
    %82 = vector.shape_cast %81 : vector<8x8x8xf32> to vector<1x8x8x8xf32>
    %83 = arith.truncf %82 : vector<1x8x8x8xf32> to vector<1x8x8x8xbf16>
    %c0_23 = arith.constant 0 : index
    %c0_24 = arith.constant 0 : index
    %c0_25 = arith.constant 0 : index
    %c0_26 = arith.constant 0 : index
    %84 = vector.load %arg8[%c0_23, %c0_24, %c0_25, %c0_26] : memref<1x8x8x8xbf16, #tpu.memory_space<vmem>>, vector<1x8x8x8xbf16>
    tpu.vector_store %arg8[%c0_23, %c0_24, %c0_25, %c0_26], %83 {strides = array<i32>} : memref<1x8x8x8xbf16, #tpu.memory_space<vmem>>, vector<1x8x8x8xbf16>,
    return
  }
  func.func @transform_0(%arg0: i32) -> (i32, i32, i32, i32) {
    %c0_i32 = arith.constant 0 : i32
    %c0_i32_0 = arith.constant 0 : i32
    %c0_i32_1 = arith.constant 0 : i32
    %c0_i32_2 = arith.constant 0 : i32
    return %arg0, %c0_i32, %c0_i32_0, %c0_i32_1 : i32, i32, i32, i32
  }
  func.func @transform_1(%arg0: i32) -> (i32, i32) {
    %c0_i32 = arith.constant 0 : i32
    %c0_i32_0 = arith.constant 0 : i32
    %c0_i32_1 = arith.constant 0 : i32
    return %c0_i32, %c0_i32_0 : i32, i32
  }
  func.func @transform_2(%arg0: i32) -> (i32, i32) {
    %c0_i32 = arith.constant 0 : i32
    %c0_i32_0 = arith.constant 0 : i32
    %c0_i32_1 = arith.constant 0 : i32
    return %c0_i32, %c0_i32_0 : i32, i32
  }
  func.func @transform_3(%arg0: i32) -> (i32, i32) {
    %c0_i32 = arith.constant 0 : i32
    %c0_i32_0 = arith.constant 0 : i32
    %c0_i32_1 = arith.constant 0 : i32
    return %c0_i32, %c0_i32_0 : i32, i32
  }
  func.func @transform_4(%arg0: i32) -> (i32, i32) {
    %c0_i32 = arith.constant 0 : i32
    %c0_i32_0 = arith.constant 0 : i32
    %c0_i32_1 = arith.constant 0 : i32
    return %c0_i32, %c0_i32_0 : i32, i32
  }
  func.func @transform_5(%arg0: i32) -> (i32, i32) {
    %c0_i32 = arith.constant 0 : i32
    %c0_i32_0 = arith.constant 0 : i32
    %c0_i32_1 = arith.constant 0 : i32
    return %c0_i32, %c0_i32_0 : i32, i32
  }
  func.func @transform_6(%arg0: i32) -> (i32, i32) {
    %c0_i32 = arith.constant 0 : i32
    %c0_i32_0 = arith.constant 0 : i32
    %c0_i32_1 = arith.constant 0 : i32
    return %c0_i32, %c0_i32_0 : i32, i32
  }
  func.func @transform_7(%arg0: i32) -> (i32, i32, i32, i32) {
    %c0_i32 = arith.constant 0 : i32
    %c0_i32_0 = arith.constant 0 : i32
    %c0_i32_1 = arith.constant 0 : i32
    %c0_i32_2 = arith.constant 0 : i32
    return %arg0, %c0_i32, %c0_i32_0, %c0_i32_1 : i32, i32, i32, i32
  }
}

module attributes {stable_mosaic.version = 11 : i64} {
  func.func @_block_kernel_v1(%arg0: i32, %arg1: memref<1x16x16x4xbf16, #tpu.memory_space<vmem>>, %arg2: memref<9x4x8xbf16, #tpu.memory_space<vmem>>, %arg3: memref<1x8xf32, #tpu.memory_space<vmem>>, %arg4: memref<1x8xf32, #tpu.memory_space<vmem>>, %arg5: memref<9x8x8xbf16, #tpu.memory_space<vmem>>, %arg6: memref<1x8xf32, #tpu.memory_space<vmem>>, %arg7: memref<1x8xf32, #tpu.memory_space<vmem>>, %arg8: memref<1x8x8x8xbf16, #tpu.memory_space<vmem>>, %arg9: memref<18x18x4xf32, #tpu.memory_space<vmem>>, %arg10: memref<18x18x8xf32, #tpu.memory_space<vmem>>) attributes {dimension_semantics = [#tpu.dimension_semantics<parallel>], iteration_bounds = array<i64: 2>, scalar_prefetch = 0 : i64, scratch_operands = 2 : i64, tpu.core_type = #tpu.core_type<tc>, window_params = [{transform_indices = @transform_0, window_bounds = array<i64: 1, 16, 16, 4>}, {pipeline_mode = #tpu.pipeline_mode<synchronous>, transform_indices = @transform_1, window_bounds = array<i64: 9, 4, 8>}, {pipeline_mode = #tpu.pipeline_mode<synchronous>, transform_indices = @transform_2, window_bounds = array<i64: 1, 8>}, {pipeline_mode = #tpu.pipeline_mode<synchronous>, transform_indices = @transform_3, window_bounds = array<i64: 1, 8>}, {pipeline_mode = #tpu.pipeline_mode<synchronous>, transform_indices = @transform_4, window_bounds = array<i64: 9, 8, 8>}, {pipeline_mode = #tpu.pipeline_mode<synchronous>, transform_indices = @transform_5, window_bounds = array<i64: 1, 8>}, {pipeline_mode = #tpu.pipeline_mode<synchronous>, transform_indices = @transform_6, window_bounds = array<i64: 1, 8>}, {transform_indices = @transform_7, window_bounds = array<i64: 1, 8, 8, 8>}]} {
    %c0 = arith.constant 0 : index
    %c0_0 = arith.constant 0 : index
    %c0_1 = arith.constant 0 : index
    %c0_2 = arith.constant 0 : index
    %0 = vector.load %arg1[%c0, %c0_0, %c0_1, %c0_2] : memref<1x16x16x4xbf16, #tpu.memory_space<vmem>>, vector<1x16x16x4xbf16>
    %1 = vector.shape_cast %0 : vector<1x16x16x4xbf16> to vector<16x16x4xbf16>
    %2 = arith.extf %1 : vector<16x16x4xbf16> to vector<16x16x4xf32>
    %cst = arith.constant 0.000000e+00 : f32
    %3 = vector.broadcast %cst : f32 to vector<18x18x4xf32>
    %c0_3 = arith.constant 0 : index
    %c0_4 = arith.constant 0 : index
    %c0_5 = arith.constant 0 : index
    %4 = vector.load %arg9[%c0_3, %c0_4, %c0_5] : memref<18x18x4xf32, #tpu.memory_space<vmem>>, vector<18x18x4xf32>
    tpu.vector_store %arg9[%c0_3, %c0_4, %c0_5], %3 {strides = array<i32>} : memref<18x18x4xf32, #tpu.memory_space<vmem>>, vector<18x18x4xf32>,
    %c1 = arith.constant 1 : index
    %c1_6 = arith.constant 1 : index
    %c0_7 = arith.constant 0 : index
    %5 = vector.load %arg9[%c1, %c1_6, %c0_7] : memref<18x18x4xf32, #tpu.memory_space<vmem>>, vector<16x16x4xf32>
    tpu.vector_store %arg9[%c1, %c1_6, %c0_7], %2 {strides = array<i32>} : memref<18x18x4xf32, #tpu.memory_space<vmem>>, vector<16x16x4xf32>,
    %cst_8 = arith.constant 0.000000e+00 : f32
    %6 = vector.broadcast %cst_8 : f32 to vector<256x8xf32>
    %c0_9 = arith.constant 0 : index
    %c0_10 = arith.constant 0 : index
    %c0_11 = arith.constant 0 : index
    %7 = vector.load %arg9[%c0_9, %c0_10, %c0_11] : memref<18x18x4xf32, #tpu.memory_space<vmem>>, vector<16x16x4xf32>
    %8 = vector.shape_cast %7 : vector<16x16x4xf32> to vector<256x4xf32>
    %9 = arith.truncf %8 : vector<256x4xf32> to vector<256x4xbf16>
    %c0_12 = arith.constant 0 : index
    %c0_13 = arith.constant 0 : index
    %c0_14 = arith.constant 0 : index
    %10 = vector.load %arg2[%c0_12, %c0_13, %c0_14] : memref<9x4x8xbf16, #tpu.memory_space<vmem>>, vector<1x4x8xbf16>
    %11 = vector.shape_cast %10 : vector<1x4x8xbf16> to vector<4x8xbf16>
    %cst_15 = arith.constant dense<0.000000e+00> : vector<256x8xf32>
    %12 = tpu.matmul %9, %11, %cst_15 {dimension_numbers = #tpu.dot_dimension_numbers<[1], [0], [0], [1], [0, 0, 1, 1], [], []>} : vector<256x4xbf16>, vector<4x8xbf16>, vector<256x8xf32> -> vector<256x8xf32>
    %13 = arith.addf %6, %12 : vector<256x8xf32>
    %c0_16 = arith.constant 0 : index
    %c1_17 = arith.constant 1 : index
    %c0_18 = arith.constant 0 : index
    %14 = vector.load %arg9[%c0_16, %c1_17, %c0_18] : memref<18x18x4xf32, #tpu.memory_space<vmem>>, vector<16x16x4xf32>
    %15 = vector.shape_cast %14 : vector<16x16x4xf32> to vector<256x4xf32>
    %16 = arith.truncf %15 : vector<256x4xf32> to vector<256x4xbf16>
    %c1_19 = arith.constant 1 : index
    %c0_20 = arith.constant 0 : index
    %c0_21 = arith.constant 0 : index
    %17 = vector.load %arg2[%c1_19, %c0_20, %c0_21] : memref<9x4x8xbf16, #tpu.memory_space<vmem>>, vector<1x4x8xbf16>
    %18 = vector.shape_cast %17 : vector<1x4x8xbf16> to vector<4x8xbf16>
    %cst_22 = arith.constant dense<0.000000e+00> : vector<256x8xf32>
    %19 = tpu.matmul %16, %18, %cst_22 {dimension_numbers = #tpu.dot_dimension_numbers<[1], [0], [0], [1], [0, 0, 1, 1], [], []>} : vector<256x4xbf16>, vector<4x8xbf16>, vector<256x8xf32> -> vector<256x8xf32>
    %20 = arith.addf %13, %19 : vector<256x8xf32>
    %c0_23 = arith.constant 0 : index
    %c2 = arith.constant 2 : index
    %c0_24 = arith.constant 0 : index
    %21 = vector.load %arg9[%c0_23, %c2, %c0_24] : memref<18x18x4xf32, #tpu.memory_space<vmem>>, vector<16x16x4xf32>
    %22 = vector.shape_cast %21 : vector<16x16x4xf32> to vector<256x4xf32>
    %23 = arith.truncf %22 : vector<256x4xf32> to vector<256x4xbf16>
    %c2_25 = arith.constant 2 : index
    %c0_26 = arith.constant 0 : index
    %c0_27 = arith.constant 0 : index
    %24 = vector.load %arg2[%c2_25, %c0_26, %c0_27] : memref<9x4x8xbf16, #tpu.memory_space<vmem>>, vector<1x4x8xbf16>
    %25 = vector.shape_cast %24 : vector<1x4x8xbf16> to vector<4x8xbf16>
    %cst_28 = arith.constant dense<0.000000e+00> : vector<256x8xf32>
    %26 = tpu.matmul %23, %25, %cst_28 {dimension_numbers = #tpu.dot_dimension_numbers<[1], [0], [0], [1], [0, 0, 1, 1], [], []>} : vector<256x4xbf16>, vector<4x8xbf16>, vector<256x8xf32> -> vector<256x8xf32>
    %27 = arith.addf %20, %26 : vector<256x8xf32>
    %c1_29 = arith.constant 1 : index
    %c0_30 = arith.constant 0 : index
    %c0_31 = arith.constant 0 : index
    %28 = vector.load %arg9[%c1_29, %c0_30, %c0_31] : memref<18x18x4xf32, #tpu.memory_space<vmem>>, vector<16x16x4xf32>
    %29 = vector.shape_cast %28 : vector<16x16x4xf32> to vector<256x4xf32>
    %30 = arith.truncf %29 : vector<256x4xf32> to vector<256x4xbf16>
    %c3 = arith.constant 3 : index
    %c0_32 = arith.constant 0 : index
    %c0_33 = arith.constant 0 : index
    %31 = vector.load %arg2[%c3, %c0_32, %c0_33] : memref<9x4x8xbf16, #tpu.memory_space<vmem>>, vector<1x4x8xbf16>
    %32 = vector.shape_cast %31 : vector<1x4x8xbf16> to vector<4x8xbf16>
    %cst_34 = arith.constant dense<0.000000e+00> : vector<256x8xf32>
    %33 = tpu.matmul %30, %32, %cst_34 {dimension_numbers = #tpu.dot_dimension_numbers<[1], [0], [0], [1], [0, 0, 1, 1], [], []>} : vector<256x4xbf16>, vector<4x8xbf16>, vector<256x8xf32> -> vector<256x8xf32>
    %34 = arith.addf %27, %33 : vector<256x8xf32>
    %c1_35 = arith.constant 1 : index
    %c1_36 = arith.constant 1 : index
    %c0_37 = arith.constant 0 : index
    %35 = vector.load %arg9[%c1_35, %c1_36, %c0_37] : memref<18x18x4xf32, #tpu.memory_space<vmem>>, vector<16x16x4xf32>
    %36 = vector.shape_cast %35 : vector<16x16x4xf32> to vector<256x4xf32>
    %37 = arith.truncf %36 : vector<256x4xf32> to vector<256x4xbf16>
    %c4 = arith.constant 4 : index
    %c0_38 = arith.constant 0 : index
    %c0_39 = arith.constant 0 : index
    %38 = vector.load %arg2[%c4, %c0_38, %c0_39] : memref<9x4x8xbf16, #tpu.memory_space<vmem>>, vector<1x4x8xbf16>
    %39 = vector.shape_cast %38 : vector<1x4x8xbf16> to vector<4x8xbf16>
    %cst_40 = arith.constant dense<0.000000e+00> : vector<256x8xf32>
    %40 = tpu.matmul %37, %39, %cst_40 {dimension_numbers = #tpu.dot_dimension_numbers<[1], [0], [0], [1], [0, 0, 1, 1], [], []>} : vector<256x4xbf16>, vector<4x8xbf16>, vector<256x8xf32> -> vector<256x8xf32>
    %41 = arith.addf %34, %40 : vector<256x8xf32>
    %c1_41 = arith.constant 1 : index
    %c2_42 = arith.constant 2 : index
    %c0_43 = arith.constant 0 : index
    %42 = vector.load %arg9[%c1_41, %c2_42, %c0_43] : memref<18x18x4xf32, #tpu.memory_space<vmem>>, vector<16x16x4xf32>
    %43 = vector.shape_cast %42 : vector<16x16x4xf32> to vector<256x4xf32>
    %44 = arith.truncf %43 : vector<256x4xf32> to vector<256x4xbf16>
    %c5 = arith.constant 5 : index
    %c0_44 = arith.constant 0 : index
    %c0_45 = arith.constant 0 : index
    %45 = vector.load %arg2[%c5, %c0_44, %c0_45] : memref<9x4x8xbf16, #tpu.memory_space<vmem>>, vector<1x4x8xbf16>
    %46 = vector.shape_cast %45 : vector<1x4x8xbf16> to vector<4x8xbf16>
    %cst_46 = arith.constant dense<0.000000e+00> : vector<256x8xf32>
    %47 = tpu.matmul %44, %46, %cst_46 {dimension_numbers = #tpu.dot_dimension_numbers<[1], [0], [0], [1], [0, 0, 1, 1], [], []>} : vector<256x4xbf16>, vector<4x8xbf16>, vector<256x8xf32> -> vector<256x8xf32>
    %48 = arith.addf %41, %47 : vector<256x8xf32>
    %c2_47 = arith.constant 2 : index
    %c0_48 = arith.constant 0 : index
    %c0_49 = arith.constant 0 : index
    %49 = vector.load %arg9[%c2_47, %c0_48, %c0_49] : memref<18x18x4xf32, #tpu.memory_space<vmem>>, vector<16x16x4xf32>
    %50 = vector.shape_cast %49 : vector<16x16x4xf32> to vector<256x4xf32>
    %51 = arith.truncf %50 : vector<256x4xf32> to vector<256x4xbf16>
    %c6 = arith.constant 6 : index
    %c0_50 = arith.constant 0 : index
    %c0_51 = arith.constant 0 : index
    %52 = vector.load %arg2[%c6, %c0_50, %c0_51] : memref<9x4x8xbf16, #tpu.memory_space<vmem>>, vector<1x4x8xbf16>
    %53 = vector.shape_cast %52 : vector<1x4x8xbf16> to vector<4x8xbf16>
    %cst_52 = arith.constant dense<0.000000e+00> : vector<256x8xf32>
    %54 = tpu.matmul %51, %53, %cst_52 {dimension_numbers = #tpu.dot_dimension_numbers<[1], [0], [0], [1], [0, 0, 1, 1], [], []>} : vector<256x4xbf16>, vector<4x8xbf16>, vector<256x8xf32> -> vector<256x8xf32>
    %55 = arith.addf %48, %54 : vector<256x8xf32>
    %c2_53 = arith.constant 2 : index
    %c1_54 = arith.constant 1 : index
    %c0_55 = arith.constant 0 : index
    %56 = vector.load %arg9[%c2_53, %c1_54, %c0_55] : memref<18x18x4xf32, #tpu.memory_space<vmem>>, vector<16x16x4xf32>
    %57 = vector.shape_cast %56 : vector<16x16x4xf32> to vector<256x4xf32>
    %58 = arith.truncf %57 : vector<256x4xf32> to vector<256x4xbf16>
    %c7 = arith.constant 7 : index
    %c0_56 = arith.constant 0 : index
    %c0_57 = arith.constant 0 : index
    %59 = vector.load %arg2[%c7, %c0_56, %c0_57] : memref<9x4x8xbf16, #tpu.memory_space<vmem>>, vector<1x4x8xbf16>
    %60 = vector.shape_cast %59 : vector<1x4x8xbf16> to vector<4x8xbf16>
    %cst_58 = arith.constant dense<0.000000e+00> : vector<256x8xf32>
    %61 = tpu.matmul %58, %60, %cst_58 {dimension_numbers = #tpu.dot_dimension_numbers<[1], [0], [0], [1], [0, 0, 1, 1], [], []>} : vector<256x4xbf16>, vector<4x8xbf16>, vector<256x8xf32> -> vector<256x8xf32>
    %62 = arith.addf %55, %61 : vector<256x8xf32>
    %c2_59 = arith.constant 2 : index
    %c2_60 = arith.constant 2 : index
    %c0_61 = arith.constant 0 : index
    %63 = vector.load %arg9[%c2_59, %c2_60, %c0_61] : memref<18x18x4xf32, #tpu.memory_space<vmem>>, vector<16x16x4xf32>
    %64 = vector.shape_cast %63 : vector<16x16x4xf32> to vector<256x4xf32>
    %65 = arith.truncf %64 : vector<256x4xf32> to vector<256x4xbf16>
    %c8 = arith.constant 8 : index
    %c0_62 = arith.constant 0 : index
    %c0_63 = arith.constant 0 : index
    %66 = vector.load %arg2[%c8, %c0_62, %c0_63] : memref<9x4x8xbf16, #tpu.memory_space<vmem>>, vector<1x4x8xbf16>
    %67 = vector.shape_cast %66 : vector<1x4x8xbf16> to vector<4x8xbf16>
    %cst_64 = arith.constant dense<0.000000e+00> : vector<256x8xf32>
    %68 = tpu.matmul %65, %67, %cst_64 {dimension_numbers = #tpu.dot_dimension_numbers<[1], [0], [0], [1], [0, 0, 1, 1], [], []>} : vector<256x4xbf16>, vector<4x8xbf16>, vector<256x8xf32> -> vector<256x8xf32>
    %69 = arith.addf %62, %68 : vector<256x8xf32>
    %c0_65 = arith.constant 0 : index
    %c0_66 = arith.constant 0 : index
    %70 = vector.load %arg3[%c0_65, %c0_66] : memref<1x8xf32, #tpu.memory_space<vmem>>, vector<1x8xf32>
    %71 = vector.shape_cast %70 : vector<1x8xf32> to vector<8xf32>
    %72 = vector.shape_cast %71 : vector<8xf32> to vector<1x8xf32>
    %73 = vector.broadcast %72 : vector<1x8xf32> to vector<256x8xf32>
    %74 = arith.mulf %69, %73 : vector<256x8xf32>
    %c0_67 = arith.constant 0 : index
    %c0_68 = arith.constant 0 : index
    %75 = vector.load %arg4[%c0_67, %c0_68] : memref<1x8xf32, #tpu.memory_space<vmem>>, vector<1x8xf32>
    %76 = vector.shape_cast %75 : vector<1x8xf32> to vector<8xf32>
    %77 = vector.shape_cast %76 : vector<8xf32> to vector<1x8xf32>
    %78 = vector.broadcast %77 : vector<1x8xf32> to vector<256x8xf32>
    %79 = arith.addf %74, %78 : vector<256x8xf32>
    %cst_69 = arith.constant 0.000000e+00 : f32
    %80 = vector.broadcast %cst_69 : f32 to vector<256x8xf32>
    %81 = arith.maximumf %79, %80 : vector<256x8xf32>
    %82 = vector.shape_cast %81 : vector<256x8xf32> to vector<16x16x8xf32>
    %cst_70 = arith.constant 0.000000e+00 : f32
    %83 = vector.broadcast %cst_70 : f32 to vector<18x18x8xf32>
    %c0_71 = arith.constant 0 : index
    %c0_72 = arith.constant 0 : index
    %c0_73 = arith.constant 0 : index
    %84 = vector.load %arg10[%c0_71, %c0_72, %c0_73] : memref<18x18x8xf32, #tpu.memory_space<vmem>>, vector<18x18x8xf32>
    tpu.vector_store %arg10[%c0_71, %c0_72, %c0_73], %83 {strides = array<i32>} : memref<18x18x8xf32, #tpu.memory_space<vmem>>, vector<18x18x8xf32>,
    %c1_74 = arith.constant 1 : index
    %c1_75 = arith.constant 1 : index
    %c0_76 = arith.constant 0 : index
    %85 = vector.load %arg10[%c1_74, %c1_75, %c0_76] : memref<18x18x8xf32, #tpu.memory_space<vmem>>, vector<16x16x8xf32>
    tpu.vector_store %arg10[%c1_74, %c1_75, %c0_76], %82 {strides = array<i32>} : memref<18x18x8xf32, #tpu.memory_space<vmem>>, vector<16x16x8xf32>,
    %cst_77 = arith.constant 0.000000e+00 : f32
    %86 = vector.broadcast %cst_77 : f32 to vector<256x8xf32>
    %c0_78 = arith.constant 0 : index
    %c0_79 = arith.constant 0 : index
    %c0_80 = arith.constant 0 : index
    %87 = vector.load %arg10[%c0_78, %c0_79, %c0_80] : memref<18x18x8xf32, #tpu.memory_space<vmem>>, vector<16x16x8xf32>
    %88 = vector.shape_cast %87 : vector<16x16x8xf32> to vector<256x8xf32>
    %89 = arith.truncf %88 : vector<256x8xf32> to vector<256x8xbf16>
    %c0_81 = arith.constant 0 : index
    %c0_82 = arith.constant 0 : index
    %c0_83 = arith.constant 0 : index
    %90 = vector.load %arg5[%c0_81, %c0_82, %c0_83] : memref<9x8x8xbf16, #tpu.memory_space<vmem>>, vector<1x8x8xbf16>
    %91 = vector.shape_cast %90 : vector<1x8x8xbf16> to vector<8x8xbf16>
    %cst_84 = arith.constant dense<0.000000e+00> : vector<256x8xf32>
    %92 = tpu.matmul %89, %91, %cst_84 {dimension_numbers = #tpu.dot_dimension_numbers<[1], [0], [0], [1], [0, 0, 1, 1], [], []>} : vector<256x8xbf16>, vector<8x8xbf16>, vector<256x8xf32> -> vector<256x8xf32>
    %93 = arith.addf %86, %92 : vector<256x8xf32>
    %c0_85 = arith.constant 0 : index
    %c1_86 = arith.constant 1 : index
    %c0_87 = arith.constant 0 : index
    %94 = vector.load %arg10[%c0_85, %c1_86, %c0_87] : memref<18x18x8xf32, #tpu.memory_space<vmem>>, vector<16x16x8xf32>
    %95 = vector.shape_cast %94 : vector<16x16x8xf32> to vector<256x8xf32>
    %96 = arith.truncf %95 : vector<256x8xf32> to vector<256x8xbf16>
    %c1_88 = arith.constant 1 : index
    %c0_89 = arith.constant 0 : index
    %c0_90 = arith.constant 0 : index
    %97 = vector.load %arg5[%c1_88, %c0_89, %c0_90] : memref<9x8x8xbf16, #tpu.memory_space<vmem>>, vector<1x8x8xbf16>
    %98 = vector.shape_cast %97 : vector<1x8x8xbf16> to vector<8x8xbf16>
    %cst_91 = arith.constant dense<0.000000e+00> : vector<256x8xf32>
    %99 = tpu.matmul %96, %98, %cst_91 {dimension_numbers = #tpu.dot_dimension_numbers<[1], [0], [0], [1], [0, 0, 1, 1], [], []>} : vector<256x8xbf16>, vector<8x8xbf16>, vector<256x8xf32> -> vector<256x8xf32>
    %100 = arith.addf %93, %99 : vector<256x8xf32>
    %c0_92 = arith.constant 0 : index
    %c2_93 = arith.constant 2 : index
    %c0_94 = arith.constant 0 : index
    %101 = vector.load %arg10[%c0_92, %c2_93, %c0_94] : memref<18x18x8xf32, #tpu.memory_space<vmem>>, vector<16x16x8xf32>
    %102 = vector.shape_cast %101 : vector<16x16x8xf32> to vector<256x8xf32>
    %103 = arith.truncf %102 : vector<256x8xf32> to vector<256x8xbf16>
    %c2_95 = arith.constant 2 : index
    %c0_96 = arith.constant 0 : index
    %c0_97 = arith.constant 0 : index
    %104 = vector.load %arg5[%c2_95, %c0_96, %c0_97] : memref<9x8x8xbf16, #tpu.memory_space<vmem>>, vector<1x8x8xbf16>
    %105 = vector.shape_cast %104 : vector<1x8x8xbf16> to vector<8x8xbf16>
    %cst_98 = arith.constant dense<0.000000e+00> : vector<256x8xf32>
    %106 = tpu.matmul %103, %105, %cst_98 {dimension_numbers = #tpu.dot_dimension_numbers<[1], [0], [0], [1], [0, 0, 1, 1], [], []>} : vector<256x8xbf16>, vector<8x8xbf16>, vector<256x8xf32> -> vector<256x8xf32>
    %107 = arith.addf %100, %106 : vector<256x8xf32>
    %c1_99 = arith.constant 1 : index
    %c0_100 = arith.constant 0 : index
    %c0_101 = arith.constant 0 : index
    %108 = vector.load %arg10[%c1_99, %c0_100, %c0_101] : memref<18x18x8xf32, #tpu.memory_space<vmem>>, vector<16x16x8xf32>
    %109 = vector.shape_cast %108 : vector<16x16x8xf32> to vector<256x8xf32>
    %110 = arith.truncf %109 : vector<256x8xf32> to vector<256x8xbf16>
    %c3_102 = arith.constant 3 : index
    %c0_103 = arith.constant 0 : index
    %c0_104 = arith.constant 0 : index
    %111 = vector.load %arg5[%c3_102, %c0_103, %c0_104] : memref<9x8x8xbf16, #tpu.memory_space<vmem>>, vector<1x8x8xbf16>
    %112 = vector.shape_cast %111 : vector<1x8x8xbf16> to vector<8x8xbf16>
    %cst_105 = arith.constant dense<0.000000e+00> : vector<256x8xf32>
    %113 = tpu.matmul %110, %112, %cst_105 {dimension_numbers = #tpu.dot_dimension_numbers<[1], [0], [0], [1], [0, 0, 1, 1], [], []>} : vector<256x8xbf16>, vector<8x8xbf16>, vector<256x8xf32> -> vector<256x8xf32>
    %114 = arith.addf %107, %113 : vector<256x8xf32>
    %c1_106 = arith.constant 1 : index
    %c1_107 = arith.constant 1 : index
    %c0_108 = arith.constant 0 : index
    %115 = vector.load %arg10[%c1_106, %c1_107, %c0_108] : memref<18x18x8xf32, #tpu.memory_space<vmem>>, vector<16x16x8xf32>
    %116 = vector.shape_cast %115 : vector<16x16x8xf32> to vector<256x8xf32>
    %117 = arith.truncf %116 : vector<256x8xf32> to vector<256x8xbf16>
    %c4_109 = arith.constant 4 : index
    %c0_110 = arith.constant 0 : index
    %c0_111 = arith.constant 0 : index
    %118 = vector.load %arg5[%c4_109, %c0_110, %c0_111] : memref<9x8x8xbf16, #tpu.memory_space<vmem>>, vector<1x8x8xbf16>
    %119 = vector.shape_cast %118 : vector<1x8x8xbf16> to vector<8x8xbf16>
    %cst_112 = arith.constant dense<0.000000e+00> : vector<256x8xf32>
    %120 = tpu.matmul %117, %119, %cst_112 {dimension_numbers = #tpu.dot_dimension_numbers<[1], [0], [0], [1], [0, 0, 1, 1], [], []>} : vector<256x8xbf16>, vector<8x8xbf16>, vector<256x8xf32> -> vector<256x8xf32>
    %121 = arith.addf %114, %120 : vector<256x8xf32>
    %c1_113 = arith.constant 1 : index
    %c2_114 = arith.constant 2 : index
    %c0_115 = arith.constant 0 : index
    %122 = vector.load %arg10[%c1_113, %c2_114, %c0_115] : memref<18x18x8xf32, #tpu.memory_space<vmem>>, vector<16x16x8xf32>
    %123 = vector.shape_cast %122 : vector<16x16x8xf32> to vector<256x8xf32>
    %124 = arith.truncf %123 : vector<256x8xf32> to vector<256x8xbf16>
    %c5_116 = arith.constant 5 : index
    %c0_117 = arith.constant 0 : index
    %c0_118 = arith.constant 0 : index
    %125 = vector.load %arg5[%c5_116, %c0_117, %c0_118] : memref<9x8x8xbf16, #tpu.memory_space<vmem>>, vector<1x8x8xbf16>
    %126 = vector.shape_cast %125 : vector<1x8x8xbf16> to vector<8x8xbf16>
    %cst_119 = arith.constant dense<0.000000e+00> : vector<256x8xf32>
    %127 = tpu.matmul %124, %126, %cst_119 {dimension_numbers = #tpu.dot_dimension_numbers<[1], [0], [0], [1], [0, 0, 1, 1], [], []>} : vector<256x8xbf16>, vector<8x8xbf16>, vector<256x8xf32> -> vector<256x8xf32>
    %128 = arith.addf %121, %127 : vector<256x8xf32>
    %c2_120 = arith.constant 2 : index
    %c0_121 = arith.constant 0 : index
    %c0_122 = arith.constant 0 : index
    %129 = vector.load %arg10[%c2_120, %c0_121, %c0_122] : memref<18x18x8xf32, #tpu.memory_space<vmem>>, vector<16x16x8xf32>
    %130 = vector.shape_cast %129 : vector<16x16x8xf32> to vector<256x8xf32>
    %131 = arith.truncf %130 : vector<256x8xf32> to vector<256x8xbf16>
    %c6_123 = arith.constant 6 : index
    %c0_124 = arith.constant 0 : index
    %c0_125 = arith.constant 0 : index
    %132 = vector.load %arg5[%c6_123, %c0_124, %c0_125] : memref<9x8x8xbf16, #tpu.memory_space<vmem>>, vector<1x8x8xbf16>
    %133 = vector.shape_cast %132 : vector<1x8x8xbf16> to vector<8x8xbf16>
    %cst_126 = arith.constant dense<0.000000e+00> : vector<256x8xf32>
    %134 = tpu.matmul %131, %133, %cst_126 {dimension_numbers = #tpu.dot_dimension_numbers<[1], [0], [0], [1], [0, 0, 1, 1], [], []>} : vector<256x8xbf16>, vector<8x8xbf16>, vector<256x8xf32> -> vector<256x8xf32>
    %135 = arith.addf %128, %134 : vector<256x8xf32>
    %c2_127 = arith.constant 2 : index
    %c1_128 = arith.constant 1 : index
    %c0_129 = arith.constant 0 : index
    %136 = vector.load %arg10[%c2_127, %c1_128, %c0_129] : memref<18x18x8xf32, #tpu.memory_space<vmem>>, vector<16x16x8xf32>
    %137 = vector.shape_cast %136 : vector<16x16x8xf32> to vector<256x8xf32>
    %138 = arith.truncf %137 : vector<256x8xf32> to vector<256x8xbf16>
    %c7_130 = arith.constant 7 : index
    %c0_131 = arith.constant 0 : index
    %c0_132 = arith.constant 0 : index
    %139 = vector.load %arg5[%c7_130, %c0_131, %c0_132] : memref<9x8x8xbf16, #tpu.memory_space<vmem>>, vector<1x8x8xbf16>
    %140 = vector.shape_cast %139 : vector<1x8x8xbf16> to vector<8x8xbf16>
    %cst_133 = arith.constant dense<0.000000e+00> : vector<256x8xf32>
    %141 = tpu.matmul %138, %140, %cst_133 {dimension_numbers = #tpu.dot_dimension_numbers<[1], [0], [0], [1], [0, 0, 1, 1], [], []>} : vector<256x8xbf16>, vector<8x8xbf16>, vector<256x8xf32> -> vector<256x8xf32>
    %142 = arith.addf %135, %141 : vector<256x8xf32>
    %c2_134 = arith.constant 2 : index
    %c2_135 = arith.constant 2 : index
    %c0_136 = arith.constant 0 : index
    %143 = vector.load %arg10[%c2_134, %c2_135, %c0_136] : memref<18x18x8xf32, #tpu.memory_space<vmem>>, vector<16x16x8xf32>
    %144 = vector.shape_cast %143 : vector<16x16x8xf32> to vector<256x8xf32>
    %145 = arith.truncf %144 : vector<256x8xf32> to vector<256x8xbf16>
    %c8_137 = arith.constant 8 : index
    %c0_138 = arith.constant 0 : index
    %c0_139 = arith.constant 0 : index
    %146 = vector.load %arg5[%c8_137, %c0_138, %c0_139] : memref<9x8x8xbf16, #tpu.memory_space<vmem>>, vector<1x8x8xbf16>
    %147 = vector.shape_cast %146 : vector<1x8x8xbf16> to vector<8x8xbf16>
    %cst_140 = arith.constant dense<0.000000e+00> : vector<256x8xf32>
    %148 = tpu.matmul %145, %147, %cst_140 {dimension_numbers = #tpu.dot_dimension_numbers<[1], [0], [0], [1], [0, 0, 1, 1], [], []>} : vector<256x8xbf16>, vector<8x8xbf16>, vector<256x8xf32> -> vector<256x8xf32>
    %149 = arith.addf %142, %148 : vector<256x8xf32>
    %c0_141 = arith.constant 0 : index
    %c0_142 = arith.constant 0 : index
    %150 = vector.load %arg6[%c0_141, %c0_142] : memref<1x8xf32, #tpu.memory_space<vmem>>, vector<1x8xf32>
    %151 = vector.shape_cast %150 : vector<1x8xf32> to vector<8xf32>
    %152 = vector.shape_cast %151 : vector<8xf32> to vector<1x8xf32>
    %153 = vector.broadcast %152 : vector<1x8xf32> to vector<256x8xf32>
    %154 = arith.mulf %149, %153 : vector<256x8xf32>
    %c0_143 = arith.constant 0 : index
    %c0_144 = arith.constant 0 : index
    %155 = vector.load %arg7[%c0_143, %c0_144] : memref<1x8xf32, #tpu.memory_space<vmem>>, vector<1x8xf32>
    %156 = vector.shape_cast %155 : vector<1x8xf32> to vector<8xf32>
    %157 = vector.shape_cast %156 : vector<8xf32> to vector<1x8xf32>
    %158 = vector.broadcast %157 : vector<1x8xf32> to vector<256x8xf32>
    %159 = arith.addf %154, %158 : vector<256x8xf32>
    %cst_145 = arith.constant 0.000000e+00 : f32
    %160 = vector.broadcast %cst_145 : f32 to vector<256x8xf32>
    %161 = arith.maximumf %159, %160 : vector<256x8xf32>
    %162 = vector.shape_cast %161 : vector<256x8xf32> to vector<16x16x8xf32>
    %163 = vector.shape_cast %162 : vector<16x16x8xf32> to vector<8x2x16x8xf32>
    %164 = vector.extract_strided_slice %163 {offsets = [0, 0, 0, 0], sizes = [8, 1, 16, 8], strides = [1, 1, 1, 1]} : vector<8x2x16x8xf32> to vector<8x1x16x8xf32>
    %165 = vector.shape_cast %164 : vector<8x1x16x8xf32> to vector<8x16x8xf32>
    %166 = vector.extract_strided_slice %163 {offsets = [0, 1, 0, 0], sizes = [8, 1, 16, 8], strides = [1, 1, 1, 1]} : vector<8x2x16x8xf32> to vector<8x1x16x8xf32>
    %167 = vector.shape_cast %166 : vector<8x1x16x8xf32> to vector<8x16x8xf32>
    %168 = arith.maximumf %165, %167 : vector<8x16x8xf32>
    %169 = vector.shape_cast %168 : vector<8x16x8xf32> to vector<8x8x2x8xf32>
    %cst_146 = arith.constant dense<0xFF800000> : vector<8x8x8xf32>
    %170 = vector.multi_reduction <maximumf>, %169, %cst_146 [2] : vector<8x8x2x8xf32> to vector<8x8x8xf32>
    %171 = arith.truncf %170 : vector<8x8x8xf32> to vector<8x8x8xbf16>
    %c0_147 = arith.constant 0 : index
    %c0_148 = arith.constant 0 : index
    %c0_149 = arith.constant 0 : index
    %c0_150 = arith.constant 0 : index
    %172 = vector.load %arg8[%c0_147, %c0_148, %c0_149, %c0_150] : memref<1x8x8x8xbf16, #tpu.memory_space<vmem>>, vector<1x8x8x8xbf16>
    %173 = vector.shape_cast %172 : vector<1x8x8x8xbf16> to vector<8x8x8xbf16>
    %174 = vector.shape_cast %171 : vector<8x8x8xbf16> to vector<1x8x8x8xbf16>
    tpu.vector_store %arg8[%c0_147, %c0_148, %c0_149, %c0_150], %174 {strides = array<i32>} : memref<1x8x8x8xbf16, #tpu.memory_space<vmem>>, vector<1x8x8x8xbf16>,
    return
  }
  func.func @transform_0(%arg0: i32) -> (i32, i32, i32, i32) {
    %c0_i32 = arith.constant 0 : i32
    %c0_i32_0 = arith.constant 0 : i32
    %c0_i32_1 = arith.constant 0 : i32
    %c0_i32_2 = arith.constant 0 : i32
    return %arg0, %c0_i32, %c0_i32_0, %c0_i32_1 : i32, i32, i32, i32
  }
  func.func @transform_1(%arg0: i32) -> (i32, i32, i32) {
    %c0_i32 = arith.constant 0 : i32
    %c0_i32_0 = arith.constant 0 : i32
    %c0_i32_1 = arith.constant 0 : i32
    %c0_i32_2 = arith.constant 0 : i32
    return %c0_i32, %c0_i32_0, %c0_i32_1 : i32, i32, i32
  }
  func.func @transform_2(%arg0: i32) -> (i32, i32) {
    %c0_i32 = arith.constant 0 : i32
    %c0_i32_0 = arith.constant 0 : i32
    %c0_i32_1 = arith.constant 0 : i32
    return %c0_i32, %c0_i32_0 : i32, i32
  }
  func.func @transform_3(%arg0: i32) -> (i32, i32) {
    %c0_i32 = arith.constant 0 : i32
    %c0_i32_0 = arith.constant 0 : i32
    %c0_i32_1 = arith.constant 0 : i32
    return %c0_i32, %c0_i32_0 : i32, i32
  }
  func.func @transform_4(%arg0: i32) -> (i32, i32, i32) {
    %c0_i32 = arith.constant 0 : i32
    %c0_i32_0 = arith.constant 0 : i32
    %c0_i32_1 = arith.constant 0 : i32
    %c0_i32_2 = arith.constant 0 : i32
    return %c0_i32, %c0_i32_0, %c0_i32_1 : i32, i32, i32
  }
  func.func @transform_5(%arg0: i32) -> (i32, i32) {
    %c0_i32 = arith.constant 0 : i32
    %c0_i32_0 = arith.constant 0 : i32
    %c0_i32_1 = arith.constant 0 : i32
    return %c0_i32, %c0_i32_0 : i32, i32
  }
  func.func @transform_6(%arg0: i32) -> (i32, i32) {
    %c0_i32 = arith.constant 0 : i32
    %c0_i32_0 = arith.constant 0 : i32
    %c0_i32_1 = arith.constant 0 : i32
    return %c0_i32, %c0_i32_0 : i32, i32
  }
  func.func @transform_7(%arg0: i32) -> (i32, i32, i32, i32) {
    %c0_i32 = arith.constant 0 : i32
    %c0_i32_0 = arith.constant 0 : i32
    %c0_i32_1 = arith.constant 0 : i32
    %c0_i32_2 = arith.constant 0 : i32
    return %arg0, %c0_i32, %c0_i32_0, %c0_i32_1 : i32, i32, i32, i32
  }
}

</mosaic_0001>

<bundles_post_ra>
// kernel: tpu_custom_call.1
= control target key start
LH: loop header
LB: loop body
LE: loop exit
PB: predicated region body
PF: predicated region fallthrough
CT: control target
= control target key end

     0   :  { %12 = vsyncpa [#allocation3], 0  ;;  %s10239_s0 = inlined_call_operand.vmem [shape: bf16[2,16,16,4], index: 0, kind: input, shape index: {}]   ;;  %s10240_s1 = inlined_call_operand.vmem [shape: bf16[36,8], index: 1, kind: input, shape index: {}]   ;;  %s10241_s2 = inlined_call_operand.vmem [shape: f32[1,8], index: 2, kind: input, shape index: {}]   ;;  %s10242_s3 = inlined_call_operand.vmem [shape: f32[1,8], index: 3, kind: input, shape index: {}]   ;;  %s10243_s4 = inlined_call_operand.vmem [shape: bf16[72,8], index: 4, kind: input, shape index: {}]   ;;  %s10244_s5 = inlined_call_operand.vmem [shape: f32[1,8], index: 5, kind: input, shape index: {}]   ;;  %s10245_s6 = inlined_call_operand.vmem [shape: f32[1,8], index: 6, kind: input, shape index: {}]   ;;  %s10246_s7 = inlined_call_operand.hbm [shape: bf16[2,8,8,8], index: 7, kind: output, shape index: {}]  }
   0x1   :  { %14 = vsyncpa [#allocation3 + $0x1], 0  ;;  %s6682_s24 = smov 0   ;;  %s6684_s25 = smov 0  }
   0x2   :  { %s6686_s26 = smov 0   ;;  %s6688_s27 = smov 0  }
   0x3 LB: > { %s6703_s28 = sadd.s32 4294967295, %s6625_s27   ;;  %s4883_s29 = sadd.s32 4294967294, %s6625_s27   ;;  %s6625_s27 = sphi %s6688_s27, %s10766_s27   ;;  %s6621_s26 = sphi %s6686_s26, %s10765_s26   ;;  %s6617_s25 = sphi %s6684_s25, %s10764_s25   ;;  %s6613_s24 = sphi %s6682_s24, %s10763_s24  }
   0x4   : > { %s6707_s30 = sadd.s32 1, %s6625_s27   ;;  %s179_s8 = sadd.s32 1, %s6621_s26 }
   0x5   : > { %s176_s9 = ssub.s32 %s6625_s27, %s6707_s30  ;;  %p189_p0 = scmp.ne.s32.totalorder %s6621_s26, %s6617_s25 }
   0x6   : > { %p177_p1 = scmp.eq.s32.totalorder %s176_s9, 0  ;;  %p190_p2 = scmp.eq.s32.totalorder %s6703_s28, 1 }
   0x7   : > { %p195_p3 = scmp.ne.s32.totalorder %s6617_s25, %s6613_s24  ;;  %p196_p4 = scmp.eq.s32.totalorder %s4883_s29, 1 }
   0x8   : > { %s6718_s10 = scalar_select %p177_p1, %s6621_s26, %s179_s8  }
   0x9   : > { %p6720_p5 = por %p190_p2, %p189_p0  ;;  %p6724_p6 = por %p196_p4, %p195_p3 }
   0xa   : > { %p4886_p7 = scmp.ge.s32.totalorder %s6625_s27, 1  ;;  %p240_p8 = scmp.lt.s32.totalorder %s6625_s27, 3 }
   0xc   : > { %p241_p9 = pnand %p4886_p7, %p240_p8 }
   0xe   : > { %244 = sbr.rel (%p241_p9) target bundleno = 1384 (0x568), region = 48 }
  0x13   : > { %p272_p10 = scmp.lt.s32.totalorder %s6703_s28, 1  ;;  %s6627_s18 = smov 4   ;;  %vm470_vm0 = vcmask 1046528   ;;  %vm374_vm1 = vcmask 1040384   ;;  %vm1684_vm2 = vcmask 1041408   ;;  %vm1337_vm3 = vcmask 31744  }
  0x14   : > { %s6629_s19 = smov 8   ;;  %s6630_s20 = smov 12   ;;  %vm1369_vm4 = vcmask 64512   ;;  %vm1401_vm5 = vcmask 97280   ;;  %vm1434_vm6 = vcmask 130048   ;;  %vm1467_vm7 = vcmask 162816  }
  0x15   : > { %s273_s13 = scalar_select %p272_p10, %s6703_s28, 1  ;;  %vm1500_vm8 = vcmask 195584   ;;  %vm1533_vm9 = vcmask 228352   ;;  %vm1566_vm10 = vcmask 261120   ;;  %vm1635_vm11 = vcmask 293888  }
  0x16   : > { %s6631_s21 = smov 16   ;;  %s6632_s22 = smov 20   ;;  %vm3307_vm12 = vcmask 1043456   ;;  %vm3074_vm13 = vcmask 326656   ;;  %vm3107_vm14 = vcmask 392192   ;;  %vm3140_vm15 = vcmask 457728  }
  0x17   : > { %s5003_s14 = sshll.u32 %s273_s13, 7  ;;  %s6633_s23 = smov 24  }
  0x18   : > { %s6735_s17 = scalar_lea.vmem %s10239_s0, %s5003_s14  ;;  %s6634_s16 = smov 28  }
  0x19   : > { %v5133_v0 = vld [vmem:[%s6735_s17 + $0x8] sm:$0xff]   ;;  %v5134_v1 = vld [vmem:[%s6735_s17 + $0x10] sm:$0xff]   ;;  %v5070_v2 = vld [vmem:[%s6735_s17] sm:$0xff]   ;;  %s6636_s9 = smov 56   ;;  %s6637_s13 = smov 48  }
  0x1a   : > { %v6740_v3 = vunpack.c.h.bf16 %v5133_v0  ;;  %v6742_v4 = vunpack.c.l.bf16 %v5134_v1  ;;  %v6744_v5 = vunpack.c.h.bf16 %v5134_v1  ;;  %v5135_v6 = vld [vmem:[%s6735_s17 + $0x18] sm:$0xff]   ;;  %v6747_v7 = vunpack.c.l.bf16 %v5133_v0  ;;  %v5136_v11 = vld [vmem:[%s6735_s17 + $0x20] sm:$0xff]   ;;  %v5137_v12 = vld [vmem:[%s6735_s17 + $0x28] sm:$0xff]   ;;  %s6638_s14 = smov 40   ;;  %s6639_s15 = smov 64  }
  0x1b   : > { %v6749_v8 = vunpack.c.l.bf16 %v5070_v2  ;;  %v6751_v9 = vunpack.c.h.bf16 %v5070_v2  ;;  %v6753_v10 = vunpack.c.l.bf16 %v5135_v6  ;;  %v6762_v15 = vunpack.c.h.bf16 %v5136_v11  ;;  %v5138_v20 = vld [vmem:[%s6735_s17 + $0x30] sm:$0xff]   ;;  %v5139_v21 = vld [vmem:[%s6735_s17 + $0x38] sm:$0xff]   ;;  %v5140_v28 = vld [vmem:[%s6735_s17 + $0x40] sm:$0xff]  }
  0x1c   : > { %v5333_v13 = vpack.i.bf16 %v6742_v4, %v6740_v3  ;;  %v6764_v16 = vunpack.c.l.bf16 %v5137_v12  ;;  %v6770_v18 = vunpack.c.h.bf16 %v5135_v6  ;;  %v6772_v19 = vunpack.c.l.bf16 %v5136_v11  ;;  %v5141_v29 = vld [vmem:[%s6735_s17 + $0x48] sm:$0xff]   ;;  %v5142_v36 = vld [vmem:[%s6735_s17 + $0x50] sm:$0xff]   ;;  %v5143_v37 = vld [vmem:[%s6735_s17 + $0x58] sm:$0xff]  }
  0x1d   : > { %v5338_v14 = vpack.i.bf16 %v6753_v10, %v6744_v5  ;;  %5324 = vrot.lane.b32.xlu0 %v6749_v8, %s6627_s18  ;;  %v5328_v17 = vpack.i.bf16 %v6747_v7, %v6751_v9  ;;  %v6779_v23 = vunpack.c.h.bf16 %v5138_v20  ;;  %v6781_v24 = vunpack.c.l.bf16 %v5139_v21  ;;  %v5144_v44 = vld [vmem:[%s6735_s17 + $0x60] sm:$0xff]   ;;  %v5145_v45 = vld [vmem:[%s6735_s17 + $0x68] sm:$0xff]   ;;  %v5146_v52 = vld [vmem:[%s6735_s17 + $0x70] sm:$0xff]  }
  0x1e   : > { %5334 = vrot.lane.b32.xlu1 %v5333_v13, %s6627_s18  ;;  %v5348_v22 = vpack.i.bf16 %v6764_v16, %v6762_v15  ;;  %v5343_v25 = vpack.i.bf16 %v6772_v19, %v6770_v18  ;;  %v6786_v26 = vunpack.c.h.bf16 %v5137_v12  ;;  %v6788_v27 = vunpack.c.l.bf16 %v5138_v20 }
  0x1f   : > { %v5358_v30 = vpack.i.bf16 %v6781_v24, %v6779_v23  ;;  %v6795_v31 = vunpack.c.h.bf16 %v5140_v28  ;;  %v6797_v32 = vunpack.c.l.bf16 %v5141_v29  ;;  %v6802_v34 = vunpack.c.h.bf16 %v5139_v21 }
  0x20   : > { %v5353_v33 = vpack.i.bf16 %v6788_v27, %v6786_v26  ;;  %v6804_v35 = vunpack.c.l.bf16 %v5140_v28  ;;  %v6811_v39 = vunpack.c.h.bf16 %v5142_v36  ;;  %v6813_v40 = vunpack.c.l.bf16 %v5143_v37 }
  0x21   : > { %5329 = vrot.lane.b32.xlu0 %v5328_v17, %s6627_s18  ;;  %v5368_v38 = vpack.i.bf16 %v6797_v32, %v6795_v31  ;;  %v6818_v42 = vunpack.c.h.bf16 %v5141_v29  ;;  %v6820_v43 = vunpack.c.l.bf16 %v5142_v36  ;;  %v6827_v47 = vunpack.c.h.bf16 %v5144_v44 }
  0x22   : > { %5339 = vrot.lane.b32.xlu1 %v5338_v14, %s6627_s18  ;;  %v5363_v41 = vpack.i.bf16 %v6804_v35, %v6802_v34  ;;  %v5378_v46 = vpack.i.bf16 %v6813_v40, %v6811_v39  ;;  %v6829_v48 = vunpack.c.l.bf16 %v5145_v45  ;;  %v6834_v50 = vunpack.c.h.bf16 %v5143_v37 }
  0x23   : > { %10393 = vst [vmem:[#allocation5_spill] sm:$0xff] %v6827_v47  ;;  %v5373_v49 = vpack.i.bf16 %v6820_v43, %v6818_v42  ;;  %v6836_v51 = vunpack.c.l.bf16 %v5144_v44  ;;  %v472_v54 = vrot.slane %v6751_v9, 1  ;;  %v474_v55 = vrot.slane %v6747_v7, 1 }
  0x24   : > { %10394 = vst [vmem:[#allocation6_spill] sm:$0xff] %v6829_v48  ;;  %v5388_v53 = vpack.i.bf16 %v6829_v48, %v6827_v47  ;;  %v475_v56 = vrot.slane %v6740_v3, 1  ;;  %v6848_v58 = vunpack.c.l.bf16 %v5146_v52  ;;  %v6850_v59 = vunpack.c.h.bf16 %v5146_v52 }
  0x25   : > { %5344 = vrot.lane.b32.xlu0 %v5343_v25, %s6627_s18  ;;  %v5383_v57 = vpack.i.bf16 %v6836_v51, %v6834_v50  ;;  %v6852_v60 = vunpack.c.h.bf16 %v5145_v45  ;;  %v471_v61 = vrot.slane %v6749_v8, 1  ;;  %v478_v62 = vrot.slane %v6744_v5, 1 }
  0x26   : > { %5349 = vrot.lane.b32.xlu1 %v5348_v22, %s6627_s18  ;;  %10395 = vst [vmem:[#allocation7_spill] sm:$0xff] %v6848_v58  ;;  %10396 = vst [vmem:[#allocation8_spill] sm:$0xff] %v6850_v59  ;;  %v513_v63 = vrot.slane %v6848_v58, 1  ;;  %v514_v0 = vrot.slane %v6850_v59, 1  ;;  %v6860_v1 = vsel %vm470_vm0, %v474_v55, %v475_v56  ;;  %v6863_v2 = vsel %vm470_vm0, %v472_v54, 0.0 }
  0x27   : > { %10397 = vst [vmem:[#allocation9_spill] sm:$0xff] %v6852_v60  ;;  %v480_v6 = vrot.slane %v6753_v10, 1  ;;  %v481_v11 = vrot.slane %v6770_v18, 1  ;;  %v5393_v12 = vpack.i.bf16 %v6848_v58, %v6852_v60  ;;  %v6877_v17 = vsel %vm470_vm0, %v471_v61, %v472_v54 }
  0x28   : > { %v6871_v13 = vsel %vm470_vm0, %v513_v63, %v514_v0  ;;  %v6874_v14 = vsel %vm470_vm0, %v514_v0, 0.0  ;;  %v477_v20 = vrot.slane %v6742_v4, 1  ;;  %v5403_v22 = vpack.i.bf16 %v6860_v1, %v6863_v2 }
  0x29   : > { %5354 = vrot.lane.b32.xlu0 %v5353_v33, %s6627_s18  ;;  %v6882_v21 = vpack.i.bf16 %v6874_v14, %v6871_v13  ;;  %v6887_v25 = vsel %vm470_vm0, %v478_v62, 0.0  ;;  %v484_v28 = vrot.slane %v6762_v15, 1  ;;  %v6893_v29 = vsel %vm470_vm0, %v480_v6, %v481_v11 }
  0x2a   : > { %5359 = vrot.lane.b32.xlu1 %v5358_v30, %s6627_s18  ;;  %v486_v30 = vrot.slane %v6764_v16, 1  ;;  %v487_v33 = vrot.slane %v6786_v26, 1  ;;  %v483_v36 = vrot.slane %v6772_v19, 1  ;;  %v10247_v37 = vmov 0.0  }
  0x2b   : > { %10398 = vst [vmem:[#allocation10_spill] sm:$0xff] %v6882_v21  ;;  %v6905_v44 = vsel %vm470_vm0, %v475_v56, 0.0  ;;  %v5413_v45 = vpack.i.bf16 %v6893_v29, %v6887_v25  ;;  %v490_v52 = vrot.slane %v6779_v23, 1  ;;  %v492_v55 = vrot.slane %v6781_v24, 1 }
  0x2c   : > { %v6921_v54 = vsel %vm470_vm0, %v483_v36, %v484_v28  ;;  %v493_v56 = vrot.slane %v6802_v34, 1  ;;  %v489_v61 = vrot.slane %v6788_v27, 1  ;;  %v501_v21 = vrot.slane %v6820_v43, 1 }
  0x2d   : > { %5364 = vrot.lane.b32.xlu0 %v5363_v41, %s6627_s18  ;;  %v6902_v41 = vsel %vm470_vm0, %v477_v20, %v478_v62  ;;  %v541_v6 = vsel %vm470_vm0, %v490_v52, 0.0 }
  0x2e   : > { %5369 = vrot.lane.b32.xlu1 %v5368_v38, %s6627_s18  ;;  %v5398_v38 = vpack.i.bf16 %v6877_v17, %v10247_v37  ;;  %v6935_v0 = vsel %vm470_vm0, %v492_v55, %v493_v56  ;;  %v491_v20 = vsel %vm470_vm0, %v489_v61, %v490_v52  ;;  %v6952_v55 = vsel %vm470_vm0, %v493_v56, 0.0 }
  0x2f   : > { %10399 = vst [vmem:[#allocation11_spill] sm:$0xff] %v6935_v0  ;;  %v5433_v36 = vpack.i.bf16 %v6935_v0, %v541_v6  ;;  %10401 = vst [vmem:[#allocation13_spill] sm:$0xff] %v6952_v55  ;;  %v502_v52 = vrot.slane %v6811_v39, 1  ;;  %v504_v37 = vrot.slane %v6813_v40, 1  ;;  %v508_v0 = vrot.slane %v6827_v47, 1 }
  0x31   : > { %5374 = vrot.lane.b32.xlu0 %v5373_v49, %s6627_s18  ;;  %v6913_v49 = vsel %vm470_vm0, %v481_v11, 0.0  ;;  %v540_v11 = vsel %vm470_vm0, %v487_v33, 0.0 }
  0x32   : > { %5379 = vrot.lane.b32.xlu1 %v5378_v46, %s6627_s18  ;;  %v6910_v46 = vsel %vm470_vm0, %v484_v28, 0.0  ;;  %v5418_v63 = vpack.i.bf16 %v6921_v54, %v6913_v49  ;;  %v499_v28 = vrot.slane %v6818_v42, 1 }
  0x35   : > { %5384 = vrot.lane.b32.xlu0 %v5383_v57, %s6627_s18  ;;  %v5408_v57 = vpack.i.bf16 %v6902_v41, %v6905_v44 }
  0x36   : > { %5389 = vrot.lane.b32.xlu1 %v5388_v53, %s6627_s18  ;;  %v6918_v53 = vsel %vm470_vm0, %v486_v30, %v487_v33  ;;  %v495_v30 = vrot.slane %v6804_v35, 1 }
  0x37   : > { %v5423_v62 = vpack.i.bf16 %v6918_v53, %v6910_v46 }
  0x39   : > { %5394 = vrot.lane.b32.xlu0 %v5393_v12, %s6627_s18  ;;  %v496_v12 = vrot.slane %v6795_v31, 1 }
  0x3a   : > { %612 = vrot.lane.b32.xlu1 %v6850_v59, %s6627_s18 }
  0x3b   : > { %v6949_v33 = vsel %vm470_vm0, %v496_v12, 0.0  ;;  %v6960_v61 = vsel %vm470_vm0, %v495_v30, %v496_v12  ;;  %v6974_v12 = vpack.i.bf16 %v6740_v3, %v6747_v7 }
  0x3c   : > { %10400 = vst [vmem:[#allocation12_spill] sm:$0xff] %v6949_v33  ;;  %10403 = vst [vmem:[#allocation15_spill] sm:$0xff] %v6960_v61  ;;  %v5438_v58 = vpack.i.bf16 %v6960_v61, %v6952_v55  ;;  %v6997_v61 = vsel %vm470_vm0, %v508_v0, 0.0 }
  0x3d   : > { %5399 = vrot.lane.b32.xlu0 %v5398_v38, %s6629_s19  ;;  %v5147_v38 = vld [vmem:[%s6735_s17 + $0x78] sm:$0xff]   ;;  %10404 = vst [vmem:[#allocation16_spill] sm:$0xff] %v6974_v12  ;;  %v6990_v12 = vsel %vm470_vm0, %v499_v28, 0.0  ;;  %s6635_s17 = smov 32  }
  0x3e   : > { %5404 = vrot.lane.b32.xlu1 %v5403_v22, %s6629_s19  ;;  %v498_v22 = vrot.slane %v6797_v32, 1  ;;  %v6966_v56 = vunpack.c.l.bf16 %v5147_v38  ;;  %v6968_v59 = vunpack.c.h.bf16 %v5147_v38 }
  0x40   : > { %v420_v38 = vrot.slane %v6966_v56, 7 }
  0x41   : > { %5409 = vrot.lane.b32.xlu0 %v5408_v57, %s6629_s19  ;;  %v6957_v57 = vsel %vm470_vm0, %v498_v22, %v499_v28  ;;  %v511_v22 = vrot.slane %v6852_v60, 1  ;;  %v6987_v60 = vsel %vm470_vm0, %v502_v52, 0.0 }
  0x42   : > { %5414 = vrot.lane.b32.xlu1 %v5413_v45, %s6629_s19  ;;  %v5428_v45 = vpack.i.bf16 %v491_v20, %v540_v11  ;;  %10402 = vst [vmem:[#allocation14_spill] sm:$0xff] %v6957_v57  ;;  %v5443_v30 = vpack.i.bf16 %v6957_v57, %v6949_v33  ;;  %v6994_v33 = vsel %vm470_vm0, %v501_v21, %v502_v52  ;;  %v507_v57 = vrot.slane %v6836_v51, 1 }
  0x43   : > { %v469_v28 = vsel %vm374_vm1, 0.0, %v420_v38 }
  0x45   : > { %5419 = vrot.lane.b32.xlu0 %v5418_v63, %s6629_s19  ;;  %v510_v63 = vrot.slane %v6829_v48, 1  ;;  %v7009_v48 = vpack.i.bf16 %v6744_v5, %v6742_v4 }
  0x46   : > { %5424 = vrot.lane.b32.xlu1 %v5423_v62, %s6629_s19  ;;  %v505_v62 = vrot.slane %v6834_v50, 1 }
  0x48   : > { %v6984_v47 = vsel %vm470_vm0, %v504_v37, %v505_v62  ;;  %v7025_v37 = vsel %vm470_vm0, %v505_v62, 0.0 }
  0x49   : > { %5429 = vrot.lane.b32.xlu0 %v5428_v45, %s6629_s19  ;;  %v7003_v45 = vsel %vm470_vm0, %v510_v63, %v511_v22  ;;  %v5453_v21 = vpack.i.bf16 %v6984_v47, %v6987_v60  ;;  %v5448_v63 = vpack.i.bf16 %v6994_v33, %v6990_v12 }
  0x4a   : > { %5434 = vrot.lane.b32.xlu1 %v5433_v36, %s6629_s19  ;;  %v421_v36 = vrot.slane %v6968_v59, 7 }
  0x4c   : > { %v422_v55 = vsel %vm374_vm1, %v420_v38, %v421_v36  ;;  %v5463_v36 = vpack.i.bf16 %v7003_v45, %v6997_v61  ;;  %v7022_v38 = vsel %vm470_vm0, %v507_v57, %v508_v0  ;;  %v7040_v0 = vpack.i.bf16 %v6887_v25, %v6902_v41 }
  0x4d   : > { %v7014_v52 = vpack.i.bf16 %v422_v55, %v469_v28  ;;  %5439 = vrot.lane.b32.xlu0 %v5438_v58, %s6629_s19  ;;  %v7030_v55 = vpack.i.bf16 %v6905_v44, %v6860_v1  ;;  %v7036_v28 = vpack.i.bf16 %v6913_v49, %v6893_v29  ;;  %v379_v57 = vrot.slane %v6740_v3, 7 }
  0x4e   : > { %5444 = vrot.lane.b32.xlu1 %v5443_v30, %s6629_s19  ;;  %v378_v30 = vrot.slane %v6747_v7, 7  ;;  %v7045_v7 = vpack.i.bf16 %v540_v11, %v6918_v53  ;;  %v7049_v1 = vpack.i.bf16 %v6910_v46, %v6921_v54  ;;  %v7051_v44 = vpack.i.bf16 %v541_v6, %v491_v20 }
  0x4f   : > { %v5458_v29 = vpack.i.bf16 %v7022_v38, %v7025_v37  ;;  %v7057_v25 = vsel %vm470_vm0, %v511_v22, 0.0  ;;  %v375_v41 = vrot.slane %v6749_v8, 7  ;;  %v376_v3 = vrot.slane %v6751_v9, 7 }
  0x50   : > { %v384_v49 = vrot.slane %v6753_v10, 7  ;;  %v385_v53 = vrot.slane %v6770_v18, 7  ;;  %v516_v46 = vrot.slane %v6966_v56, 1  ;;  %v381_v54 = vrot.slane %v6742_v4, 7 }
  0x51   : > { %5449 = vrot.lane.b32.xlu0 %v5448_v63, %s6629_s19  ;;  %v382_v6 = vrot.slane %v6744_v5, 7  ;;  %v517_v11 = vrot.slane %v6968_v59, 1  ;;  %v7069_v20 = vsel %vm374_vm1, %v378_v30, %v379_v57  ;;  %v7072_v62 = vsel %vm374_vm1, 0.0, %v378_v30 }
  0x52   : > { %5454 = vrot.lane.b32.xlu1 %v5453_v21, %s6629_s19  ;;  %10405 = vst [vmem:[#allocation17_spill] sm:$0xff] %v7069_v20  ;;  %10406 = vst [vmem:[#allocation18_spill] sm:$0xff] %v7072_v62  ;;  %v5468_v22 = vpack.i.bf16 %v6871_v13, %v7057_v25  ;;  %v7080_v5 = vsel %vm374_vm1, %v375_v41, %v376_v3  ;;  %v7083_v63 = vsel %vm374_vm1, 0.0, %v375_v41  ;;  %v7104_v41 = vsel %vm374_vm1, 0.0, %v381_v54 }
  0x53   : > { %v518_v21 = vsel %vm470_vm0, %v516_v46, %v517_v11  ;;  %v550_v4 = vsel %vm470_vm0, %v517_v11, 0.0  ;;  %10407 = vst [vmem:[#allocation19_spill] sm:$0xff] %v7080_v5  ;;  %10408 = vst [vmem:[#allocation20_spill] sm:$0xff] %v7083_v63  ;;  %v7090_v30 = vpack.i.bf16 %v7069_v20, %v7072_v62  ;;  %v7093_v13 = vsel %vm374_vm1, %v384_v49, %v385_v53 }
  0x54   : > { %v7086_v57 = vpack.i.bf16 %v550_v4, %v518_v21  ;;  %10409 = vst [vmem:[#allocation21_spill] sm:$0xff] %v7093_v13  ;;  %v7099_v3 = vsel %vm374_vm1, %v381_v54, %v382_v6  ;;  %10412 = vst [vmem:[#allocation24_spill] sm:$0xff] %v7104_v41  ;;  %v391_v46 = vrot.slane %v6786_v26, 7  ;;  %v5473_v53 = vpack.i.bf16 %v7080_v5, %v7083_v63 }
  0x55   : > { %5459 = vrot.lane.b32.xlu0 %v5458_v29, %s6629_s19  ;;  %v7096_v29 = vsel %vm374_vm1, 0.0, %v384_v49  ;;  %10411 = vst [vmem:[#allocation23_spill] sm:$0xff] %v7099_v3  ;;  %v387_v11 = vrot.slane %v6772_v19, 7  ;;  %v388_v49 = vrot.slane %v6762_v15, 7  ;;  %v396_v21 = vrot.slane %v6781_v24, 7 }
  0x56   : > { %5464 = vrot.lane.b32.xlu1 %v5463_v36, %s6629_s19  ;;  %v390_v36 = vrot.slane %v6764_v16, 7  ;;  %10410 = vst [vmem:[#allocation22_spill] sm:$0xff] %v7096_v29  ;;  %v7114_v6 = vpack.i.bf16 %v7093_v13, %v7096_v29  ;;  %v397_v4 = vrot.slane %v6802_v34, 7  ;;  %v393_v5 = vrot.slane %v6788_v27, 7 }
  0x57   : > { %v7132_v58 = vsel %vm374_vm1, %v387_v11, %v388_v49  ;;  %v7135_v13 = vsel %vm374_vm1, 0.0, %v387_v11  ;;  %v402_v11 = vrot.slane %v6797_v32, 7  ;;  %v7156_v62 = vsel %vm374_vm1, 0.0, %v396_v21 }
  0x58   : > { %10413 = vst [vmem:[#allocation25_spill] sm:$0xff] %v7114_v6  ;;  %v7123_v54 = vsel %vm374_vm1, %v390_v36, %v391_v46  ;;  %10416 = vst [vmem:[#allocation28_spill] sm:$0xff] %v7132_v58  ;;  %v394_v46 = vrot.slane %v6779_v23, 7  ;;  %v7150_v49 = vsel %vm374_vm1, %v396_v21, %v397_v4  ;;  %v400_v4 = vrot.slane %v6795_v31, 7 }
  0x59   : > { %5469 = vrot.lane.b32.xlu0 %v5468_v22, %s6629_s19  ;;  %10414 = vst [vmem:[#allocation26_spill] sm:$0xff] %v7123_v54  ;;  %v7126_v22 = vsel %vm374_vm1, 0.0, %v390_v36  ;;  %10417 = vst [vmem:[#allocation29_spill] sm:$0xff] %v7135_v13  ;;  %v408_v29 = vrot.slane %v6813_v40, 7  ;;  %v409_v63 = vrot.slane %v6834_v50, 7 }
  0x5a   : > { %720 = vrot.lane.b32.xlu1 %v6874_v14, %s6629_s19  ;;  %v7118_v14 = vpack.i.bf16 %v7099_v3, %v7104_v41  ;;  %10415 = vst [vmem:[#allocation27_spill] sm:$0xff] %v7126_v22  ;;  %v7143_v36 = vpack.i.bf16 %v7123_v54, %v7126_v22  ;;  %10420 = vst [vmem:[#allocation32_spill] sm:$0xff] %v7150_v49  ;;  %v7159_v3 = vsel %vm374_vm1, %v393_v5, %v394_v46 }
  0x5b   : > { %10421 = vst [vmem:[#allocation33_spill] sm:$0xff] %v7156_v62  ;;  %10422 = vst [vmem:[#allocation34_spill] sm:$0xff] %v7159_v3  ;;  %v7162_v54 = vsel %vm374_vm1, 0.0, %v393_v5  ;;  %v7171_v22 = vpack.i.bf16 %v7150_v49, %v7156_v62  ;;  %v7183_v46 = vsel %vm374_vm1, 0.0, %v402_v11  ;;  %v7212_v41 = vsel %vm374_vm1, 0.0, %v408_v29 }
  0x5c   : > { %10418 = vst [vmem:[#allocation30_spill] sm:$0xff] %v7143_v36  ;;  %10423 = vst [vmem:[#allocation35_spill] sm:$0xff] %v7162_v54  ;;  %v7175_v21 = vpack.i.bf16 %v7159_v3, %v7162_v54  ;;  %v405_v54 = vrot.slane %v6820_v43, 7  ;;  %v406_v3 = vrot.slane %v6811_v39, 7 }
  0x5d   : > { %5474 = vrot.lane.b32.xlu0 %v5473_v53, %s6630_s20  ;;  %v7147_v53 = vpack.i.bf16 %v7132_v58, %v7135_v13  ;;  %v403_v13 = vrot.slane %v6818_v42, 7  ;;  %v399_v58 = vrot.slane %v6804_v35, 7  ;;  %10424 = vst [vmem:[#allocation36_spill] sm:$0xff] %v7171_v22  ;;  %10427 = vst [vmem:[#allocation39_spill] sm:$0xff] %v7183_v46 }
  0x5e   : > { %5479 = vrot.lane.b32.xlu1 %v7090_v30, %s6630_s20  ;;  %10425 = vst [vmem:[#allocation37_spill] sm:$0xff] %v7175_v21  ;;  %10434 = vst [vmem:[#allocation44_spill] sm:$0xff] %v7212_v41 }
  0x5f   : > { %10419 = vst [vmem:[#allocation31_spill] sm:$0xff] %v7147_v53  ;;  %v7180_v5 = vsel %vm374_vm1, %v402_v11, %v403_v13  ;;  %v7188_v49 = vsel %vm374_vm1, %v399_v58, %v400_v4  ;;  %v7191_v62 = vsel %vm374_vm1, 0.0, %v399_v58  ;;  %v10431_v11 = vld [vmem:[#allocation6_spill] sm:$0xff]  ;;  %v7209_v4 = vsel %vm374_vm1, %v408_v29, %v409_v63 }
  0x60   : > { %10426 = vst [vmem:[#allocation38_spill] sm:$0xff] %v7180_v5  ;;  %10428 = vst [vmem:[#allocation40_spill] sm:$0xff] %v7188_v49  ;;  %v7199_v13 = vpack.i.bf16 %v7180_v5, %v7183_v46  ;;  %v414_v20 = vrot.slane %v10431_v11, 7  ;;  %v7206_v58 = vpack.i.bf16 %v7188_v49, %v7191_v62  ;;  %v7216_v5 = vsel %vm374_vm1, %v405_v54, %v406_v3 }
  0x61   : > { %5484 = vrot.lane.b32.xlu0 %v7118_v14, %s6630_s20  ;;  %10429 = vst [vmem:[#allocation41_spill] sm:$0xff] %v7191_v62  ;;  %10433 = vst [vmem:[#allocation43_spill] sm:$0xff] %v7209_v4  ;;  %v7219_v46 = vsel %vm374_vm1, 0.0, %v405_v54  ;;  %v7227_v63 = vpack.i.bf16 %v7209_v4, %v7212_v41  ;;  %v10442_v4 = vld [vmem:[#allocation7_spill] sm:$0xff] }
  0x62   : > { %5489 = vrot.lane.b32.xlu1 %v7114_v6, %s6630_s20  ;;  %10430 = vst [vmem:[#allocation42_spill] sm:$0xff] %v7199_v13  ;;  %10432 = vst [vmem:[#allocation6_spill] sm:$0xff] %v7206_v58  ;;  %v10437_v6 = vld [vmem:[#allocation5_spill] sm:$0xff]  ;;  %v7233_v29 = vpack.i.bf16 %v7216_v5, %v7219_v46  ;;  %v7239_v54 = vsel %vm374_vm1, 0.0, %v414_v20  ;;  %v417_v41 = vrot.slane %v10442_v4, 7 }
  0x63   : > { %10439 = vst [vmem:[#allocation45_spill] sm:$0xff] %v7239_v54 }
  0x65   : > { %5494 = vrot.lane.b32.xlu0 %v7147_v53, %s6630_s20  ;;  %v412_v53 = vrot.slane %v10437_v6, 7 }
  0x66   : > { %5499 = vrot.lane.b32.xlu1 %v7143_v36, %s6630_s20 }
  0x69   : > { %5504 = vrot.lane.b32.xlu0 %v7175_v21, %s6630_s20  ;;  %v411_v21 = vrot.slane %v6836_v51, 7 }
  0x6a   : > { %5509 = vrot.lane.b32.xlu1 %v7171_v22, %s6630_s20  ;;  %v10435_v22 = vld [vmem:[#allocation9_spill] sm:$0xff] }
  0x6b   : > { %v415_v36 = vrot.slane %v10435_v22, 7  ;;  %10436 = vst [vmem:[#allocation9_spill] sm:$0xff] %v7219_v46  ;;  %v7242_v62 = vsel %vm374_vm1, %v411_v21, %v412_v53  ;;  %v7245_v49 = vsel %vm374_vm1, 0.0, %v411_v21  ;;  %v7265_v21 = vsel %vm374_vm1, 0.0, %v417_v41 }
  0x6c   : > { %10440 = vst [vmem:[#allocation46_spill] sm:$0xff] %v7242_v62  ;;  %10441 = vst [vmem:[#allocation47_spill] sm:$0xff] %v7245_v49 }
  0x6d   : > { %5514 = vrot.lane.b32.xlu0 %v7206_v58, %s6630_s20  ;;  %v7236_v3 = vsel %vm374_vm1, %v414_v20, %v415_v36  ;;  %v7259_v20 = vpack.i.bf16 %v7242_v62, %v7245_v49  ;;  %v7293_v49 = vpack.i.bf16 %v6786_v26, %v6764_v16  ;;  %v7299_v62 = vpack.i.bf16 %v6762_v15, %v6772_v19 }
  0x6e   : > { %5519 = vrot.lane.b32.xlu1 %v7199_v13, %s6630_s20  ;;  %10438 = vst [vmem:[#allocation5_spill] sm:$0xff] %v7236_v3  ;;  %v10443_v13 = vld [vmem:[#allocation8_spill] sm:$0xff]  ;;  %v7253_v36 = vpack.i.bf16 %v7236_v3, %v7239_v54  ;;  %v10445_v54 = vpack.i.bf16 %v6751_v9, %v6749_v8  ;;  %v7305_v8 = vpack.i.bf16 %v6802_v34, %v6781_v24 }
  0x6f   : > { %v418_v58 = vrot.slane %v10443_v13, 7  ;;  %v7311_v9 = vpack.i.bf16 %v6779_v23, %v6788_v27  ;;  %v7323_v15 = vpack.i.bf16 %v6795_v31, %v6804_v35  ;;  %v7329_v16 = vpack.i.bf16 %v6834_v50, %v6813_v40 }
  0x70   : > { %v7345_v24 = vpack.i.bf16 %v10435_v22, %v10431_v11  ;;  %v7351_v26 = vpack.i.bf16 %v10437_v6, %v6836_v51  ;;  %v7367_v34 = vpack.i.bf16 %v10443_v13, %v10442_v4  ;;  %v10447_v6 = vld [vmem:[#allocation11_spill] sm:$0xff]  ;;  %v10451_v11 = vld [vmem:[#allocation14_spill] sm:$0xff] }
  0x71   : > { %5524 = vrot.lane.b32.xlu0 %v7233_v29, %s6630_s20  ;;  %v7262_v53 = vsel %vm374_vm1, %v417_v41, %v418_v58  ;;  %v10444_v41 = vld [vmem:[#allocation16_spill] sm:$0xff]  ;;  %v7283_v58 = vpack.i.bf16 %v6770_v18, %v6753_v10  ;;  %v7317_v10 = vpack.i.bf16 %v6818_v42, %v6797_v32  ;;  %v7335_v18 = vpack.i.bf16 %v6811_v39, %v6820_v43 }
  0x72   : > { %5529 = vrot.lane.b32.xlu1 %v7227_v63, %s6630_s20  ;;  %v7273_v3 = vpack.i.bf16 %v7262_v53, %v7265_v21  ;;  %v7361_v32 = vpack.i.bf16 %v6968_v59, %v6966_v56  ;;  %v10446_v43 = vpack.i.bf16 %v6863_v2, %v6877_v17  ;;  %v10448_v2 = vld [vmem:[#allocation13_spill] sm:$0xff]  ;;  %v7415_v4 = vpack.i.bf16 %v6990_v12, %v10451_v11 }
  0x73   : > { %v7403_v17 = vpack.i.bf16 %v10448_v2, %v10447_v6  ;;  %v7437_v12 = vpack.i.bf16 %v6987_v60, %v6994_v33 }
  0x75   : > { %5534 = vrot.lane.b32.xlu0 %v7259_v20, %s6630_s20 }
  0x76   : > { %5539 = vrot.lane.b32.xlu1 %v7253_v36, %s6630_s20 }
  0x79   : > { %5544 = vrot.lane.b32.xlu0 %v7273_v3, %s6630_s20 }
  0x7a   : > { %5549 = vrot.lane.b32.xlu1 %v7014_v52, %s6630_s20  ;;  %s269_s20 = sand.u32 1, %s6617_s25  }
  0x7d   : > { %5554 = vrot.lane.b32.xlu0 %v10445_v54, %s6631_s21  ;;  %v10452_v54 = vld [vmem:[#allocation15_spill] sm:$0xff] }
  0x7e   : > { %5559 = vrot.lane.b32.xlu1 %v10444_v41, %s6631_s21 }
  0x81   : > { %5564 = vrot.lane.b32.xlu0 %v7009_v48, %s6631_s21 }
  0x82   : > { %5569 = vrot.lane.b32.xlu1 %v7283_v58, %s6631_s21 }
  0x85   : > { %5574 = vrot.lane.b32.xlu0 %v7299_v62, %s6631_s21 }
  0x86   : > { %5579 = vrot.lane.b32.xlu1 %v7293_v49, %s6631_s21 }
  0x89   : > { %5584 = vrot.lane.b32.xlu0 %v7311_v9, %s6631_s21 }
  0x8a   : > { %5589 = vrot.lane.b32.xlu1 %v7305_v8, %s6631_s21 }
  0x8d   : > { %5594 = vrot.lane.b32.xlu0 %v7323_v15, %s6631_s21 }
  0x8e   : > { %5599 = vrot.lane.b32.xlu1 %v7317_v10, %s6631_s21 }
  0x8f   : > { %v7339_v23 = vpop.permute.xlu0 %5324 }
  0x90   : > { %v7337_v19 = vpop.permute.xlu1 %5334 }
  0x91   : > { %5604 = vrot.lane.b32.xlu0 %v7335_v18, %s6631_s21 }
  0x92   : > { %5609 = vrot.lane.b32.xlu1 %v7329_v16, %s6631_s21 }
  0x93   : > { %v7355_v31 = vpop.permute.xlu0 %5329 }
  0x94   : > { %v7353_v27 = vpop.permute.xlu1 %5339 }
  0x95   : > { %5614 = vrot.lane.b32.xlu0 %v7351_v26, %s6631_s21 }
  0x96   : > { %5619 = vrot.lane.b32.xlu1 %v7345_v24, %s6631_s21 }
  0x97   : > { %v7371_v39 = vpop.permute.xlu0 %5344 }
  0x98   : > { %v7369_v35 = vpop.permute.xlu1 %5349 }
  0x99   : > { %5624 = vrot.lane.b32.xlu0 %v7367_v34, %s6631_s21 }
  0x9a   : > { %5629 = vrot.lane.b32.xlu1 %v7361_v32, %s6631_s21 }
  0x9b   : > { %v7379_v42 = vpop.permute.xlu0 %5354 }
  0x9c   : > { %v7377_v40 = vpop.permute.xlu1 %5359 }
  0x9d   : > { %5634 = vrot.lane.b32.xlu0 %v10446_v43, %s6632_s22  ;;  %v10453_v43 = vld [vmem:[#allocation12_spill] sm:$0xff] }
  0x9e   : > { %5639 = vrot.lane.b32.xlu1 %v7030_v55, %s6632_s22  ;;  %v7421_v6 = vpack.i.bf16 %v10453_v43, %v10452_v54  ;;  %v7447_v43 = vpack.i.bf16 %v7057_v25, %v7003_v45 }
  0x9f   : > { %v7389_v51 = vpop.permute.xlu0 %5364 }
  0xa0   : > { %v7387_v50 = vpop.permute.xlu1 %5369 }
  0xa1   : > { %5644 = vrot.lane.b32.xlu0 %v7040_v0, %s6632_s22 }
  0xa2   : > { %5649 = vrot.lane.b32.xlu1 %v7036_v28, %s6632_s22 }
  0xa3   : > { %v7397_v56 = vpop.permute.xlu0 %5374 }
  0xa4   : > { %v7395_v59 = vpop.permute.xlu1 %5379 }
  0xa5   : > { %5654 = vrot.lane.b32.xlu0 %v7049_v1, %s6632_s22 }
  0xa6   : > { %5659 = vrot.lane.b32.xlu1 %v7045_v7, %s6632_s22 }
  0xa7   : > { %v7409_v13 = vpop.permute.xlu0 %5384 }
  0xa8   : > { %v7407_v22 = vpop.permute.xlu1 %5389  ;;  %10450 = vst [vmem:[#allocation8_spill] sm:$0xff] %v7409_v13  ;;  %v7431_v13 = vpack.i.bf16 %v7025_v37, %v6984_v47  ;;  %v7453_v47 = vpack.i.bf16 %v6997_v61, %v7022_v38  ;;  %v10460_v61 = vld [vmem:[#allocation10_spill] sm:$0xff] }
  0xa9   : > { %10449 = vst [vmem:[#allocation7_spill] sm:$0xff] %v7407_v22  ;;  %5664 = vrot.lane.b32.xlu0 %v7051_v44, %s6632_s22 }
  0xaa   : > { %5669 = vrot.lane.b32.xlu1 %v7403_v17, %s6632_s22 }
  0xab   : > { %v7425_v46 = vpop.permute.xlu0 %5394 }
  0xac   : > { %v7423_v2 = vpop.permute.xlu1 %612  ;;  %10454 = vst [vmem:[#allocation16_spill] sm:$0xff] %v7425_v46 }
  0xad   : > { %5674 = vrot.lane.b32.xlu0 %v7421_v6, %s6632_s22 }
  0xae   : > { %5679 = vrot.lane.b32.xlu1 %v7415_v4, %s6632_s22 }
  0xaf   : > { %v7441_v54 = vpop.permute.xlu0 %5399 }
  0xb0   : > { %v7439_v11 = vpop.permute.xlu1 %5404  ;;  %10455 = vst [vmem:[#allocation11_spill] sm:$0xff] %v7441_v54  ;;  %v10469_v54 = vld [vmem:[#allocation37_spill] sm:$0xff] }
  0xb1   : > { %5684 = vrot.lane.b32.xlu0 %v7437_v12, %s6632_s22 }
  0xb2   : > { %5689 = vrot.lane.b32.xlu1 %v7431_v13, %s6632_s22 }
  0xb3   : > { %v7457_v33 = vpop.permute.xlu0 %5409 }
  0xb4   : > { %v7455_v60 = vpop.permute.xlu1 %5414  ;;  %10457 = vst [vmem:[#allocation14_spill] sm:$0xff] %v7457_v33  ;;  %v10465_v33 = vld [vmem:[#allocation31_spill] sm:$0xff] }
  0xb5   : > { %10456 = vst [vmem:[#allocation13_spill] sm:$0xff] %v7455_v60  ;;  %5694 = vrot.lane.b32.xlu0 %v7453_v47, %s6632_s22  ;;  %v10466_v60 = vld [vmem:[#allocation25_spill] sm:$0xff] }
  0xb6   : > { %5699 = vrot.lane.b32.xlu1 %v7447_v43, %s6632_s22 }
  0xb7   : > { %v7465_v45 = vpop.permute.xlu0 %5419 }
  0xb8   : > { %v7463_v37 = vpop.permute.xlu1 %5424  ;;  %10459 = vst [vmem:[#allocation12_spill] sm:$0xff] %v7465_v45 }
  0xb9   : > { %10458 = vst [vmem:[#allocation15_spill] sm:$0xff] %v7463_v37  ;;  %5704 = vrot.lane.b32.xlu0 %v10460_v61, %s6632_s22 }
  0xba   : > { %5709 = vrot.lane.b32.xlu1 %v7086_v57, %s6632_s22  ;;  %s4887_s22 = sshll.u32 %s269_s20, 5 }
  0xbb   : > { %v7473_v25 = vpop.permute.xlu0 %5429  ;;  %s9635_s29 = scalar_lea.vmem [#allocation2], %s4887_s22 }
  0xbc   : > { %v7471_v38 = vpop.permute.xlu1 %5434  ;;  %10462 = vst [vmem:[#allocation48_spill] sm:$0xff] %v7473_v25 }
  0xbd   : > { %10461 = vst [vmem:[#allocation10_spill] sm:$0xff] %v7471_v38  ;;  %5714 = vrot.lane.b32.xlu0 %v7090_v30, %s6633_s23 }
  0xbe   : > { %5719 = vrot.lane.b32.xlu1 %v7118_v14, %s6633_s23  ;;  %v10470_v14 = vld [vmem:[#allocation30_spill] sm:$0xff] }
  0xbf   : > { %v7481_v45 = vpop.permute.xlu0 %5439 }
  0xc0   : > { %v7479_v37 = vpop.permute.xlu1 %5444  ;;  %10464 = vst [vmem:[#allocation50_spill] sm:$0xff] %v7481_v45  ;;  %v10473_v45 = vld [vmem:[#allocation6_spill] sm:$0xff] }
  0xc1   : > { %10463 = vst [vmem:[#allocation49_spill] sm:$0xff] %v7479_v37  ;;  %5724 = vrot.lane.b32.xlu0 %v10466_v60, %s6633_s23  ;;  %v6553_v60 = vld [vmem:[%s10240_s1 + $0x10] ss:$0 sps:$4 sm:$0x33]  }
  0xc2   : > { %5729 = vrot.lane.b32.xlu1 %v10465_v33, %s6633_s23  ;;  %v10474_v33 = vld [vmem:[#allocation36_spill] sm:$0xff]  ;;  %5268 = vmatprep.subr.msk.bf16.mxu0 %vm1684_vm2, %v6553_v60 }
  0xc3   : > { %v7489_v25 = vpop.permute.xlu0 %5449 }
  0xc4   : > { %v7487_v38 = vpop.permute.xlu1 %5454  ;;  %10468 = vst [vmem:[#allocation25_spill] sm:$0xff] %v7489_v25 }
  0xc5   : > { %10467 = vst [vmem:[#allocation31_spill] sm:$0xff] %v7487_v38  ;;  %5734 = vrot.lane.b32.xlu0 %v10470_v14, %s6633_s23  ;;  %v10476_v14 = vld [vmem:[#allocation42_spill] sm:$0xff] }
  0xc6   : > { %5739 = vrot.lane.b32.xlu1 %v10469_v54, %s6633_s23  ;;  %v1686_v54 = vsel %vm1684_vm2, %v6553_v60, 0  ;;  %vm10385_vm2 = vcmask 523264  }
  0xc7   : > { %v7497_v37 = vpop.permute.xlu0 %5459  ;;  %5189 = vmatpush3.bf16.msra.mxu0 %v1686_v54 }
  0xc8   : > { %v7495_v30 = vpop.permute.xlu1 %5464  ;;  %10472 = vst [vmem:[#allocation30_spill] sm:$0xff] %v7497_v37 }
  0xc9   : > { %10471 = vst [vmem:[#allocation37_spill] sm:$0xff] %v7495_v30  ;;  %5744 = vrot.lane.b32.xlu0 %v10474_v33, %s6633_s23 }
  0xca   : > { %5749 = vrot.lane.b32.xlu1 %v10473_v45, %s6633_s23  ;;  %v6554_v45 = vld [vmem:[%s10240_s1 + $0x8] sm:$0xff]  }
  0xcb   : > { %v7506_v38 = vpop.permute.xlu0 %5469  ;;  %5190 = vmatprep.subr.bf16.mxu0 %v6554_v45 }
  0xcc   : > { %v721_v25 = vpop.permute.xlu1 %720  ;;  %10475 = vst [vmem:[#allocation6_spill] sm:$0xff] %v7506_v38  ;;  %5191 = vmatpush3.bf16.msra.mxu0 %v6554_v45 }
  0xcd   : > { %5754 = vrot.lane.b32.xlu0 %v10476_v14, %s6633_s23 }
  0xce   : > { %5759 = vrot.lane.b32.xlu1 %v7233_v29, %s6633_s23  ;;  %v6555_v29 = vld [vmem:[%s10240_s1] sm:$0xff]  }
  0xcf   : > { %v7517_v33 = vpop.permute.xlu0 %5474  ;;  %5192 = vmatprep.subr.bf16.mxu0 %v6555_v29 }
  0xd0   : > { %v7515_v37 = vpop.permute.xlu1 %5479  ;;  %5193 = vmatpush3.bf16.msra.mxu0 %v6555_v29 }
  0xd1   : > { %5764 = vrot.lane.b32.xlu0 %v7227_v63, %s6633_s23 }
  0xd2   : > { %5769 = vrot.lane.b32.xlu1 %v7259_v20, %s6633_s23 }
  0xd3   : > { %v7528_v54 = vpop.permute.xlu0 %5484 }
  0xd4   : > { %v7526_v60 = vpop.permute.xlu1 %5489 }
  0xd5   : > { %5774 = vrot.lane.b32.xlu0 %v7253_v36, %s6633_s23 }
  0xd6   : > { %5779 = vrot.lane.b32.xlu1 %v7273_v3, %s6633_s23 }
  0xd7   : > { %v7536_v45 = vpop.permute.xlu0 %5494 }
  0xd8   : > { %v7534_v20 = vpop.permute.xlu1 %5499 }
  0xd9   : > { %5784 = vrot.lane.b32.xlu0 %v10444_v41, %s6634_s16 }
  0xda   : > { %5789 = vrot.lane.b32.xlu1 %v7009_v48, %s6634_s16 }
  0xdb   : > { %v7544_v14 = vpop.permute.xlu0 %5504 }
  0xdc   : > { %v7542_v63 = vpop.permute.xlu1 %5509 }
  0xdd   : > { %5794 = vrot.lane.b32.xlu0 %v7030_v55, %s6635_s17 }
  0xde   : > { %5799 = vrot.lane.b32.xlu1 %v7040_v0, %s6635_s17  ;;  %v5397_v0 = vunpack.i.h.bf16 %v7425_v46 }
  0xdf   : > { %v7552_v36 = vpop.permute.xlu0 %5514 }
  0xe0   : > { %v7550_v3 = vpop.permute.xlu1 %5519 }
  0xe1   : > { %5804 = vrot.lane.b32.xlu0 %v7283_v58, %s6634_s16  ;;  %v1367_v58 = vsel %vm1337_vm3, %v7265_v21, %v5397_v0  ;;  %v5326_v0 = vunpack.i.l.bf16 %v7339_v23 }
  0xe2   : > { %5809 = vrot.lane.b32.xlu1 %v7299_v62, %s6634_s16  ;;  %v5472_v62 = vunpack.i.h.bf16 %v7506_v38 }
  0xe3   : > { %v7560_v41 = vpop.permute.xlu0 %5524 }
  0xe4   : > { %v7558_v48 = vpop.permute.xlu1 %5529 }
  0xe5   : > { %5814 = vrot.lane.b32.xlu0 %v7036_v28, %s6635_s17  ;;  %v1368_v28 = vsel %vm1337_vm3, %v7262_v53, %v7423_v2 }
  0xe6   : > { %5819 = vrot.lane.b32.xlu1 %v7049_v1, %s6635_s17  ;;  %v1400_v38 = vsel %vm1369_vm4, %v1368_v28, %v721_v25  ;;  %v5337_v25 = vunpack.i.h.bf16 %v7337_v19  ;;  %v10498_v28 = vld [vmem:[#allocation17_spill] sm:$0xff] }
  0xe7   : > { %v7569_v29 = vpop.permute.xlu0 %5534 }
  0xe8   : > { %v7566_v55 = vpop.permute.xlu1 %5539  ;;  %10478 = vst [vmem:[#allocation42_spill] sm:$0xff] %v7569_v29 }
  0xe9   : > { %10477 = vst [vmem:[#allocation36_spill] sm:$0xff] %v7566_v55  ;;  %5824 = vrot.lane.b32.xlu0 %v7293_v49, %s6634_s16 }
  0xea   : > { %5829 = vrot.lane.b32.xlu1 %v7311_v9, %s6634_s16  ;;  %v1399_v9 = vsel %vm1369_vm4, %v1367_v58, %v5472_v62  ;;  %v5332_v62 = vunpack.i.h.bf16 %v7355_v31  ;;  %v5331_v58 = vunpack.i.l.bf16 %v7355_v31  ;;  %v10502_v31 = vld [vmem:[#allocation23_spill] sm:$0xff] }
  0xeb   : > { %v7581_v55 = vpop.permute.xlu0 %5544 }
  0xec   : > { %v5550_v1 = vpop.permute.xlu1 %5549  ;;  %10479 = vst [vmem:[#allocation51_spill] sm:$0xff] %v7581_v55 }
  0xed   : > { %v5552_v46 = vunpack.i.h.bf16 %v5550_v1  ;;  %v5551_v29 = vunpack.i.l.bf16 %v5550_v1  ;;  %5834 = vrot.lane.b32.xlu0 %v7045_v7, %s6635_s17 }
  0xee   : > { %5839 = vrot.lane.b32.xlu1 %v7051_v44, %s6635_s17 }
  0xef   : > { %v7588_v49 = vsel %vm1401_vm5, %v1400_v38, %v5552_v46  ;;  %v7591_v53 = vsel %vm1401_vm5, %v1399_v9, %v5551_v29  ;;  %v7597_v2 = vpop.permute.xlu0 %5554  ;;  %v7683_v9 = vsel %vm1337_vm3, 0.0, %v5326_v0  ;;  %v5347_v0 = vunpack.i.h.bf16 %v7371_v39 }
  0xf0   : > { %v7595_v21 = vpop.permute.xlu1 %5559  ;;  %10481 = vst [vmem:[#allocation53_spill] sm:$0xff] %v7597_v2  ;;  %v10533_v2 = vld [vmem:[#allocation43_spill] sm:$0xff] }
  0xf1   : > { %10480 = vst [vmem:[#allocation52_spill] sm:$0xff] %v7595_v21  ;;  %5844 = vrot.lane.b32.xlu0 %v7305_v8, %s6634_s16 }
  0xf2   : > { %5849 = vrot.lane.b32.xlu1 %v7323_v15, %s6634_s16 }
  0xf3   : > { %v7605_v46 = vpop.permute.xlu0 %5564 }
  0xf4   : > { %v7603_v44 = vpop.permute.xlu1 %5569  ;;  %10483 = vst [vmem:[#allocation55_spill] sm:$0xff] %v7605_v46 }
  0xf5   : > { %10482 = vst [vmem:[#allocation54_spill] sm:$0xff] %v7603_v44  ;;  %5854 = vrot.lane.b32.xlu0 %v7403_v17, %s6635_s17  ;;  %v10532_v44 = vld [vmem:[#allocation47_spill] sm:$0xff] }
  0xf6   : > { %5859 = vrot.lane.b32.xlu1 %v7421_v6, %s6635_s17 }
  0xf7   : > { %v7613_v38 = vpop.permute.xlu0 %5574 }
  0xf8   : > { %v7611_v7 = vpop.permute.xlu1 %5579  ;;  %10485 = vst [vmem:[#allocation57_spill] sm:$0xff] %v7613_v38 }
  0xf9   : > { %10484 = vst [vmem:[#allocation56_spill] sm:$0xff] %v7611_v7  ;;  %5864 = vrot.lane.b32.xlu0 %v7317_v10, %s6634_s16  ;;  %v10531_v7 = vld [vmem:[#allocation15_spill] sm:$0xff] }
  0xfa   : > { %5869 = vrot.lane.b32.xlu1 %v7335_v18, %s6634_s16  ;;  %v5427_v46 = vunpack.i.h.bf16 %v10531_v7 }
  0xfb   : > { %v7621_v15 = vpop.permute.xlu0 %5584 }
  0xfc   : > { %v7619_v8 = vpop.permute.xlu1 %5589  ;;  %10487 = vst [vmem:[#allocation59_spill] sm:$0xff] %v7621_v15 }
  0xfd   : > { %10486 = vst [vmem:[#allocation58_spill] sm:$0xff] %v7619_v8  ;;  %5874 = vrot.lane.b32.xlu0 %v7415_v4, %s6635_s17  ;;  %v10529_v8 = vld [vmem:[#allocation13_spill] sm:$0xff] }
  0xfe   : > { %5879 = vrot.lane.b32.xlu1 %v7437_v12, %s6635_s17  ;;  %v5416_v38 = vunpack.i.l.bf16 %v10529_v8 }
  0xff   : > { %v7629_v6 = vpop.permute.xlu0 %5594 }
 0x100   : > { %v7627_v17 = vpop.permute.xlu1 %5599  ;;  %10489 = vst [vmem:[#allocation61_spill] sm:$0xff] %v7629_v6  ;;  %v10513_v6 = vld [vmem:[#allocation34_spill] sm:$0xff] }
 0x101   : > { %10488 = vst [vmem:[#allocation60_spill] sm:$0xff] %v7627_v17  ;;  %5884 = vrot.lane.b32.xlu0 %v7329_v16, %s6634_s16 }
 0x102   : > { %5889 = vrot.lane.b32.xlu1 %v7351_v26, %s6634_s16 }
 0x103   : > { %v7637_v18 = vpop.permute.xlu0 %5604 }
 0x104   : > { %v7635_v10 = vpop.permute.xlu1 %5609  ;;  %10491 = vst [vmem:[#allocation63_spill] sm:$0xff] %v7637_v18 }
 0x105   : > { %10490 = vst [vmem:[#allocation62_spill] sm:$0xff] %v7635_v10  ;;  %5894 = vrot.lane.b32.xlu0 %v7431_v13, %s6635_s17  ;;  %v5327_v13 = vunpack.i.h.bf16 %v7339_v23  ;;  %v10512_v10 = vld [vmem:[#allocation33_spill] sm:$0xff] }
 0x106   : > { %5899 = vrot.lane.b32.xlu1 %v7453_v47, %s6635_s17  ;;  %v5336_v47 = vunpack.i.l.bf16 %v7337_v19  ;;  %v10497_v19 = vld [vmem:[#allocation24_spill] sm:$0xff] }
 0x107   : > { %v7645_v12 = vpop.permute.xlu0 %5614 }
 0x108   : > { %v7643_v4 = vpop.permute.xlu1 %5619  ;;  %10493 = vst [vmem:[#allocation65_spill] sm:$0xff] %v7645_v12  ;;  %v7676_v23 = vsel %vm1337_vm3, %v10498_v28, %v5336_v47  ;;  %v5351_v28 = vunpack.i.l.bf16 %v7369_v35 }
 0x109   : > { %10492 = vst [vmem:[#allocation64_spill] sm:$0xff] %v7643_v4  ;;  %5904 = vrot.lane.b32.xlu0 %v7345_v24, %s6634_s16  ;;  %v5341_v24 = vunpack.i.l.bf16 %v7353_v27  ;;  %v5382_v4 = vunpack.i.h.bf16 %v7395_v59 }
 0x10a   : > { %5909 = vrot.lane.b32.xlu1 %v7367_v34, %s6634_s16  ;;  %v5342_v34 = vunpack.i.h.bf16 %v7353_v27  ;;  %v10499_v27 = vmov 0.0  }
 0x10b   : > { %v7653_v26 = vpop.permute.xlu0 %5624  ;;  %v7697_v47 = vsel %vm1337_vm3, %v10502_v31, %v5341_v24  ;;  %v10506_v24 = vld [vmem:[#allocation19_spill] sm:$0xff] }
 0x10c   : > { %v7651_v16 = vpop.permute.xlu1 %5629  ;;  %10494 = vst [vmem:[#allocation66_spill] sm:$0xff] %v7653_v26  ;;  %v10500_v26 = vld [vmem:[#allocation20_spill] sm:$0xff]  ;;  %v10507_v31 = vld [vmem:[#allocation27_spill] sm:$0xff] }
 0x10d   : > { %5914 = vrot.lane.b32.xlu0 %v7447_v43, %s6635_s17  ;;  %v5352_v43 = vunpack.i.h.bf16 %v7369_v35  ;;  %v7687_v55 = vsel %vm1337_vm3, %v10500_v26, %v5327_v13  ;;  %v10504_v26 = vld [vmem:[#allocation18_spill] sm:$0xff]  ;;  %v1340_v35 = vsel %vm1337_vm3, %v10506_v24, %v5331_v58  ;;  %v10509_v24 = vld [vmem:[#allocation29_spill] sm:$0xff] }
 0x10e   : > { %5919 = vrot.lane.b32.xlu1 %v10460_v61, %s6635_s17  ;;  %v7672_v61 = vsel %vm1337_vm3, %v10497_v19, %v5337_v25  ;;  %v10501_v25 = vld [vmem:[#allocation22_spill] sm:$0xff]  ;;  %v1341_v13 = vsel %vm1337_vm3, %v10504_v26, %v5332_v62  ;;  %v5371_v62 = vunpack.i.l.bf16 %v7387_v50  ;;  %v5367_v26 = vunpack.i.h.bf16 %v7389_v51 }
 0x10f   : > { %v7668_v1 = vpop.permute.xlu0 %5634  ;;  %v7691_v19 = vsel %vm1337_vm3, %v10501_v25, %v5342_v34  ;;  %v5362_v34 = vunpack.i.h.bf16 %v7377_v40  ;;  %v5361_v25 = vunpack.i.l.bf16 %v7377_v40  ;;  %v5366_v40 = vunpack.i.l.bf16 %v7389_v51 }
 0x110   : > { %v7665_v29 = vpop.permute.xlu1 %5639  ;;  %10496 = vst [vmem:[#allocation68_spill] sm:$0xff] %v7668_v1 }
 0x111   : > { %10495 = vst [vmem:[#allocation67_spill] sm:$0xff] %v7665_v29  ;;  %5924 = vrot.lane.b32.xlu0 %v7014_v52, %s6633_s23  ;;  %v5357_v52 = vunpack.i.h.bf16 %v7379_v42  ;;  %v1349_v29 = vsel %vm1337_vm3, %v10507_v31, %v5352_v43  ;;  %v1347_v43 = vsel %vm1337_vm3, %v10509_v24, %v5347_v0  ;;  %v1353_v51 = vsel %vm1337_vm3, %v10512_v10, %v5362_v34  ;;  %v10516_v0 = vld [vmem:[#allocation26_spill] sm:$0xff]  ;;  %v10518_v34 = vld [vmem:[#allocation40_spill] sm:$0xff] }
 0x112   : > { %1211 = vrot.lane.b32.xlu1 %v10499_v27, %s6634_s16  ;;  %v5346_v27 = vunpack.i.l.bf16 %v7371_v39  ;;  %v5356_v39 = vunpack.i.l.bf16 %v7379_v42  ;;  %v10510_v42 = vld [vmem:[#allocation21_spill] sm:$0xff]  ;;  %v1352_v17 = vsel %vm1337_vm3, %v10513_v6, %v5361_v25  ;;  %v5376_v10 = vunpack.i.l.bf16 %v7397_v56 }
 0x113   : > { %v7709_v1 = vpop.permute.xlu0 %5644  ;;  %v5391_v6 = vunpack.i.l.bf16 %v7407_v22  ;;  %v7755_v25 = vsel %vm1337_vm3, %v10518_v34, %v5371_v62  ;;  %v10522_v62 = vld [vmem:[#allocation8_spill] sm:$0xff]  ;;  %v5406_v34 = vunpack.i.l.bf16 %v7439_v11  ;;  %v5426_v22 = vunpack.i.l.bf16 %v10531_v7 }
 0x114   : > { %v7702_v12 = vpop.permute.xlu1 %5649  ;;  %10505 = vst [vmem:[#allocation17_spill] sm:$0xff] %v7709_v1  ;;  %v10508_v1 = vld [vmem:[#allocation28_spill] sm:$0xff]  ;;  %v1346_v31 = vsel %vm1337_vm3, %v10510_v42, %v5346_v27  ;;  %v7745_v27 = vsel %vm1337_vm3, %v10516_v0, %v5356_v39 }
 0x115   : > { %10503 = vst [vmem:[#allocation24_spill] sm:$0xff] %v7702_v12  ;;  %v5372_v12 = vunpack.i.h.bf16 %v7387_v50  ;;  %5929 = vrot.lane.b32.xlu0 %v7361_v32, %s6634_s16  ;;  %v1348_v58 = vsel %vm1337_vm3, %v10508_v1, %v5351_v28  ;;  %v5381_v50 = vunpack.i.l.bf16 %v7395_v59  ;;  %v10514_v32 = vld [vmem:[#allocation35_spill] sm:$0xff]  ;;  %v5377_v1 = vunpack.i.h.bf16 %v7397_v56  ;;  %v10521_v0 = vld [vmem:[#allocation44_spill] sm:$0xff] }
 0x116   : > { %v7738_v15 = vsel %vm1337_vm3, %v10514_v32, %v5357_v52  ;;  %v10517_v59 = vld [vmem:[#allocation39_spill] sm:$0xff]  ;;  %v10519_v52 = vld [vmem:[#allocation41_spill] sm:$0xff]  ;;  %v10520_v32 = vld [vmem:[#allocation32_spill] sm:$0xff] }
 0x117   : > { %v7741_v28 = vpop.permute.xlu0 %5654  ;;  %v7749_v24 = vsel %vm1337_vm3, %v10517_v59, %v5372_v12  ;;  %v7759_v42 = vsel %vm1337_vm3, %v10519_v52, %v5367_v26  ;;  %v7763_v39 = vsel %vm1337_vm3, %v10520_v32, %v5366_v40  ;;  %v7767_v12 = vsel %vm1337_vm3, %v10521_v0, %v5382_v4  ;;  %v10524_v40 = vld [vmem:[#allocation9_spill] sm:$0xff]  ;;  %v10525_v0 = vld [vmem:[#allocation11_spill] sm:$0xff] }
 0x118   : > { %v7730_v18 = vpop.permute.xlu1 %5659  ;;  %10515 = vst [vmem:[#allocation22_spill] sm:$0xff] %v7741_v28  ;;  %v7773_v56 = vsel %vm1337_vm3, %v7216_v5, %v5381_v50  ;;  %v5387_v59 = vunpack.i.h.bf16 %v10522_v62  ;;  %v5386_v26 = vunpack.i.l.bf16 %v10522_v62  ;;  %v7782_v32 = vsel %vm1337_vm3, %v10524_v40, %v5377_v1  ;;  %v10527_v50 = vld [vmem:[#allocation38_spill] sm:$0xff] }
 0x119   : > { %10511 = vst [vmem:[#allocation20_spill] sm:$0xff] %v7730_v18  ;;  %5934 = vrot.lane.b32.xlu0 %v7086_v57, %s6635_s17  ;;  %v5407_v4 = vunpack.i.h.bf16 %v7439_v11  ;;  %v5402_v57 = vunpack.i.h.bf16 %v10525_v0  ;;  %v1358_v28 = vsel %vm1337_vm3, %v10527_v50, %v5376_v10  ;;  %v10528_v62 = vld [vmem:[#allocation46_spill] sm:$0xff]  ;;  %v10534_v50 = vld [vmem:[#allocation12_spill] sm:$0xff] }
 0x11a   : > { %v1364_v18 = vsel %vm1337_vm3, %v10528_v62, %v5391_v6  ;;  %v10530_v1 = vld [vmem:[#allocation14_spill] sm:$0xff]  ;;  %v1362_v10 = vsel %vm1337_vm3, %v10533_v2, %v5386_v26  ;;  %v7804_v6 = vsel %vm1369_vm4, %v1340_v35, %v5406_v34  ;;  %v5422_v62 = vunpack.i.h.bf16 %v10534_v50 }
 0x11b   : > { %v7787_v5 = vpop.permute.xlu0 %5664  ;;  %v5412_v40 = vunpack.i.h.bf16 %v10530_v1  ;;  %v5411_v11 = vunpack.i.l.bf16 %v10530_v1  ;;  %v7810_v21 = vsel %vm1369_vm4, %v1341_v13, %v5407_v4  ;;  %v10535_v1 = vunpack.i.l.bf16 %v10525_v0  ;;  %v10537_v26 = vld [vmem:[#allocation10_spill] sm:$0xff] }
 0x11c   : > { %v7778_v52 = vpop.permute.xlu1 %5669  ;;  %10526 = vst [vmem:[#allocation18_spill] sm:$0xff] %v7787_v5  ;;  %v1363_v5 = vsel %vm1337_vm3, %v10532_v44, %v5387_v59  ;;  %v1371_v44 = vsel %vm1369_vm4, %v7687_v55, %v5402_v57  ;;  %v5421_v2 = vunpack.i.l.bf16 %v10534_v50  ;;  %v7829_v13 = vsel %vm1369_vm4, %v7697_v47, %v5416_v38  ;;  %v10538_v47 = vld [vmem:[#allocation48_spill] sm:$0xff] }
 0x11d   : > { %10523 = vst [vmem:[#allocation23_spill] sm:$0xff] %v7778_v52  ;;  %v5417_v52 = vunpack.i.h.bf16 %v10529_v8  ;;  %v7816_v7 = vsel %vm1369_vm4, %v7683_v9, %v10535_v1  ;;  %v5437_v34 = vunpack.i.h.bf16 %v10537_v26  ;;  %v5436_v9 = vunpack.i.l.bf16 %v10537_v26  ;;  %v10539_v1 = vld [vmem:[#allocation49_spill] sm:$0xff]  ;;  %v10542_v26 = vld [vmem:[#allocation31_spill] sm:$0xff] }
 0x11e   : > { %v7835_v4 = vsel %vm1369_vm4, %v7672_v61, %v5412_v40  ;;  %v7839_v55 = vsel %vm1369_vm4, %v7676_v23, %v5411_v11  ;;  %v7842_v57 = vsel %vm1369_vm4, %v1349_v29, %v5427_v46  ;;  %v7848_v38 = vsel %vm1369_vm4, %v1347_v43, %v5422_v62  ;;  %v10541_v29 = vld [vmem:[#allocation50_spill] sm:$0xff] }
 0x11f   : > { %v7821_v35 = vpop.permute.xlu0 %5674  ;;  %v7825_v59 = vsel %vm1369_vm4, %v7691_v19, %v5417_v52  ;;  %v7845_v19 = vsel %vm1369_vm4, %v1348_v58, %v5426_v22  ;;  %v5432_v52 = vunpack.i.h.bf16 %v10538_v47  ;;  %v5431_v50 = vunpack.i.l.bf16 %v10538_v47 }
 0x120   : > { %v7807_v8 = vpop.permute.xlu1 %5679  ;;  %10536 = vst [vmem:[#allocation19_spill] sm:$0xff] %v7821_v35  ;;  %v5447_v61 = vunpack.i.h.bf16 %v10539_v1  ;;  %v7856_v23 = vsel %vm1369_vm4, %v1346_v31, %v5421_v2  ;;  %v5446_v46 = vunpack.i.l.bf16 %v10539_v1  ;;  %v5442_v11 = vunpack.i.h.bf16 %v10541_v29  ;;  %v10543_v2 = vld [vmem:[#allocation25_spill] sm:$0xff] }
 0x121   : > { %v5441_v22 = vunpack.i.l.bf16 %v10541_v29  ;;  %v7864_v43 = vsel %vm1369_vm4, %v1353_v51, %v5437_v34  ;;  %v7867_v62 = vsel %vm1369_vm4, %v1352_v17, %v5436_v9  ;;  %v5457_v47 = vunpack.i.h.bf16 %v10542_v26 }
 0x122   : > { %v5456_v31 = vunpack.i.l.bf16 %v10542_v26  ;;  %v5452_v1 = vunpack.i.h.bf16 %v10543_v2  ;;  %v5451_v0 = vunpack.i.l.bf16 %v10543_v2  ;;  %v5466_v29 = vunpack.i.l.bf16 %v7495_v30 }
 0x123   : > { %v7861_v58 = vpop.permute.xlu0 %5684  ;;  %v1383_v51 = vsel %vm1369_vm4, %v7738_v15, %v5432_v52  ;;  %v7879_v17 = vsel %vm1369_vm4, %v7745_v27, %v5431_v50  ;;  %v7883_v34 = vsel %vm1369_vm4, %v7749_v24, %v5447_v61  ;;  %v7890_v2 = vsel %vm1369_vm4, %v7755_v25, %v5446_v46 }
 0x124   : > { %v7853_v40 = vpop.permute.xlu1 %5689  ;;  %v7894_v30 = vsel %vm1369_vm4, %v7759_v42, %v5442_v11  ;;  %v7898_v15 = vsel %vm1369_vm4, %v7763_v39, %v5441_v22  ;;  %v5481_v27 = vunpack.i.l.bf16 %v7515_v37  ;;  %v7905_v52 = vsel %vm1369_vm4, %v7767_v12, %v5457_v47 }
 0x125   : > { %10540 = vst [vmem:[#allocation27_spill] sm:$0xff] %v7853_v40  ;;  %v10544_v40 = vld [vmem:[#allocation30_spill] sm:$0xff]  ;;  %v7909_v25 = vsel %vm1369_vm4, %v7773_v56, %v5456_v31  ;;  %v5632_v50 = vunpack.i.h.bf16 %v7651_v16  ;;  %v5631_v42 = vunpack.i.l.bf16 %v7651_v16  ;;  %v7915_v39 = vsel %vm1369_vm4, %v7782_v32, %v5452_v1 }
 0x126   : > { %v5462_v35 = vunpack.i.h.bf16 %v10544_v40  ;;  %v5461_v9 = vunpack.i.l.bf16 %v10544_v40  ;;  %v7918_v61 = vsel %vm1369_vm4, %v1358_v28, %v5451_v0  ;;  %v7921_v40 = vsel %vm1369_vm4, %v1364_v18, %v5466_v29 }
 0x127   : > { %v7901_v24 = vpop.permute.xlu0 %5694  ;;  %v5482_v46 = vunpack.i.h.bf16 %v7515_v37  ;;  %v5477_v16 = vunpack.i.h.bf16 %v7517_v33  ;;  %v5476_v11 = vunpack.i.l.bf16 %v7517_v33  ;;  %v7933_v22 = vsel %vm1401_vm5, %v1371_v44, %v5481_v27 }
 0x128   : > { %v7886_v26 = vpop.permute.xlu1 %5699  ;;  %v7924_v12 = vsel %vm1369_vm4, %v1363_v5, %v5462_v35  ;;  %v7927_v56 = vsel %vm1369_vm4, %v1362_v10, %v5461_v9  ;;  %v5492_v28 = vunpack.i.h.bf16 %v7526_v60  ;;  %v5491_v5 = vunpack.i.l.bf16 %v7526_v60 }
 0x129   : > { %v5487_v10 = vunpack.i.h.bf16 %v7528_v54  ;;  %v1465_v37 = vsel %vm1434_vm6, %v7591_v53, %v5631_v42  ;;  %v1466_v33 = vsel %vm1434_vm6, %v7588_v49, %v5632_v50  ;;  %v5486_v35 = vunpack.i.l.bf16 %v7528_v54 }
 0x12a   : > { %v5501_v44 = vunpack.i.l.bf16 %v7534_v20  ;;  %v7954_v60 = vsel %vm1401_vm5, %v7804_v6, %v5482_v46  ;;  %v7958_v53 = vsel %vm1401_vm5, %v7816_v7, %v5477_v16  ;;  %v7962_v49 = vsel %vm1401_vm5, %v7816_v7, %v5476_v11 }
 0x12b   : > { %v7936_v47 = vpop.permute.xlu0 %5704  ;;  %v5502_v54 = vunpack.i.h.bf16 %v7534_v20  ;;  %v5497_v9 = vunpack.i.h.bf16 %v7536_v45  ;;  %v5496_v27 = vunpack.i.l.bf16 %v7536_v45  ;;  %v5512_v50 = vunpack.i.h.bf16 %v7542_v63 }
 0x12c   : > { %v5710_v32 = vpop.permute.xlu1 %5709  ;;  %10545 = vst [vmem:[#allocation28_spill] sm:$0xff] %v7936_v47  ;;  %v5511_v6 = vunpack.i.l.bf16 %v7542_v63  ;;  %v1408_v46 = vsel %vm1401_vm5, %v7835_v4, %v5491_v5  ;;  %v1409_v7 = vsel %vm1401_vm5, %v7829_v13, %v5492_v28  ;;  %v5507_v20 = vunpack.i.h.bf16 %v7544_v14 }
 0x12d   : > { %v5712_v18 = vunpack.i.h.bf16 %v5710_v32  ;;  %v5711_v0 = vunpack.i.l.bf16 %v5710_v32  ;;  %v5506_v16 = vunpack.i.l.bf16 %v7544_v14  ;;  %v1407_v11 = vsel %vm1401_vm5, %v7839_v55, %v5487_v10  ;;  %v10548_v10 = vld [vmem:[#allocation36_spill] sm:$0xff] }
 0x12e   : > { %v1406_v45 = vsel %vm1401_vm5, %v7810_v21, %v5486_v35  ;;  %v7985_v63 = vsel %vm1401_vm5, %v7848_v38, %v5501_v44  ;;  %v5521_v32 = vunpack.i.l.bf16 %v7550_v3  ;;  %v7990_v4 = vsel %vm1401_vm5, %v7845_v19, %v5502_v54  ;;  %v10549_v35 = vld [vmem:[#allocation42_spill] sm:$0xff]  ;;  %v10550_v54 = vld [vmem:[#allocation52_spill] sm:$0xff] }
 0x12f   : > { %v7947_v31 = vsel %vm1467_vm7, %v1465_v37, %v5711_v0  ;;  %v7950_v1 = vsel %vm1467_vm7, %v1466_v33, %v5712_v18  ;;  %v7971_v42 = vpop.permute.xlu0 %5714  ;;  %v5522_v13 = vunpack.i.h.bf16 %v7550_v3  ;;  %v5517_v14 = vunpack.i.h.bf16 %v7552_v36 }
 0x130   : > { %10546 = vst [vmem:[#allocation29_spill] sm:$0xff] %v7947_v31  ;;  %10547 = vst [vmem:[#allocation21_spill] sm:$0xff] %v7950_v1  ;;  %v7965_v29 = vpop.permute.xlu1 %5719  ;;  %v5516_v28 = vunpack.i.l.bf16 %v7552_v36  ;;  %v7999_v21 = vsel %vm1401_vm5, %v7856_v23, %v5497_v9  ;;  %v8003_v38 = vsel %vm1401_vm5, %v7825_v59, %v5496_v27  ;;  %v8006_v18 = vsel %vm1401_vm5, %v1383_v51, %v5511_v6  ;;  %v10569_v1 = vld [vmem:[#allocation17_spill] sm:$0xff] }
 0x131   : > { %v8010_v3 = vsel %vm1401_vm5, %v7867_v62, %v5512_v50  ;;  %v8016_v36 = vsel %vm1401_vm5, %v7879_v17, %v5507_v20  ;;  %v8020_v23 = vsel %vm1401_vm5, %v7842_v57, %v5506_v16  ;;  %v5532_v59 = vunpack.i.h.bf16 %v7558_v48  ;;  %v10551_v50 = vld [vmem:[#allocation53_spill] sm:$0xff] }
 0x132   : > { %v5531_v0 = vunpack.i.l.bf16 %v7558_v48  ;;  %v8026_v51 = vsel %vm1401_vm5, %v7894_v30, %v5521_v32  ;;  %v5527_v62 = vunpack.i.h.bf16 %v7560_v41  ;;  %v5526_v5 = vunpack.i.l.bf16 %v7560_v41 }
 0x133   : > { %v8012_v19 = vpop.permute.xlu0 %5724  ;;  %v5541_v37 = vunpack.i.l.bf16 %v10548_v10  ;;  %v8033_v17 = vsel %vm1401_vm5, %v7890_v2, %v5522_v13  ;;  %v8037_v57 = vsel %vm1401_vm5, %v7898_v15, %v5517_v14  ;;  %v8041_v48 = vsel %vm1401_vm5, %v7864_v43, %v5516_v28 }
 0x134   : > { %v7995_v55 = vpop.permute.xlu1 %5729  ;;  %v5542_v30 = vunpack.i.h.bf16 %v10548_v10  ;;  %v5537_v41 = vunpack.i.h.bf16 %v10549_v35  ;;  %v5536_v44 = vunpack.i.l.bf16 %v10549_v35  ;;  %v5562_v9 = vunpack.i.h.bf16 %v10550_v54 }
 0x135   : > { %v5561_v2 = vunpack.i.l.bf16 %v10550_v54  ;;  %v1424_v15 = vsel %vm1401_vm5, %v7915_v39, %v5531_v0  ;;  %v8056_v43 = vsel %vm1401_vm5, %v7909_v25, %v5532_v59  ;;  %v5557_v6 = vunpack.i.h.bf16 %v10551_v50  ;;  %v10552_v39 = vld [vmem:[#allocation54_spill] sm:$0xff]  ;;  %v10554_v59 = vld [vmem:[#allocation55_spill] sm:$0xff] }
 0x136   : > { %v5556_v20 = vunpack.i.l.bf16 %v10551_v50  ;;  %v8062_v16 = vsel %vm1401_vm5, %v7918_v61, %v5527_v62  ;;  %v1422_v32 = vsel %vm1401_vm5, %v7883_v34, %v5526_v5  ;;  %v8068_v13 = vsel %vm1401_vm5, %v7924_v12, %v5541_v37  ;;  %v10559_v54 = vld [vmem:[#allocation58_spill] sm:$0xff] }
 0x137   : > { %v8050_v27 = vpop.permute.xlu0 %5734  ;;  %v5571_v14 = vunpack.i.l.bf16 %v10552_v39  ;;  %v8073_v25 = vsel %vm1401_vm5, %v7921_v40, %v5542_v30  ;;  %v5572_v28 = vunpack.i.h.bf16 %v10552_v39  ;;  %v5567_v0 = vunpack.i.h.bf16 %v10554_v59 }
 0x138   : > { %v8044_v33 = vpop.permute.xlu1 %5739  ;;  %10553 = vst [vmem:[#allocation33_spill] sm:$0xff] %v8073_v25  ;;  %v5566_v61 = vunpack.i.l.bf16 %v10554_v59  ;;  %v8082_v34 = vsel %vm1401_vm5, %v7927_v56, %v5537_v41  ;;  %v8086_v12 = vsel %vm1401_vm5, %v7905_v52, %v5536_v44  ;;  %v8090_v40 = vsel %vm1434_vm6, %v7933_v22, %v5561_v2  ;;  %v10557_v52 = vld [vmem:[#allocation56_spill] sm:$0xff]  ;;  %v10558_v41 = vld [vmem:[#allocation57_spill] sm:$0xff] }
 0x139   : > { %10555 = vst [vmem:[#allocation34_spill] sm:$0xff] %v8082_v34  ;;  %10556 = vst [vmem:[#allocation35_spill] sm:$0xff] %v8086_v12  ;;  %v8094_v5 = vsel %vm1434_vm6, %v7954_v60, %v5562_v9  ;;  %v8100_v37 = vsel %vm1434_vm6, %v7962_v49, %v5556_v20  ;;  %v8104_v56 = vsel %vm1434_vm6, %v7958_v53, %v5557_v6  ;;  %v5582_v30 = vunpack.i.h.bf16 %v10557_v52 }
 0x13a   : > { %v5581_v35 = vunpack.i.l.bf16 %v10557_v52  ;;  %v1441_v22 = vsel %vm1434_vm6, %v1408_v46, %v5571_v14  ;;  %v5577_v44 = vunpack.i.h.bf16 %v10558_v41  ;;  %v5576_v60 = vunpack.i.l.bf16 %v10558_v41  ;;  %v10560_v46 = vld [vmem:[#allocation59_spill] sm:$0xff]  ;;  %v10561_v14 = vld [vmem:[#allocation60_spill] sm:$0xff] }
 0x13b   : > { %v8096_v10 = vpop.permute.xlu0 %5744  ;;  %v5591_v9 = vunpack.i.l.bf16 %v10559_v54  ;;  %v8113_v2 = vsel %vm1434_vm6, %v1409_v7, %v5572_v28  ;;  %v8116_v49 = vsel %vm1434_vm6, %v1406_v45, %v5566_v61  ;;  %v8119_v53 = vsel %vm1434_vm6, %v1407_v11, %v5567_v0  ;;  %v10562_v28 = vld [vmem:[#allocation61_spill] sm:$0xff] }
 0x13c   : > { %v8078_v62 = vpop.permute.xlu1 %5749  ;;  %v5592_v50 = vunpack.i.h.bf16 %v10559_v54  ;;  %v5587_v20 = vunpack.i.h.bf16 %v10560_v46  ;;  %v5586_v39 = vunpack.i.l.bf16 %v10560_v46  ;;  %v5602_v59 = vunpack.i.h.bf16 %v10561_v14 }
 0x13d   : > { %v5601_v52 = vunpack.i.l.bf16 %v10561_v14  ;;  %v8132_v45 = vsel %vm1434_vm6, %v7985_v63, %v5581_v35  ;;  %v8136_v11 = vsel %vm1434_vm6, %v7990_v4, %v5582_v30  ;;  %v5597_v0 = vunpack.i.h.bf16 %v10562_v28  ;;  %v10563_v35 = vld [vmem:[#allocation62_spill] sm:$0xff]  ;;  %v10564_v14 = vld [vmem:[#allocation63_spill] sm:$0xff] }
 0x13e   : > { %v5596_v61 = vunpack.i.l.bf16 %v10562_v28  ;;  %v8142_v41 = vsel %vm1434_vm6, %v8003_v38, %v5576_v60  ;;  %v8146_v54 = vsel %vm1434_vm6, %v7999_v21, %v5577_v44  ;;  %v8150_v63 = vsel %vm1434_vm6, %v8006_v18, %v5591_v9 }
 0x13f   : > { %v8128_v7 = vpop.permute.xlu0 %5754  ;;  %v5611_v46 = vunpack.i.l.bf16 %v10563_v35  ;;  %v8155_v4 = vsel %vm1434_vm6, %v8010_v3, %v5592_v50  ;;  %v5612_v30 = vunpack.i.h.bf16 %v10563_v35  ;;  %v5607_v28 = vunpack.i.h.bf16 %v10564_v14 }
 0x140   : > { %v8122_v6 = vpop.permute.xlu1 %5759  ;;  %v5606_v38 = vunpack.i.l.bf16 %v10564_v14  ;;  %v8164_v21 = vsel %vm1434_vm6, %v8020_v23, %v5586_v39  ;;  %v8168_v18 = vsel %vm1434_vm6, %v8016_v36, %v5587_v20  ;;  %v8172_v3 = vsel %vm1434_vm6, %v8026_v51, %v5601_v52  ;;  %v10565_v36 = vld [vmem:[#allocation64_spill] sm:$0xff]  ;;  %v10566_v39 = vld [vmem:[#allocation67_spill] sm:$0xff] }
 0x141   : > { %v8176_v44 = vsel %vm1434_vm6, %v8033_v17, %v5602_v59  ;;  %v8182_v50 = vsel %vm1434_vm6, %v8041_v48, %v5596_v61  ;;  %v8186_v23 = vsel %vm1434_vm6, %v8037_v57, %v5597_v0  ;;  %v5621_v20 = vunpack.i.l.bf16 %v10565_v36  ;;  %v10567_v59 = vld [vmem:[#allocation68_spill] sm:$0xff] }
 0x142   : > { %v5641_v35 = vunpack.i.l.bf16 %v10566_v39  ;;  %v8191_v51 = vsel %vm1434_vm6, %v1424_v15, %v5611_v46  ;;  %v5642_v17 = vunpack.i.h.bf16 %v10566_v39  ;;  %v5637_v52 = vunpack.i.h.bf16 %v10567_v59  ;;  %v10568_v15 = vld [vmem:[#allocation24_spill] sm:$0xff] }
 0x143   : > { %v8178_v9 = vpop.permute.xlu0 %5764  ;;  %v5636_v14 = vunpack.i.l.bf16 %v10567_v59  ;;  %v8198_v48 = vsel %vm1434_vm6, %v8056_v43, %v5612_v30  ;;  %v8201_v57 = vsel %vm1434_vm6, %v1422_v32, %v5606_v38  ;;  %v8205_v0 = vsel %vm1434_vm6, %v8062_v16, %v5607_v28 }
 0x144   : > { %v8160_v60 = vpop.permute.xlu1 %5769  ;;  %v5651_v61 = vunpack.i.l.bf16 %v10568_v15  ;;  %v5652_v59 = vunpack.i.h.bf16 %v10568_v15  ;;  %v5647_v31 = vunpack.i.h.bf16 %v10569_v1  ;;  %v5646_v43 = vunpack.i.l.bf16 %v10569_v1 }
 0x145   : > { %v8218_v32 = vsel %vm1434_vm6, %v8068_v13, %v5621_v20  ;;  %v1470_v47 = vsel %vm1467_vm7, %v8090_v40, %v5641_v35  ;;  %v1471_v15 = vsel %vm1467_vm7, %v8094_v5, %v5642_v17  ;;  %v1468_v39 = vsel %vm1467_vm7, %v8100_v37, %v5636_v14  ;;  %v10573_v35 = vld [vmem:[#allocation20_spill] sm:$0xff] }
 0x146   : > { %10571 = vst [vmem:[#allocation39_spill] sm:$0xff] %v8218_v32  ;;  %v1469_v1 = vsel %vm1467_vm7, %v8104_v56, %v5637_v52  ;;  %v5721_v34 = vunpack.i.l.bf16 %v7965_v29  ;;  %v1474_v13 = vsel %vm1467_vm7, %v1441_v22, %v5651_v61  ;;  %v5722_v20 = vunpack.i.h.bf16 %v7965_v29  ;;  %v10574_v52 = vld [vmem:[#allocation22_spill] sm:$0xff] }
 0x147   : > { %v8214_v30 = vpop.permute.xlu0 %5774  ;;  %v5717_v28 = vunpack.i.h.bf16 %v7971_v42  ;;  %v5716_v38 = vunpack.i.l.bf16 %v7971_v42  ;;  %v1475_v5 = vsel %vm1467_vm7, %v8113_v2, %v5652_v59  ;;  %v1472_v37 = vsel %vm1467_vm7, %v8116_v49, %v5646_v43 }
 0x148   : > { %v8208_v46 = vpop.permute.xlu1 %5779  ;;  %10570 = vst [vmem:[#allocation26_spill] sm:$0xff] %v8214_v30  ;;  %v1473_v56 = vsel %vm1467_vm7, %v8119_v53, %v5647_v31  ;;  %v5662_v17 = vunpack.i.h.bf16 %v10573_v35  ;;  %v5661_v29 = vunpack.i.l.bf16 %v10573_v35  ;;  %v5656_v32 = vunpack.i.l.bf16 %v10574_v52 }
 0x149   : > { %v1503_v12 = vsel %vm1500_vm8, %v1470_v47, %v5721_v34  ;;  %v1504_v49 = vsel %vm1500_vm8, %v1471_v15, %v5722_v20  ;;  %v5732_v43 = vunpack.i.h.bf16 %v7995_v55  ;;  %v1501_v53 = vsel %vm1500_vm8, %v1468_v39, %v5716_v38 }
 0x14a   : > { %v1502_v16 = vsel %vm1500_vm8, %v1469_v1, %v5717_v28  ;;  %v5731_v35 = vunpack.i.l.bf16 %v7995_v55  ;;  %v5727_v14 = vunpack.i.h.bf16 %v8012_v19  ;;  %v5726_v55 = vunpack.i.l.bf16 %v8012_v19 }
 0x14b   : > { %v5785_v22 = vpop.permute.xlu0 %5784 }
 0x14c   : > { %v5790_v40 = vpop.permute.xlu1 %5789  ;;  %v5787_v2 = vunpack.i.h.bf16 %v5785_v22  ;;  %v5786_v59 = vunpack.i.l.bf16 %v5785_v22 }
 0x14d   : > { %v5792_v61 = vunpack.i.h.bf16 %v5790_v40  ;;  %v5791_v42 = vunpack.i.l.bf16 %v5790_v40 }
 0x14e   : > { %v1534_v39 = vsel %vm1533_vm9, %v1501_v53, %v5786_v59  ;;  %v1535_v28 = vsel %vm1533_vm9, %v1502_v16, %v5787_v2  ;;  %v10575_v16 = vld [vmem:[#allocation23_spill] sm:$0xff] }
 0x14f   : > { %v5795_v25 = vpop.permute.xlu0 %5794  ;;  %v1536_v47 = vsel %vm1533_vm9, %v1503_v12, %v5791_v42  ;;  %v1537_v34 = vsel %vm1533_vm9, %v1504_v49, %v5792_v61  ;;  %v1478_v61 = vsel %vm1467_vm7, %v8132_v45, %v5661_v29  ;;  %v5672_v2 = vunpack.i.h.bf16 %v10575_v16 }
 0x150   : > { %v5800_v31 = vpop.permute.xlu1 %5799  ;;  %v5797_v22 = vunpack.i.h.bf16 %v5795_v25  ;;  %v5796_v15 = vunpack.i.l.bf16 %v5795_v25  ;;  %v1479_v25 = vsel %vm1467_vm7, %v8136_v11, %v5662_v17  ;;  %v5671_v19 = vunpack.i.l.bf16 %v10575_v16 }
 0x151   : > { %v5802_v40 = vunpack.i.h.bf16 %v5800_v31  ;;  %v5801_v30 = vunpack.i.l.bf16 %v5800_v31  ;;  %v1508_v11 = vsel %vm1500_vm8, %v1475_v5, %v5732_v43  ;;  %v5742_v17 = vunpack.i.h.bf16 %v8044_v33 }
 0x152   : > { %v1567_v1 = vsel %vm1566_vm10, %v1534_v39, %v5796_v15  ;;  %v1568_v31 = vsel %vm1566_vm10, %v1535_v28, %v5797_v22  ;;  %v5741_v22 = vunpack.i.l.bf16 %v8044_v33  ;;  %v5737_v15 = vunpack.i.h.bf16 %v8050_v27 }
 0x153   : > { %v1569_v20 = vsel %vm1566_vm10, %v1536_v47, %v5801_v30  ;;  %v1570_v36 = vsel %vm1566_vm10, %v1537_v34, %v5802_v40  ;;  %v1476_v30 = vsel %vm1467_vm7, %v8142_v41, %v5656_v32  ;;  %v5805_v42 = vpop.permute.xlu0 %5804  ;;  %v1599_v59 = vpack.c.bf16 %v1568_v31, %v1567_v1  ;;  %v10576_v40 = vld [vmem:[#allocation18_spill] sm:$0xff] }
 0x154   : > { %v5810_v38 = vpop.permute.xlu1 %5809  ;;  %v1600_v12 = vpack.c.bf16 %v1570_v36, %v1569_v20  ;;  %v5666_v47 = vunpack.i.l.bf16 %v10576_v40  ;;  %v1507_v36 = vsel %vm1500_vm8, %v1474_v13, %v5731_v35  ;;  %v5807_v34 = vunpack.i.h.bf16 %v5805_v42 }
 0x155   : > { %v5812_v49 = vunpack.i.h.bf16 %v5810_v38  ;;  %v5811_v53 = vunpack.i.l.bf16 %v5810_v38  ;;  %v5806_v45 = vunpack.i.l.bf16 %v5805_v42  ;;  %5194 = vmatprep.mubr.msk.bf16.mxu0 %vm1635_vm11, %v1599_v59  ;;  %v1505_v41 = vsel %vm1500_vm8, %v1472_v37, %v5726_v55 }
 0x156   : > { %v1506_v32 = vsel %vm1500_vm8, %v1473_v56, %v5727_v14  ;;  %5195 = vmatmul.mubr.msk.bf16.vlgmr.msra.gmra.mxu0 %vm1635_vm11, %v1600_v12  ;;  %v5736_v33 = vunpack.i.l.bf16 %v8050_v27  ;;  %v10577_v42 = vunpack.i.h.bf16 %v10574_v52  ;;  %v1482_v16 = vsel %vm1467_vm7, %v8150_v63, %v5671_v19 }
 0x157   : > { %v5815_v20 = vpop.permute.xlu0 %5814  ;;  %v1540_v39 = vsel %vm1533_vm9, %v1507_v36, %v5811_v53  ;;  %v1541_v5 = vsel %vm1533_vm9, %v1508_v11, %v5812_v49  ;;  %v1538_v56 = vsel %vm1533_vm9, %v1505_v41, %v5806_v45  ;;  %v1539_v14 = vsel %vm1533_vm9, %v1506_v32, %v5807_v34 }
 0x158   : > { %v5820_v29 = vpop.permute.xlu1 %5819  ;;  %v5817_v43 = vunpack.i.h.bf16 %v5815_v20  ;;  %v5816_v37 = vunpack.i.l.bf16 %v5815_v20  ;;  %v1477_v59 = vsel %vm1467_vm7, %v8146_v54, %v10577_v42  ;;  %v5667_v49 = vunpack.i.h.bf16 %v10576_v40 }
 0x159   : > { %v5822_v13 = vunpack.i.h.bf16 %v5820_v29  ;;  %v5821_v35 = vunpack.i.l.bf16 %v5820_v29  ;;  %v1483_v27 = vsel %vm1467_vm7, %v8155_v4, %v5672_v2  ;;  %v1480_v34 = vsel %vm1467_vm7, %v8164_v21, %v5666_v47 }
 0x15a   : > { %v1571_v38 = vsel %vm1566_vm10, %v1538_v56, %v5816_v37  ;;  %v1572_v1 = vsel %vm1566_vm10, %v1539_v14, %v5817_v43  ;;  %v5681_v52 = vunpack.i.l.bf16 %v7807_v8  ;;  %v1511_v41 = vsel %vm1500_vm8, %v1478_v61, %v5741_v22 }
 0x15b   : > { %v1573_v28 = vsel %vm1566_vm10, %v1540_v39, %v5821_v35  ;;  %v1574_v55 = vsel %vm1566_vm10, %v1541_v5, %v5822_v13  ;;  %v5825_v53 = vpop.permute.xlu0 %5824  ;;  %v1601_v36 = vpack.c.bf16 %v1572_v1, %v1571_v38  ;;  %v1512_v63 = vsel %vm1500_vm8, %v1479_v25, %v5742_v17 }
 0x15c   : > { %v5830_v31 = vpop.permute.xlu1 %5829  ;;  %v1602_v12 = vpack.c.bf16 %v1574_v55, %v1573_v28  ;;  %v5827_v54 = vunpack.i.h.bf16 %v5825_v53  ;;  %v5826_v32 = vunpack.i.l.bf16 %v5825_v53  ;;  %v1509_v19 = vsel %vm1500_vm8, %v1476_v30, %v5736_v33  ;;  %v10578_v55 = vld [vmem:[#allocation19_spill] sm:$0xff] }
 0x15d   : > { %v5832_v45 = vunpack.i.h.bf16 %v5830_v31  ;;  %v5831_v11 = vunpack.i.l.bf16 %v5830_v31  ;;  %5198 = vmatprep.mubr.msk.bf16.mxu0 %vm1635_vm11, %v1601_v36  ;;  %v1510_v40 = vsel %vm1500_vm8, %v1477_v59, %v5737_v15  ;;  %v5752_v4 = vunpack.i.h.bf16 %v8078_v62  ;;  %v10579_v59 = vld [vmem:[#allocation27_spill] sm:$0xff] }
 0x15e   : > { %5199 = vmatmul.mubr.msk.bf16.gmra.mxu0 %vm1635_vm11, %v1602_v12  ;;  %v5751_v2 = vunpack.i.l.bf16 %v8078_v62  ;;  %v5747_v47 = vunpack.i.h.bf16 %v8096_v10  ;;  %v1542_v15 = vsel %vm1533_vm9, %v1509_v19, %v5826_v32  ;;  %v1543_v35 = vsel %vm1533_vm9, %v1510_v40, %v5827_v54 }
 0x15f   : > { %v5835_v22 = vpop.permute.xlu0 %5834  ;;  %v1544_v13 = vsel %vm1533_vm9, %v1511_v41, %v5831_v11  ;;  %v1545_v25 = vsel %vm1533_vm9, %v1512_v63, %v5832_v45  ;;  %v5746_v62 = vunpack.i.l.bf16 %v8096_v10  ;;  %v1481_v14 = vsel %vm1467_vm7, %v8168_v18, %v5667_v49 }
 0x160   : > { %v5840_v21 = vpop.permute.xlu1 %5839  ;;  %v5837_v17 = vunpack.i.h.bf16 %v5835_v22  ;;  %v5836_v30 = vunpack.i.l.bf16 %v5835_v22  ;;  %v5682_v28 = vunpack.i.h.bf16 %v7807_v8  ;;  %v5677_v33 = vunpack.i.h.bf16 %v10578_v55 }
 0x161   : > { %v5842_v61 = vunpack.i.h.bf16 %v5840_v21  ;;  %v5841_v29 = vunpack.i.l.bf16 %v5840_v21  ;;  %v1486_v31 = vsel %vm1467_vm7, %v8172_v3, %v5681_v52  ;;  %v5676_v10 = vunpack.i.l.bf16 %v10578_v55 }
 0x162   : > { %v1575_v5 = vsel %vm1566_vm10, %v1542_v15, %v5836_v30  ;;  %v1576_v43 = vsel %vm1566_vm10, %v1543_v35, %v5837_v17  ;;  %v5691_v53 = vunpack.i.l.bf16 %v10579_v59  ;;  %v1515_v36 = vsel %vm1500_vm8, %v1482_v16, %v5751_v2 }
 0x163   : > { %v1577_v20 = vsel %vm1566_vm10, %v1544_v13, %v5841_v29  ;;  %v1578_v39 = vsel %vm1566_vm10, %v1545_v25, %v5842_v61  ;;  %v5845_v38 = vpop.permute.xlu0 %5844  ;;  %v1603_v1 = vpack.c.bf16 %v1576_v43, %v1575_v5  ;;  %v1516_v8 = vsel %vm1500_vm8, %v1483_v27, %v5752_v4 }
 0x164   : > { %v5850_v37 = vpop.permute.xlu1 %5849  ;;  %v1604_v56 = vpack.c.bf16 %v1578_v39, %v1577_v20  ;;  %v5847_v45 = vunpack.i.h.bf16 %v5845_v38  ;;  %v5846_v11 = vunpack.i.l.bf16 %v5845_v38  ;;  %v1513_v18 = vsel %vm1500_vm8, %v1480_v34, %v5746_v62 }
 0x165   : > { %v5852_v12 = vunpack.i.h.bf16 %v5850_v37  ;;  %v5851_v42 = vunpack.i.l.bf16 %v5850_v37  ;;  %5202 = vmatprep.mubr.msk.bf16.mxu0 %vm1635_vm11, %v1603_v1  ;;  %v1514_v49 = vsel %vm1500_vm8, %v1481_v14, %v5747_v47  ;;  %v5762_v3 = vunpack.i.h.bf16 %v8122_v6 }
 0x166   : > { %5203 = vmatmul.mubr.msk.bf16.gmra.mxu0 %vm1635_vm11, %v1604_v56  ;;  %v5761_v41 = vunpack.i.l.bf16 %v8122_v6  ;;  %v5757_v54 = vunpack.i.h.bf16 %v8128_v7  ;;  %v1546_v4 = vsel %vm1533_vm9, %v1513_v18, %v5846_v11  ;;  %v1547_v21 = vsel %vm1533_vm9, %v1514_v49, %v5847_v45 }
 0x167   : > { %v5855_v63 = vpop.permute.xlu0 %5854  ;;  %v1548_v19 = vsel %vm1533_vm9, %v1515_v36, %v5851_v42  ;;  %v1549_v27 = vsel %vm1533_vm9, %v1516_v8, %v5852_v12  ;;  %v5756_v6 = vunpack.i.l.bf16 %v8128_v7  ;;  %v1487_v25 = vsel %vm1467_vm7, %v8176_v44, %v5682_v28 }
 0x168   : > { %v5860_v52 = vpop.permute.xlu1 %5859  ;;  %v5857_v40 = vunpack.i.h.bf16 %v5855_v63  ;;  %v5856_v34 = vunpack.i.l.bf16 %v5855_v63  ;;  %v1484_v17 = vsel %vm1467_vm7, %v8182_v50, %v5676_v10  ;;  %v1485_v30 = vsel %vm1467_vm7, %v8186_v23, %v5677_v33 }
 0x169   : > { %v5862_v16 = vunpack.i.h.bf16 %v5860_v52  ;;  %v5861_v32 = vunpack.i.l.bf16 %v5860_v52  ;;  %v5692_v20 = vunpack.i.h.bf16 %v10579_v59  ;;  %v5687_v7 = vunpack.i.h.bf16 %v7861_v58 }
 0x16a   : > { %v1579_v61 = vsel %vm1566_vm10, %v1546_v4, %v5856_v34  ;;  %v1580_v29 = vsel %vm1566_vm10, %v1547_v21, %v5857_v40  ;;  %v1490_v5 = vsel %vm1467_vm7, %v8191_v51, %v5691_v53  ;;  %v5686_v43 = vunpack.i.l.bf16 %v7861_v58 }
 0x16b   : > { %v1581_v2 = vsel %vm1566_vm10, %v1548_v19, %v5861_v32  ;;  %v1582_v47 = vsel %vm1566_vm10, %v1549_v27, %v5862_v16  ;;  %v5865_v15 = vpop.permute.xlu0 %5864  ;;  %v1605_v35 = vpack.c.bf16 %v1580_v29, %v1579_v61  ;;  %v1519_v50 = vsel %vm1500_vm8, %v1486_v31, %v5761_v41 }
 0x16c   : > { %v5870_v22 = vpop.permute.xlu1 %5869  ;;  %v1606_v13 = vpack.c.bf16 %v1582_v47, %v1581_v2  ;;  %v5867_v44 = vunpack.i.h.bf16 %v5865_v15  ;;  %v5866_v37 = vunpack.i.l.bf16 %v5865_v15  ;;  %v1520_v23 = vsel %vm1500_vm8, %v1487_v25, %v5762_v3 }
 0x16d   : > { %v5872_v39 = vunpack.i.h.bf16 %v5870_v22  ;;  %v5871_v62 = vunpack.i.l.bf16 %v5870_v22  ;;  %5206 = vmatprep.mubr.msk.bf16.mxu0 %vm1635_vm11, %v1605_v35  ;;  %v1517_v56 = vsel %vm1500_vm8, %v1484_v17, %v5756_v6  ;;  %v1518_v14 = vsel %vm1500_vm8, %v1485_v30, %v5757_v54 }
 0x16e   : > { %5207 = vmatmul.mubr.msk.bf16.gmra.mxu0 %vm1635_vm11, %v1606_v13  ;;  %v5772_v55 = vunpack.i.h.bf16 %v8160_v60  ;;  %v5771_v51 = vunpack.i.l.bf16 %v8160_v60  ;;  %v1550_v42 = vsel %vm1533_vm9, %v1517_v56, %v5866_v37  ;;  %v1551_v59 = vsel %vm1533_vm9, %v1518_v14, %v5867_v44  ;;  %v10582_v44 = vld [vmem:[#allocation33_spill] sm:$0xff] }
 0x16f   : > { %v5875_v38 = vpop.permute.xlu0 %5874  ;;  %v1552_v1 = vsel %vm1533_vm9, %v1519_v50, %v5871_v62  ;;  %v1553_v31 = vsel %vm1533_vm9, %v1520_v23, %v5872_v39  ;;  %v5766_v45 = vunpack.i.l.bf16 %v8178_v9  ;;  %v1491_v49 = vsel %vm1467_vm7, %v8198_v48, %v5692_v20  ;;  %v10583_v50 = vld [vmem:[#allocation26_spill] sm:$0xff] }
 0x170   : > { %v5880_v28 = vpop.permute.xlu1 %5879  ;;  %v5877_v10 = vunpack.i.h.bf16 %v5875_v38  ;;  %v5876_v12 = vunpack.i.l.bf16 %v5875_v38  ;;  %v1488_v3 = vsel %vm1467_vm7, %v8201_v57, %v5686_v43  ;;  %v5767_v52 = vunpack.i.h.bf16 %v8178_v9  ;;  %v10588_v38 = vld [vmem:[#allocation34_spill] sm:$0xff] }
 0x171   : > { %v5882_v58 = vunpack.i.h.bf16 %v5880_v28  ;;  %v5881_v33 = vunpack.i.l.bf16 %v5880_v28  ;;  %v1489_v16 = vsel %vm1467_vm7, %v8205_v0, %v5687_v7  ;;  %v5702_v32 = vunpack.i.h.bf16 %v7886_v26 }
 0x172   : > { %v1583_v60 = vsel %vm1566_vm10, %v1550_v42, %v5876_v12  ;;  %v1584_v11 = vsel %vm1566_vm10, %v1551_v59, %v5877_v10  ;;  %v5701_v27 = vunpack.i.l.bf16 %v7886_v26  ;;  %v5697_v40 = vunpack.i.h.bf16 %v7901_v24  ;;  %v10589_v12 = vld [vmem:[#allocation39_spill] sm:$0xff] }
 0x173   : > { %v1585_v53 = vsel %vm1566_vm10, %v1552_v1, %v5881_v33  ;;  %v1586_v36 = vsel %vm1566_vm10, %v1553_v31, %v5882_v58  ;;  %v5885_v41 = vpop.permute.xlu0 %5884  ;;  %v1607_v54 = vpack.c.bf16 %v1584_v11, %v1583_v60  ;;  %v5696_v57 = vunpack.i.l.bf16 %v7901_v24 }
 0x174   : > { %v5890_v8 = vpop.permute.xlu1 %5889  ;;  %v1608_v18 = vpack.c.bf16 %v1586_v36, %v1585_v53  ;;  %v5887_v34 = vunpack.i.h.bf16 %v5885_v41  ;;  %v5886_v48 = vunpack.i.l.bf16 %v5885_v41  ;;  %v1523_v9 = vsel %vm1500_vm8, %v1490_v5, %v5771_v51  ;;  %v10580_v5 = vld [vmem:[#allocation64_spill] sm:$0xff] }
 0x175   : > { %v5892_v63 = vunpack.i.h.bf16 %v5890_v8  ;;  %v5891_v19 = vunpack.i.l.bf16 %v5890_v8  ;;  %5210 = vmatprep.mubr.msk.bf16.mxu0 %vm1635_vm11, %v1607_v54  ;;  %v1524_v4 = vsel %vm1500_vm8, %v1491_v49, %v5772_v55  ;;  %v1521_v0 = vsel %vm1500_vm8, %v1488_v3, %v5766_v45  ;;  %v10584_v55 = vld [vmem:[#allocation65_spill] sm:$0xff] }
 0x176   : > { %5211 = vmatmul.mubr.msk.bf16.gmra.mxu0 %vm1635_vm11, %v1608_v18  ;;  %v1522_v2 = vsel %vm1500_vm8, %v1489_v16, %v5767_v52  ;;  %v5782_v26 = vunpack.i.h.bf16 %v8208_v46  ;;  %v1554_v25 = vsel %vm1533_vm9, %v1521_v0, %v5886_v48  ;;  %v5781_v35 = vunpack.i.l.bf16 %v8208_v46  ;;  %v10586_v46 = vld [vmem:[#allocation35_spill] sm:$0xff] }
 0x177   : > { %v5895_v61 = vpop.permute.xlu0 %5894  ;;  %v1556_v29 = vsel %vm1533_vm9, %v1523_v9, %v5891_v19  ;;  %v1557_v24 = vsel %vm1533_vm9, %v1524_v4, %v5892_v63  ;;  %v1555_v17 = vsel %vm1533_vm9, %v1522_v2, %v5887_v34  ;;  %v10581_v43 = vunpack.i.h.bf16 %v10580_v5  ;;  %v10590_v0 = vld [vmem:[#allocation7_spill] sm:$0xff]  ;;  %v10591_v2 = vld [vmem:[#allocation16_spill] sm:$0xff] }
 0x178   : > { %v5900_v21 = vpop.permute.xlu1 %5899  ;;  %v5897_v22 = vunpack.i.h.bf16 %v5895_v61  ;;  %v5896_v13 = vunpack.i.l.bf16 %v5895_v61  ;;  %v5777_v23 = vunpack.i.h.bf16 %v10583_v50  ;;  %v5776_v56 = vunpack.i.l.bf16 %v10583_v50  ;;  %v10592_v61 = vld [vmem:[#allocation37_spill] sm:$0xff]  ;;  %v10598_v5 = vld [vmem:[#allocation28_spill] sm:$0xff] }
 0x179   : > { %v5902_v47 = vunpack.i.h.bf16 %v5900_v21  ;;  %v5901_v6 = vunpack.i.l.bf16 %v5900_v21  ;;  %v1462_v37 = vsel %vm1434_vm6, %v10582_v44, %v10581_v43  ;;  %v10585_v51 = vunpack.i.l.bf16 %v10584_v55 }
 0x17a   : > { %v1587_v20 = vsel %vm1566_vm10, %v1554_v25, %v5896_v13  ;;  %v1588_v7 = vsel %vm1566_vm10, %v1555_v17, %v5897_v22  ;;  %v10587_v33 = vunpack.i.h.bf16 %v10584_v55  ;;  %v1494_v42 = vsel %vm1467_vm7, %v10589_v12, %v5701_v27  ;;  %v10594_v13 = vld [vmem:[#allocation51_spill] sm:$0xff] }
 0x17b   : > { %v1589_v30 = vsel %vm1566_vm10, %v1556_v29, %v5901_v6  ;;  %v1590_v15 = vsel %vm1566_vm10, %v1557_v24, %v5902_v47  ;;  %v5905_v14 = vpop.permute.xlu0 %5904  ;;  %v1609_v28 = vpack.c.bf16 %v1588_v7, %v1587_v20  ;;  %v1459_v58 = vsel %vm1434_vm6, %v10586_v46, %v10585_v51  ;;  %v10593_v24 = vld [vmem:[#allocation6_spill] sm:$0xff]  ;;  %v10596_v20 = vld [vmem:[#allocation45_spill] sm:$0xff] }
 0x17c   : > { %v5910_v39 = vpop.permute.xlu1 %5909  ;;  %v1610_v62 = vpack.c.bf16 %v1590_v15, %v1589_v30  ;;  %v1460_v1 = vsel %vm1434_vm6, %v10588_v38, %v10587_v33  ;;  %v1495_v59 = vsel %vm1467_vm7, %v1462_v37, %v5702_v32  ;;  %v5907_v53 = vunpack.i.h.bf16 %v5905_v14  ;;  %v10595_v30 = vld [vmem:[#allocation66_spill] sm:$0xff] }
 0x17d   : > { %v5912_v31 = vunpack.i.h.bf16 %v5910_v39  ;;  %v5911_v10 = vunpack.i.l.bf16 %v5910_v39  ;;  %v5906_v36 = vunpack.i.l.bf16 %v5905_v14  ;;  %5214 = vmatprep.mubr.msk.bf16.mxu0 %vm1635_vm11, %v1609_v28  ;;  %v1492_v45 = vsel %vm1467_vm7, %v1459_v58, %v5696_v57  ;;  %v10597_v39 = vld [vmem:[#allocation5_spill] sm:$0xff] }
 0x17e   : > { %v1493_v60 = vsel %vm1467_vm7, %v1460_v1, %v5697_v40  ;;  %v1527_v11 = vsel %vm1500_vm8, %v1494_v42, %v5781_v35  ;;  %v1528_v8 = vsel %vm1500_vm8, %v1495_v59, %v5782_v26  ;;  %5215 = vmatmul.mubr.msk.bf16.gmra.mxu0 %vm1635_vm11, %v1610_v62  ;;  %v1525_v49 = vsel %vm1500_vm8, %v1492_v45, %v5776_v56 }
 0x17f   : > { %v1526_v3 = vsel %vm1500_vm8, %v1493_v60, %v5777_v23  ;;  %v5915_v54 = vpop.permute.xlu0 %5914  ;;  %v1560_v16 = vsel %vm1533_vm9, %v1527_v11, %v5911_v10  ;;  %v1561_v32 = vsel %vm1533_vm9, %v1528_v8, %v5912_v31  ;;  %v1558_v27 = vsel %vm1533_vm9, %v1525_v49, %v5906_v36  ;;  %v8466_v8 = vld [vmem:[%s10241_s2] ss:$0 sm:$0xff] }
 0x180   : > { %v5920_v18 = vpop.permute.xlu1 %5919  ;;  %v5917_v63 = vunpack.i.h.bf16 %v5915_v54  ;;  %v5916_v19 = vunpack.i.l.bf16 %v5915_v54  ;;  %v1559_v40 = vsel %vm1533_vm9, %v1526_v3, %v5907_v53  ;;  %v5392_v21 = vunpack.i.h.bf16 %v10590_v0  ;;  %v8472_v3 = vld [vmem:[%s10242_s3] ss:$0 sm:$0xff] }
 0x181   : > { %v5922_v52 = vunpack.i.h.bf16 %v5920_v18  ;;  %v5921_v41 = vunpack.i.l.bf16 %v5920_v18  ;;  %v5396_v26 = vunpack.i.l.bf16 %v10591_v2  ;;  %v5467_v29 = vunpack.i.h.bf16 %v10592_v61 }
 0x182   : > { %v1591_v57 = vsel %vm1566_vm10, %v1558_v27, %v5916_v19  ;;  %v1592_v9 = vsel %vm1566_vm10, %v1559_v40, %v5917_v63  ;;  %v5471_v22 = vunpack.i.l.bf16 %v10593_v24  ;;  %v5547_v25 = vunpack.i.h.bf16 %v10594_v13 }
 0x183   : > { %v1593_v34 = vsel %vm1566_vm10, %v1560_v16, %v5921_v41  ;;  %v1594_v48 = vsel %vm1566_vm10, %v1561_v32, %v5922_v52  ;;  %v5925_v47 = vpop.permute.xlu0 %5924  ;;  %v1611_v6 = vpack.c.bf16 %v1592_v9, %v1591_v57  ;;  %v5546_v17 = vunpack.i.l.bf16 %v10594_v13 }
 0x184   : > { %v1612_v4 = vpack.c.bf16 %v1594_v48, %v1593_v34  ;;  %v5627_v15 = vunpack.i.h.bf16 %v10595_v30  ;;  %v5626_v35 = vunpack.i.l.bf16 %v10595_v30  ;;  %v1365_v7 = vsel %vm1337_vm3, %v10596_v20, %v5392_v21 }
 0x185   : > { %5218 = vmatprep.mubr.msk.bf16.mxu0 %vm1635_vm11, %v1611_v6  ;;  %v1366_v62 = vsel %vm1337_vm3, %v10597_v39, %v5396_v26  ;;  %v5707_v43 = vunpack.i.h.bf16 %v10598_v5  ;;  %v5706_v44 = vunpack.i.l.bf16 %v10598_v5  ;;  %v1397_v50 = vsel %vm1369_vm4, %v1365_v7, %v5467_v29 }
 0x186   : > { %5219 = vmatmul.mubr.msk.bf16.gmra.mxu0 %vm1635_vm11, %v1612_v4  ;;  %v1398_v23 = vsel %vm1369_vm4, %v1366_v62, %v5471_v22  ;;  %v5927_v56 = vunpack.i.h.bf16 %v5925_v47  ;;  %v5926_v14 = vunpack.i.l.bf16 %v5925_v47  ;;  %v1430_v55 = vsel %vm1401_vm5, %v1397_v50, %v5546_v17 }
 0x187   : > { %v5930_v37 = vpop.permute.xlu0 %5929  ;;  %v1431_v28 = vsel %vm1401_vm5, %v1398_v23, %v5547_v25  ;;  %v1463_v58 = vsel %vm1434_vm6, %v1430_v55, %v5626_v35  ;;  %v10599_v61 = vmov 0.0   ;;  %vm10384_vm3 = vcmask 588800  }
 0x188   : > { %v5932_v51 = vunpack.i.h.bf16 %v5930_v37  ;;  %v5931_v46 = vunpack.i.l.bf16 %v5930_v37  ;;  %v1464_v33 = vsel %vm1434_vm6, %v1431_v28, %v5627_v15  ;;  %v1496_v38 = vsel %vm1467_vm7, %v1463_v58, %v5706_v44 }
 0x189   : > { %v1497_v1 = vsel %vm1467_vm7, %v1464_v33, %v5707_v43  ;;  %v1529_v10 = vsel %vm1500_vm8, %v1496_v38, %v5926_v14  ;;  %vm10386_vm5 = vcmask 1041409   ;;  %vm4721_vm7 = vcmask 1042434  }
 0x18a   : > { %v1530_v12 = vsel %vm1500_vm8, %v1497_v1, %v5927_v56  ;;  %v1562_v53 = vsel %vm1533_vm9, %v1529_v10, %v5931_v46 }
 0x18b   : > { %v5935_v31 = vpop.permute.xlu0 %5934  ;;  %v1563_v36 = vsel %vm1533_vm9, %v1530_v12, %v5932_v51 }
 0x18c   : > { %v5937_v42 = vunpack.i.h.bf16 %v5935_v31  ;;  %v5936_v59 = vunpack.i.l.bf16 %v5935_v31 }
 0x18e   : > { %v1595_v45 = vsel %vm1566_vm10, %v1562_v53, %v5936_v59  ;;  %v1596_v60 = vsel %vm1566_vm10, %v1563_v36, %v5937_v42 }
 0x18f   : > { %v1613_v11 = vpack.c.bf16 %v1596_v60, %v1595_v45 }
 0x191   : > { %5222 = vmatprep.mubr.msk.bf16.mxu0 %vm1635_vm11, %v1613_v11 }
 0x216   : > { %v5196_v18 = vpop.f32.mrf.mxu0 }
 0x217   : > { %v1858_v49 = vmul.f32 %v5196_v18, %v8466_v8 }
 0x218   : > { %v1722_v52 = vpop.f32.mrf.mxu0 }
 0x219   : > { %v1856_v41 = vmul.f32 %v8466_v8, %v1722_v52  ;;  %v1897_v16 = vadd.f32 %v8472_v3, %v1858_v49 }
 0x21a   : > { %v5197_v54 = vpop.f32.mrf.mxu0 }
 0x21b   : > { %v1895_v32 = vadd.f32 %v8472_v3, %v1856_v41  ;;  %v1859_v63 = vmul.f32 %v5197_v54, %v8466_v8  ;;  %v1929_v57 = vmax.f32 %v1897_v16, 0.0 }
 0x21c   : > { %v1725_v19 = vpop.f32.mrf.mxu0 }
 0x21d   : > { %v8478_v27 = vmax.f32 %v1895_v32, 0.0  ;;  %v1898_v40 = vadd.f32 %v8472_v3, %v1859_v63  ;;  %v1857_v34 = vmul.f32 %v8466_v8, %v1725_v19  ;;  %v1994_v15 = vrot.slane %v1929_v57, 7 }
 0x21e   : > { %v5200_v48 = vpop.f32.mrf.mxu0  ;;  %v2089_v62 = vrot.slane %v1929_v57, 1 }
 0x21f   : > { %v8482_v9 = vmax.f32 %v1898_v40, 0.0  ;;  %v1896_v4 = vadd.f32 %v8472_v3, %v1857_v34  ;;  %v1991_v21 = vrot.slane %v8478_v27, 7  ;;  %v5943_v17 = vpack.i.bf16 %v8478_v27, %v10599_v61 }
 0x220   : > { %v1738_v0 = vpop.f32.mrf.mxu0  ;;  %v8508_v43 = vsel %vm374_vm1, 0.0, %v1994_v15  ;;  %v2086_v28 = vrot.slane %v8478_v27, 1  ;;  %v1862_v10 = vmul.f32 %v5200_v48, %v8466_v8 }
 0x221   : > { %v1928_v2 = vmax.f32 %v1896_v4, 0.0  ;;  %v5953_v26 = vpack.i.bf16 %v8482_v9, %v1929_v57  ;;  %v8488_v6 = vsel %vm374_vm1, 0.0, %v1991_v21  ;;  %v1995_v25 = vrot.slane %v8482_v9, 7 }
 0x222   : > { %v5201_v47 = vpop.f32.mrf.mxu0  ;;  %v5938_v29 = vpack.i.bf16 %v8488_v6, %v10599_v61  ;;  %v2090_v20 = vrot.slane %v8482_v9, 1  ;;  %v1860_v56 = vmul.f32 %v8466_v8, %v1738_v0  ;;  %v1901_v18 = vadd.f32 %v8472_v3, %v1862_v10 }
 0x223   : > { %5954 = vrot.lane.b32.xlu0 %v5953_v26, %s6636_s9  ;;  %v5958_v22 = vpack.i.bf16 %v1928_v2, %v8478_v27  ;;  %v5963_v35 = vpack.i.bf16 %v1929_v57, %v1928_v2  ;;  %v8504_v39 = vsel %vm374_vm1, %v1994_v15, %v1995_v25  ;;  %v2087_v44 = vrot.slane %v1928_v2, 1 }
 0x224   : > { %v1741_v24 = vpop.f32.mrf.mxu0  ;;  %5939 = vrot.lane.b32.xlu1 %v5938_v29, %s6633_s23  ;;  %v5973_v37 = vpack.i.bf16 %v8504_v39, %v8508_v43  ;;  %v2091_v50 = vsel %vm470_vm0, %v2089_v62, %v2090_v20  ;;  %v8514_v23 = vsel %vm470_vm0, %v2090_v20, 0.0  ;;  %v1992_v46 = vrot.slane %v1928_v2, 7 }
 0x225   : > { %v5968_v55 = vpack.i.bf16 %v8514_v23, %v2091_v50  ;;  %v1863_v58 = vmul.f32 %v5201_v47, %v8466_v8  ;;  %v2088_v33 = vsel %vm470_vm0, %v2086_v28, %v2087_v44  ;;  %v1899_v38 = vadd.f32 %v8472_v3, %v1860_v56 }
 0x226   : > { %v8495_v13 = vpop.f32.mrf.mxu0  ;;  %v2150_v31 = vsel %vm470_vm0, %v2087_v44, 0.0  ;;  %v5983_v12 = vpack.i.bf16 %v2088_v33, %v10599_v61  ;;  %v8533_v36 = vsel %vm374_vm1, %v1991_v21, %v1992_v46  ;;  %v1861_v60 = vmul.f32 %v8466_v8, %v1741_v24 }
 0x227   : > { %5959 = vrot.lane.b32.xlu0 %v5958_v22, %s6629_s19  ;;  %v1902_v59 = vadd.f32 %v8472_v3, %v1863_v58  ;;  %v5988_v53 = vpack.i.bf16 %v2091_v50, %v2150_v31  ;;  %v8535_v45 = vmax.f32 %v1899_v38, 0.0  ;;  %v5993_v49 = vpack.i.bf16 %v8508_v43, %v8533_v36 }
 0x228   : > { %v1754_v30 = vpop.f32.mrf.mxu0  ;;  %5944 = vrot.lane.b32.xlu1 %v5943_v17, %s6635_s17  ;;  %v5998_v54 = vpack.i.bf16 %v2150_v31, %v2088_v33  ;;  %v1900_v16 = vadd.f32 %v8472_v3, %v1861_v60  ;;  %v1933_v19 = vmax.f32 %v1901_v18, 0.0  ;;  %v1866_v57 = vmul.f32 %v8495_v13, %v8466_v8 }
 0x229   : > { %v8547_v41 = vmax.f32 %v1902_v59, 0.0  ;;  %v1997_v63 = vrot.slane %v8535_v45, 7  ;;  %v6003_v27 = vpack.i.bf16 %v8535_v45, %v8482_v9  ;;  %v1864_v4 = vmul.f32 %v8466_v8, %v1754_v30 }
 0x22a   : > { %v5205_v7 = vpop.f32.mrf.mxu0  ;;  %v1932_v48 = vmax.f32 %v1900_v16, 0.0  ;;  %v1905_v24 = vadd.f32 %v8472_v3, %v1866_v57  ;;  %v2095_v30 = vrot.slane %v1933_v19, 1  ;;  %v2000_v58 = vrot.slane %v1933_v19, 7 }
 0x22b   : > { %5964 = vrot.lane.b32.xlu0 %v5963_v35, %s6635_s17  ;;  %v6013_v34 = vpack.i.bf16 %v8547_v41, %v1933_v19  ;;  %v8565_v21 = vsel %vm374_vm1, 0.0, %v1997_v63  ;;  %v1867_v9 = vmul.f32 %v5205_v7, %v8466_v8  ;;  %v2096_v29 = vrot.slane %v8547_v41, 1 }
 0x22c   : > { %v1757_v5 = vpop.f32.mrf.mxu0  ;;  %5949 = vrot.lane.b32.xlu1 %v5953_v26, %s6629_s19  ;;  %v6018_v47 = vpack.i.bf16 %v8565_v21, %v8504_v39  ;;  %v1903_v22 = vadd.f32 %v8472_v3, %v1864_v4  ;;  %v6028_v25 = vpack.i.bf16 %v1932_v48, %v8535_v45  ;;  %v2093_v15 = vrot.slane %v1932_v48, 1 }
 0x22d   : > { %v1865_v2 = vmul.f32 %v8466_v8, %v1757_v5  ;;  %v1906_v35 = vadd.f32 %v8472_v3, %v1867_v9  ;;  %v2092_v5 = vrot.slane %v8535_v45, 1  ;;  %v8584_v44 = vsel %vm470_vm0, %v2095_v30, %v2096_v29 }
 0x22e   : > { %v5208_v14 = vpop.f32.mrf.mxu0  ;;  %v2001_v50 = vrot.slane %v8547_v41, 7  ;;  %v1998_v56 = vrot.slane %v1932_v48, 7  ;;  %v8599_v33 = vmax.f32 %v1905_v24, 0.0  ;;  %v6033_v10 = vpack.i.bf16 %v1933_v19, %v1932_v48 }
 0x22f   : > { %5974 = vrot.lane.b32.xlu0 %v5973_v37, %s6637_s13  ;;  %v1870_v17 = vmul.f32 %v5208_v14, %v8466_v8  ;;  %v1904_v20 = vadd.f32 %v8472_v3, %v1865_v2  ;;  %v8587_v37 = vsel %vm470_vm0, %v2096_v29, 0.0  ;;  %v2094_v46 = vsel %vm470_vm0, %v2092_v5, %v2093_v15 }
 0x230   : > { %v1770_v51 = vpop.f32.mrf.mxu0  ;;  %5969 = vrot.lane.b32.xlu1 %v5968_v55, %s6638_s14  ;;  %v8612_v45 = vsel %vm374_vm1, %v1997_v63, %v1998_v56 }
 0x231   : > { %v1868_v7 = vmul.f32 %v8466_v8, %v1770_v51  ;;  %v1909_v51 = vadd.f32 %v8472_v3, %v1870_v17  ;;  %v8606_v59 = vmax.f32 %v1904_v20, 0.0  ;;  %v6068_v9 = vpack.i.bf16 %v8612_v45, %v8565_v21 }
 0x232   : > { %v5209_v1 = vpop.f32.mrf.mxu0 }
 0x233   : > { %5979 = vrot.lane.b32.xlu0 %v5968_v55, %s6639_s15  ;;  %v1871_v14 = vmul.f32 %v5209_v1, %v8466_v8  ;;  %v8594_v55 = vmax.f32 %v1903_v22, 0.0  ;;  %v1907_v38 = vadd.f32 %v8472_v3, %v1868_v7  ;;  %v6038_v1 = vpack.i.bf16 %v8587_v37, %v8584_v44 }
 0x234   : > { %v8529_v42 = vpop.f32.mrf.mxu0  ;;  %5984 = vrot.lane.b32.xlu1 %v5983_v12, %s6631_s21  ;;  %v8604_v12 = vmax.f32 %v1906_v35, 0.0  ;;  %v8619_v16 = vmax.f32 %v1909_v51, 0.0 }
 0x235   : > { %v1910_v60 = vadd.f32 %v8472_v3, %v1871_v14  ;;  %v6083_v63 = vpack.i.bf16 %v8594_v55, %v8547_v41 }
 0x236   : > { %v8539_v11 = vpop.f32.mrf.mxu0  ;;  %v2102_v56 = vrot.slane %v8604_v12, 1 }
 0x237   : > { %5989 = vrot.lane.b32.xlu0 %v5988_v53, %s6631_s21  ;;  %v8609_v53 = vsel %vm374_vm1, %v2000_v58, %v2001_v50  ;;  %v1874_v57 = vmul.f32 %v8539_v11, %v8466_v8 }
 0x238   : > { %v8545_v52 = vpop.f32.mrf.mxu0  ;;  %5994 = vrot.lane.b32.xlu1 %v5993_v49, %s6633_s23  ;;  %v6053_v49 = vpack.i.bf16 %v2094_v46, %v8514_v23 }
 0x239   : > { %v1872_v4 = vmul.f32 %v8466_v8, %v8545_v52 }
 0x23a   : > { %v8551_v32 = vpop.f32.mrf.mxu0 }
 0x23b   : > { %5999 = vrot.lane.b32.xlu0 %v5998_v54, %s6638_s14  ;;  %v2152_v54 = vsel %vm470_vm0, %v2093_v15, 0.0  ;;  %v8665_v15 = vpack.i.bf16 %v8606_v59, %v8594_v55  ;;  %v1911_v35 = vadd.f32 %v8472_v3, %v1872_v4 }
 0x23c   : > { %v1789_v40 = vpop.f32.mrf.mxu0  ;;  %6004 = vrot.lane.b32.xlu1 %v6003_v27, %s6635_s17  ;;  %v8625_v27 = vsel %vm374_vm1, 0.0, %v2000_v58  ;;  %v6058_v2 = vpack.i.bf16 %v8584_v44, %v2152_v54  ;;  %v6073_v24 = vpack.i.bf16 %v2152_v54, %v2094_v46 }
 0x23d   : > { %v1873_v18 = vmul.f32 %v8466_v8, %v1789_v40  ;;  %v8633_v40 = vmul.f32 %v8466_v8, %v8529_v42  ;;  %v6043_v23 = vpack.i.bf16 %v8609_v53, %v8625_v27  ;;  %v6063_v48 = vpack.i.bf16 %v8625_v27, %v8612_v45 }
 0x23e   : > { %v8562_v0 = vpop.f32.mrf.mxu0  ;;  %v1875_v42 = vmul.f32 %v8551_v32, %v8466_v8  ;;  %v8661_v32 = vpack.i.bf16 %v8604_v12, %v8599_v33  ;;  %v8688_v58 = vmax.f32 %v1911_v35, 0.0 }
 0x23f   : > { %6014 = vrot.lane.b32.xlu0 %v6013_v34, %s6636_s9  ;;  %v1912_v29 = vadd.f32 %v8472_v3, %v1873_v18  ;;  %v1878_v17 = vmul.f32 %v8562_v0, %v8466_v8 }
 0x240   : > { %v1802_v26 = vpop.f32.mrf.mxu0  ;;  %6009 = vrot.lane.b32.xlu1 %v6013_v34, %s6629_s19  ;;  %v8629_v34 = vmax.f32 %v1907_v38, 0.0  ;;  %v1914_v7 = vadd.f32 %v8472_v3, %v1875_v42 }
 0x241   : > { %v1876_v11 = vmul.f32 %v8466_v8, %v1802_v26  ;;  %v1913_v26 = vadd.f32 %v8472_v3, %v1874_v57  ;;  %v1917_v14 = vadd.f32 %v8472_v3, %v1878_v17 }
 0x242   : > { %v5217_v13 = vpop.f32.mrf.mxu0 }
 0x243   : > { %6019 = vrot.lane.b32.xlu0 %v6018_v47, %s6633_s23  ;;  %v8646_v47 = vmax.f32 %v1910_v60, 0.0  ;;  %v1879_v30 = vmul.f32 %v5217_v13, %v8466_v8  ;;  %v2101_v13 = vrot.slane %v8599_v33, 1  ;;  %v1915_v5 = vadd.f32 %v8472_v3, %v1876_v11 }
 0x244   : > { %v1805_v62 = vpop.f32.mrf.mxu0  ;;  %6029 = vrot.lane.b32.xlu1 %v6028_v25, %s6636_s9  ;;  %v8696_v60 = vmax.f32 %v1914_v7, 0.0  ;;  %v8709_v57 = vmax.f32 %v1917_v14, 0.0 }
 0x245   : > { %v1877_v22 = vmul.f32 %v8466_v8, %v1805_v62  ;;  %v8671_v62 = vmax.f32 %v1912_v29, 0.0  ;;  %v1918_v51 = vadd.f32 %v8472_v3, %v1879_v30  ;;  %v8701_v54 = vmax.f32 %v1915_v5, 0.0  ;;  %v6556_v29 = vld [vmem:[%s10243_s4 + $0x20] ss:$0 sps:$4 sm:$0xff]  }
 0x246   : > { %v8592_v28 = vpop.f32.mrf.mxu0  ;;  %10601 = vst [vmem:[#allocation41_spill] sm:$0xff] %v8696_v60  ;;  %v8714_v42 = vsel %vm470_vm0, %v2101_v13, %v2102_v56  ;;  %5269 = vmatprep.subr.msk.bf16.mxu1 %vm3307_vm12, %v6556_v29  ;;  %v3309_v5 = vsel %vm3307_vm12, %v6556_v29, 0  ;;  %v2019_v14 = vrot.slane %v8696_v60, 7  ;;  %v6558_v29 = vld [vmem:[%s10243_s4 + $0x10] sm:$0xff]   ;;  %vm4729_vm12 = vcmask 1046534  }
 0x247   : > { %6024 = vrot.lane.b32.xlu0 %v6028_v25, %s6629_s19  ;;  %v10355_v25 = vrot.slane %v8594_v55, 7  ;;  %10600 = vst [vmem:[#allocation40_spill] sm:$0xff] %v8671_v62  ;;  %v1916_v44 = vadd.f32 %v8472_v3, %v1877_v22  ;;  %v1882_v38 = vmul.f32 %v8592_v28, %v8466_v8  ;;  %v8711_v4 = vmax.f32 %v1918_v51, 0.0  ;;  %5227 = vmatpush3.bf16.msra.mxu1 %v3309_v5 }
 0x248   : > { %v1818_v31 = vpop.f32.mrf.mxu0  ;;  %6039 = vrot.lane.b32.xlu1 %v6038_v1, %s6638_s14  ;;  %v10351_v13 = vrot.slane %v8701_v54, 7 }
 0x249   : > { %v1880_v20 = vmul.f32 %v8466_v8, %v1818_v31  ;;  %v8682_v50 = vsel %vm374_vm1, 0.0, %v10355_v25  ;;  %v2108_v31 = vrot.slane %v8646_v47, 1  ;;  %10603 = vst [vmem:[#allocation44_spill] sm:$0xff] %v8711_v4  ;;  %v2120_v51 = vrot.slane %v8711_v4, 1 }
 0x24a   : > { %v8621_v19 = vpop.f32.mrf.mxu0  ;;  %v6098_v28 = vpack.i.bf16 %v8682_v50, %v8609_v53 }
 0x24b   : > { %6034 = vrot.lane.b32.xlu0 %v6033_v10, %s6635_s17  ;;  %v8694_v10 = vmax.f32 %v1913_v26, 0.0  ;;  %v2114_v26 = vrot.slane %v8696_v60, 1 }
 0x24c   : > { %6054 = vrot.lane.b32.xlu1 %v6053_v49, %s6631_s21  ;;  %v1821_v52 = vpop.f32.mrf.mxu0  ;;  %v2111_v49 = vrot.slane %v8671_v62, 1 }
 0x24d   : > { %v1881_v0 = vmul.f32 %v8466_v8, %v1821_v52  ;;  %v10350_v52 = vrot.slane %v8688_v58, 7  ;;  %v2113_v30 = vrot.slane %v8694_v10, 1  ;;  %v8849_v61 = vpack.i.bf16 %v8696_v60, %v8694_v10 }
 0x24e   : > { %v8737_v35 = vsel %vm470_vm0, %v2111_v49, 0.0  ;;  %v2007_v60 = vrot.slane %v8604_v12, 7 }
 0x24f   : > { %6044 = vrot.lane.b32.xlu0 %v6043_v23, %s6637_s13  ;;  %v1920_v18 = vadd.f32 %v8472_v3, %v1881_v0  ;;  %v8703_v23 = vmax.f32 %v1916_v44, 0.0  ;;  %v2016_v0 = vrot.slane %v8671_v62, 7 }
 0x250   : > { %6064 = vrot.lane.b32.xlu1 %v6063_v48, %s6633_s23  ;;  %v2107_v48 = vrot.slane %v8619_v16, 1 }
 0x251   : > { %10602 = vst [vmem:[#allocation32_spill] sm:$0xff] %v8703_v23  ;;  %v8731_v17 = vmax.f32 %v1920_v18, 0.0  ;;  %v2117_v7 = vrot.slane %v8703_v23, 1  ;;  %v2022_v44 = vrot.slane %v8703_v23, 7  ;;  %v2110_v18 = vrot.slane %v8688_v58, 1 }
 0x252   : > { %v8728_v22 = vsel %vm470_vm0, %v2107_v48, %v2108_v31  ;;  %v8763_v48 = vsel %vm470_vm0, %v2108_v31, 0.0 }
 0x253   : > { %6049 = vrot.lane.b32.xlu0 %v6038_v1, %s6639_s15  ;;  %v1919_v1 = vadd.f32 %v8472_v3, %v1880_v20  ;;  %10604 = vst [vmem:[#allocation8_spill] sm:$0xff] %v8731_v17  ;;  %v6557_v20 = vld [vmem:[%s10243_s4 + $0x18] sm:$0xff]  }
 0x254   : > { %6069 = vrot.lane.b32.xlu1 %v6068_v9, %s6637_s13  ;;  %v8717_v9 = vsel %vm470_vm0, %v2102_v56, 0.0  ;;  %v10352_v56 = vrot.slane %v8694_v10, 7  ;;  %5228 = vmatprep.subr.bf16.mxu1 %v6557_v20 }
 0x255   : > { %v8725_v11 = vmax.f32 %v1919_v1, 0.0  ;;  %v2025_v1 = vrot.slane %v8711_v4, 7  ;;  %5229 = vmatpush3.bf16.msra.mxu1 %v6557_v20  ;;  %v8827_v20 = vpack.i.bf16 %v8671_v62, %v8688_v58 }
 0x256   : > { %v8776_v41 = vsel %vm374_vm1, %v10352_v56, %v2019_v14  ;;  %v2116_v14 = vrot.slane %v8701_v54, 1  ;;  %5230 = vmatprep.subr.bf16.mxu1 %v6558_v29 }
 0x257   : > { %6059 = vrot.lane.b32.xlu0 %v6058_v2, %s6631_s21  ;;  %v8723_v2 = vadd.f32 %v8472_v3, %v1882_v38  ;;  %v10354_v38 = vrot.slane %v8709_v57, 7  ;;  %v10353_v5 = vrot.slane %v8725_v11, 7 }
 0x258   : > { %6074 = vrot.lane.b32.xlu1 %v6073_v24, %s6639_s15 }
 0x259   : > { %v8783_v31 = vsel %vm374_vm1, %v10354_v38, %v2025_v1  ;;  %v8802_v1 = vsel %vm470_vm0, %v2114_v26, 0.0  ;;  %v8839_v38 = vsel %vm470_vm0, %v2120_v51, 0.0  ;;  %5231 = vmatpush3.bf16.msra.mxu1 %v6558_v29 }
 0x25b   : > { %6079 = vrot.lane.b32.xlu0 %v6073_v24, %s6638_s14  ;;  %v8753_v24 = vsel %vm374_vm1, %v10350_v52, %v2016_v0  ;;  %v8771_v0 = vsel %vm374_vm1, %v10351_v13, %v2022_v44  ;;  %v2028_v52 = vrot.slane %v8731_v17, 7  ;;  %v8788_v44 = vsel %vm470_vm0, %v2113_v30, %v2114_v26 }
 0x25c   : > { %10605 = vst [vmem:[#allocation9_spill] sm:$0xff] %v8753_v24  ;;  %6084 = vrot.lane.b32.xlu1 %v6083_v63, %s6635_s17  ;;  %v2119_v63 = vrot.slane %v8709_v57, 1  ;;  %v8791_v13 = vsel %vm470_vm0, %v2110_v18, %v2111_v49  ;;  %v8811_v49 = vpack.i.bf16 %v8763_v48, %v8728_v22  ;;  %v8816_v18 = vsel %vm470_vm0, %v2117_v7, 0.0 }
 0x25d   : > { %v8807_v30 = vsel %vm374_vm1, %v10353_v5, %v2028_v52  ;;  %v2123_v26 = vrot.slane %v8731_v17, 1  ;;  %v6559_v52 = vld [vmem:[%s10243_s4 + $0x8] sm:$0xff]   ;;  %v2122_v5 = vrot.slane %v8725_v11, 1  ;;  %v8845_v46 = vpack.i.bf16 %v8802_v1, %v8788_v44 }
 0x25e   : > { %v8799_v56 = vsel %vm470_vm0, %v2119_v63, %v2120_v51  ;;  %10606 = vst [vmem:[#allocation38_spill] sm:$0xff] %v8807_v30  ;;  %v8819_v63 = vsel %vm470_vm0, %v2116_v14, %v2117_v7  ;;  %v8834_v7 = vpack.i.bf16 %v8737_v35, %v8791_v13  ;;  %v6118_v30 = vpack.i.bf16 %v8717_v9, %v8714_v42 }
 0x25f   : > { %6099 = vrot.lane.b32.xlu0 %v6098_v28, %s6633_s23  ;;  %v8796_v28 = vpack.i.bf16 %v8646_v47, %v8619_v16  ;;  %10608 = vst [vmem:[#allocation13_spill] sm:$0xff] %v8845_v46  ;;  %v8860_v51 = vpack.i.bf16 %v8703_v23, %v8701_v54  ;;  %v8865_v25 = vsel %vm470_vm0, %v2123_v26, 0.0  ;;  %v8868_v46 = vsel %vm470_vm0, %v2122_v5, %v2123_v26 }
 0x260   : > { %6089 = vrot.lane.b32.xlu1 %v8661_v32, %s6629_s19  ;;  %10607 = vst [vmem:[#allocation46_spill] sm:$0xff] %v8834_v7  ;;  %v10609_v7 = vrot.slane %v8606_v59, 1  ;;  %5232 = vmatprep.subr.bf16.mxu1 %v6559_v52  ;;  %v8875_v29 = vpack.i.bf16 %v8816_v18, %v8819_v63  ;;  %v8887_v26 = vpack.i.bf16 %v8839_v38, %v8799_v56 }
 0x261   : > { %5233 = vmatpush3.bf16.msra.mxu1 %v6559_v52  ;;  %v8902_v5 = vpack.i.bf16 %v8865_v25, %v8868_v46  ;;  %v6113_v52 = vpack.i.bf16 %v8599_v33, %v8606_v59  ;;  %v1908_v23 = vadd.f32 %v8472_v3, %v8633_v40 }
 0x262   : > { %v8856_v14 = vsel %vm470_vm0, %v10609_v7, 0.0  ;;  %v6560_v7 = vld [vmem:[%s10243_s4] sm:$0xff]   ;;  %10610 = vst [vmem:[#allocation14_spill] sm:$0xff] %v8875_v29  ;;  %10611 = vst [vmem:[#allocation15_spill] sm:$0xff] %v8887_v26  ;;  %v8893_v29 = vpack.i.bf16 %v8711_v4, %v8709_v57  ;;  %v2006_v4 = vrot.slane %v8599_v33, 7 }
 0x263   : > { %6104 = vrot.lane.b32.xlu0 %v8665_v15, %s6629_s19  ;;  %v6138_v62 = vpack.i.bf16 %v8714_v42, %v8856_v14  ;;  %10612 = vst [vmem:[#allocation47_spill] sm:$0xff] %v8902_v5  ;;  %v2009_v42 = vrot.slane %v8629_v34, 7  ;;  %5234 = vmatprep.subr.bf16.mxu1 %v6560_v7  ;;  %v6163_v5 = vpack.i.bf16 %v8629_v34, %v8604_v12  ;;  %v1940_v40 = vmax.f32 %v1908_v23, 0.0 }
 0x264   : > { %6094 = vrot.lane.b32.xlu1 %v8661_v32, %s6636_s9  ;;  %v8880_v32 = vmax.f32 %v8723_v2, 0.0  ;;  %v8897_v2 = vpack.i.bf16 %v8731_v17, %v8725_v11  ;;  %v8918_v26 = vsel %vm374_vm1, %v2006_v4, %v2007_v60  ;;  %v2098_v60 = vrot.slane %v8594_v55, 1 }
 0x265   : > { %10613 = vst [vmem:[#allocation43_spill] sm:$0xff] %v8918_v26  ;;  %5235 = vmatpush3.bf16.msra.mxu1 %v6560_v7  ;;  %v6178_v7 = vpack.i.bf16 %v1940_v40, %v8629_v34  ;;  %v2105_v23 = vrot.slane %v1940_v40, 1  ;;  %v2010_v24 = vrot.slane %v1940_v40, 7 }
 0x267   : > { %6119 = vrot.lane.b32.xlu0 %v6118_v30, %s6638_s14  ;;  %v2156_v17 = vsel %vm470_vm0, %v2105_v23, 0.0 }
 0x268   : > { %6109 = vrot.lane.b32.xlu1 %v8665_v15, %s6636_s9  ;;  %v8922_v15 = vsel %vm374_vm1, 0.0, %v2009_v42 }
 0x269   : > { %10614 = vst [vmem:[#allocation12_spill] sm:$0xff] %v8922_v15  ;;  %v6173_v12 = vpack.i.bf16 %v8922_v15, %v8918_v26 }
 0x26b   : > { %6139 = vrot.lane.b32.xlu0 %v6138_v62, %s6631_s21  ;;  %v8926_v62 = vsel %vm374_vm1, 0.0, %v2006_v4 }
 0x26c   : > { %6114 = vrot.lane.b32.xlu1 %v6113_v52, %s6635_s17  ;;  %v6123_v33 = vpack.i.bf16 %v8918_v26, %v8926_v62  ;;  %v2004_v52 = vrot.slane %v8606_v59, 7 }
 0x26f   : > { %6164 = vrot.lane.b32.xlu0 %v6163_v5, %s6635_s17  ;;  %v10615_v5 = vrot.slane %v8606_v59, 1 }
 0x270   : > { %6124 = vrot.lane.b32.xlu1 %v6123_v33, %s6637_s13  ;;  %v10616_v33 = vrot.slane %v8594_v55, 7 }
 0x271   : > { %v2100_v4 = vsel %vm470_vm0, %v2098_v60, %v10615_v5  ;;  %v2012_v5 = vrot.slane %v8619_v16, 7 }
 0x272   : > { %v6133_v26 = vpack.i.bf16 %v2100_v4, %v8587_v37  ;;  %v8956_v37 = vsel %vm374_vm1, %v2009_v42, %v2010_v24  ;;  %v6218_v42 = vpack.i.bf16 %v8688_v58, %v8646_v47 }
 0x273   : > { %6174 = vrot.lane.b32.xlu0 %v6173_v12, %s6633_s23  ;;  %v8946_v12 = vsel %vm374_vm1, %v10616_v33, %v2004_v52  ;;  %v6203_v60 = vpack.i.bf16 %v8956_v37, %v8922_v15  ;;  %v10617_v52 = vrot.slane %v8688_v58, 7  ;;  %v1212_v58 = vpop.permute.xlu1 %1211 }
 0x274   : > { %6129 = vrot.lane.b32.xlu1 %v6118_v30, %s6639_s15  ;;  %v6143_v59 = vpack.i.bf16 %v8926_v62, %v8946_v12  ;;  %v6198_v30 = vpack.i.bf16 %v8728_v22, %v2156_v17  ;;  %v6148_v55 = vpack.i.bf16 %v8946_v12, %v8682_v50  ;;  %v6153_v22 = vpack.i.bf16 %v8856_v14, %v2100_v4 }
 0x275   : > { %v8981_v14 = vsel %vm374_vm1, 0.0, %v10617_v52 }
 0x277   : > { %6179 = vrot.lane.b32.xlu0 %v6178_v7, %s6629_s19 }
 0x278   : > { %6134 = vrot.lane.b32.xlu1 %v6133_v26, %s6631_s21  ;;  %v2104_v26 = vrot.slane %v8629_v34, 1  ;;  %v2013_v34 = vrot.slane %v8646_v47, 7  ;;  %v6188_v47 = vpack.i.bf16 %v8619_v16, %v1940_v40  ;;  %v1883_v16 = vmul.f32 %v8621_v19, %v8466_v8 }
 0x27a   : > { %v1922_v8 = vadd.f32 %v8472_v3, %v1883_v16 }
 0x27b   : > { %6184 = vrot.lane.b32.xlu0 %v6178_v7, %s6636_s9  ;;  %v2106_v7 = vsel %vm470_vm0, %v2104_v26, %v2105_v23 }
 0x27c   : > { %6144 = vrot.lane.b32.xlu1 %v6143_v59, %s6633_s23  ;;  %v8968_v24 = vpack.i.bf16 %v2156_v17, %v2106_v7  ;;  %v8985_v17 = vsel %vm374_vm1, %v2012_v5, %v2013_v34  ;;  %v6193_v23 = vpack.i.bf16 %v2106_v7, %v8717_v9  ;;  %v6243_v59 = vpack.i.bf16 %v8788_v44, %v8737_v35  ;;  %v10618_v35 = vld [vmem:[#allocation29_spill] sm:$0xff] }
 0x27d   : > { %v6228_v4 = vpack.i.bf16 %v8981_v14, %v8985_v17  ;;  %v9031_v3 = vmax.f32 %v1922_v8, 0.0  ;;  %v10620_v8 = vld [vmem:[#allocation11_spill] sm:$0xff] }
 0x27f   : > { %6199 = vrot.lane.b32.xlu0 %v6198_v30, %s6631_s21  ;;  %v9004_v30 = vsel %vm374_vm1, 0.0, %v2012_v5  ;;  %v10370_v16 = vrot.slane %v9031_v3, 1 }
 0x280   : > { %6149 = vrot.lane.b32.xlu1 %v6148_v55, %s6637_s13  ;;  %v6213_v55 = vpack.i.bf16 %v9004_v30, %v8956_v37 }
 0x283   : > { %6204 = vrot.lane.b32.xlu0 %v6203_v60, %s6637_s13  ;;  %v10619_v60 = vld [vmem:[#allocation21_spill] sm:$0xff] }
 0x284   : > { %6154 = vrot.lane.b32.xlu1 %v6153_v22, %s6639_s15 }
 0x287   : > { %6209 = vrot.lane.b32.xlu0 %v8968_v24, %s6639_s15 }
 0x288   : > { %6159 = vrot.lane.b32.xlu1 %v6153_v22, %s6638_s14 }
 0x28b   : > { %6219 = vrot.lane.b32.xlu0 %v6218_v42, %s6635_s17  ;;  %v6263_v42 = vpack.i.bf16 %v8799_v56, %v8816_v18  ;;  %v6238_v56 = vpack.i.bf16 %v8791_v13, %v8763_v48  ;;  %v6258_v48 = vpack.i.bf16 %v8819_v63, %v8802_v1 }
 0x28c   : > { %6169 = vrot.lane.b32.xlu1 %v8796_v28, %s6629_s19 }
 0x28f   : > { %6229 = vrot.lane.b32.xlu0 %v6228_v4, %s6633_s23 }
 0x290   : > { %6189 = vrot.lane.b32.xlu1 %v6188_v47, %s6635_s17 }
 0x293   : > { %6234 = vrot.lane.b32.xlu0 %v8827_v20, %s6629_s19 }
 0x294   : > { %6194 = vrot.lane.b32.xlu1 %v6193_v23, %s6631_s21 }
 0x295   : > { %v8997_v33 = vpop.permute.xlu0 %5954 }
 0x296   : > { %v5940_v40 = vpop.permute.xlu1 %5939 }
 0x297   : > { %6244 = vrot.lane.b32.xlu0 %v6243_v59, %s6631_s21  ;;  %v5941_v9 = vunpack.i.l.bf16 %v5940_v40 }
 0x298   : > { %6214 = vrot.lane.b32.xlu1 %v6213_v55, %s6633_s23 }
 0x299   : > { %v9010_v26 = vpop.permute.xlu0 %5959  ;;  %v1531_v44 = vsel %vm1500_vm8, %v10618_v35, %v5941_v9  ;;  %v1532_v7 = vsel %vm1500_vm8, %v10619_v60, %v5941_v9  ;;  %v2125_v9 = vrot.slane %v8880_v32, 1 }
 0x29a   : > { %v5945_v19 = vpop.permute.xlu1 %5944  ;;  %v1564_v5 = vsel %vm1533_vm9, %v1531_v44, %v1212_v58  ;;  %v1565_v52 = vsel %vm1533_vm9, %v1532_v7, %v1212_v58  ;;  %vm10388_vm9 = vcmask 1043459  }
 0x29b   : > { %6254 = vrot.lane.b32.xlu0 %v8860_v51, %s6629_s19  ;;  %v5946_v22 = vunpack.i.l.bf16 %v5945_v19  ;;  %v9056_v35 = vsel %vm470_vm0, %v2125_v9, %v10370_v16  ;;  %v5957_v16 = vunpack.i.h.bf16 %v8997_v33 }
 0x29c   : > { %6224 = vrot.lane.b32.xlu1 %v8849_v61, %s6629_s19  ;;  %v6298_v7 = vpack.i.bf16 %v9056_v35, %v8865_v25  ;;  %v5947_v25 = vunpack.i.h.bf16 %v5945_v19 }
 0x29d   : > { %v9020_v34 = vpop.permute.xlu0 %5964  ;;  %v1597_v4 = vsel %vm1566_vm10, %v1564_v5, %v5946_v22  ;;  %v1598_v47 = vsel %vm1566_vm10, %v1565_v52, %v5946_v22  ;;  %v10621_v22 = vunpack.i.l.bf16 %v10620_v8  ;;  %v5942_v5 = vunpack.i.h.bf16 %v5940_v40 }
 0x29e   : > { %v9033_v23 = vpop.permute.xlu1 %5949  ;;  %v1614_v59 = vpack.c.bf16 %v1598_v47, %v1597_v4  ;;  %v9072_v4 = vpack.i.bf16 %v9031_v3, %v8880_v32  ;;  %v5966_v40 = vunpack.i.l.bf16 %v9020_v34  ;;  %v5956_v8 = vunpack.i.l.bf16 %v8997_v33 }
 0x29f   : > { %6264 = vrot.lane.b32.xlu0 %v6263_v42, %s6631_s21  ;;  %v2948_v42 = vsel %vm1369_vm4, 0.0, %v10621_v22 }
 0x2a0   : > { %5223 = vmatmul.mubr.msk.bf16.gmra.mxu0 %vm1635_vm11, %v1614_v59  ;;  %6239 = vrot.lane.b32.xlu1 %v6238_v56, %s6631_s21  ;;  %10622 = vst [vmem:[#allocation10_spill] sm:$0xff] %v9072_v4  ;;  %vm4727_vm11 = vcmask 1045509  }
 0x2a1   : > { %v5975_v18 = vpop.permute.xlu0 %5974 }
 0x2a2   : > { %v9041_v58 = vpop.permute.xlu1 %5969  ;;  %v5977_v19 = vunpack.i.h.bf16 %v5975_v18 }
 0x2a3   : > { %6279 = vrot.lane.b32.xlu0 %v8811_v49, %s6638_s14 }
 0x2a4   : > { %6249 = vrot.lane.b32.xlu1 %v8893_v29, %s6629_s19 }
 0x2a5   : > { %v5980_v55 = vpop.permute.xlu0 %5979 }
 0x2a6   : > { %v9049_v13 = vpop.permute.xlu1 %5984 }
 0x2a7   : > { %6284 = vrot.lane.b32.xlu0 %v8897_v2, %s6629_s19  ;;  %v5986_v44 = vunpack.i.l.bf16 %v9049_v13 }
 0x2a8   : > { %6259 = vrot.lane.b32.xlu1 %v6258_v48, %s6631_s21  ;;  %v5976_v48 = vunpack.i.l.bf16 %v5975_v18 }
 0x2a9   : > { %v9059_v60 = vpop.permute.xlu0 %5989  ;;  %v2979_v1 = vsel %vm1434_vm6, %v2948_v42, %v5986_v44 }
 0x2aa   : > { %v3010_v63 = vsel %vm1500_vm8, %v2979_v1, %v5942_v5  ;;  %v5995_v52 = vpop.permute.xlu1 %5994 }
 0x2ab   : > { %6299 = vrot.lane.b32.xlu0 %v6298_v7, %s6631_s21  ;;  %v5996_v47 = vunpack.i.l.bf16 %v5995_v52  ;;  %v3042_v7 = vsel %vm1566_vm10, %v3010_v63, %v5947_v25  ;;  %v5982_v63 = vunpack.i.h.bf16 %v5980_v55 }
 0x2ac   : > { %6269 = vrot.lane.b32.xlu1 %v9072_v4, %s6629_s19  ;;  %v5981_v4 = vunpack.i.l.bf16 %v5980_v55 }
 0x2ad   : > { %v6000_v59 = vpop.permute.xlu0 %5999  ;;  %v3011_v44 = vsel %vm1500_vm8, %v2979_v1, %v5996_v47 }
 0x2ae   : > { %v6002_v56 = vunpack.i.h.bf16 %v6000_v59  ;;  %v6001_v9 = vunpack.i.l.bf16 %v6000_v59  ;;  %v3043_v22 = vsel %vm1566_vm10, %v3011_v44, %v5966_v40  ;;  %v9082_v5 = vpop.permute.xlu1 %6004 }
 0x2b0   : > { %v3075_v42 = vsel %vm3074_vm13, %v3042_v7, %v6001_v9  ;;  %v3076_v59 = vsel %vm3074_vm13, %v3043_v22, %v6002_v56  ;;  %6274 = vrot.lane.b32.xlu1 %v8968_v24, %s6638_s14  ;;  %v6288_v56 = vpack.i.bf16 %v8868_v46, %v8839_v38  ;;  %v5962_v38 = vunpack.i.h.bf16 %v9010_v26 }
 0x2b1   : > { %v9086_v15 = vpop.permute.xlu0 %6014  ;;  %v3108_v1 = vsel %vm3107_vm14, %v3075_v42, %v5976_v48  ;;  %v3109_v18 = vsel %vm3107_vm14, %v3076_v59, %v5977_v19  ;;  %v5961_v7 = vunpack.i.l.bf16 %v9010_v26  ;;  %v5991_v19 = vunpack.i.l.bf16 %v9059_v60 }
 0x2b2   : > { %v3141_v25 = vsel %vm3140_vm15, %v3108_v1, %v5956_v8  ;;  %v3142_v47 = vsel %vm3140_vm15, %v3109_v18, %v5957_v16  ;;  %v9095_v33 = vpop.permute.xlu1 %6009  ;;  %v6293_v16 = vpack.i.bf16 %v8985_v17, %v9004_v30  ;;  %v5987_v8 = vunpack.i.h.bf16 %v9049_v13 }
 0x2b3   : > { %v3174_v40 = vsel %vm10385_vm2, %v3141_v25, %v5981_v4  ;;  %v3175_v9 = vsel %vm10385_vm2, %v3142_v47, %v5982_v63  ;;  %v5997_v22 = vunpack.i.h.bf16 %v5995_v52  ;;  %v2949_v63 = vsel %vm1369_vm4, %v8488_v6, %v5961_v7 }
 0x2b4   : > { %v3206_v48 = vpack.c.bf16 %v3175_v9, %v3174_v40  ;;  %6289 = vrot.lane.b32.xlu1 %v6288_v56, %s6631_s21  ;;  %v2950_v18 = vsel %vm1369_vm4, %v8533_v36, %v5962_v38  ;;  %v5951_v25 = vunpack.i.l.bf16 %v9033_v23  ;;  %v2980_v26 = vsel %vm1434_vm6, %v2949_v63, %v5987_v8 }
 0x2b5   : > { %v6020_v55 = vpop.permute.xlu0 %6019  ;;  %v2981_v13 = vsel %vm1434_vm6, %v2950_v18, %v5991_v19  ;;  %v5992_v47 = vunpack.i.h.bf16 %v9059_v60  ;;  %v3012_v52 = vsel %vm1500_vm8, %v2980_v26, %v5997_v22  ;;  %v5967_v9 = vunpack.i.h.bf16 %v9020_v34 }
 0x2b6   : > { %5236 = vmatprep.mubr.msk.bf16.mxu1 %vm10384_vm3, %v3206_v48  ;;  %v6030_v24 = vpop.permute.xlu1 %6029  ;;  %v6021_v42 = vunpack.i.l.bf16 %v6020_v55  ;;  %v6006_v6 = vunpack.i.l.bf16 %v9082_v5  ;;  %v6022_v48 = vunpack.i.h.bf16 %v6020_v55  ;;  %v2951_v38 = vsel %vm1369_vm4, %v8508_v43, %v5951_v25 }
 0x2b7   : > { %v3044_v7 = vsel %vm1566_vm10, %v3012_v52, %v5967_v9  ;;  %v5972_v19 = vunpack.i.h.bf16 %v9041_v58  ;;  %v5971_v22 = vunpack.i.l.bf16 %v9041_v58  ;;  %v2982_v34 = vsel %vm1434_vm6, %v2951_v38, %v5992_v47 }
 0x2b8   : > { %6294 = vrot.lane.b32.xlu1 %v6293_v16, %s6637_s13  ;;  %v3013_v40 = vsel %vm1500_vm8, %v2981_v13, %v6021_v42  ;;  %v5952_v16 = vunpack.i.h.bf16 %v9033_v23  ;;  %v3014_v23 = vsel %vm1500_vm8, %v2982_v34, %v6022_v48  ;;  %v6007_v26 = vunpack.i.h.bf16 %v9082_v5 }
 0x2b9   : > { %v9104_v44 = vpop.permute.xlu0 %6024  ;;  %v3045_v60 = vsel %vm1566_vm10, %v3013_v40, %v6006_v6  ;;  %v3077_v13 = vsel %vm3074_vm13, %v3044_v7, %v5971_v22  ;;  %v6017_v47 = vunpack.i.h.bf16 %v9086_v15  ;;  %v6032_v6 = vunpack.i.h.bf16 %v6030_v24 }
 0x2ba   : > { %v9107_v4 = vpop.permute.xlu1 %6039  ;;  %v2952_v25 = vsel %vm1369_vm4, %v8504_v39, %v5952_v16  ;;  %v3078_v58 = vsel %vm3074_vm13, %v3045_v60, %v5972_v19  ;;  %v6031_v48 = vunpack.i.l.bf16 %v6030_v24  ;;  %v3046_v39 = vsel %vm1566_vm10, %v3014_v23, %v6007_v26 }
 0x2bd   : > { %v9109_v46 = vpop.permute.xlu0 %6034 }
 0x2be   : > { %v9115_v59 = vpop.permute.xlu1 %6054  ;;  %v6036_v5 = vunpack.i.l.bf16 %v9109_v46 }
 0x2bf   : > { %v6056_v8 = vunpack.i.l.bf16 %v9115_v59 }
 0x2c1   : > { %v9117_v1 = vpop.permute.xlu0 %6044  ;;  %v2983_v52 = vsel %vm1434_vm6, %v2952_v25, %v6056_v8  ;;  %v6016_v25 = vunpack.i.l.bf16 %v9086_v15 }
 0x2c2   : > { %v9129_v56 = vpop.permute.xlu1 %6064  ;;  %v6047_v16 = vunpack.i.h.bf16 %v9117_v1  ;;  %v6046_v24 = vunpack.i.l.bf16 %v9117_v1 }
 0x2c3   : > { %v6066_v55 = vunpack.i.l.bf16 %v9129_v56 }
 0x2c5   : > { %v6050_v36 = vpop.permute.xlu0 %6049  ;;  %v3015_v38 = vsel %vm1500_vm8, %v2983_v52, %v6066_v55 }
 0x2c6   : > { %v6070_v42 = vpop.permute.xlu1 %6069  ;;  %v3047_v23 = vsel %vm1566_vm10, %v3015_v38, %v6036_v5 }
 0x2c7   : > { %v6072_v63 = vunpack.i.h.bf16 %v6070_v42  ;;  %v6071_v18 = vunpack.i.l.bf16 %v6070_v42 }
 0x2c9   : > { %v9144_v43 = vpop.permute.xlu0 %6059  ;;  %v3111_v40 = vsel %vm3107_vm14, %v3078_v58, %v6072_v63  ;;  %v3110_v9 = vsel %vm3107_vm14, %v3077_v13, %v6071_v18 }
 0x2ca   : > { %v6075_v34 = vpop.permute.xlu1 %6074  ;;  %v3143_v8 = vsel %vm3140_vm15, %v3110_v9, %v6031_v48  ;;  %v3144_v22 = vsel %vm3140_vm15, %v3111_v40, %v6032_v6  ;;  %v6052_v40 = vunpack.i.h.bf16 %v6050_v36  ;;  %v6051_v9 = vunpack.i.l.bf16 %v6050_v36 }
 0x2cb   : > { %v6077_v7 = vunpack.i.h.bf16 %v6075_v34  ;;  %v6076_v60 = vunpack.i.l.bf16 %v6075_v34 }
 0x2cd   : > { %v6080_v19 = vpop.permute.xlu0 %6079  ;;  %v3176_v55 = vsel %vm10385_vm2, %v3143_v8, %v6076_v60  ;;  %v3177_v18 = vsel %vm10385_vm2, %v3144_v22, %v6077_v7 }
 0x2ce   : > { %v6082_v42 = vunpack.i.h.bf16 %v6080_v19  ;;  %v6081_v63 = vunpack.i.l.bf16 %v6080_v19  ;;  %v9168_v58 = vpop.permute.xlu1 %6084  ;;  %v3207_v52 = vpack.c.bf16 %v3177_v18, %v3176_v55  ;;  %v6026_v55 = vunpack.i.l.bf16 %v9104_v44 }
 0x2d0   : > { %v3079_v26 = vsel %vm3074_vm13, %v3046_v39, %v6081_v63  ;;  %v3080_v13 = vsel %vm3074_vm13, %v3047_v23, %v6082_v42  ;;  %5237 = vmatmul.mubr.msk.bf16.vlgmr.msra.gmra.mxu1 %vm10384_vm3, %v3207_v52  ;;  %v6027_v23 = vunpack.i.h.bf16 %v9104_v44  ;;  %v6067_v52 = vunpack.i.h.bf16 %v9129_v56 }
 0x2d1   : > { %v3112_v6 = vsel %vm3107_vm14, %v3079_v26, %v6046_v24  ;;  %v3113_v1 = vsel %vm3107_vm14, %v3080_v13, %v6047_v16  ;;  %v6100_v48 = vpop.permute.xlu0 %6099 }
 0x2d2   : > { %v3145_v38 = vsel %vm3140_vm15, %v3112_v6, %v6016_v25  ;;  %v3146_v15 = vsel %vm3140_vm15, %v3113_v1, %v6017_v47  ;;  %v9177_v5 = vpop.permute.xlu1 %6089  ;;  %v6057_v25 = vunpack.i.h.bf16 %v9115_v59  ;;  %v6011_v1 = vunpack.i.l.bf16 %v9095_v33 }
 0x2d3   : > { %v3178_v34 = vsel %vm10385_vm2, %v3145_v38, %v6051_v9  ;;  %v3179_v39 = vsel %vm10385_vm2, %v3146_v15, %v6052_v40  ;;  %v6091_v42 = vunpack.i.l.bf16 %v9177_v5  ;;  %v6061_v40 = vunpack.i.l.bf16 %v9144_v43 }
 0x2d4   : > { %v3208_v7 = vpack.c.bf16 %v3179_v39, %v3178_v34  ;;  %v6101_v38 = vunpack.i.l.bf16 %v6100_v48  ;;  %v2953_v59 = vsel %vm1369_vm4, %v8565_v21, %v6026_v55  ;;  %v2954_v39 = vsel %vm1369_vm4, %v8612_v45, %v6027_v23 }
 0x2d5   : > { %v9179_v60 = vpop.permute.xlu0 %6104  ;;  %v2959_v26 = vsel %vm1369_vm4, %v8926_v62, %v6091_v42  ;;  %v6062_v62 = vunpack.i.h.bf16 %v9144_v43  ;;  %v6102_v42 = vunpack.i.h.bf16 %v6100_v48  ;;  %v2955_v21 = vsel %vm1369_vm4, %v8625_v27, %v6011_v1 }
 0x2d6   : > { %5240 = vmatprep.mubr.msk.bf16.mxu1 %vm10384_vm3, %v3208_v7  ;;  %v9182_v36 = vpop.permute.xlu1 %6094  ;;  %v2984_v7 = vsel %vm1434_vm6, %v2953_v59, %v6057_v25  ;;  %v6037_v43 = vunpack.i.h.bf16 %v9109_v46  ;;  %v6086_v48 = vunpack.i.l.bf16 %v9168_v58  ;;  %v6107_v27 = vunpack.i.h.bf16 %v9179_v60 }
 0x2d7   : > { %v2986_v45 = vsel %vm1434_vm6, %v2955_v21, %v6062_v62  ;;  %v6106_v46 = vunpack.i.l.bf16 %v9179_v60  ;;  %v6096_v21 = vunpack.i.l.bf16 %v9182_v36 }
 0x2d9   : > { %v9184_v16 = vpop.permute.xlu0 %6119 }
 0x2da   : > { %v9186_v19 = vpop.permute.xlu1 %6109 }
 0x2dd   : > { %v9188_v8 = vpop.permute.xlu0 %6139 }
 0x2de   : > { %v9190_v47 = vpop.permute.xlu1 %6114  ;;  %v6142_v63 = vunpack.i.h.bf16 %v9188_v8  ;;  %v6141_v1 = vunpack.i.l.bf16 %v9188_v8  ;;  %v2957_v8 = vsel %vm1369_vm4, %v8682_v50, %v6106_v46 }
 0x2e0   : > { %v2990_v9 = vsel %vm1434_vm6, %v2959_v26, %v6142_v63  ;;  %v3016_v63 = vsel %vm1500_vm8, %v2984_v7, %v6067_v52  ;;  %v2985_v26 = vsel %vm1434_vm6, %v2954_v39, %v6061_v40  ;;  %v3018_v52 = vsel %vm1500_vm8, %v2986_v45, %v6102_v42 }
 0x2e1   : > { %v9192_v22 = vpop.permute.xlu0 %6164  ;;  %v3017_v55 = vsel %vm1500_vm8, %v2985_v26, %v6101_v38  ;;  %v3048_v25 = vsel %vm1566_vm10, %v3016_v63, %v6037_v43  ;;  %v6087_v40 = vunpack.i.h.bf16 %v9168_v58 }
 0x2e2   : > { %v9196_v24 = vpop.permute.xlu1 %6124  ;;  %v6167_v6 = vunpack.i.h.bf16 %v9192_v22 }
 0x2e3   : > { %v9249_v58 = vsel %vm1566_vm10, %v3018_v52, %v6087_v40  ;;  %v6121_v40 = vunpack.i.l.bf16 %v9184_v16 }
 0x2e5   : > { %v6175_v18 = vpop.permute.xlu0 %6174 }
 0x2e6   : > { %v6177_v13 = vunpack.i.h.bf16 %v6175_v18  ;;  %v9209_v44 = vpop.permute.xlu1 %6129  ;;  %v6176_v59 = vunpack.i.l.bf16 %v6175_v18 }
 0x2e8   : > { %v3022_v15 = vsel %vm1500_vm8, %v2990_v9, %v6177_v13  ;;  %v6012_v9 = vunpack.i.h.bf16 %v9095_v33  ;;  %v3049_v33 = vsel %vm1566_vm10, %v3017_v55, %v6086_v48  ;;  %v6166_v48 = vunpack.i.l.bf16 %v9192_v22 }
 0x2e9   : > { %v9214_v34 = vpop.permute.xlu0 %6179  ;;  %v9217_v56 = vsel %vm1566_vm10, %v3022_v15, %v6167_v6  ;;  %v6041_v6 = vunpack.i.l.bf16 %v9107_v4  ;;  %v6042_v15 = vunpack.i.h.bf16 %v9107_v4  ;;  %v2958_v4 = vsel %vm1369_vm4, %v8946_v12, %v6107_v27 }
 0x2ea   : > { %10623 = vst [vmem:[#allocation48_spill] sm:$0xff] %v9217_v56  ;;  %v6135_v13 = vpop.permute.xlu1 %6134  ;;  %v6182_v38 = vunpack.i.h.bf16 %v9214_v34  ;;  %v2956_v7 = vsel %vm1369_vm4, %v8609_v53, %v6012_v9  ;;  %v6097_v53 = vunpack.i.h.bf16 %v9182_v36  ;;  %v2989_v43 = vsel %vm1434_vm6, %v2958_v4, %v6141_v1 }
 0x2eb   : > { %v6137_v62 = vunpack.i.h.bf16 %v6135_v13  ;;  %v3081_v60 = vsel %vm3074_vm13, %v3048_v25, %v6041_v6  ;;  %v3082_v26 = vsel %vm3074_vm13, %v3049_v33, %v6042_v15  ;;  %v6122_v9 = vunpack.i.h.bf16 %v9184_v16 }
 0x2ec   : > { %v2962_v55 = vsel %vm1369_vm4, %v8956_v37, %v6182_v38  ;;  %v3021_v50 = vsel %vm1500_vm8, %v2989_v43, %v6176_v59  ;;  %v6112_v37 = vunpack.i.h.bf16 %v9186_v19  ;;  %v6117_v33 = vunpack.i.h.bf16 %v9190_v47 }
 0x2ed   : > { %v9232_v23 = vpop.permute.xlu0 %6184  ;;  %v2988_v6 = vsel %vm1434_vm6, %v2957_v8, %v6137_v62  ;;  %v6136_v1 = vunpack.i.l.bf16 %v6135_v13  ;;  %v3053_v38 = vsel %vm1566_vm10, %v3021_v50, %v6166_v48  ;;  %v6111_v22 = vunpack.i.l.bf16 %v9186_v19 }
 0x2ee   : > { %v6145_v39 = vpop.permute.xlu1 %6144 }
 0x2ef   : > { %v6147_v42 = vunpack.i.h.bf16 %v6145_v39  ;;  %v6146_v15 = vunpack.i.l.bf16 %v6145_v39  ;;  %v2987_v39 = vsel %vm1434_vm6, %v2956_v7, %v6136_v1 }
 0x2f1   : > { %v9245_v63 = vpop.permute.xlu0 %6199  ;;  %v3020_v25 = vsel %vm1500_vm8, %v2988_v6, %v6147_v42  ;;  %v6116_v42 = vunpack.i.l.bf16 %v9190_v47  ;;  %v3019_v47 = vsel %vm1500_vm8, %v2987_v39, %v6146_v15  ;;  %v6132_v15 = vunpack.i.h.bf16 %v9209_v44 }
 0x2f2   : > { %v6201_v18 = vunpack.i.l.bf16 %v9245_v63  ;;  %v6150_v45 = vpop.permute.xlu1 %6149  ;;  %v3052_v8 = vsel %vm1566_vm10, %v3020_v25, %v6117_v33  ;;  %v6186_v25 = vunpack.i.l.bf16 %v9232_v23 }
 0x2f3   : > { %v6152_v52 = vunpack.i.h.bf16 %v6150_v45  ;;  %v6151_v27 = vunpack.i.l.bf16 %v6150_v45  ;;  %v3085_v50 = vsel %vm3074_vm13, %v3052_v8, %v6121_v40  ;;  %v6126_v40 = vunpack.i.l.bf16 %v9196_v24 }
 0x2f4   : > { %v9266_v12 = vsel %vm1434_vm6, %v2962_v55, %v6201_v18  ;;  %v6127_v18 = vunpack.i.h.bf16 %v9196_v24 }
 0x2f5   : > { %v6205_v46 = vpop.permute.xlu0 %6204  ;;  %v3115_v59 = vsel %vm3107_vm14, %v3082_v26, %v6152_v52  ;;  %v3114_v62 = vsel %vm3107_vm14, %v3081_v60, %v6151_v27  ;;  %v3086_v26 = vsel %vm3074_vm13, %v3053_v38, %v6122_v9 }
 0x2f6   : > { %v6206_v4 = vunpack.i.l.bf16 %v6205_v46  ;;  %v6155_v16 = vpop.permute.xlu1 %6154  ;;  %v6207_v43 = vunpack.i.h.bf16 %v6205_v46  ;;  %v3147_v60 = vsel %vm3140_vm15, %v3114_v62, %v6111_v22  ;;  %v3148_v19 = vsel %vm3140_vm15, %v3115_v59, %v6112_v37 }
 0x2f7   : > { %v6157_v55 = vunpack.i.h.bf16 %v6155_v16  ;;  %v6156_v13 = vunpack.i.l.bf16 %v6155_v16  ;;  %v6187_v59 = vunpack.i.h.bf16 %v9232_v23  ;;  %v3051_v62 = vsel %vm1566_vm10, %v3019_v47, %v6116_v42 }
 0x2f8   : > { %v3118_v52 = vsel %vm3107_vm14, %v3085_v50, %v6206_v4  ;;  %v3119_v9 = vsel %vm3107_vm14, %v3086_v26, %v6207_v43  ;;  %v6131_v22 = vunpack.i.l.bf16 %v9209_v44  ;;  %v6202_v26 = vunpack.i.h.bf16 %v9245_v63 }
 0x2f9   : > { %v6210_v6 = vpop.permute.xlu0 %6209  ;;  %v3180_v45 = vsel %vm10385_vm2, %v3147_v60, %v6156_v13  ;;  %v3181_v48 = vsel %vm10385_vm2, %v3148_v19, %v6157_v55  ;;  %v3151_v8 = vsel %vm3140_vm15, %v3118_v52, %v6186_v25  ;;  %v3152_v43 = vsel %vm3140_vm15, %v3119_v9, %v6187_v59 }
 0x2fa   : > { %v3209_v27 = vpack.c.bf16 %v3181_v48, %v3180_v45  ;;  %v6211_v7 = vunpack.i.l.bf16 %v6210_v6  ;;  %v6160_v46 = vpop.permute.xlu1 %6159  ;;  %v6212_v33 = vunpack.i.h.bf16 %v6210_v6 }
 0x2fb   : > { %v6162_v1 = vunpack.i.h.bf16 %v6160_v46  ;;  %v6161_v37 = vunpack.i.l.bf16 %v6160_v46 }
 0x2fc   : > { %5241 = vmatmul.mubr.msk.bf16.gmra.mxu1 %vm10384_vm3, %v3209_v27  ;;  %v3184_v24 = vsel %vm10385_vm2, %v3151_v8, %v6211_v7  ;;  %v3185_v13 = vsel %vm10385_vm2, %v3152_v43, %v6212_v33 }
 0x2fd   : > { %v9291_v38 = vpop.permute.xlu0 %6219  ;;  %v3083_v4 = vsel %vm3074_vm13, %v9249_v58, %v6161_v37  ;;  %v3084_v16 = vsel %vm3074_vm13, %v3051_v62, %v6162_v1  ;;  %v3211_v45 = vpack.c.bf16 %v3185_v13, %v3184_v24 }
 0x2fe   : > { %v3116_v55 = vsel %vm3107_vm14, %v3083_v4, %v6126_v40  ;;  %v3117_v23 = vsel %vm3107_vm14, %v3084_v16, %v6127_v18  ;;  %v9307_v42 = vpop.permute.xlu1 %6169  ;;  %v6222_v48 = vunpack.i.h.bf16 %v9291_v38  ;;  %v10625_v40 = vrot.slane %v8694_v10, 7 }
 0x2ff   : > { %v6171_v44 = vunpack.i.l.bf16 %v9307_v42  ;;  %v3149_v58 = vsel %vm3140_vm15, %v3116_v55, %v6096_v21  ;;  %v3150_v39 = vsel %vm3140_vm15, %v3117_v23, %v6097_v53 }
 0x300   : > { %v3182_v60 = vsel %vm10385_vm2, %v3149_v58, %v6131_v22  ;;  %v3183_v19 = vsel %vm10385_vm2, %v3150_v39, %v6132_v15  ;;  %v9347_v15 = vsel %vm374_vm1, 0.0, %v10625_v40  ;;  %vm10389_vm2 = vcmask 60416  }
 0x301   : > { %v9311_v6 = vpop.permute.xlu0 %6229  ;;  %v2963_v47 = vsel %vm1369_vm4, %v9004_v30, %v6171_v44  ;;  %v3210_v50 = vpack.c.bf16 %v3183_v19, %v3182_v60  ;;  %v10628_v44 = vrot.slane %v8709_v57, 7  ;;  %v10630_v60 = vrot.slane %v8701_v54, 7 }
 0x302   : > { %v6232_v18 = vunpack.i.h.bf16 %v9311_v6  ;;  %v2994_v21 = vsel %vm1434_vm6, %v2963_v47, %v6202_v26  ;;  %v9327_v36 = vpop.permute.xlu1 %6189 }
 0x303   : > { %5244 = vmatprep.mubr.msk.bf16.mxu1 %vm10384_vm3, %v3210_v50  ;;  %v9364_v58 = vsel %vm374_vm1, 0.0, %v10628_v44  ;;  %v9374_v19 = vsel %vm374_vm1, 0.0, %v10630_v60 }
 0x304   : > { %v3026_v53 = vsel %vm1500_vm8, %v2994_v21, %v6232_v18  ;;  %5245 = vmatmul.mubr.msk.bf16.gmra.mxu1 %vm10384_vm3, %v3211_v45  ;;  %vm10390_vm3 = vcmask 1047559  }
 0x305   : > { %v9331_v63 = vpop.permute.xlu0 %6234  ;;  %v9335_v25 = vsel %vm1566_vm10, %v3026_v53, %v6222_v48 }
 0x306   : > { %10624 = vst [vmem:[#allocation49_spill] sm:$0xff] %v9335_v25  ;;  %v9337_v30 = vpop.permute.xlu1 %6194 }
 0x309   : > { %v9339_v52 = vpop.permute.xlu0 %6244 }
 0x30a   : > { %v9341_v27 = vpop.permute.xlu1 %6214  ;;  %v6247_v37 = vunpack.i.h.bf16 %v9339_v52 }
 0x30d   : > { %v6255_v7 = vpop.permute.xlu0 %6254 }
 0x30e   : > { %v6257_v46 = vunpack.i.h.bf16 %v6255_v7  ;;  %v6225_v9 = vpop.permute.xlu1 %6224  ;;  %v6256_v55 = vunpack.i.l.bf16 %v6255_v7 }
 0x30f   : > { %v6226_v33 = vunpack.i.l.bf16 %v6225_v9  ;;  %v6227_v23 = vunpack.i.h.bf16 %v6225_v9 }
 0x310   : > { %v2970_v62 = vsel %vm1369_vm4, %v8771_v0, %v6257_v46  ;;  %v2969_v48 = vsel %vm1369_vm4, %v9374_v19, %v6256_v55 }
 0x311   : > { %v6265_v1 = vpop.permute.xlu0 %6264  ;;  %v2967_v22 = vsel %vm1369_vm4, %v9347_v15, %v6226_v33  ;;  %v2968_v21 = vsel %vm1369_vm4, %v8776_v41, %v6227_v23 }
 0x312   : > { %v6266_v59 = vunpack.i.l.bf16 %v6265_v1  ;;  %v9356_v4 = vpop.permute.xlu1 %6239  ;;  %v9359_v16 = vsel %vm1434_vm6, %v2967_v22, %v6247_v37  ;;  %v6267_v13 = vunpack.i.h.bf16 %v6265_v1 }
 0x313   : > { %10627 = vst [vmem:[#allocation31_spill] sm:$0xff] %v9359_v16 }
 0x314   : > { %v9354_v8 = vsel %vm1434_vm6, %v2970_v62, %v6266_v59  ;;  %v10634_v59 = vrot.slane %v8725_v11, 7 }
 0x315   : > { %10626 = vst [vmem:[#allocation50_spill] sm:$0xff] %v9354_v8  ;;  %v9376_v47 = vpop.permute.xlu0 %6279 }
 0x316   : > { %v6250_v43 = vpop.permute.xlu1 %6249  ;;  %v9398_v62 = vsel %vm374_vm1, 0.0, %v10634_v59 }
 0x317   : > { %v6251_v24 = vunpack.i.l.bf16 %v6250_v43  ;;  %v6252_v1 = vunpack.i.h.bf16 %v6250_v43 }
 0x319   : > { %v2971_v39 = vsel %vm1369_vm4, %v9364_v58, %v6251_v24  ;;  %v9390_v9 = vpop.permute.xlu0 %6284  ;;  %v2972_v55 = vsel %vm1369_vm4, %v8783_v31, %v6252_v1 }
 0x31a   : > { %v6260_v26 = vpop.permute.xlu1 %6259  ;;  %v9369_v18 = vsel %vm1434_vm6, %v2971_v39, %v6267_v13  ;;  %10633 = vst [vmem:[#allocation42_spill] sm:$0xff] %v9390_v9  ;;  %v6286_v37 = vunpack.i.l.bf16 %v9390_v9  ;;  %v6561_v39 = vld [vmem:[%s10241_s2] ss:$0 sm:$0xff] }
 0x31b   : > { %10629 = vst [vmem:[#allocation25_spill] sm:$0xff] %v9369_v18  ;;  %v6262_v50 = vunpack.i.h.bf16 %v6260_v26  ;;  %v6261_v45 = vunpack.i.l.bf16 %v6260_v26 }
 0x31c   : > { %v2973_v23 = vsel %vm1369_vm4, %v9398_v62, %v6286_v37 }
 0x31d   : > { %v9383_v53 = vsel %vm1434_vm6, %v2969_v48, %v6262_v50  ;;  %v9386_v7 = vsel %vm1434_vm6, %v2968_v21, %v6261_v45  ;;  %v6562_v50 = vld [vmem:[%s10242_s3] ss:$0 sm:$0xff] }
 0x31e   : > { %10631 = vst [vmem:[#allocation30_spill] sm:$0xff] %v9383_v53  ;;  %10632 = vst [vmem:[#allocation36_spill] sm:$0xff] %v9386_v7  ;;  %v9388_v46 = vpop.permute.xlu1 %6269 }
 0x322   : > { %v9392_v33 = vpop.permute.xlu1 %6274 }
 0x326   : > { %v6290_v40 = vpop.permute.xlu1 %6289 }
 0x327   : > { %v6292_v22 = vunpack.i.h.bf16 %v6290_v40  ;;  %v6291_v24 = vunpack.i.l.bf16 %v6290_v40 }
 0x329   : > { %v9405_v13 = vsel %vm1434_vm6, %v2973_v23, %v6292_v22  ;;  %v9408_v43 = vsel %vm1434_vm6, %v2972_v55, %v6291_v24 }
 0x32a   : > { %10635 = vst [vmem:[#allocation52_spill] sm:$0xff] %v9405_v13  ;;  %10636 = vst [vmem:[#allocation53_spill] sm:$0xff] %v9408_v43  ;;  %v10639_v13 = vrot.slane %v9031_v3, 1 }
 0x360   : > { %v5224_v44 = vpop.f32.mrf.mxu0 }
 0x361   : > { %v1886_v26 = vmul.f32 %v6561_v39, %v5224_v44 }
 0x362   : > { %v1834_v60 = vpop.f32.mrf.mxu0 }
 0x363   : > { %v1925_v45 = vadd.f32 %v6562_v50, %v1886_v26  ;;  %v1884_v48 = vmul.f32 %v6561_v39, %v1834_v60  ;;  %v9426_v26 = vsel %vm470_vm0, %v10639_v13, 0.0 }
 0x364   : > { %v5225_v21 = vpop.f32.mrf.mxu0 }
 0x365   : > { %v9416_v1 = vmax.f32 %v1925_v45, 0.0  ;;  %v1923_v37 = vadd.f32 %v6562_v50, %v1884_v48  ;;  %v1887_v40 = vmul.f32 %v6561_v39, %v5225_v21 }
 0x366   : > { %v1837_v59 = vpop.f32.mrf.mxu0 }
 0x367   : > { %10637 = vst [vmem:[#allocation54_spill] sm:$0xff] %v9416_v1  ;;  %v1926_v22 = vadd.f32 %v6562_v50, %v1887_v40  ;;  %v1885_v24 = vmul.f32 %v6561_v39, %v1837_v59  ;;  %v9418_v55 = vmax.f32 %v1923_v37, 0.0  ;;  %v2036_v23 = vrot.slane %v9416_v1, 7 }
 0x368   : > { %v2131_v60 = vrot.slane %v9416_v1, 1 }
 0x369   : > { %v9421_v44 = vmax.f32 %v1926_v22, 0.0  ;;  %v1924_v43 = vadd.f32 %v6562_v50, %v1885_v24  ;;  %v2128_v21 = vrot.slane %v9418_v55, 1  ;;  %v9436_v40 = vsel %vm374_vm1, 0.0, %v2036_v23 }
 0x36a   : > { %v10642_v8 = vrot.slane %v9418_v55, 7 }
 0x36b   : > { %10638 = vst [vmem:[#allocation55_spill] sm:$0xff] %v9421_v44  ;;  %v9429_v45 = vmax.f32 %v1924_v43, 0.0  ;;  %v2037_v48 = vrot.slane %v9421_v44, 7  ;;  %v2132_v39 = vrot.slane %v9421_v44, 1 }
 0x36d   : > { %10640 = vst [vmem:[#allocation56_spill] sm:$0xff] %v9429_v45  ;;  %v9442_v13 = vpack.i.bf16 %v9429_v45, %v9418_v55  ;;  %v2129_v43 = vrot.slane %v9429_v45, 1  ;;  %v2034_v59 = vrot.slane %v9429_v45, 7  ;;  %v9449_v24 = vsel %vm374_vm1, %v2036_v23, %v2037_v48 }
 0x36e   : > { %10641 = vst [vmem:[#allocation57_spill] sm:$0xff] %v9449_v24  ;;  %v2133_v37 = vsel %vm470_vm0, %v2131_v60, %v2132_v39  ;;  %v2165_v18 = vsel %vm470_vm0, %v2132_v39, 0.0 }
 0x36f   : > { %6304 = vrot.lane.b32.xlu0 %v9442_v13, %s6629_s19  ;;  %v2130_v50 = vsel %vm470_vm0, %v2128_v21, %v2129_v43  ;;  %v2164_v9 = vsel %vm470_vm0, %v2129_v43, 0.0  ;;  %v9460_v7 = vsel %vm374_vm1, %v10642_v8, %v2034_v59  ;;  %v9467_v39 = vpack.i.bf16 %v2165_v18, %v2133_v37  ;;  %v10645_v21 = vld [vmem:[#allocation9_spill] sm:$0xff]  ;;  %v10646_v18 = vld [vmem:[#allocation46_spill] sm:$0xff]  ;;  %s4821_s19 = sshll.u32 %s9635_s29, 4  ;;  %s10193_s19 = int_to_ptr.vmem [resolvable:$true] %s4821_s19 }
 0x370   : > { %v6308_v48 = vpack.i.bf16 %v2130_v50, %v9426_v26  ;;  %v9465_v60 = vpack.i.bf16 %v2164_v9, %v2130_v50  ;;  %v6313_v43 = vpack.i.bf16 %v10645_v21, %v8981_v14  ;;  %v6338_v8 = vpack.i.bf16 %v9347_v15, %v10645_v21  ;;  %v10651_v59 = vld [vmem:[#allocation13_spill] sm:$0xff]  ;;  %s6565_s22 = scalar_lea.vmem %s10193_s19, 512 }
 0x371   : > { %10644 = vst [vmem:[#allocation59_spill] sm:$0xff] %v9467_v39  ;;  %v6368_v50 = vpack.i.bf16 %v8776_v41, %v9347_v15  ;;  %v9516_v15 = vld [vmem:[%s10245_s6] ss:$0 sm:$0xff]  ;;  %vm10387_vm0 = vcmask 58368   ;;  %p6566_p11 = scmp.ne.s32.totalorder %s10193_s19, %s6565_s22 }
 0x372   : > { %10643 = vst [vmem:[#allocation58_spill] sm:$0xff] %v9465_v60  ;;  %6309 = vrot.lane.b32.xlu1 %v6308_v48, %s6631_s21  ;;  %v9510_v48 = vld [vmem:[%s10244_s5] ss:$0 sm:$0xff] }
 0x373   : > { %2331 = vrot.lane.b32.xlu0 %v2164_v9, %s6631_s21  ;;  %v6343_v9 = vpack.i.bf16 %v9374_v19, %v8776_v41  ;;  %p6567_p12 = pnand %p6566_p11, %p6720_p5 }
 0x375   : > { %p6568_p13 = pneg %p6567_p12 }
 0x376   : > { %6319 = vrot.lane.b32.xlu1 %v8796_v28, %s6636_s9  ;;  %v10647_v28 = vld [vmem:[#allocation40_spill] sm:$0xff] }
 0x377   : > { %6314 = vrot.lane.b32.xlu0 %v6313_v43, %s6637_s13  ;;  %v10648_v37 = vpack.i.bf16 %v8694_v10, %v10647_v28  ;;  %v6373_v10 = vpack.i.bf16 %v8771_v0, %v9374_v19 }
 0x37a   : > { %6329 = vrot.lane.b32.xlu1 %v8811_v49, %s6639_s15  ;;  %v10649_v49 = vld [vmem:[#allocation41_spill] sm:$0xff] }
 0x37b   : > { %6324 = vrot.lane.b32.xlu0 %v8827_v20, %s6636_s9  ;;  %v10650_v20 = vpack.i.bf16 %v8701_v54, %v10649_v49  ;;  %v6640_v54 = vmov 1983009808  }
 0x37c   : > { %v3616_v43 = vunpack.c.l.s4 %v6640_v54 }
 0x37e   : > { %6339 = vrot.lane.b32.xlu1 %v6338_v8, %s6633_s23  ;;  %v3618_v8 = vlaneseq }
 0x37f   : > { %6334 = vrot.lane.b32.xlu0 %v10646_v18, %s6639_s15 }
 0x382   : > { %6349 = vrot.lane.b32.xlu1 %v10648_v37, %s6635_s17 }
 0x383   : > { %6344 = vrot.lane.b32.xlu0 %v6343_v9, %s6633_s23  ;;  %v3619_v9 = vshrl.u32 %v3618_v8, 7 }
 0x386   : > { %6359 = vrot.lane.b32.xlu1 %v10646_v18, %s6638_s14 }
 0x387   : > { %6354 = vrot.lane.b32.xlu0 %v10650_v20, %s6635_s17  ;;  %v6398_v20 = vpack.i.bf16 %v9364_v58, %v8771_v0 }
 0x38a   : > { %6369 = vrot.lane.b32.xlu1 %v6368_v50, %s6637_s13 }
 0x38b   : > { %6364 = vrot.lane.b32.xlu0 %v10651_v59, %s6638_s14 }
 0x38e   : > { %6379 = vrot.lane.b32.xlu1 %v8849_v61, %s6636_s9  ;;  %v3617_v61 = vunpack.c.0.s8 %v3616_v43 }
 0x38f   : > { %6374 = vrot.lane.b32.xlu0 %v6373_v10, %s6637_s13 }
 0x390   : > { %v5238_v41 = vpop.f32.mrf.mxu1  ;;  %v9529_v54 = vsub.s32 %v3617_v61, %v3619_v9  ;;  %v2030_v61 = vrot.slane %v8880_v32, 7  ;;  %v2031_v9 = vrot.slane %v9031_v3, 7 }
 0x391   : > { %v3481_v19 = vmul.f32 %v5238_v41, %v9510_v48 }
 0x392   : > { %v3345_v18 = vpop.f32.mrf.mxu1  ;;  %6389 = vrot.lane.b32.xlu1 %v10651_v59, %s6639_s15  ;;  %v9550_v22 = vsel %vm374_vm1, 0.0, %v2030_v61  ;;  %v9553_v53 = vsel %vm374_vm1, %v2030_v61, %v2031_v9 }
 0x393   : > { %v3520_v28 = vadd.f32 %v9516_v15, %v3481_v19  ;;  %v3479_v37 = vmul.f32 %v9510_v48, %v3345_v18  ;;  %6384 = vrot.lane.b32.xlu0 %v8860_v51, %s6636_s9  ;;  %v10652_v51 = vld [vmem:[#allocation14_spill] sm:$0xff] }
 0x394   : > { %v5239_v49 = vpop.f32.mrf.mxu1 }
 0x395   : > { %v3518_v50 = vadd.f32 %v9516_v15, %v3479_v37  ;;  %v3482_v10 = vmul.f32 %v5239_v49, %v9510_v48  ;;  %v3552_v59 = vmax.f32 %v3520_v28, 0.0  ;;  %v6403_v37 = vpack.i.bf16 %v9398_v62, %v8783_v31  ;;  %v10653_v28 = vld [vmem:[#allocation32_spill] sm:$0xff] }
 0x396   : > { %v3348_v43 = vpop.f32.mrf.mxu1  ;;  %6399 = vrot.lane.b32.xlu1 %v6398_v20, %s6633_s23  ;;  %v10654_v49 = vpack.i.bf16 %v8709_v57, %v10653_v28 }
 0x397   : > { %v3550_v8 = vmax.f32 %v3518_v50, 0.0  ;;  %v3521_v41 = vadd.f32 %v9516_v15, %v3482_v10  ;;  %v3480_v19 = vmul.f32 %v9510_v48, %v3348_v43  ;;  %6394 = vrot.lane.b32.xlu0 %v10652_v51, %s6639_s15 }
 0x399   : > { %v3582_v18 = vmax.f32 %v3550_v8, %v3552_v59  ;;  %v3519_v0 = vadd.f32 %v9516_v15, %v3480_v19  ;;  %v3553_v10 = vmax.f32 %v3521_v41, 0.0  ;;  %v6428_v41 = vpack.i.bf16 %v8783_v31, %v9364_v58  ;;  %v10657_v58 = vld [vmem:[#allocation38_spill] sm:$0xff] }
 0x39a   : > { %6409 = vrot.lane.b32.xlu1 %v10654_v49, %s6635_s17  ;;  %v10655_v49 = vld [vmem:[#allocation44_spill] sm:$0xff] }
 0x39b   : > { %v3614_v20 = vcombine.high %v3582_v18, %v3582_v18  ;;  %v3621_v50 = vrot.slane %v3582_v18, %v9529_v54  ;;  %v3551_v43 = vmax.f32 %v3519_v0, 0.0  ;;  %6404 = vrot.lane.b32.xlu0 %v6403_v37, %s6633_s23 }
 0x39d   : > { %v3628_v59 = vrot.slane %v3614_v20, %v9529_v54  ;;  %v3629_v8 = vcombine.high %v3621_v50, %v3621_v50  ;;  %v3951_v19 = vsel %vm10387_vm0, %v3621_v50, -inf  ;;  %v3583_v23 = vmax.f32 %v3551_v43, %v3553_v10 }
 0x39e   : > { %v3952_v57 = vrot.slane %v3951_v19, 4  ;;  %6419 = vrot.lane.b32.xlu1 %v10652_v51, %s6638_s14  ;;  %v10656_v20 = vpack.i.bf16 %v8725_v11, %v10655_v49  ;;  %v6433_v43 = vpack.i.bf16 %v10657_v58, %v9398_v62 }
 0x39f   : > { %v3630_v18 = vcombine.high %v3628_v59, %v3628_v59  ;;  %v3958_v0 = vsel %vm10387_vm0, %v3629_v8, -inf  ;;  %v3965_v37 = vsel %vm10387_vm0, %v3628_v59, -inf  ;;  %v3631_v28 = vcombine.high %v3583_v23, %v3583_v23 }
 0x3a0   : > { %6414 = vrot.lane.b32.xlu0 %v10656_v20, %s6635_s17  ;;  %v3953_v61 = vmax.f32 %v3951_v19, %v3952_v57  ;;  %v3959_v9 = vrot.slane %v3958_v0, 4  ;;  %v3966_v50 = vrot.slane %v3965_v37, 4  ;;  %v3638_v10 = vrot.slane %v3583_v23, %v9529_v54 }
 0x3a1   : > { %v3972_v51 = vsel %vm10387_vm0, %v3630_v18, -inf  ;;  %v3645_v31 = vrot.slane %v3631_v28, %v9529_v54  ;;  %v6458_v59 = vpack.i.bf16 %v9550_v22, %v10657_v58  ;;  %v10658_v28 = vld [vmem:[#allocation15_spill] sm:$0xff] }
 0x3a2   : > { %v3954_v8 = vrot.slane %v3953_v61, 2  ;;  %v3960_v16 = vmax.f32 %v3958_v0, %v3959_v9  ;;  %v3967_v25 = vmax.f32 %v3965_v37, %v3966_v50  ;;  %v3973_v11 = vrot.slane %v3972_v51, 4  ;;  %6429 = vrot.lane.b32.xlu1 %v6428_v41, %s6637_s13 }
 0x3a3   : > { %v3646_v19 = vcombine.high %v3638_v10, %v3638_v10  ;;  %v3647_v57 = vcombine.high %v3645_v31, %v3645_v31  ;;  %v3979_v23 = vsel %vm10387_vm0, %v3638_v10, -inf  ;;  %v3993_v18 = vsel %vm10387_vm0, %v3645_v31, -inf }
 0x3a4   : > { %6424 = vrot.lane.b32.xlu0 %v10658_v28, %s6638_s14  ;;  %v3955_v49 = vmax.f32 %v3953_v61, %v3954_v8  ;;  %v3961_v62 = vrot.slane %v3960_v16, 2  ;;  %v3968_v20 = vrot.slane %v3967_v25, 2  ;;  %v3974_v56 = vmax.f32 %v3972_v51, %v3973_v11 }
 0x3a5   : > { %v3980_v58 = vrot.slane %v3979_v23, 4  ;;  %v3986_v0 = vsel %vm10387_vm0, %v3646_v19, -inf  ;;  %v3994_v37 = vrot.slane %v3993_v18, 4  ;;  %v4000_v41 = vsel %vm10387_vm0, %v3647_v57, -inf }
 0x3a6   : > { %v3956_v9 = vrot.slane %v3955_v49, 1  ;;  %v3962_v50 = vmax.f32 %v3960_v16, %v3961_v62  ;;  %v3969_v39 = vmax.f32 %v3967_v25, %v3968_v20  ;;  %v3975_v10 = vrot.slane %v3974_v56, 2  ;;  %6439 = vrot.lane.b32.xlu1 %v8893_v29, %s6636_s9 }
 0x3a7   : > { %v3981_v31 = vmax.f32 %v3979_v23, %v3980_v58  ;;  %v3987_v61 = vrot.slane %v3986_v0, 4  ;;  %v3995_v8 = vmax.f32 %v3993_v18, %v3994_v37  ;;  %v4001_v44 = vrot.slane %v4000_v41, 4 }
 0x3a8   : > { %6434 = vrot.lane.b32.xlu0 %v6433_v43, %s6637_s13  ;;  %v3957_v51 = vmax.f32 %v3955_v49, %v3956_v9  ;;  %v3963_v11 = vrot.slane %v3962_v50, 1  ;;  %v3970_v19 = vrot.slane %v3969_v39, 1  ;;  %v3976_v24 = vmax.f32 %v3974_v56, %v3975_v10 }
 0x3a9   : > { %v3982_v57 = vrot.slane %v3981_v31, 2  ;;  %v3988_v45 = vmax.f32 %v3986_v0, %v3987_v61  ;;  %v3996_v16 = vrot.slane %v3995_v8, 2  ;;  %v4002_v25 = vmax.f32 %v4000_v41, %v4001_v44 }
 0x3aa   : > { %v3964_v62 = vmax.f32 %v3962_v50, %v3963_v11  ;;  %v3971_v20 = vmax.f32 %v3969_v39, %v3970_v19  ;;  %v3977_v1 = vrot.slane %v3976_v24, 1  ;;  %v5004_v60 = vpack.c.bf16 %v3957_v51, %v3957_v51  ;;  %6449 = vrot.lane.b32.xlu1 %v10658_v28, %s6639_s15 }
 0x3ab   : > { %v3983_v29 = vmax.f32 %v3981_v31, %v3982_v57  ;;  %v3989_v58 = vrot.slane %v3988_v45, 2  ;;  %v3997_v23 = vmax.f32 %v3995_v8, %v3996_v16  ;;  %v4003_v18 = vrot.slane %v4002_v25, 2  ;;  %v10660_v8 = vld [vmem:[#allocation47_spill] sm:$0xff] }
 0x3ac   : > { %6444 = vrot.lane.b32.xlu0 %v8897_v2, %s6636_s9  ;;  %v3978_v43 = vmax.f32 %v3976_v24, %v3977_v1  ;;  %v5005_v56 = vpack.c.bf16 %v3964_v62, %v3964_v62  ;;  %v5006_v49 = vpack.c.bf16 %v3971_v20, %v3971_v20  ;;  %v10659_v0 = vrot.slane %v9418_v55, 7  ;;  %v10661_v62 = vld [vmem:[#allocation8_spill] sm:$0xff] }
 0x3ad   : > { %v3984_v39 = vrot.slane %v3983_v29, 1  ;;  %v3990_v37 = vmax.f32 %v3988_v45, %v3989_v58  ;;  %v3998_v41 = vrot.slane %v3997_v23, 1  ;;  %v4004_v9 = vmax.f32 %v4002_v25, %v4003_v18 }
 0x3ae   : > { %v9589_v44 = vsel %vm374_vm1, 0.0, %v10659_v0  ;;  %v5007_v28 = vpack.c.bf16 %v3978_v43, %v3978_v43  ;;  %v4655_v50 = vunpack.c.l.b16 %v5004_v60  ;;  %v4656_v10 = vunpack.c.l.b16 %v5005_v56  ;;  %6459 = vrot.lane.b32.xlu1 %v6458_v59, %s6633_s23 }
 0x3af   : > { %v4657_v31 = vunpack.c.l.b16 %v5006_v49  ;;  %v3985_v61 = vmax.f32 %v3983_v29, %v3984_v39  ;;  %v3991_v2 = vrot.slane %v3990_v37, 1  ;;  %v3999_v1 = vmax.f32 %v3997_v23, %v3998_v41 }
 0x3b0   : > { %v4005_v24 = vrot.slane %v4004_v9, 1  ;;  %6454 = vrot.lane.b32.xlu0 %v10660_v8, %s6639_s15  ;;  %v4658_v51 = vunpack.c.l.b16 %v5007_v28  ;;  %v4720_v11 = vsel %vm10386_vm5, %v4656_v10, %v4655_v50  ;;  %v6463_v45 = vpack.i.bf16 %v9589_v44, %v9553_v53 }
 0x3b1   : > { %v4722_v60 = vsel %vm4721_vm7, %v4657_v31, %v4720_v11  ;;  %v3992_v19 = vmax.f32 %v3990_v37, %v3991_v2  ;;  %v5008_v16 = vpack.c.bf16 %v3985_v61, %v3985_v61  ;;  %v5010_v59 = vpack.c.bf16 %v3999_v1, %v3999_v1 }
 0x3b2   : > { %v4006_v57 = vmax.f32 %v4004_v9, %v4005_v24  ;;  %v4724_v25 = vsel %vm10388_vm9, %v4658_v51, %v4722_v60  ;;  %vm4725_vm1 = vcmask 1044484   ;;  %v10662_v20 = vpack.i.bf16 %v8880_v32, %v10661_v62 }
 0x3b3   : > { %v5009_v29 = vpack.c.bf16 %v3992_v19, %v3992_v19  ;;  %v4659_v23 = vunpack.c.l.b16 %v5008_v16  ;;  %v4661_v18 = vunpack.c.l.b16 %v5010_v59  ;;  %v6473_v0 = vpack.i.bf16 %v9418_v55, %v9031_v3 }
 0x3b4   : > { %6469 = vrot.lane.b32.xlu1 %v10662_v20, %s6635_s17  ;;  %v5011_v58 = vpack.c.bf16 %v4006_v57, %v4006_v57  ;;  %6464 = vrot.lane.b32.xlu0 %v6463_v45, %s6633_s23  ;;  %v6092_v32 = vunpack.i.h.bf16 %v9177_v5  ;;  %v6181_v37 = vunpack.i.l.bf16 %v9214_v34  ;;  %v6488_v9 = vpack.i.bf16 %v9553_v53, %v9550_v22  ;;  %v10663_v34 = vld [vmem:[#allocation43_spill] sm:$0xff] }
 0x3b5   : > { %v4660_v43 = vunpack.c.l.b16 %v5009_v29  ;;  %v4726_v49 = vsel %vm4725_vm1, %v4659_v23, %v4724_v25  ;;  %v6231_v3 = vunpack.i.l.bf16 %v9311_v6  ;;  %v6483_v28 = vpack.i.bf16 %v9426_v26, %v9056_v35  ;;  %v10664_v6 = vld [vmem:[#allocation12_spill] sm:$0xff] }
 0x3b6   : > { %v4662_v56 = vunpack.c.l.b16 %v5011_v58  ;;  %v6172_v5 = vunpack.i.h.bf16 %v9307_v42  ;;  %v6197_v50 = vunpack.i.h.bf16 %v9337_v30  ;;  %v2960_v31 = vsel %vm1369_vm4, %v10663_v34, %v6092_v32 }
 0x3b7   : > { %v4728_v39 = vsel %vm4727_vm11, %v4660_v43, %v4726_v49  ;;  %v6217_v61 = vunpack.i.h.bf16 %v9341_v27  ;;  %v2961_v2 = vsel %vm1369_vm4, %v10664_v6, %v6181_v37  ;;  %v6237_v1 = vunpack.i.h.bf16 %v9331_v63 }
 0x3b8   : > { %6479 = vrot.lane.b32.xlu1 %v10660_v8, %s6638_s14  ;;  %6474 = vrot.lane.b32.xlu0 %v6473_v0, %s6635_s17  ;;  %v4730_v41 = vsel %vm4729_vm12, %v4661_v18, %v4728_v39  ;;  %v6236_v35 = vunpack.i.l.bf16 %v9331_v63  ;;  %v6196_v42 = vunpack.i.l.bf16 %v9337_v30  ;;  %v3025_v24 = vsel %vm1500_vm8, %v9266_v12, %v6231_v3  ;;  %v10665_v12 = vld [vmem:[#allocation10_spill] sm:$0xff] }
 0x3b9   : > { %v4732_v55 = vsel %vm10390_vm3, %v4662_v56, %v4730_v41  ;;  %v6216_v8 = vunpack.i.l.bf16 %v9341_v27  ;;  %v6493_v11 = vpack.i.bf16 %v9460_v7, %v9589_v44  ;;  %v6221_v63 = vunpack.i.l.bf16 %v9291_v38 }
 0x3ba   : > { %v4782_v10 = vpack.c.b16 %v4732_v55, %v4732_v55  ;;  %v9648_v30 = vsel %vm1369_vm4, %v8985_v17, %v6172_v5  ;;  %v6192_v45 = vunpack.i.h.bf16 %v9327_v36  ;;  %v2992_v60 = vsel %vm1434_vm6, %v2961_v2, %v6197_v50 }
 0x3bb   : > { %v6191_v27 = vunpack.i.l.bf16 %v9327_v36  ;;  %v3024_v57 = vsel %vm1500_vm8, %v2992_v60, %v6217_v61  ;;  %v9661_v17 = vsel %vm1369_vm4, %v8981_v14, %v6236_v35  ;;  %v9665_v59 = vsel %vm1369_vm4, %v10645_v21, %v6237_v1 }
 0x3bc   : > { %6489 = vrot.lane.b32.xlu1 %v6488_v9, %s6637_s13  ;;  %6484 = vrot.lane.b32.xlu0 %v6483_v28, %s6638_s14  ;;  %4799 = vst.msk [vmem:[%s9635_s29] sm:$0xf] %vm10389_vm2, %v4782_v10  ;;  %v5242_v26 = vpop.f32.mrf.mxu1  ;;  %v2991_v25 = vsel %vm1434_vm6, %v2960_v31, %v6196_v42  ;;  %v3057_v36 = vsel %vm1566_vm10, %v3025_v24, %v6221_v63  ;;  %v6246_v20 = vunpack.i.l.bf16 %v9339_v52  ;;  %v6282_v18 = vunpack.i.h.bf16 %v9376_v47 }
 0x3bd   : > { %v3485_v51 = vmul.f32 %v5242_v26, %v9510_v48  ;;  %v3023_v29 = vsel %vm1500_vm8, %v2991_v25, %v6216_v8  ;;  %v3056_v14 = vsel %vm1566_vm10, %v3024_v57, %v6192_v45  ;;  %v6281_v21 = vunpack.i.l.bf16 %v9376_v47  ;;  %v10666_v26 = vld [vmem:[#allocation58_spill] sm:$0xff]  ;;  %v10668_v25 = vld [vmem:[#allocation56_spill] sm:$0xff] }
 0x3be   : > { %v3361_v19 = vpop.f32.mrf.mxu1  ;;  %v6272_v43 = vunpack.i.h.bf16 %v9388_v46  ;;  %v6242_v37 = vunpack.i.h.bf16 %v9356_v4  ;;  %v3055_v41 = vsel %vm1566_vm10, %v3023_v29, %v6191_v27  ;;  %v6277_v47 = vunpack.i.h.bf16 %v9392_v33 }
 0x3bf   : > { %v3524_v16 = vadd.f32 %v9516_v15, %v3485_v51  ;;  %v3483_v38 = vmul.f32 %v9510_v48, %v3361_v19  ;;  %v6518_v3 = vpack.i.bf16 %v9436_v40, %v9460_v7  ;;  %v6241_v55 = vunpack.i.l.bf16 %v9356_v4 }
 0x3c0   : > { %6499 = vrot.lane.b32.xlu1 %v10665_v12, %s6636_s9  ;;  %6494 = vrot.lane.b32.xlu0 %v6493_v11, %s6637_s13  ;;  %v5243_v62 = vpop.f32.mrf.mxu1  ;;  %v9696_v34 = vsel %vm3074_vm13, %v3056_v14, %v6281_v21  ;;  %v9700_v31 = vsel %vm1369_vm4, %v9553_v53, %v6272_v43  ;;  %v9710_v24 = vsel %vm3074_vm13, %v3055_v41, %v6277_v47  ;;  %v6276_v53 = vunpack.i.l.bf16 %v9392_v33  ;;  %v10670_v14 = vld [vmem:[#allocation57_spill] sm:$0xff] }
 0x3c1   : > { %v3522_v58 = vadd.f32 %v9516_v15, %v3483_v38  ;;  %v3486_v23 = vmul.f32 %v5243_v62, %v9510_v48  ;;  %v3556_v49 = vmax.f32 %v3524_v16, 0.0  ;;  %v10667_v38 = vld [vmem:[#allocation54_spill] sm:$0xff] }
 0x3c2   : > { %v3364_v56 = vpop.f32.mrf.mxu1 }
 0x3c3   : > { %v3554_v0 = vmax.f32 %v3522_v58, 0.0  ;;  %v3525_v32 = vadd.f32 %v9516_v15, %v3486_v23  ;;  %v3484_v39 = vmul.f32 %v9510_v48, %v3364_v56 }
 0x3c4   : > { %6509 = vrot.lane.b32.xlu1 %v6483_v28, %s6639_s15  ;;  %6504 = vrot.lane.b32.xlu0 %v9442_v13, %s6636_s9  ;;  %v5246_v9 = vpop.f32.mrf.mxu1  ;;  %v9688_v28 = vpop.permute.xlu1 %6294  ;;  %v9693_v13 = vsel %vm3074_vm13, %v3057_v36, %v6282_v18  ;;  %v10669_v36 = vpack.i.bf16 %v10667_v38, %v10668_v25 }
 0x3c5   : > { %v3584_v5 = vmax.f32 %v3554_v0, %v3556_v49  ;;  %v3523_v50 = vadd.f32 %v9516_v15, %v3484_v39  ;;  %v3489_v10 = vmul.f32 %v5246_v9, %v9510_v48  ;;  %v3557_v61 = vmax.f32 %v3525_v32, 0.0 }
 0x3c6   : > { %v3377_v6 = vpop.f32.mrf.mxu1  ;;  %v6297_v8 = vunpack.i.h.bf16 %v9688_v28 }
 0x3c7   : > { %v3648_v2 = vcombine.high %v3584_v5, %v3584_v5  ;;  %v3655_v1 = vrot.slane %v3584_v5, %v9529_v54  ;;  %v3555_v35 = vmax.f32 %v3523_v50, 0.0  ;;  %v9705_v42 = vadd.f32 %v9516_v15, %v3489_v10 }
 0x3c8   : > { %6519 = vrot.lane.b32.xlu1 %v6518_v3, %s6633_s23  ;;  %6514 = vrot.lane.b32.xlu0 %v10666_v26, %s6639_s15  ;;  %v3487_v51 = vmul.f32 %v9510_v48, %v3377_v6  ;;  %v5247_v11 = vpop.f32.mrf.mxu1  ;;  %v10671_v6 = vld [vmem:[#allocation55_spill] sm:$0xff] }
 0x3c9   : > { %v3662_v63 = vrot.slane %v3648_v2, %v9529_v54  ;;  %v3663_v45 = vcombine.high %v3655_v1, %v3655_v1  ;;  %v4007_v60 = vsel %vm10387_vm0, %v3655_v1, -inf  ;;  %v3585_v19 = vmax.f32 %v3555_v35, %v3557_v61 }
 0x3ca   : > { %v4008_v12 = vrot.slane %v4007_v60, 4  ;;  %v3560_v27 = vmax.f32 %v9705_v42, 0.0  ;;  %v9719_v57 = vadd.f32 %v9516_v15, %v3487_v51  ;;  %v3490_v16 = vmul.f32 %v5247_v11, %v9510_v48 }
 0x3cb   : > { %v3664_v62 = vcombine.high %v3662_v63, %v3662_v63  ;;  %v4014_v29 = vsel %vm10387_vm0, %v3663_v45, -inf  ;;  %v4021_v58 = vsel %vm10387_vm0, %v3662_v63, -inf  ;;  %v3665_v23 = vcombine.high %v3585_v19, %v3585_v19 }
 0x3cc   : > { %6524 = vrot.lane.b32.xlu1 %v10669_v36, %s6635_s17  ;;  %2442 = vrot.lane.b32.xlu0 %v10670_v14, %s6633_s23  ;;  %v4009_v18 = vmax.f32 %v4007_v60, %v4008_v12  ;;  %v4015_v21 = vrot.slane %v4014_v29, 4  ;;  %v4022_v43 = vrot.slane %v4021_v58, 4  ;;  %v3672_v56 = vrot.slane %v3585_v19, %v9529_v54  ;;  %s6641_s23 = smov [#allocation2]  }
 0x3cd   : > { %v4028_v49 = vsel %vm10387_vm0, %v3664_v62, -inf  ;;  %v3679_v0 = vrot.slane %v3665_v23, %v9529_v54  ;;  %v3558_v32 = vmax.f32 %v9719_v57, 0.0  ;;  %v9735_v39 = vadd.f32 %v9516_v15, %v3490_v16 }
 0x3ce   : > { %v4010_v41 = vrot.slane %v4009_v18, 2  ;;  %v4016_v47 = vmax.f32 %v4014_v29, %v4015_v21  ;;  %v4023_v9 = vmax.f32 %v4021_v58, %v4022_v43  ;;  %v4029_v3 = vrot.slane %v4028_v49, 4  ;;  %v10673_v58 = vld [vmem:[#allocation59_spill] sm:$0xff] }
 0x3cf   : > { %v3680_v5 = vcombine.high %v3672_v56, %v3672_v56  ;;  %v3681_v50 = vcombine.high %v3679_v0, %v3679_v0  ;;  %v4035_v10 = vsel %vm10387_vm0, %v3672_v56, -inf  ;;  %v4049_v61 = vsel %vm10387_vm0, %v3679_v0, -inf }
 0x3d0   : > { %6529 = vrot.lane.b32.xlu1 %v10666_v26, %s6638_s14  ;;  %2538 = vrot.lane.b32.xlu0 %v10671_v6, %s6635_s17  ;;  %v4011_v2 = vmax.f32 %v4009_v18, %v4010_v41  ;;  %v4017_v1 = vrot.slane %v4016_v47, 2  ;;  %v4024_v35 = vrot.slane %v4023_v9, 2  ;;  %v4030_v51 = vmax.f32 %v4028_v49, %v4029_v3  ;;  %s6569_s17 = sshll.u32 %s6641_s23, 4  ;;  %s6570_s17 = int_to_ptr.vmem [resolvable:$false] %s6569_s17 }
 0x3d1   : > { %v4036_v11 = vrot.slane %v4035_v10, 4  ;;  %v4042_v63 = vsel %vm10387_vm0, %v3680_v5, -inf  ;;  %v4050_v45 = vrot.slane %v4049_v61, 4  ;;  %v4056_v60 = vsel %vm10387_vm0, %v3681_v50, -inf  ;;  %p6572_p0 = scmp.lt.s32.totalorder %s10193_s19, %s6570_s17 }
 0x3d2   : > { %v4012_v26 = vrot.slane %v4011_v2, 1  ;;  %v4018_v19 = vmax.f32 %v4016_v47, %v4017_v1  ;;  %v4025_v12 = vmax.f32 %v4023_v9, %v4024_v35  ;;  %v4031_v57 = vrot.slane %v4030_v51, 2 }
 0x3d3   : > { %v10672_v16 = vpack.i.bf16 %v10670_v14, %v9436_v40  ;;  %v4037_v25 = vmax.f32 %v4035_v10, %v4036_v11  ;;  %v4043_v36 = vrot.slane %v4042_v63, 4  ;;  %v4051_v62 = vmax.f32 %v4049_v61, %v4050_v45 }
 0x3d4   : > { %v4057_v29 = vrot.slane %v4056_v60, 4  ;;  %6534 = vrot.lane.b32.xlu0 %v10673_v58, %s6638_s14  ;;  %v4013_v23 = vmax.f32 %v4011_v2, %v4012_v26  ;;  %v4019_v18 = vrot.slane %v4018_v19, 1  ;;  %v4026_v21 = vrot.slane %v4025_v12, 1  ;;  %s5068_s14 = sshll.u32 %s6703_s28, 9  ;;  %s4808_s28 = scalar_lea.sflag [#allocation3], %s269_s20 }
 0x3d5   : > { %6539 = vrot.lane.b32.xlu1 %v10672_v16, %s6637_s13  ;;  %v4032_v43 = vmax.f32 %v4030_v51, %v4031_v57  ;;  %v4038_v56 = vrot.slane %v4037_v25, 2  ;;  %v4044_v49 = vmax.f32 %v4042_v63, %v4043_v36  ;;  %v4052_v0 = vrot.slane %v4051_v62, 2  ;;  %s10191_s16 = scalar_lea.hbm %s10246_s7, %s5068_s14 }
 0x3d6   : > { %v4058_v41 = vmax.f32 %v4056_v60, %v4057_v29  ;;  %v4020_v47 = vmax.f32 %v4018_v19, %v4019_v18  ;;  %v4027_v9 = vmax.f32 %v4025_v12, %v4026_v21  ;;  %v5012_v40 = vpack.c.bf16 %v4013_v23, %v4013_v23  ;;  %v9765_v21 = vpop.permute.xlu0 %6299 }
 0x3d7   : > { %v4033_v3 = vrot.slane %v4032_v43, 1  ;;  %v10674_v14 = vpack.i.bf16 %v10671_v6, %v10667_v38  ;;  %v4039_v5 = vmax.f32 %v4037_v25, %v4038_v56  ;;  %v4045_v50 = vrot.slane %v4044_v49, 2 }
 0x3d8   : > { %v4053_v10 = vmax.f32 %v4051_v62, %v4052_v0  ;;  %v4059_v61 = vrot.slane %v4058_v41, 2  ;;  %v10675_v2 = vmov 0.0   ;;  %v5013_v35 = vpack.c.bf16 %v4020_v47, %v4020_v47 }
 0x3d9   : > { %6544 = vrot.lane.b32.xlu1 %v10674_v14, %s6636_s9  ;;  %2729 = vrot.lane.b32.xlu0 %v10675_v2, %s6637_s13  ;;  %v4034_v1 = vmax.f32 %v4032_v43, %v4033_v3  ;;  %v5014_v51 = vpack.c.bf16 %v4027_v9, %v4027_v9  ;;  %v4663_v11 = vunpack.c.l.b16 %v5012_v40  ;;  %v4040_v63 = vrot.slane %v4039_v5, 1 }
 0x3da   : > { %v4046_v45 = vmax.f32 %v4044_v49, %v4045_v50  ;;  %v4054_v60 = vrot.slane %v4053_v10, 1  ;;  %v4060_v26 = vmax.f32 %v4058_v41, %v4059_v61  ;;  %v4664_v12 = vunpack.c.l.b16 %v5013_v35 }
 0x3db   : > { %v5015_v19 = vpack.c.bf16 %v4034_v1, %v4034_v1  ;;  %v4665_v57 = vunpack.c.l.b16 %v5014_v51  ;;  %v3586_v38 = vmax.f32 %v3558_v32, %v3560_v27  ;;  %v4041_v6 = vmax.f32 %v4039_v5, %v4040_v63  ;;  %v3380_v51 = vpop.f32.mrf.mxu1 }
 0x3dc   : > { %v4047_v16 = vrot.slane %v4046_v45, 1  ;;  %v4055_v25 = vmax.f32 %v4053_v10, %v4054_v60  ;;  %v4061_v36 = vrot.slane %v4060_v26, 1  ;;  %v4733_v29 = vsel %vm10386_vm5, %v4664_v12, %v4663_v11 }
 0x3dd   : > { %6549 = vrot.lane.b32.xlu1 %v10673_v58, %s6639_s15  ;;  %2822 = vrot.lane.b32.xlu0 %v10675_v2, %s6636_s9  ;;  %v4666_v62 = vunpack.c.l.b16 %v5015_v19  ;;  %v3682_v23 = vcombine.high %v3586_v38, %v3586_v38  ;;  %v3689_v18 = vrot.slane %v3586_v38, %v9529_v54  ;;  %v4734_v42 = vsel %vm4721_vm7, %v4665_v57, %v4733_v29  ;;  %s6571_s9 = scalar_lea.vmem %s6570_s17, 1024 }
 0x3de   : > { %v4048_v27 = vmax.f32 %v4046_v45, %v4047_v16  ;;  %v4062_v32 = vmax.f32 %v4060_v26, %v4061_v36  ;;  %v5016_v58 = vpack.c.bf16 %v4041_v6, %v4041_v6  ;;  %v5018_v43 = vpack.c.bf16 %v4055_v25, %v4055_v25  ;;  %p6573_p1 = scmp.lt.s32.totalorder %s6571_s9, %s6565_s22 }
 0x3df   : > { %v4735_v56 = vsel %vm10388_vm9, %v4666_v62, %v4734_v42  ;;  %v3696_v49 = vrot.slane %v3682_v23, %v9529_v54  ;;  %v3697_v0 = vcombine.high %v3689_v18, %v3689_v18  ;;  %v4063_v3 = vsel %vm10387_vm0, %v3689_v18, -inf }
 0x3e0   : > { %v5017_v41 = vpack.c.bf16 %v4048_v27, %v4048_v27  ;;  %v5019_v47 = vpack.c.bf16 %v4062_v32, %v4062_v32  ;;  %v4667_v9 = vunpack.c.l.b16 %v5016_v58  ;;  %v4669_v40 = vunpack.c.l.b16 %v5018_v43  ;;  %p6574_p2 = por %p6573_p1, %p6572_p0 }
 0x3e1   : > { %2915 = vrot.lane.b32.xlu0 %v10675_v2, %s6639_s15  ;;  %v3698_v14 = vcombine.high %v3696_v49, %v3696_v49  ;;  %v4064_v5 = vrot.slane %v4063_v3, 4  ;;  %v4070_v50 = vsel %vm10387_vm0, %v3697_v0, -inf  ;;  %v6305_v11 = vpop.permute.xlu0 %6304  ;;  %v4077_v45 = vsel %vm10387_vm0, %v3696_v49, -inf }
 0x3e2   : > { %v4668_v10 = vunpack.c.l.b16 %v5017_v41  ;;  %v4670_v61 = vunpack.c.l.b16 %v5019_v47  ;;  %v4736_v1 = vsel %vm4725_vm1, %v4667_v9, %v4735_v56  ;;  %v4071_v35 = vrot.slane %v4070_v50, 4  ;;  %p6575_p3 = pnand %p6574_p2, %p6568_p13 }
 0x3e3   : > { %v4065_v63 = vmax.f32 %v4063_v3, %v4064_v5  ;;  %v4084_v60 = vsel %vm10387_vm0, %v3698_v14, -inf  ;;  %v3561_v26 = vmax.f32 %v9735_v39, 0.0  ;;  %v4078_v12 = vrot.slane %v4077_v45, 4 }
 0x3e4   : > { %v4737_v2 = vsel %vm4727_vm11, %v4668_v10, %v4736_v1  ;;  %v4072_v19 = vmax.f32 %v4070_v50, %v4071_v35  ;;  %v4085_v57 = vrot.slane %v4084_v60, 4  ;;  %v3488_v16 = vmul.f32 %v9510_v48, %v3380_v51  ;;  %v6310_v36 = vpop.permute.xlu1 %6309 }
 0x3e5   : > { %v4738_v38 = vsel %vm4729_vm12, %v4669_v40, %v4737_v2  ;;  %v4066_v6 = vrot.slane %v4065_v63, 2  ;;  %v6307_v25 = vunpack.i.h.bf16 %v6305_v11  ;;  %v4079_v23 = vmax.f32 %v4077_v45, %v4078_v12  ;;  %v2332_v42 = vpop.permute.xlu0 %2331 }
 0x3e6   : > { %v4739_v62 = vsel %vm10390_vm3, %v4670_v61, %v4738_v38  ;;  %v4073_v29 = vrot.slane %v4072_v19, 2  ;;  %v4086_v18 = vmax.f32 %v4084_v60, %v4085_v57  ;;  %v3527_v32 = vadd.f32 %v9516_v15, %v3488_v16 }
 0x3e7   : > { %v4783_v39 = vpack.c.b16 %v4739_v62, %v4739_v62  ;;  %v4067_v27 = vmax.f32 %v4065_v63, %v4066_v6  ;;  %v6306_v58 = vunpack.i.l.bf16 %v6305_v11  ;;  %v4080_v56 = vrot.slane %v4079_v23, 2 }
 0x3e8   : > { %v4074_v43 = vmax.f32 %v4072_v19, %v4073_v29  ;;  %v4087_v49 = vrot.slane %v4086_v18, 2  ;;  %v6312_v0 = vunpack.i.h.bf16 %v6310_v36  ;;  %v3559_v41 = vmax.f32 %v3527_v32, 0.0  ;;  %v6320_v3 = vpop.permute.xlu1 %6319 }
 0x3e9   : > { %4800 = vst.msk [vmem:[%s9635_s29 + $0x4] sm:$0xf] %vm10389_vm2, %v4783_v39  ;;  %v4068_v48 = vrot.slane %v4067_v27, 1  ;;  %v2977_v47 = vsel %vm1369_vm4, %v9589_v44, %v6306_v58  ;;  %v6311_v9 = vunpack.i.l.bf16 %v6310_v36  ;;  %v4081_v14 = vmax.f32 %v4079_v23, %v4080_v56  ;;  %v9790_v15 = vpop.permute.xlu0 %6314 }
 0x3ea   : > { %v4075_v40 = vrot.slane %v4074_v43, 1  ;;  %v4088_v5 = vmax.f32 %v4086_v18, %v4087_v49  ;;  %v9788_v50 = vsel %vm1434_vm6, %v2977_v47, %v6312_v0  ;;  %v3587_v61 = vmax.f32 %v3559_v41, %v3561_v26 }
 0x3eb   : > { %v4069_v10 = vmax.f32 %v4067_v27, %v4068_v48  ;;  %v9794_v1 = vsel %vm1434_vm6, %v9700_v31, %v6311_v9  ;;  %v2978_v35 = vsel %vm1369_vm4, %v9460_v7, %v6307_v25  ;;  %v4082_v51 = vrot.slane %v4081_v14, 1 }
 0x3ec   : > { %v4076_v44 = vmax.f32 %v4074_v43, %v4075_v40  ;;  %v4089_v11 = vrot.slane %v4088_v5, 1  ;;  %v9799_v63 = vsel %vm1434_vm6, %v2978_v35, %v2332_v42  ;;  %v6296_v45 = vunpack.i.l.bf16 %v9688_v28  ;;  %v6330_v26 = vpop.permute.xlu1 %6329  ;;  %v10676_v43 = vld [vmem:[#allocation48_spill] sm:$0xff] }
 0x3ed   : > { %v5020_v60 = vpack.c.bf16 %v4069_v10, %v4069_v10  ;;  %v3699_v2 = vcombine.high %v3587_v61, %v3587_v61  ;;  %v3706_v19 = vrot.slane %v3587_v61, %v9529_v54  ;;  %v4083_v12 = vmax.f32 %v4081_v14, %v4082_v51  ;;  %v9803_v6 = vpop.permute.xlu0 %6324 }
 0x3ee   : > { %v4090_v57 = vmax.f32 %v4088_v5, %v4089_v11  ;;  %v5021_v31 = vpack.c.bf16 %v4076_v44, %v4076_v44  ;;  %v6322_v38 = vunpack.i.h.bf16 %v6320_v3  ;;  %v6321_v36 = vunpack.i.l.bf16 %v6320_v3 }
 0x3ef   : > { %v3713_v7 = vrot.slane %v3699_v2, %v9529_v54  ;;  %v3714_v16 = vcombine.high %v3706_v19, %v3706_v19  ;;  %v4091_v25 = vsel %vm10387_vm0, %v3706_v19, -inf  ;;  %v5022_v62 = vpack.c.bf16 %v4083_v12, %v4083_v12 }
 0x3f0   : > { %v4671_v29 = vunpack.c.l.b16 %v5020_v60  ;;  %v4672_v23 = vunpack.c.l.b16 %v5021_v31  ;;  %v4092_v18 = vrot.slane %v4091_v25, 4  ;;  %v5023_v42 = vpack.c.bf16 %v4090_v57, %v4090_v57  ;;  %v9809_v58 = vpop.permute.xlu1 %6339 }
 0x3f1   : > { %v3715_v39 = vcombine.high %v3713_v7, %v3713_v7  ;;  %v4098_v27 = vsel %vm10387_vm0, %v3714_v16, -inf  ;;  %v4105_v32 = vsel %vm10387_vm0, %v3713_v7, -inf  ;;  %v3087_v56 = vsel %vm3074_vm13, %v10676_v43, %v6276_v53  ;;  %v6335_v41 = vpop.permute.xlu0 %6334 }
 0x3f2   : > { %v3121_v49 = vsel %vm3107_vm14, %v9710_v24, %v6297_v8  ;;  %v4673_v0 = vunpack.c.l.b16 %v5022_v62  ;;  %v4093_v48 = vmax.f32 %v4091_v25, %v4092_v18  ;;  %v4740_v47 = vsel %vm10386_vm5, %v4672_v23, %v4671_v29 }
 0x3f3   : > { %v4099_v9 = vrot.slane %v4098_v27, 4  ;;  %v4106_v3 = vrot.slane %v4105_v32, 4  ;;  %v4112_v40 = vsel %vm10387_vm0, %v3715_v39, -inf  ;;  %v3120_v14 = vsel %vm3107_vm14, %v3087_v56, %v6296_v45 }
 0x3f4   : > { %v4094_v33 = vrot.slane %v4093_v48, 2  ;;  %v4113_v5 = vrot.slane %v4112_v40, 4  ;;  %v3154_v53 = vsel %vm3140_vm15, %v3121_v49, %v6322_v38  ;;  %v4674_v10 = vunpack.c.l.b16 %v5023_v42  ;;  %v9824_v8 = vpop.permute.xlu1 %6349 }
 0x3f5   : > { %v4100_v28 = vmax.f32 %v4098_v27, %v4099_v9  ;;  %v4107_v61 = vmax.f32 %v4105_v32, %v4106_v3  ;;  %v3153_v24 = vsel %vm3140_vm15, %v3120_v14, %v6321_v36  ;;  %v4741_v35 = vsel %vm4721_vm7, %v4673_v0, %v4740_v47  ;;  %v9827_v60 = vpop.permute.xlu0 %6344 }
 0x3f6   : > { %v4095_v44 = vmax.f32 %v4093_v48, %v4094_v33  ;;  %v4114_v51 = vmax.f32 %v4112_v40, %v4113_v5  ;;  %v6332_v11 = vunpack.i.h.bf16 %v6330_v26  ;;  %v6317_v19 = vunpack.i.h.bf16 %v9790_v15 }
 0x3f7   : > { %v4101_v2 = vrot.slane %v4100_v28, 2  ;;  %v4108_v45 = vrot.slane %v4107_v61, 2  ;;  %v6331_v12 = vunpack.i.l.bf16 %v6330_v26  ;;  %v6316_v38 = vunpack.i.l.bf16 %v9790_v15 }
 0x3f8   : > { %v4096_v57 = vrot.slane %v4095_v44, 1  ;;  %v4115_v31 = vrot.slane %v4114_v51, 2  ;;  %vm10677_vm5 = vcmask 523264   ;;  %v6327_v62 = vunpack.i.h.bf16 %v9803_v6  ;;  %v9834_v29 = vpop.permute.xlu1 %6359 }
 0x3f9   : > { %v3187_v7 = vsel %vm10677_vm5, %v3154_v53, %v6332_v11  ;;  %v4102_v16 = vmax.f32 %v4100_v28, %v4101_v2  ;;  %v4109_v25 = vmax.f32 %v4107_v61, %v4108_v45  ;;  %vm10678_vm0 = vmmov %vm10677_vm5  ;;  %v6326_v39 = vunpack.i.l.bf16 %v9803_v6  ;;  %v9837_v26 = vpop.permute.xlu0 %6354 }
 0x3fa   : > { %v3186_v36 = vsel %vm10678_vm0, %v3153_v24, %v6331_v12  ;;  %v4097_v23 = vmax.f32 %v4095_v44, %v4096_v57  ;;  %v4116_v18 = vmax.f32 %v4114_v51, %v4115_v31  ;;  %v4742_v15 = vsel %vm10388_vm9, %v4674_v10, %v4741_v35  ;;  %vm10680_vm9 = vmmov %vm10677_vm5 }
 0x3fb   : > { %v3212_v42 = vpack.c.bf16 %v3187_v7, %v3186_v36  ;;  %v4103_v27 = vrot.slane %v4102_v16, 1  ;;  %v4110_v32 = vrot.slane %v4109_v25, 1  ;;  %v3123_v43 = vsel %vm3107_vm14, %v9693_v13, %v6317_v19 }
 0x3fc   : > { %v4117_v56 = vrot.slane %v4116_v18, 1  ;;  %v5024_v49 = vpack.c.bf16 %v4097_v23, %v4097_v23  ;;  %v3122_v0 = vsel %vm3107_vm14, %v9696_v34, %v6316_v38  ;;  %v6337_v48 = vunpack.i.h.bf16 %v6335_v41  ;;  %v6370_v40 = vpop.permute.xlu1 %6369 }
 0x3fd   : > { %vm10679_vm0 = vcmask 588800   ;;  %v4104_v47 = vmax.f32 %v4102_v16, %v4103_v27  ;;  %v4111_v9 = vmax.f32 %v4109_v25, %v4110_v32  ;;  %v3156_v6 = vsel %vm3140_vm15, %v3123_v43, %v6327_v62  ;;  %v6365_v53 = vpop.permute.xlu0 %6364  ;;  %v10682_v43 = vld [vmem:[#allocation49_spill] sm:$0xff] }
 0x3fe   : > { %5248 = vmatprep.mubr.msk.bf16.mxu1 %vm10679_vm0, %v3212_v42  ;;  %v6336_v3 = vunpack.i.l.bf16 %v6335_v41  ;;  %v4118_v14 = vmax.f32 %v4116_v18, %v4117_v56  ;;  %v4675_v33 = vunpack.c.l.b16 %v5024_v49  ;;  %v3155_v5 = vsel %vm3140_vm15, %v3122_v0, %v6326_v39 }
 0x3ff   : > { %v3189_v13 = vsel %vm10677_vm5, %v3156_v6, %v6337_v48  ;;  %v5025_v10 = vpack.c.bf16 %v4104_v47, %v4104_v47  ;;  %v5026_v28 = vpack.c.bf16 %v4111_v9, %v4111_v9  ;;  %v6342_v34 = vunpack.i.h.bf16 %v9809_v58 }
 0x400   : > { %v3188_v61 = vsel %vm10680_vm9, %v3155_v5, %v6336_v3  ;;  %v5027_v24 = vpack.c.bf16 %v4118_v14, %v4118_v14  ;;  %v4743_v35 = vsel %vm4725_vm1, %v4675_v33, %v4742_v15  ;;  %v6341_v44 = vunpack.i.l.bf16 %v9809_v58  ;;  %v6380_v19 = vpop.permute.xlu1 %6379  ;;  %vm10681_vm9 = vmmov %vm10679_vm0 }
 0x401   : > { %v3213_v41 = vpack.c.bf16 %v3189_v13, %v3188_v61  ;;  %v4676_v51 = vunpack.c.l.b16 %v5025_v10  ;;  %v4677_v11 = vunpack.c.l.b16 %v5026_v28  ;;  %v6352_v2 = vunpack.i.h.bf16 %v9824_v8  ;;  %v6375_v38 = vpop.permute.xlu0 %6374  ;;  %vm10683_vm0 = vmmov %vm10677_vm5 }
 0x402   : > { %v6351_v45 = vunpack.i.l.bf16 %v9824_v8  ;;  %v2997_v12 = vsel %vm1434_vm6, %v9665_v59, %v6246_v20  ;;  %v2996_v57 = vsel %vm1434_vm6, %v9661_v17, %v6242_v37  ;;  %v4678_v31 = vunpack.c.l.b16 %v5027_v24  ;;  %vm10684_vm5 = vmmov %vm10683_vm0 }
 0x403   : > { %v6346_v58 = vunpack.i.l.bf16 %v9827_v60  ;;  %5249 = vmatmul.mubr.msk.bf16.gmra.mxu1 %vm10681_vm9, %v3213_v41  ;;  %v2995_v8 = vsel %vm1434_vm6, %v9648_v30, %v6241_v55  ;;  %v4744_v52 = vsel %vm4727_vm11, %v4676_v51, %v4743_v35  ;;  %v3028_v59 = vsel %vm1500_vm8, %v2996_v57, %v6342_v34  ;;  %vm10685_vm9 = vmmov %vm10683_vm0 }
 0x404   : > { %v6362_v20 = vunpack.i.h.bf16 %v9834_v29  ;;  %v4745_v7 = vsel %vm4729_vm12, %v4677_v11, %v4744_v52  ;;  %v3027_v17 = vsel %vm1500_vm8, %v2995_v8, %v6341_v44  ;;  %v6361_v37 = vunpack.i.l.bf16 %v9834_v29  ;;  %v6390_v36 = vpop.permute.xlu1 %6389 }
 0x405   : > { %v6356_v16 = vunpack.i.l.bf16 %v9837_v26  ;;  %v4746_v4 = vsel %vm10390_vm3, %v4678_v31, %v4745_v7  ;;  %v3059_v25 = vsel %vm1566_vm10, %v3027_v17, %v6351_v45  ;;  %v3060_v30 = vsel %vm1566_vm10, %v3028_v59, %v6352_v2  ;;  %v6385_v39 = vpop.permute.xlu0 %6384 }
 0x406   : > { %v6372_v55 = vunpack.i.h.bf16 %v6370_v40  ;;  %v4784_v62 = vpack.c.b16 %v4746_v4, %v4746_v4  ;;  %v3029_v23 = vsel %vm1500_vm8, %v2997_v12, %v6346_v58  ;;  %v6371_v18 = vunpack.i.l.bf16 %v6370_v40  ;;  %v10689_v4 = vld [vmem:[#allocation31_spill] sm:$0xff] }
 0x407   : > { %v6367_v42 = vunpack.i.h.bf16 %v6365_v53  ;;  %v3092_v27 = vsel %vm3074_vm13, %v3059_v25, %v6362_v20  ;;  %v6366_v29 = vunpack.i.l.bf16 %v6365_v53  ;;  %v6382_v32 = vunpack.i.h.bf16 %v6380_v19 }
 0x408   : > { %v6381_v15 = vunpack.i.l.bf16 %v6380_v19  ;;  %4801 = vst.msk [vmem:[%s9635_s29 + $0x8] sm:$0xf] %vm10389_vm2, %v4784_v62  ;;  %v3091_v56 = vsel %vm3074_vm13, %v10682_v43, %v6361_v37  ;;  %v3061_v49 = vsel %vm1566_vm10, %v3029_v23, %v6356_v16  ;;  %v6377_v0 = vunpack.i.h.bf16 %v6375_v38  ;;  %v6400_v40 = vpop.permute.xlu1 %6399  ;;  %vm10686_vm2 = vmmov %vm10683_vm0 }
 0x409   : > { %v6376_v48 = vunpack.i.l.bf16 %v6375_v38  ;;  %v3124_v47 = vsel %vm3107_vm14, %v3091_v56, %v6371_v18  ;;  %v3125_v9 = vsel %vm3107_vm14, %v3092_v27, %v6372_v55  ;;  %v3094_v6 = vsel %vm3074_vm13, %v3061_v49, %v6367_v42  ;;  %v6395_v53 = vpop.permute.xlu0 %6394  ;;  %v10690_v42 = vld [vmem:[#allocation30_spill] sm:$0xff] }
 0x40a   : > { %v6392_v3 = vunpack.i.h.bf16 %v6390_v36  ;;  %v3093_v14 = vsel %vm3074_vm13, %v3060_v30, %v6366_v29  ;;  %v3158_v33 = vsel %vm3140_vm15, %v3125_v9, %v6382_v32  ;;  %v6391_v5 = vunpack.i.l.bf16 %v6390_v36  ;;  %v10692_v56 = vld [vmem:[#allocation50_spill] sm:$0xff] }
 0x40b   : > { %v6387_v13 = vunpack.i.h.bf16 %v6385_v39  ;;  %v3157_v10 = vsel %vm3140_vm15, %v3124_v47, %v6381_v15  ;;  %v3126_v28 = vsel %vm3107_vm14, %v3093_v14, %v6376_v48  ;;  %v6386_v61 = vunpack.i.l.bf16 %v6385_v39  ;;  %v10691_v39 = vld [vmem:[#allocation36_spill] sm:$0xff] }
 0x40c   : > { %v3191_v34 = vsel %vm10683_vm0, %v3158_v33, %v6392_v3  ;;  %v3127_v24 = vsel %vm3107_vm14, %v3094_v6, %v6377_v0  ;;  %v3190_v35 = vsel %vm10684_vm5, %v3157_v10, %v6391_v5  ;;  %v6397_v44 = vunpack.i.h.bf16 %v6395_v53  ;;  %v6410_v45 = vpop.permute.xlu1 %6409 }
 0x40d   : > { %v6396_v41 = vunpack.i.l.bf16 %v6395_v53  ;;  %v3214_v51 = vpack.c.bf16 %v3191_v34, %v3190_v35  ;;  %v3159_v11 = vsel %vm3140_vm15, %v3126_v28, %v6386_v61  ;;  %v3160_v2 = vsel %vm3140_vm15, %v3127_v24, %v6387_v13  ;;  %v9899_v57 = vpop.permute.xlu0 %6404 }
 0x40e   : > { %v3193_v12 = vsel %vm10686_vm2, %v3160_v2, %v6397_v44  ;;  %vm10687_vm0 = vcmask 588800   ;;  %v6347_v8 = vunpack.i.h.bf16 %v9827_v60  ;;  %v6357_v59 = vunpack.i.h.bf16 %v9837_v26 }
 0x40f   : > { %v3192_v19 = vsel %vm10685_vm9, %v3159_v11, %v6396_v41  ;;  %5252 = vmatprep.mubr.msk.bf16.mxu1 %vm10687_vm0, %v3214_v51  ;;  %vm10688_vm3 = vmmov %vm10687_vm0  ;;  %v6402_v7 = vunpack.i.h.bf16 %v6400_v40  ;;  %v6401_v17 = vunpack.i.l.bf16 %v6400_v40  ;;  %v6411_v37 = vunpack.i.l.bf16 %v6410_v45 }
 0x410   : > { %v3215_v31 = vpack.c.bf16 %v3193_v12, %v3192_v19  ;;  %v6420_v58 = vpop.permute.xlu1 %6419  ;;  %v6406_v16 = vunpack.i.l.bf16 %v9899_v57  ;;  %v3030_v25 = vsel %vm1500_vm8, %v10689_v4, %v6347_v8  ;;  %v6412_v15 = vunpack.i.h.bf16 %v6410_v45  ;;  %vm10694_vm5 = vmmov %vm10687_vm0 }
 0x411   : > { %v6422_v30 = vunpack.i.h.bf16 %v6420_v58  ;;  %v6421_v55 = vunpack.i.l.bf16 %v6420_v58  ;;  %v3062_v62 = vsel %vm1566_vm10, %v3030_v25, %v6357_v59  ;;  %v3032_v26 = vsel %vm1500_vm8, %v10690_v42, %v6402_v7  ;;  %vm10695_vm9 = vmmov %vm10686_vm2 }
 0x412   : > { %5253 = vmatmul.mubr.msk.bf16.gmra.mxu1 %vm10688_vm3, %v3215_v31  ;;  %v9903_v38 = vpop.permute.xlu0 %6414  ;;  %v3031_v27 = vsel %vm1500_vm8, %v10691_v39, %v6401_v17  ;;  %v3033_v49 = vsel %vm1500_vm8, %v10692_v56, %v6406_v16  ;;  %vm10693_vm3 = vmmov %vm10686_vm2  ;;  %v3064_v41 = vsel %vm1566_vm10, %v3032_v26, %v6412_v15 }
 0x413   : > { %v3063_v43 = vsel %vm1566_vm10, %v3031_v27, %v6411_v37  ;;  %v6416_v0 = vunpack.i.l.bf16 %v9903_v38  ;;  %v3095_v48 = vsel %vm3074_vm13, %v3062_v62, %v6421_v55  ;;  %vm10696_vm0 = vmmov %vm10686_vm2  ;;  %v10698_v55 = vld [vmem:[#allocation42_spill] sm:$0xff]  ;;  %v6407_v62 = vunpack.i.h.bf16 %v9899_v57 }
 0x414   : > { %v6430_v52 = vpop.permute.xlu1 %6429  ;;  %v3096_v47 = vsel %vm3074_vm13, %v3063_v43, %v6422_v30  ;;  %v10700_v43 = vld [vmem:[#allocation25_spill] sm:$0xff] }
 0x415   : > { %v6432_v23 = vunpack.i.h.bf16 %v6430_v52  ;;  %v6431_v18 = vunpack.i.l.bf16 %v6430_v52  ;;  %v3065_v51 = vsel %vm1566_vm10, %v3033_v49, %v6416_v0  ;;  %v3034_v56 = vsel %vm1500_vm8, %v10700_v43, %v6407_v62 }
 0x416   : > { %v6425_v20 = vpop.permute.xlu0 %6424 }
 0x417   : > { %v6427_v9 = vunpack.i.h.bf16 %v6425_v20  ;;  %v6426_v6 = vunpack.i.l.bf16 %v6425_v20  ;;  %v3128_v40 = vsel %vm3107_vm14, %v3095_v48, %v6431_v18  ;;  %v3129_v14 = vsel %vm3107_vm14, %v3096_v47, %v6432_v23 }
 0x418   : > { %v6440_v36 = vpop.permute.xlu1 %6439  ;;  %v6301_v18 = vunpack.i.l.bf16 %v9765_v21 }
 0x419   : > { %v6442_v29 = vunpack.i.h.bf16 %v6440_v36  ;;  %v6441_v32 = vunpack.i.l.bf16 %v6440_v36  ;;  %v3097_v45 = vsel %vm3074_vm13, %v3064_v41, %v6426_v6  ;;  %v3098_v19 = vsel %vm3074_vm13, %v3065_v51, %v6427_v9 }
 0x41a   : > { %v6435_v60 = vpop.permute.xlu0 %6434  ;;  %v6287_v36 = vunpack.i.h.bf16 %v10698_v55 }
 0x41b   : > { %v3161_v53 = vsel %vm3140_vm15, %v3128_v40, %v6441_v32  ;;  %v3162_v10 = vsel %vm3140_vm15, %v3129_v14, %v6442_v29  ;;  %v6437_v28 = vunpack.i.h.bf16 %v6435_v60  ;;  %v6436_v34 = vunpack.i.l.bf16 %v6435_v60  ;;  %v10699_v32 = vld [vmem:[#allocation38_spill] sm:$0xff]  ;;  %v10702_v14 = vld [vmem:[#allocation53_spill] sm:$0xff] }
 0x41c   : > { %v6450_v3 = vpop.permute.xlu1 %6449  ;;  %v6417_v60 = vunpack.i.h.bf16 %v9903_v38  ;;  %v2974_v15 = vsel %vm1369_vm4, %v10699_v32, %v6287_v36 }
 0x41d   : > { %v6452_v33 = vunpack.i.h.bf16 %v6450_v3  ;;  %v6451_v5 = vunpack.i.l.bf16 %v6450_v3  ;;  %v3130_v31 = vsel %vm3107_vm14, %v3097_v45, %v6436_v34  ;;  %v3131_v58 = vsel %vm3107_vm14, %v3098_v19, %v6437_v28  ;;  %v10701_v3 = vld [vmem:[#allocation52_spill] sm:$0xff] }
 0x41e   : > { %v6445_v13 = vpop.permute.xlu0 %6444  ;;  %v3005_v48 = vsel %vm1434_vm6, %v2974_v15, %v6301_v18  ;;  %v3066_v47 = vsel %vm1566_vm10, %v3034_v56, %v6417_v60 }
 0x41f   : > { %v3194_v61 = vsel %vm10686_vm2, %v3161_v53, %v6451_v5  ;;  %v3195_v24 = vsel %vm10693_vm3, %v3162_v10, %v6452_v33  ;;  %v6447_v35 = vunpack.i.h.bf16 %v6445_v13  ;;  %v6446_v44 = vunpack.i.l.bf16 %v6445_v13  ;;  %vm10697_vm2 = vmmov %vm10694_vm5 }
 0x420   : > { %v3216_v11 = vpack.c.bf16 %v3195_v24, %v3194_v61  ;;  %v6460_v2 = vpop.permute.xlu1 %6459  ;;  %vm10703_vm3 = vmmov %vm10696_vm0 }
 0x421   : > { %v3163_v59 = vsel %vm3140_vm15, %v3130_v31, %v6446_v44  ;;  %v3164_v20 = vsel %vm3140_vm15, %v3131_v58, %v6447_v35  ;;  %v6462_v26 = vunpack.i.h.bf16 %v6460_v2  ;;  %v6461_v39 = vunpack.i.l.bf16 %v6460_v2 }
 0x422   : > { %v6455_v12 = vpop.permute.xlu0 %6454  ;;  %5256 = vmatprep.mubr.msk.bf16.mxu1 %vm10694_vm5, %v3216_v11  ;;  %vm10704_vm5 = vmmov %vm10696_vm0 }
 0x423   : > { %v6457_v8 = vunpack.i.h.bf16 %v6455_v12  ;;  %v6456_v52 = vunpack.i.l.bf16 %v6455_v12  ;;  %v3036_v40 = vsel %vm1500_vm8, %v10701_v3, %v6462_v26  ;;  %v3035_v33 = vsel %vm1500_vm8, %v10702_v14, %v6461_v39 }
 0x425   : > { %v3196_v7 = vsel %vm10695_vm9, %v3163_v59, %v6456_v52  ;;  %v3197_v17 = vsel %vm10696_vm0, %v3164_v20, %v6457_v8  ;;  %vm10705_vm9 = vmmov %vm10697_vm2 }
 0x426   : > { %v6470_v37 = vpop.permute.xlu1 %6469  ;;  %v3217_v16 = vpack.c.bf16 %v3197_v17, %v3196_v7  ;;  %v9938_v4 = vpop.permute.xlu0 %6464 }
 0x427   : > { %v6471_v27 = vunpack.i.l.bf16 %v6470_v37  ;;  %v6466_v29 = vunpack.i.l.bf16 %v9938_v4  ;;  %v6472_v53 = vunpack.i.h.bf16 %v6470_v37 }
 0x428   : > { %5257 = vmatmul.mubr.msk.bf16.gmra.mxu1 %vm10697_vm2, %v3217_v16  ;;  %vm10706_vm2 = vmmov %vm10696_vm0 }
 0x429   : > { %v3067_v10 = vsel %vm1566_vm10, %v3035_v33, %v6471_v27  ;;  %v3037_v28 = vsel %vm1500_vm8, %v3005_v48, %v6466_v29  ;;  %v3068_v17 = vsel %vm1566_vm10, %v3036_v40, %v6472_v53 }
 0x42a   : > { %v6480_v25 = vpop.permute.xlu1 %6479  ;;  %v9941_v30 = vpop.permute.xlu0 %6474 }
 0x42b   : > { %v6482_v49 = vunpack.i.h.bf16 %v6480_v25  ;;  %v6481_v0 = vunpack.i.l.bf16 %v6480_v25  ;;  %v6476_v34 = vunpack.i.l.bf16 %v9941_v30  ;;  %v6477_v3 = vunpack.i.h.bf16 %v9941_v30 }
 0x42d   : > { %v3099_v61 = vsel %vm3074_vm13, %v3066_v47, %v6481_v0  ;;  %v3100_v24 = vsel %vm3074_vm13, %v3067_v10, %v6482_v49  ;;  %v3069_v37 = vsel %vm1566_vm10, %v3037_v28, %v6476_v34  ;;  %v6271_v49 = vunpack.i.l.bf16 %v9388_v46 }
 0x42e   : > { %v6490_v23 = vpop.permute.xlu1 %6489  ;;  %v6485_v42 = vpop.permute.xlu0 %6484  ;;  %v6467_v47 = vunpack.i.h.bf16 %v9938_v4 }
 0x42f   : > { %v6492_v38 = vunpack.i.h.bf16 %v6490_v23  ;;  %v6491_v9 = vunpack.i.l.bf16 %v6490_v23  ;;  %v6487_v35 = vunpack.i.h.bf16 %v6485_v42  ;;  %v6486_v44 = vunpack.i.l.bf16 %v6485_v42 }
 0x430   : > { %v2975_v48 = vsel %vm1369_vm4, %v9550_v22, %v6271_v49  ;;  %vm10708_vm4 = vmmov %vm10696_vm0 }
 0x431   : > { %v3132_v51 = vsel %vm3107_vm14, %v3099_v61, %v6491_v9  ;;  %v3133_v11 = vsel %vm3107_vm14, %v3100_v24, %v6492_v38  ;;  %v3101_v55 = vsel %vm3074_vm13, %v3068_v17, %v6486_v44  ;;  %v3102_v36 = vsel %vm3074_vm13, %v3069_v37, %v6487_v35 }
 0x432   : > { %v6500_v57 = vpop.permute.xlu1 %6499  ;;  %v6495_v6 = vpop.permute.xlu0 %6494 }
 0x433   : > { %v6502_v5 = vunpack.i.h.bf16 %v6500_v57  ;;  %v6501_v13 = vunpack.i.l.bf16 %v6500_v57  ;;  %v6497_v58 = vunpack.i.h.bf16 %v6495_v6  ;;  %v6496_v8 = vunpack.i.l.bf16 %v6495_v6 }
 0x434   : > { %v6302_v6 = vunpack.i.h.bf16 %v9765_v21 }
 0x435   : > { %v3165_v12 = vsel %vm3140_vm15, %v3132_v51, %v6501_v13  ;;  %v3166_v31 = vsel %vm3140_vm15, %v3133_v11, %v6502_v5  ;;  %v3135_v23 = vsel %vm3107_vm14, %v3102_v36, %v6497_v58  ;;  %v3134_v18 = vsel %vm3107_vm14, %v3101_v55, %v6496_v8 }
 0x436   : > { %v6510_v41 = vpop.permute.xlu1 %6509  ;;  %v6505_v19 = vpop.permute.xlu0 %6504  ;;  %v3006_v13 = vsel %vm1434_vm6, %v2975_v48, %v6302_v6  ;;  %vm10709_vm6 = vmmov %vm10696_vm0 }
 0x437   : > { %v6512_v2 = vunpack.i.h.bf16 %v6510_v41  ;;  %v6511_v45 = vunpack.i.l.bf16 %v6510_v41  ;;  %v6507_v20 = vunpack.i.h.bf16 %v6505_v19  ;;  %v6506_v7 = vunpack.i.l.bf16 %v6505_v19 }
 0x438   : > { %v3038_v22 = vsel %vm1500_vm8, %v3006_v13, %v6467_v47 }
 0x439   : > { %v3198_v52 = vsel %vm10703_vm3, %v3165_v12, %v6511_v45  ;;  %v3199_v59 = vsel %vm10704_vm5, %v3166_v31, %v6512_v2  ;;  %v3167_v26 = vsel %vm3140_vm15, %v3134_v18, %v6506_v7  ;;  %v3168_v39 = vsel %vm3140_vm15, %v3135_v23, %v6507_v20  ;;  %vm10707_vm3 = vmmov %vm10705_vm9 }
 0x43a   : > { %v3218_v16 = vpack.c.bf16 %v3199_v59, %v3198_v52  ;;  %v6520_v25 = vpop.permute.xlu1 %6519  ;;  %v6515_v62 = vpop.permute.xlu0 %6514  ;;  %v3070_v30 = vsel %vm1566_vm10, %v3038_v22, %v6477_v3  ;;  %vm10713_vm5 = vmmov %vm10707_vm3 }
 0x43b   : > { %v6517_v60 = vunpack.i.h.bf16 %v6515_v62  ;;  %v6516_v42 = vunpack.i.l.bf16 %v6515_v62  ;;  %v6521_v38 = vunpack.i.l.bf16 %v6520_v25  ;;  %v6522_v14 = vunpack.i.h.bf16 %v6520_v25 }
 0x43c   : > { %5260 = vmatprep.mubr.msk.bf16.mxu1 %vm10705_vm9, %v3218_v16 }
 0x43d   : > { %v3200_v27 = vsel %vm10696_vm0, %v3167_v26, %v6516_v42  ;;  %v3201_v29 = vsel %vm10706_vm2, %v3168_v39, %v6517_v60  ;;  %v3039_v4 = vsel %vm1500_vm8, %v9794_v1, %v6521_v38  ;;  %v3040_v41 = vsel %vm1500_vm8, %v9788_v50, %v6522_v14  ;;  %v10020_v26 = vld [vmem:[%s10244_s5] ss:$0 sm:$0xff] }
 0x43e   : > { %v6525_v32 = vpop.permute.xlu1 %6524  ;;  %v3219_v15 = vpack.c.bf16 %v3201_v29, %v3200_v27  ;;  %v2443_v43 = vpop.permute.xlu0 %2442  ;;  %v10026_v29 = vld [vmem:[%s10245_s6] ss:$0 sm:$0xff] }
 0x43f   : > { %v6526_v40 = vunpack.i.l.bf16 %v6525_v32  ;;  %v6527_v46 = vunpack.i.h.bf16 %v6525_v32  ;;  %v3041_v51 = vsel %vm1500_vm8, %v9799_v63, %v2443_v43  ;;  %vm10710_vm8 = vmmov %vm10696_vm0 }
 0x440   : > { %5261 = vmatmul.mubr.msk.bf16.gmra.mxu1 %vm10707_vm3, %v3219_v15 }
 0x441   : > { %v3071_v24 = vsel %vm1566_vm10, %v3039_v4, %v6526_v40  ;;  %v3072_v12 = vsel %vm1566_vm10, %v3040_v41, %v6527_v46 }
 0x442   : > { %v6530_v56 = vpop.permute.xlu1 %6529  ;;  %v2539_v0 = vpop.permute.xlu0 %2538 }
 0x443   : > { %v6532_v33 = vunpack.i.h.bf16 %v6530_v56  ;;  %v6531_v5 = vunpack.i.l.bf16 %v6530_v56  ;;  %v3073_v1 = vsel %vm1566_vm10, %v3041_v51, %v2539_v0  ;;  %vm10711_vm10 = vmmov %vm10696_vm0 }
 0x445   : > { %v3103_v11 = vsel %vm3074_vm13, %v3070_v30, %v6531_v5  ;;  %v3104_v2 = vsel %vm3074_vm13, %v3071_v24, %v6532_v33 }
 0x446   : > { %v6535_v9 = vpop.permute.xlu0 %6534 }
 0x447   : > { %v6540_v57 = vpop.permute.xlu1 %6539  ;;  %v6537_v34 = vunpack.i.h.bf16 %v6535_v9  ;;  %v6536_v61 = vunpack.i.l.bf16 %v6535_v9 }
 0x448   : > { %v6542_v53 = vunpack.i.h.bf16 %v6540_v57  ;;  %v6541_v10 = vunpack.i.l.bf16 %v6540_v57 }
 0x449   : > { %v3105_v58 = vsel %vm3074_vm13, %v3072_v12, %v6536_v61  ;;  %v3106_v50 = vsel %vm3074_vm13, %v3073_v1, %v6537_v34  ;;  %vm10712_vm13 = vmmov %vm10707_vm3 }
 0x44a   : > { %v3136_v45 = vsel %vm3107_vm14, %v3103_v11, %v6541_v10  ;;  %v3137_v19 = vsel %vm3107_vm14, %v3104_v2, %v6542_v53 }
 0x44b   : > { %v6545_v28 = vpop.permute.xlu1 %6544  ;;  %v2730_v21 = vpop.permute.xlu0 %2729 }
 0x44c   : > { %v6547_v35 = vunpack.i.h.bf16 %v6545_v28  ;;  %v6546_v44 = vunpack.i.l.bf16 %v6545_v28  ;;  %v3138_v37 = vsel %vm3107_vm14, %v3105_v58, %v2730_v21  ;;  %v3139_v16 = vsel %vm3107_vm14, %v3106_v50, %v2730_v21 }
 0x44d   : > { %vm10714_vm14 = vcmask 58368  }
 0x44e   : > { %v3169_v59 = vsel %vm3140_vm15, %v3136_v45, %v6546_v44  ;;  %v3170_v20 = vsel %vm3140_vm15, %v3137_v19, %v6547_v35  ;;  %vm10716_vm9 = vmmov %vm10714_vm14 }
 0x44f   : > { %v6550_v31 = vpop.permute.xlu1 %6549  ;;  %v2823_v63 = vpop.permute.xlu0 %2822  ;;  %vm10717_vm0 = vmmov %vm10716_vm9 }
 0x450   : > { %v6552_v8 = vunpack.i.h.bf16 %v6550_v31  ;;  %v6551_v52 = vunpack.i.l.bf16 %v6550_v31  ;;  %v3171_v55 = vsel %vm3140_vm15, %v3138_v37, %v2823_v63  ;;  %v3172_v36 = vsel %vm3140_vm15, %v3139_v16, %v2823_v63  ;;  %vm10715_vm15 = vmmov %vm10714_vm14 }
 0x451   : > { %vm10718_vm2 = vmmov %vm10717_vm0 }
 0x452   : > { %v3202_v7 = vsel %vm10708_vm4, %v3169_v59, %v6551_v52  ;;  %v3203_v17 = vsel %vm10709_vm6, %v3170_v20, %v6552_v8  ;;  %vm10719_vm3 = vmmov %vm10717_vm0 }
 0x453   : > { %v3220_v25 = vpack.c.bf16 %v3203_v17, %v3202_v7  ;;  %v2916_v62 = vpop.permute.xlu0 %2915  ;;  %vm10720_vm4 = vmmov %vm10717_vm0 }
 0x454   : > { %v3204_v23 = vsel %vm10710_vm8, %v3171_v55, %v2916_v62  ;;  %v3205_v18 = vsel %vm10711_vm10, %v3172_v36, %v2916_v62  ;;  %vm10721_vm6 = vmmov %vm10717_vm0  ;;  %vm10722_vm8 = vcmask 1041409   ;;  %vm10723_vm10 = vcmask 1043459  }
 0x455   : > { %5264 = vmatprep.mubr.msk.bf16.mxu1 %vm10712_vm13, %v3220_v25  ;;  %v3221_v60 = vpack.c.bf16 %v3205_v18, %v3204_v23  ;;  %vm10724_vm13 = vcmask 1047559  }
 0x457   : > { %5265 = vmatmul.mubr.msk.bf16.gmra.mxu1 %vm10713_vm5, %v3221_v60  ;;  %vm10725_vm5 = vmmov %vm10717_vm0 }
 0x4c3   : > { %v5250_v42 = vpop.f32.mrf.mxu1 }
 0x4c4   : > { %v3493_v39 = vmul.f32 %v10020_v26, %v5250_v42 }
 0x4c5   : > { %v3393_v27 = vpop.f32.mrf.mxu1 }
 0x4c6   : > { %v3532_v32 = vadd.f32 %v10026_v29, %v3493_v39  ;;  %v3491_v15 = vmul.f32 %v10020_v26, %v3393_v27 }
 0x4c7   : > { %v5251_v43 = vpop.f32.mrf.mxu1 }
 0x4c8   : > { %v3530_v56 = vadd.f32 %v10026_v29, %v3491_v15  ;;  %v3494_v49 = vmul.f32 %v10020_v26, %v5251_v43  ;;  %v3564_v57 = vmax.f32 %v3532_v32, 0.0 }
 0x4c9   : > { %v3396_v0 = vpop.f32.mrf.mxu1 }
 0x4ca   : > { %v3562_v48 = vmax.f32 %v3530_v56, 0.0  ;;  %v3533_v47 = vadd.f32 %v10026_v29, %v3494_v49  ;;  %v3492_v38 = vmul.f32 %v10020_v26, %v3396_v0 }
 0x4cc   : > { %v3588_v9 = vmax.f32 %v3562_v48, %v3564_v57  ;;  %v3531_v6 = vadd.f32 %v10026_v29, %v3492_v38  ;;  %v3565_v14 = vmax.f32 %v3533_v47, 0.0 }
 0x4ce   : > { %v3716_v3 = vcombine.high %v3588_v9, %v3588_v9  ;;  %v3723_v40 = vrot.slane %v3588_v9, %v9529_v54  ;;  %v3563_v33 = vmax.f32 %v3531_v6, 0.0 }
 0x4d0   : > { %v3730_v5 = vrot.slane %v3716_v3, %v9529_v54  ;;  %v3731_v13 = vcombine.high %v3723_v40, %v3723_v40  ;;  %v4119_v46 = vsel %vm10714_vm14, %v3723_v40, -inf  ;;  %v3589_v53 = vmax.f32 %v3563_v33, %v3565_v14 }
 0x4d1   : > { %v4120_v10 = vrot.slane %v4119_v46, 4  ;;  %vm10726_vm14 = vcmask 60416  }
 0x4d2   : > { %v3732_v28 = vcombine.high %v3730_v5, %v3730_v5  ;;  %v4126_v22 = vsel %vm10715_vm15, %v3731_v13, -inf  ;;  %v4133_v4 = vsel %vm10716_vm9, %v3730_v5, -inf  ;;  %v3733_v34 = vcombine.high %v3589_v53, %v3589_v53  ;;  %v5254_v52 = vpop.f32.mrf.mxu1  ;;  %vm10727_vm15 = vmmov %vm10717_vm0 }
 0x4d3   : > { %v4121_v61 = vmax.f32 %v4119_v46, %v4120_v10  ;;  %v4127_v21 = vrot.slane %v4126_v22, 4  ;;  %v4134_v30 = vrot.slane %v4133_v4, 4  ;;  %v3740_v24 = vrot.slane %v3589_v53, %v9529_v54  ;;  %vm10728_vm9 = vmmov %vm10717_vm0 }
 0x4d4   : > { %v4140_v35 = vsel %vm10717_vm0, %v3732_v28, -inf  ;;  %v3747_v44 = vrot.slane %v3733_v34, %v9529_v54  ;;  %v3409_v27 = vpop.f32.mrf.mxu1  ;;  %v3497_v33 = vmul.f32 %v10020_v26, %v5254_v52 }
 0x4d5   : > { %v4122_v41 = vrot.slane %v4121_v61, 2  ;;  %v4128_v51 = vmax.f32 %v4126_v22, %v4127_v21  ;;  %v4135_v11 = vmax.f32 %v4133_v4, %v4134_v30  ;;  %v4141_v2 = vrot.slane %v4140_v35, 4 }
 0x4d6   : > { %v3748_v1 = vcombine.high %v3740_v24, %v3740_v24  ;;  %v3749_v45 = vcombine.high %v3747_v44, %v3747_v44  ;;  %v4147_v19 = vsel %vm10718_vm2, %v3740_v24, -inf  ;;  %v4161_v12 = vsel %vm10719_vm3, %v3747_v44, -inf  ;;  %v5255_v5 = vpop.f32.mrf.mxu1  ;;  %vm10729_vm2 = vmmov %vm10717_vm0 }
 0x4d7   : > { %v4123_v31 = vmax.f32 %v4121_v61, %v4122_v41  ;;  %v4129_v58 = vrot.slane %v4128_v51, 2  ;;  %v4136_v50 = vrot.slane %v4135_v11, 2  ;;  %v4142_v8 = vmax.f32 %v4140_v35, %v4141_v2  ;;  %vm10730_vm3 = vmmov %vm10717_vm0 }
 0x4d8   : > { %v4148_v63 = vrot.slane %v4147_v19, 4  ;;  %v4154_v59 = vsel %vm10720_vm4, %v3748_v1, -inf  ;;  %v4162_v20 = vrot.slane %v4161_v12, 4  ;;  %v4168_v7 = vsel %vm10721_vm6, %v3749_v45, -inf  ;;  %vm10731_vm4 = vmmov %vm10717_vm0 }
 0x4d9   : > { %v4124_v17 = vrot.slane %v4123_v31, 1  ;;  %v4130_v37 = vmax.f32 %v4128_v51, %v4129_v58  ;;  %v4137_v16 = vmax.f32 %v4135_v11, %v4136_v50  ;;  %v4143_v25 = vrot.slane %v4142_v8, 2  ;;  %v3412_v11 = vpop.f32.mrf.mxu1  ;;  %vm10732_vm6 = vmmov %vm10717_vm0 }
 0x4da   : > { %v4149_v55 = vmax.f32 %v4147_v19, %v4148_v63  ;;  %v4155_v36 = vrot.slane %v4154_v59, 4  ;;  %v4163_v62 = vmax.f32 %v4161_v12, %v4162_v20  ;;  %v4169_v23 = vrot.slane %v4168_v7, 4 }
 0x4db   : > { %v4125_v18 = vmax.f32 %v4123_v31, %v4124_v17  ;;  %v4131_v60 = vrot.slane %v4130_v37, 1  ;;  %v4138_v42 = vrot.slane %v4137_v16, 1  ;;  %v4144_v39 = vmax.f32 %v4142_v8, %v4143_v25 }
 0x4dc   : > { %v4150_v32 = vrot.slane %v4149_v55, 2  ;;  %v4156_v15 = vmax.f32 %v4154_v59, %v4155_v36  ;;  %v4164_v43 = vrot.slane %v4163_v62, 2  ;;  %v4170_v56 = vmax.f32 %v4168_v7, %v4169_v23 }
 0x4dd   : > { %v4132_v49 = vmax.f32 %v4130_v37, %v4131_v60  ;;  %v4139_v0 = vmax.f32 %v4137_v16, %v4138_v42  ;;  %v4145_v57 = vrot.slane %v4144_v39, 1  ;;  %v5028_v48 = vpack.c.bf16 %v4125_v18, %v4125_v18 }
 0x4de   : > { %v4151_v47 = vmax.f32 %v4149_v55, %v4150_v32  ;;  %v4157_v38 = vrot.slane %v4156_v15, 2  ;;  %v4165_v9 = vmax.f32 %v4163_v62, %v4164_v43  ;;  %v4171_v6 = vrot.slane %v4170_v56, 2 }
 0x4df   : > { %v4146_v3 = vmax.f32 %v4144_v39, %v4145_v57  ;;  %v5029_v40 = vpack.c.bf16 %v4132_v49, %v4132_v49  ;;  %v5030_v14 = vpack.c.bf16 %v4139_v0, %v4139_v0  ;;  %v4679_v22 = vunpack.c.l.b16 %v5028_v48 }
 0x4e0   : > { %v4152_v13 = vrot.slane %v4151_v47, 1  ;;  %v4158_v46 = vmax.f32 %v4156_v15, %v4157_v38  ;;  %v4166_v53 = vrot.slane %v4165_v9, 1  ;;  %v4172_v10 = vmax.f32 %v4170_v56, %v4171_v6 }
 0x4e1   : > { %v5031_v28 = vpack.c.bf16 %v4146_v3, %v4146_v3  ;;  %v4680_v4 = vunpack.c.l.b16 %v5029_v40  ;;  %v4681_v34 = vunpack.c.l.b16 %v5030_v14  ;;  %v3536_v41 = vadd.f32 %v10026_v29, %v3497_v33 }
 0x4e2   : > { %v4153_v61 = vmax.f32 %v4151_v47, %v4152_v13  ;;  %v4159_v21 = vrot.slane %v4158_v46, 1  ;;  %v4167_v30 = vmax.f32 %v4165_v9, %v4166_v53  ;;  %v4173_v24 = vrot.slane %v4172_v10, 1 }
 0x4e3   : > { %v4682_v35 = vunpack.c.l.b16 %v5031_v28  ;;  %v4747_v44 = vsel %vm10722_vm8, %v4680_v4, %v4679_v22  ;;  %v3495_v51 = vmul.f32 %v10020_v26, %v3409_v27  ;;  %v3498_v50 = vmul.f32 %v10020_v26, %v5255_v5 }
 0x4e4   : > { %v4748_v2 = vsel %vm4721_vm7, %v4681_v34, %v4747_v44  ;;  %v4160_v1 = vmax.f32 %v4158_v46, %v4159_v21  ;;  %v4174_v45 = vmax.f32 %v4172_v10, %v4173_v24  ;;  %v5032_v19 = vpack.c.bf16 %v4153_v61, %v4153_v61 }
 0x4e5   : > { %v5034_v12 = vpack.c.bf16 %v4167_v30, %v4167_v30  ;;  %v4749_v31 = vsel %vm10723_vm10, %v4682_v35, %v4748_v2  ;;  %v3534_v58 = vadd.f32 %v10026_v29, %v3495_v51  ;;  %v3496_v59 = vmul.f32 %v10020_v26, %v3412_v11 }
 0x4e6   : > { %v5033_v8 = vpack.c.bf16 %v4160_v1, %v4160_v1  ;;  %v5035_v52 = vpack.c.bf16 %v4174_v45, %v4174_v45  ;;  %v4683_v63 = vunpack.c.l.b16 %v5032_v19  ;;  %v3568_v7 = vmax.f32 %v3536_v41, 0.0 }
 0x4e7   : > { %v4685_v20 = vunpack.c.l.b16 %v5034_v12  ;;  %v3566_v17 = vmax.f32 %v3534_v58, 0.0  ;;  %v3537_v37 = vadd.f32 %v10026_v29, %v3498_v50  ;;  %v3535_v36 = vadd.f32 %v10026_v29, %v3496_v59 }
 0x4e8   : > { %v4684_v16 = vunpack.c.l.b16 %v5033_v8  ;;  %v4686_v25 = vunpack.c.l.b16 %v5035_v52  ;;  %v4750_v55 = vsel %vm4725_vm1, %v4683_v63, %v4749_v31  ;;  %v5258_v23 = vpop.f32.mrf.mxu1 }
 0x4e9   : > { %v3590_v62 = vmax.f32 %v3566_v17, %v3568_v7  ;;  %v3569_v60 = vmax.f32 %v3537_v37, 0.0  ;;  %v3567_v42 = vmax.f32 %v3535_v36, 0.0  ;;  %v3501_v39 = vmul.f32 %v10020_v26, %v5258_v23 }
 0x4ea   : > { %v4751_v18 = vsel %vm4727_vm11, %v4684_v16, %v4750_v55  ;;  %v3425_v43 = vpop.f32.mrf.mxu1 }
 0x4eb   : > { %v4752_v27 = vsel %vm4729_vm12, %v4685_v20, %v4751_v18  ;;  %v3750_v32 = vcombine.high %v3590_v62, %v3590_v62  ;;  %v3757_v15 = vrot.slane %v3590_v62, %v9529_v54  ;;  %v3591_v49 = vmax.f32 %v3567_v42, %v3569_v60 }
 0x4ec   : > { %v4753_v56 = vsel %vm10724_vm13, %v4686_v25, %v4752_v27  ;;  %v10065_v0 = vadd.f32 %v10026_v29, %v3501_v39  ;;  %v3499_v57 = vmul.f32 %v10020_v26, %v3425_v43  ;;  %vm10733_vm13 = vmmov %vm10717_vm0 }
 0x4ed   : > { %v4785_v48 = vpack.c.b16 %v4753_v56, %v4753_v56  ;;  %v3764_v47 = vrot.slane %v3750_v32, %v9529_v54  ;;  %v3765_v38 = vcombine.high %v3757_v15, %v3757_v15  ;;  %v4175_v9 = vsel %vm10725_vm5, %v3757_v15, -inf  ;;  %vm10734_vm5 = vmmov %vm10717_vm0 }
 0x4ee   : > { %v4176_v6 = vrot.slane %v4175_v9, 4  ;;  %v3767_v3 = vcombine.high %v3591_v49, %v3591_v49  ;;  %v3774_v40 = vrot.slane %v3591_v49, %v9529_v54  ;;  %v3572_v14 = vmax.f32 %v10065_v0, 0.0 }
 0x4ef   : > { %4802 = vst.msk [vmem:[%s9635_s29 + $0xc] sm:$0xf] %vm10726_vm14, %v4785_v48  ;;  %v3766_v33 = vcombine.high %v3764_v47, %v3764_v47  ;;  %v4182_v5 = vsel %vm10727_vm15, %v3765_v38, -inf  ;;  %v4189_v13 = vsel %vm10728_vm9, %v3764_v47, -inf  ;;  %v3538_v46 = vadd.f32 %v10026_v29, %v3499_v57  ;;  %v5259_v48 = vpop.f32.mrf.mxu1  ;;  %vm10735_vm14 = vmmov %vm10717_vm0 }
 0x4f0   : > { %v4177_v53 = vmax.f32 %v4175_v9, %v4176_v6  ;;  %v4183_v10 = vrot.slane %v4182_v5, 4  ;;  %v4190_v28 = vrot.slane %v4189_v13, 4  ;;  %v3781_v22 = vrot.slane %v3767_v3, %v9529_v54  ;;  %vm10736_vm15 = vmmov %vm10717_vm0 }
 0x4f1   : > { %v4196_v4 = vsel %vm10717_vm0, %v3766_v33, -inf  ;;  %v3782_v34 = vcombine.high %v3774_v40, %v3774_v40  ;;  %v4203_v61 = vsel %vm10729_vm2, %v3774_v40, -inf  ;;  %v3570_v21 = vmax.f32 %v3538_v46, 0.0 }
 0x4f2   : > { %v4178_v30 = vrot.slane %v4177_v53, 2  ;;  %v4184_v24 = vmax.f32 %v4182_v5, %v4183_v10  ;;  %v4191_v35 = vmax.f32 %v4189_v13, %v4190_v28  ;;  %v4197_v44 = vrot.slane %v4196_v4, 4 }
 0x4f3   : > { %v3783_v41 = vcombine.high %v3781_v22, %v3781_v22  ;;  %v4204_v51 = vrot.slane %v4203_v61, 4  ;;  %v4210_v11 = vsel %vm10730_vm3, %v3782_v34, -inf  ;;  %v4217_v2 = vsel %vm10731_vm4, %v3781_v22, -inf  ;;  %vm10739_vm3 = vmmov %vm10729_vm2 }
 0x4f4   : > { %v4179_v1 = vmax.f32 %v4177_v53, %v4178_v30  ;;  %v4185_v45 = vrot.slane %v4184_v24, 2  ;;  %v4192_v19 = vrot.slane %v4191_v35, 2  ;;  %v4198_v12 = vmax.f32 %v4196_v4, %v4197_v44  ;;  %vm10740_vm4 = vmmov %vm10722_vm8 }
 0x4f5   : > { %v4205_v31 = vmax.f32 %v4203_v61, %v4204_v51  ;;  %v4211_v58 = vrot.slane %v4210_v11, 4  ;;  %v4218_v50 = vrot.slane %v4217_v2, 4  ;;  %v4224_v8 = vsel %vm10732_vm6, %v3783_v41, -inf  ;;  %v3428_v61 = vpop.f32.mrf.mxu1  ;;  %vm10741_vm6 = vmmov %vm10729_vm2 }
 0x4f6   : > { %v4180_v52 = vrot.slane %v4179_v1, 1  ;;  %v4186_v63 = vmax.f32 %v4184_v24, %v4185_v45  ;;  %v4193_v59 = vmax.f32 %v4191_v35, %v4192_v19  ;;  %v4199_v20 = vrot.slane %v4198_v12, 2 }
 0x4f7   : > { %v4206_v7 = vrot.slane %v4205_v31, 2  ;;  %v4212_v17 = vmax.f32 %v4210_v11, %v4211_v58  ;;  %v4219_v37 = vmax.f32 %v4217_v2, %v4218_v50  ;;  %v4225_v16 = vrot.slane %v4224_v8, 4 }
 0x4f8   : > { %v4181_v25 = vmax.f32 %v4179_v1, %v4180_v52  ;;  %v4187_v55 = vrot.slane %v4186_v63, 1  ;;  %v4194_v36 = vrot.slane %v4193_v59, 1  ;;  %v4200_v62 = vmax.f32 %v4198_v12, %v4199_v20 }
 0x4f9   : > { %v4207_v23 = vmax.f32 %v4205_v31, %v4206_v7  ;;  %v4213_v18 = vrot.slane %v4212_v17, 2  ;;  %v4220_v60 = vrot.slane %v4219_v37, 2  ;;  %v4226_v42 = vmax.f32 %v4224_v8, %v4225_v16 }
 0x4fa   : > { %v4188_v39 = vmax.f32 %v4186_v63, %v4187_v55  ;;  %v4195_v27 = vmax.f32 %v4193_v59, %v4194_v36  ;;  %v4201_v32 = vrot.slane %v4200_v62, 1  ;;  %v5036_v15 = vpack.c.bf16 %v4181_v25, %v4181_v25 }
 0x4fb   : > { %v4208_v43 = vrot.slane %v4207_v23, 1  ;;  %v4214_v56 = vmax.f32 %v4212_v17, %v4213_v18  ;;  %v4221_v49 = vmax.f32 %v4219_v37, %v4220_v60  ;;  %v4227_v57 = vrot.slane %v4226_v42, 2 }
 0x4fc   : > { %v4202_v47 = vmax.f32 %v4200_v62, %v4201_v32  ;;  %v5037_v38 = vpack.c.bf16 %v4188_v39, %v4188_v39  ;;  %v5038_v9 = vpack.c.bf16 %v4195_v27, %v4195_v27  ;;  %v4687_v6 = vunpack.c.l.b16 %v5036_v15 }
 0x4fd   : > { %v4209_v3 = vmax.f32 %v4207_v23, %v4208_v43  ;;  %v4215_v40 = vrot.slane %v4214_v56, 1  ;;  %v4222_v33 = vrot.slane %v4221_v49, 1  ;;  %v4228_v5 = vmax.f32 %v4226_v42, %v4227_v57 }
 0x4fe   : > { %v5039_v13 = vpack.c.bf16 %v4202_v47, %v4202_v47  ;;  %v4688_v46 = vunpack.c.l.b16 %v5037_v38  ;;  %v4689_v53 = vunpack.c.l.b16 %v5038_v9  ;;  %v3592_v10 = vmax.f32 %v3570_v21, %v3572_v14 }
 0x4ff   : > { %v4216_v28 = vmax.f32 %v4214_v56, %v4215_v40  ;;  %v4223_v22 = vmax.f32 %v4221_v49, %v4222_v33  ;;  %v4229_v4 = vrot.slane %v4228_v5, 1  ;;  %v5040_v34 = vpack.c.bf16 %v4209_v3, %v4209_v3 }
 0x500   : > { %v4690_v30 = vunpack.c.l.b16 %v5039_v13  ;;  %v4754_v24 = vsel %vm10722_vm8, %v4688_v46, %v4687_v6  ;;  %v3784_v35 = vcombine.high %v3592_v10, %v3592_v10  ;;  %v3791_v44 = vrot.slane %v3592_v10, %v9529_v54  ;;  %v5262_v1 = vpop.f32.mrf.mxu1  ;;  %vm10742_vm8 = vmmov %vm10729_vm2 }
 0x501   : > { %v4755_v41 = vsel %vm4721_vm7, %v4689_v53, %v4754_v24  ;;  %v4230_v51 = vmax.f32 %v4228_v5, %v4229_v4  ;;  %v5041_v11 = vpack.c.bf16 %v4216_v28, %v4216_v28  ;;  %v5042_v2 = vpack.c.bf16 %v4223_v22, %v4223_v22 }
 0x502   : > { %v4691_v45 = vunpack.c.l.b16 %v5040_v34  ;;  %v4756_v0 = vsel %vm10723_vm10, %v4690_v30, %v4755_v41  ;;  %v3798_v14 = vrot.slane %v3784_v35, %v9529_v54  ;;  %v3799_v21 = vcombine.high %v3791_v44, %v3791_v44  ;;  %v3441_v59 = vpop.f32.mrf.mxu1 }
 0x503   : > { %v5043_v19 = vpack.c.bf16 %v4230_v51, %v4230_v51  ;;  %v4692_v12 = vunpack.c.l.b16 %v5041_v11  ;;  %v4693_v31 = vunpack.c.l.b16 %v5042_v2  ;;  %v4231_v58 = vsel %vm10733_vm13, %v3791_v44, -inf  ;;  %vm10743_vm13 = vmmov %vm10729_vm2 }
 0x504   : > { %v4757_v50 = vsel %vm4725_vm1, %v4691_v45, %v4756_v0  ;;  %v3800_v8 = vcombine.high %v3798_v14, %v3798_v14  ;;  %v4232_v52 = vrot.slane %v4231_v58, 4  ;;  %v4238_v63 = vsel %vm10734_vm5, %v3799_v21, -inf  ;;  %v5263_v15 = vpop.f32.mrf.mxu1  ;;  %vm10744_vm5 = vmmov %vm10729_vm2 }
 0x505   : > { %v4694_v20 = vunpack.c.l.b16 %v5043_v19  ;;  %v4758_v7 = vsel %vm4727_vm11, %v4692_v12, %v4757_v50  ;;  %v4239_v17 = vrot.slane %v4238_v63, 4  ;;  %v4245_v37 = vsel %vm10735_vm14, %v3798_v14, -inf  ;;  %vm10745_vm14 = vmmov %vm10729_vm2 }
 0x506   : > { %v4759_v16 = vsel %vm4729_vm12, %v4693_v31, %v4758_v7  ;;  %v4233_v25 = vmax.f32 %v4231_v58, %v4232_v52  ;;  %v4246_v55 = vrot.slane %v4245_v37, 4  ;;  %v4252_v36 = vsel %vm10736_vm15, %v3800_v8, -inf  ;;  %v3444_v10 = vpop.f32.mrf.mxu1  ;;  %vm10746_vm15 = vmmov %vm10729_vm2 }
 0x507   : > { %vm10737_vm9 = vcmask 1047559   ;;  %v4240_v23 = vmax.f32 %v4238_v63, %v4239_v17  ;;  %v4253_v18 = vrot.slane %v4252_v36, 4  ;;  %v3502_v60 = vmul.f32 %v10020_v26, %v5259_v48 }
 0x508   : > { %v4760_v62 = vsel %vm10737_vm9, %v4694_v20, %v4759_v16  ;;  %v4234_v39 = vrot.slane %v4233_v25, 2  ;;  %v4247_v27 = vmax.f32 %v4245_v37, %v4246_v55  ;;  %v3500_v32 = vmul.f32 %v10020_v26, %v3428_v61 }
 0x509   : > { %v4786_v42 = vpack.c.b16 %v4760_v62, %v4760_v62  ;;  %v4241_v43 = vrot.slane %v4240_v23, 2  ;;  %v4254_v56 = vmax.f32 %v4252_v36, %v4253_v18  ;;  %v3541_v49 = vadd.f32 %v10026_v29, %v3502_v60 }
 0x50a   : > { %v3505_v57 = vmul.f32 %v10020_v26, %v5262_v1  ;;  %vm10738_vm0 = vcmask 60416   ;;  %v4235_v47 = vmax.f32 %v4233_v25, %v4234_v39  ;;  %v4248_v38 = vrot.slane %v4247_v27, 2 }
 0x50b   : > { %4803 = vst.msk [vmem:[%s9635_s29 + $0x10] sm:$0xf] %vm10738_vm0, %v4786_v42  ;;  %v3539_v9 = vadd.f32 %v10026_v29, %v3500_v32  ;;  %v3503_v48 = vmul.f32 %v10020_v26, %v3441_v59  ;;  %v4242_v6 = vmax.f32 %v4240_v23, %v4241_v43  ;;  %v4255_v3 = vrot.slane %v4254_v56, 2 }
 0x50c   : > { %v3573_v40 = vmax.f32 %v3541_v49, 0.0  ;;  %v3544_v33 = vadd.f32 %v10026_v29, %v3505_v57  ;;  %v4236_v5 = vrot.slane %v4235_v47, 1  ;;  %v4249_v13 = vmax.f32 %v4247_v27, %v4248_v38 }
 0x50d   : > { %v3571_v46 = vmax.f32 %v3539_v9, 0.0  ;;  %v3542_v53 = vadd.f32 %v10026_v29, %v3503_v48  ;;  %v4243_v28 = vrot.slane %v4242_v6, 1  ;;  %v4256_v22 = vmax.f32 %v4254_v56, %v4255_v3 }
 0x50e   : > { %v3576_v4 = vmax.f32 %v3544_v33, 0.0  ;;  %v3506_v34 = vmul.f32 %v10020_v26, %v5263_v15  ;;  %v4237_v61 = vmax.f32 %v4235_v47, %v4236_v5  ;;  %v4250_v30 = vrot.slane %v4249_v13, 1 }
 0x50f   : > { %v3593_v24 = vmax.f32 %v3571_v46, %v3573_v40  ;;  %v3574_v35 = vmax.f32 %v3542_v53, 0.0  ;;  %v4244_v44 = vmax.f32 %v4242_v6, %v4243_v28  ;;  %v4257_v41 = vrot.slane %v4256_v22, 1 }
 0x510   : > { %v10110_v51 = vadd.f32 %v10026_v29, %v3506_v34  ;;  %v3504_v11 = vmul.f32 %v10020_v26, %v3444_v10  ;;  %v4251_v2 = vmax.f32 %v4249_v13, %v4250_v30  ;;  %v5044_v1 = vpack.c.bf16 %v4237_v61, %v4237_v61 }
 0x511   : > { %v3801_v45 = vcombine.high %v3593_v24, %v3593_v24  ;;  %v3808_v0 = vrot.slane %v3593_v24, %v9529_v54  ;;  %v4258_v14 = vmax.f32 %v4256_v22, %v4257_v41  ;;  %v5045_v21 = vpack.c.bf16 %v4244_v44, %v4244_v44 }
 0x512   : > { %v3594_v19 = vmax.f32 %v3574_v35, %v3576_v4  ;;  %v3577_v12 = vmax.f32 %v10110_v51, 0.0  ;;  %v5046_v31 = vpack.c.bf16 %v4251_v2, %v4251_v2  ;;  %v4695_v58 = vunpack.c.l.b16 %v5044_v1 }
 0x513   : > { %v3815_v50 = vrot.slane %v3801_v45, %v9529_v54  ;;  %v3816_v8 = vcombine.high %v3808_v0, %v3808_v0  ;;  %v5047_v52 = vpack.c.bf16 %v4258_v14, %v4258_v14  ;;  %v4696_v63 = vunpack.c.l.b16 %v5045_v21 }
 0x514   : > { %v4259_v59 = vsel %vm10729_vm2, %v3808_v0, -inf  ;;  %v3818_v20 = vcombine.high %v3594_v19, %v3594_v19  ;;  %v4697_v7 = vunpack.c.l.b16 %v5046_v31  ;;  %v3825_v15 = vrot.slane %v3594_v19, %v9529_v54  ;;  %vm10747_vm2 = vmmov %vm10740_vm4 }
 0x515   : > { %v3817_v17 = vcombine.high %v3815_v50, %v3815_v50  ;;  %v4260_v37 = vrot.slane %v4259_v59, 4  ;;  %v4266_v16 = vsel %vm10739_vm3, %v3816_v8, -inf  ;;  %v4698_v25 = vunpack.c.l.b16 %v5047_v52 }
 0x516   : > { %v4761_v55 = vsel %vm10740_vm4, %v4696_v63, %v4695_v58  ;;  %v4267_v36 = vrot.slane %v4266_v16, 4  ;;  %v4273_v62 = vsel %vm10741_vm6, %v3815_v50, -inf  ;;  %v3832_v49 = vrot.slane %v3818_v20, %v9529_v54  ;;  %vm10748_vm4 = vmmov %vm10739_vm3 }
 0x517   : > { %v4762_v23 = vsel %vm4721_vm7, %v4697_v7, %v4761_v55  ;;  %v4261_v18 = vmax.f32 %v4259_v59, %v4260_v37  ;;  %v4274_v60 = vrot.slane %v4273_v62, 4  ;;  %v4280_v42 = vsel %vm10742_vm8, %v3817_v17, -inf  ;;  %v5266_v14 = vpop.f32.mrf.mxu1  ;;  %vm10749_vm6 = vmmov %vm10739_vm3 }
 0x518   : > { %v4268_v39 = vmax.f32 %v4266_v16, %v4267_v36  ;;  %v4281_v27 = vrot.slane %v4280_v42, 4  ;;  %v4763_v32 = vsel %vm10723_vm10, %v4698_v25, %v4762_v23  ;;  %v10126_v57 = vadd.f32 %v10026_v29, %v3504_v11  ;;  %vm10750_vm8 = vmmov %vm10739_vm3 }
 0x519   : > { %v4262_v43 = vrot.slane %v4261_v18, 2  ;;  %v4275_v56 = vmax.f32 %v4273_v62, %v4274_v60  ;;  %v3833_v9 = vcombine.high %v3825_v15, %v3825_v15  ;;  %v4287_v48 = vsel %vm10743_vm13, %v3825_v15, -inf  ;;  %v3457_v36 = vpop.f32.mrf.mxu1  ;;  %vm10751_vm13 = vmmov %vm10739_vm3 }
 0x51a   : > { %v4269_v47 = vrot.slane %v4268_v39, 2  ;;  %v4282_v38 = vmax.f32 %v4280_v42, %v4281_v27  ;;  %v3834_v40 = vcombine.high %v3832_v49, %v3832_v49  ;;  %v4288_v33 = vrot.slane %v4287_v48, 4 }
 0x51b   : > { %v4263_v6 = vmax.f32 %v4261_v18, %v4262_v43  ;;  %v4276_v3 = vrot.slane %v4275_v56, 2  ;;  %v4294_v46 = vsel %vm10744_vm5, %v3833_v9, -inf  ;;  %v4301_v53 = vsel %vm10745_vm14, %v3832_v49, -inf  ;;  %vm10752_vm5 = vmmov %vm10739_vm3 }
 0x51c   : > { %v4270_v5 = vmax.f32 %v4268_v39, %v4269_v47  ;;  %v4283_v13 = vrot.slane %v4282_v38, 2  ;;  %v4289_v22 = vmax.f32 %v4287_v48, %v4288_v33  ;;  %v4295_v4 = vrot.slane %v4294_v46, 4  ;;  %vm10753_vm14 = vmmov %vm10739_vm3 }
 0x51d   : > { %v4264_v10 = vrot.slane %v4263_v6, 1  ;;  %v4277_v28 = vmax.f32 %v4275_v56, %v4276_v3  ;;  %v4302_v30 = vrot.slane %v4301_v53, 4  ;;  %v4308_v24 = vsel %vm10746_vm15, %v3834_v40, -inf  ;;  %vm10754_vm15 = vmmov %vm10739_vm3 }
 0x51e   : > { %v4271_v34 = vrot.slane %v4270_v5, 1  ;;  %v4284_v61 = vmax.f32 %v4282_v38, %v4283_v13  ;;  %v4290_v41 = vrot.slane %v4289_v22, 2  ;;  %v4296_v11 = vmax.f32 %v4294_v46, %v4295_v4 }
 0x51f   : > { %v4265_v35 = vmax.f32 %v4263_v6, %v4264_v10  ;;  %v4278_v44 = vrot.slane %v4277_v28, 1  ;;  %v4303_v45 = vmax.f32 %v4301_v53, %v4302_v30  ;;  %v4309_v0 = vrot.slane %v4308_v24, 4  ;;  %v5267_v6 = vpop.f32.mrf.mxu1 }
 0x520   : > { %v4272_v2 = vmax.f32 %v4270_v5, %v4271_v34  ;;  %v4285_v1 = vrot.slane %v4284_v61, 1  ;;  %v4291_v31 = vmax.f32 %v4289_v22, %v4290_v41  ;;  %v4297_v58 = vrot.slane %v4296_v11, 2 }
 0x521   : > { %v4279_v21 = vmax.f32 %v4277_v28, %v4278_v44  ;;  %v5048_v19 = vpack.c.bf16 %v4265_v35, %v4265_v35  ;;  %v4304_v52 = vrot.slane %v4303_v45, 2  ;;  %v4310_v63 = vmax.f32 %v4308_v24, %v4309_v0 }
 0x522   : > { %v4286_v50 = vmax.f32 %v4284_v61, %v4285_v1  ;;  %v5049_v8 = vpack.c.bf16 %v4272_v2, %v4272_v2  ;;  %v4292_v7 = vrot.slane %v4291_v31, 1  ;;  %v4298_v17 = vmax.f32 %v4296_v11, %v4297_v58 }
 0x523   : > { %v5050_v59 = vpack.c.bf16 %v4279_v21, %v4279_v21  ;;  %v4699_v20 = vunpack.c.l.b16 %v5048_v19  ;;  %v4305_v25 = vmax.f32 %v4303_v45, %v4304_v52  ;;  %v4311_v55 = vrot.slane %v4310_v63, 2  ;;  %v3460_v45 = vpop.f32.mrf.mxu1 }
 0x524   : > { %v5051_v37 = vpack.c.bf16 %v4286_v50, %v4286_v50  ;;  %v4700_v16 = vunpack.c.l.b16 %v5049_v8  ;;  %v4293_v18 = vmax.f32 %v4291_v31, %v4292_v7  ;;  %v4299_v60 = vrot.slane %v4298_v17, 1 }
 0x525   : > { %v4701_v62 = vunpack.c.l.b16 %v5050_v59  ;;  %v4764_v23 = vsel %vm4725_vm1, %v4699_v20, %v4763_v32  ;;  %v4306_v27 = vrot.slane %v4305_v25, 1  ;;  %v4312_v15 = vmax.f32 %v4310_v63, %v4311_v55 }
 0x526   : > { %v4702_v42 = vunpack.c.l.b16 %v5051_v37  ;;  %v4765_v39 = vsel %vm4727_vm11, %v4700_v16, %v4764_v23  ;;  %v4300_v56 = vmax.f32 %v4298_v17, %v4299_v60  ;;  %v5052_v49 = vpack.c.bf16 %v4293_v18, %v4293_v18 }
 0x527   : > { %v4766_v43 = vsel %vm4729_vm12, %v4701_v62, %v4765_v39  ;;  %v3575_v47 = vmax.f32 %v10126_v57, 0.0  ;;  %v4307_v9 = vmax.f32 %v4305_v25, %v4306_v27  ;;  %v4313_v48 = vrot.slane %v4312_v15, 1 }
 0x528   : > { %v4767_v38 = vsel %vm10737_vm9, %v4702_v42, %v4766_v43  ;;  %v3509_v32 = vmul.f32 %v10020_v26, %v5266_v14  ;;  %v5053_v40 = vpack.c.bf16 %v4300_v56, %v4300_v56  ;;  %v4703_v33 = vunpack.c.l.b16 %v5052_v49 }
 0x529   : > { %v4787_v3 = vpack.c.b16 %v4767_v38, %v4767_v38  ;;  %v3595_v5 = vmax.f32 %v3575_v47, %v3577_v12  ;;  %v4314_v13 = vmax.f32 %v4312_v15, %v4313_v48  ;;  %v5054_v46 = vpack.c.bf16 %v4307_v9, %v4307_v9 }
 0x52a   : > { %v3548_v53 = vadd.f32 %v10026_v29, %v3509_v32  ;;  %v3507_v10 = vmul.f32 %v10020_v26, %v3457_v36  ;;  %v4704_v57 = vunpack.c.l.b16 %v5053_v40  ;;  %v3510_v4 = vmul.f32 %v10020_v26, %v5267_v6 }
 0x52b   : > { %4804 = vst.msk [vmem:[%s9635_s29 + $0x14] sm:$0xf] %vm10738_vm0, %v4787_v3  ;;  %v3835_v28 = vcombine.high %v3595_v5, %v3595_v5  ;;  %v3842_v22 = vrot.slane %v3595_v5, %v9529_v54  ;;  %v5055_v34 = vpack.c.bf16 %v4314_v13, %v4314_v13  ;;  %v4705_v61 = vunpack.c.l.b16 %v5054_v46  ;;  %vm10755_vm0 = vmmov %vm10739_vm3 }
 0x52c   : > { %v3580_v30 = vmax.f32 %v3548_v53, 0.0  ;;  %v3546_v51 = vadd.f32 %v10026_v29, %v3507_v10  ;;  %v4768_v12 = vsel %vm10747_vm2, %v4704_v57, %v4703_v33  ;;  %v10154_v19 = vadd.f32 %v10026_v29, %v3510_v4 }
 0x52d   : > { %v3849_v24 = vrot.slane %v3835_v28, %v9529_v54  ;;  %v3850_v35 = vcombine.high %v3842_v22, %v3842_v22  ;;  %v4315_v44 = vsel %vm10739_vm3, %v3842_v22, -inf  ;;  %v4706_v41 = vunpack.c.l.b16 %v5055_v34  ;;  %vm10757_vm3 = vmmov %vm10755_vm0 }
 0x52e   : > { %v4769_v11 = vsel %vm4721_vm7, %v4705_v61, %v4768_v12  ;;  %v4316_v2 = vrot.slane %v4315_v44, 4  ;;  %v3578_v1 = vmax.f32 %v3546_v51, 0.0  ;;  %v3508_v59 = vmul.f32 %v10020_v26, %v3460_v45 }
 0x52f   : > { %v3851_v0 = vcombine.high %v3849_v24, %v3849_v24  ;;  %v4322_v14 = vsel %vm10748_vm4, %v3850_v35, -inf  ;;  %v4329_v21 = vsel %vm10749_vm6, %v3849_v24, -inf  ;;  %v4770_v52 = vsel %vm10723_vm10, %v4706_v41, %v4769_v11  ;;  %vm10758_vm4 = vmmov %vm10755_vm0 }
 0x530   : > { %v4317_v31 = vmax.f32 %v4315_v44, %v4316_v2  ;;  %v4323_v58 = vrot.slane %v4322_v14, 4  ;;  %v4330_v50 = vrot.slane %v4329_v21, 4  ;;  %v3596_v63 = vmax.f32 %v3578_v1, %v3580_v30  ;;  %vm10759_vm6 = vmmov %vm10755_vm0 }
 0x531   : > { %v4336_v8 = vsel %vm10750_vm8, %v3851_v0, -inf  ;;  %v3581_v55 = vmax.f32 %v10154_v19, 0.0  ;;  %v3547_v36 = vadd.f32 %v10026_v29, %v3508_v59  ;;  %vm10756_vm2 = vcmask 60416  }
 0x532   : > { %v4318_v20 = vrot.slane %v4317_v31, 2  ;;  %v4324_v7 = vmax.f32 %v4322_v14, %v4323_v58  ;;  %v4331_v17 = vmax.f32 %v4329_v21, %v4330_v50  ;;  %v4337_v37 = vrot.slane %v4336_v8, 4 }
 0x533   : > { %v3852_v16 = vcombine.high %v3596_v63, %v3596_v63  ;;  %v3859_v25 = vrot.slane %v3596_v63, %v9529_v54  ;;  %v3579_v27 = vmax.f32 %v3547_v36, 0.0  ;;  %vm10760_vm8 = vcmask 1041409  }
 0x534   : > { %v4319_v62 = vmax.f32 %v4317_v31, %v4318_v20  ;;  %v4325_v23 = vrot.slane %v4324_v7, 2  ;;  %v4332_v18 = vrot.slane %v4331_v17, 2  ;;  %v4338_v60 = vmax.f32 %v4336_v8, %v4337_v37 }
 0x535   : > { %v3866_v42 = vrot.slane %v3852_v16, %v9529_v54  ;;  %v3867_v39 = vcombine.high %v3859_v25, %v3859_v25  ;;  %v4343_v26 = vsel %vm10751_vm13, %v3859_v25, -inf  ;;  %v3597_v50 = vmax.f32 %v3579_v27, %v3581_v55  ;;  %vm10762_vm13 = vmmov %vm10756_vm2 }
 0x536   : > { %v4320_v15 = vrot.slane %v4319_v62, 1  ;;  %v4326_v43 = vmax.f32 %v4324_v7, %v4325_v23  ;;  %v4333_v56 = vmax.f32 %v4331_v17, %v4332_v18  ;;  %v4339_v49 = vrot.slane %v4338_v60, 2 }
 0x537   : > { %v3868_v47 = vcombine.high %v3866_v42, %v3866_v42  ;;  %v4344_v38 = vrot.slane %v4343_v26, 4  ;;  %v4350_v9 = vsel %vm10752_vm5, %v3867_v39, -inf  ;;  %v4357_v29 = vsel %vm10753_vm14, %v3866_v42, -inf }
 0x538   : > { %v4321_v48 = vmax.f32 %v4319_v62, %v4320_v15  ;;  %v4327_v32 = vrot.slane %v4326_v43, 1  ;;  %v4334_v6 = vrot.slane %v4333_v56, 1  ;;  %v4340_v3 = vmax.f32 %v4338_v60, %v4339_v49 }
 0x539   : > { %v4345_v40 = vmax.f32 %v4343_v26, %v4344_v38  ;;  %v4351_v33 = vrot.slane %v4350_v9, 4  ;;  %v4358_v5 = vrot.slane %v4357_v29, 4  ;;  %v4364_v13 = vsel %vm10754_vm15, %v3868_v47, -inf }
 0x53a   : > { %v4328_v46 = vmax.f32 %v4326_v43, %v4327_v32  ;;  %v4335_v53 = vmax.f32 %v4333_v56, %v4334_v6  ;;  %v4341_v10 = vrot.slane %v4340_v3, 1  ;;  %v5056_v57 = vpack.c.bf16 %v4321_v48, %v4321_v48 }
 0x53b   : > { %v4346_v28 = vrot.slane %v4345_v40, 2  ;;  %v4352_v22 = vmax.f32 %v4350_v9, %v4351_v33  ;;  %v4359_v4 = vmax.f32 %v4357_v29, %v4358_v5  ;;  %v4365_v34 = vrot.slane %v4364_v13, 4 }
 0x53c   : > { %v4342_v61 = vmax.f32 %v4340_v3, %v4341_v10  ;;  %v5057_v30 = vpack.c.bf16 %v4328_v46, %v4328_v46  ;;  %v5058_v51 = vpack.c.bf16 %v4335_v53, %v4335_v53  ;;  %v4707_v12 = vunpack.c.l.b16 %v5056_v57 }
 0x53d   : > { %v4347_v24 = vmax.f32 %v4345_v40, %v4346_v28  ;;  %v4353_v35 = vrot.slane %v4352_v22, 2  ;;  %v4360_v44 = vrot.slane %v4359_v4, 2  ;;  %v4366_v41 = vmax.f32 %v4364_v13, %v4365_v34 }
 0x53e   : > { %v5059_v11 = vpack.c.bf16 %v4342_v61, %v4342_v61  ;;  %v4708_v2 = vunpack.c.l.b16 %v5057_v30  ;;  %v4709_v1 = vunpack.c.l.b16 %v5058_v51  ;;  %v4771_v45 = vsel %vm4725_vm1, %v4707_v12, %v4770_v52 }
 0x53f   : > { %v4348_v0 = vrot.slane %v4347_v24, 1  ;;  %v4354_v14 = vmax.f32 %v4352_v22, %v4353_v35  ;;  %v4361_v21 = vmax.f32 %v4359_v4, %v4360_v44  ;;  %v4367_v19 = vrot.slane %v4366_v41, 2 }
 0x540   : > { %v4710_v31 = vunpack.c.l.b16 %v5059_v11  ;;  %v4772_v58 = vsel %vm4727_vm11, %v4708_v2, %v4771_v45  ;;  %v3869_v37 = vcombine.high %v3597_v50, %v3597_v50  ;;  %v3876_v52 = vrot.slane %v3597_v50, %v9529_v54 }
 0x541   : > { %v4773_v8 = vsel %vm4729_vm12, %v4709_v1, %v4772_v58  ;;  %v4349_v63 = vmax.f32 %v4347_v24, %v4348_v0  ;;  %v4355_v59 = vrot.slane %v4354_v14, 1  ;;  %v4362_v20 = vrot.slane %v4361_v21, 1 }
 0x542   : > { %v4774_v7 = vsel %vm10737_vm9, %v4710_v31, %v4773_v8  ;;  %v4368_v17 = vmax.f32 %v4366_v41, %v4367_v19  ;;  %v3883_v23 = vrot.slane %v3869_v37, %v9529_v54  ;;  %v3884_v18 = vcombine.high %v3876_v52, %v3876_v52 }
 0x543   : > { %v4788_v16 = vpack.c.b16 %v4774_v7, %v4774_v7  ;;  %v4356_v25 = vmax.f32 %v4354_v14, %v4355_v59  ;;  %v4363_v36 = vmax.f32 %v4361_v21, %v4362_v20  ;;  %v4371_v55 = vsel %vm10755_vm0, %v3876_v52, -inf }
 0x544   : > { %v4369_v62 = vrot.slane %v4368_v17, 1  ;;  %v5060_v60 = vpack.c.bf16 %v4349_v63, %v4349_v63  ;;  %v4372_v39 = vrot.slane %v4371_v55, 4  ;;  %v3885_v27 = vcombine.high %v3883_v23, %v3883_v23 }
 0x545   : > { %4805 = vst.msk [vmem:[%s9635_s29 + $0x18] sm:$0xf] %vm10756_vm2, %v4788_v16  ;;  %v5061_v42 = vpack.c.bf16 %v4356_v25, %v4356_v25  ;;  %v4378_v15 = vsel %vm10757_vm3, %v3884_v18, -inf  ;;  %v4385_v43 = vsel %vm10758_vm4, %v3883_v23, -inf  ;;  %v5062_v56 = vpack.c.bf16 %v4363_v36, %v4363_v36 }
 0x546   : > { %v4370_v26 = vmax.f32 %v4368_v17, %v4369_v62  ;;  %v4373_v49 = vmax.f32 %v4371_v55, %v4372_v39  ;;  %v4379_v47 = vrot.slane %v4378_v15, 4  ;;  %v4386_v9 = vrot.slane %v4385_v43, 4 }
 0x547   : > { %v4712_v38 = vunpack.c.l.b16 %v5061_v42  ;;  %v4392_v54 = vsel %vm10759_vm6, %v3885_v27, -inf  ;;  %v4711_v3 = vunpack.c.l.b16 %v5060_v60  ;;  %v4713_v33 = vunpack.c.l.b16 %v5062_v56 }
 0x548   : > { %v4374_v29 = vrot.slane %v4373_v49, 2  ;;  %v4380_v48 = vmax.f32 %v4378_v15, %v4379_v47  ;;  %v4393_v32 = vrot.slane %v4392_v54, 4  ;;  %v5063_v6 = vpack.c.bf16 %v4370_v26, %v4370_v26 }
 0x549   : > { %v4387_v40 = vmax.f32 %v4385_v43, %v4386_v9  ;;  %v4775_v53 = vsel %vm10760_vm8, %v4712_v38, %v4711_v3 }
 0x54a   : > { %v4375_v5 = vmax.f32 %v4373_v49, %v4374_v29  ;;  %v4381_v13 = vrot.slane %v4380_v48, 2  ;;  %v4394_v46 = vmax.f32 %v4392_v54, %v4393_v32  ;;  %v4714_v4 = vunpack.c.l.b16 %v5063_v6 }
 0x54b   : > { %v4388_v10 = vrot.slane %v4387_v40, 2  ;;  %v4776_v61 = vsel %vm4721_vm7, %v4713_v33, %v4775_v53  ;;  %vm10761_vm7 = vmmov %vm10737_vm9 }
 0x54c   : > { %v4376_v57 = vrot.slane %v4375_v5, 1  ;;  %v4382_v28 = vmax.f32 %v4380_v48, %v4381_v13  ;;  %v4395_v22 = vrot.slane %v4394_v46, 2  ;;  %v4777_v2 = vsel %vm10723_vm10, %v4714_v4, %v4776_v61 }
 0x54d   : > { %v4389_v34 = vmax.f32 %v4387_v40, %v4388_v10 }
 0x54e   : > { %v4377_v30 = vmax.f32 %v4375_v5, %v4376_v57  ;;  %v4383_v51 = vrot.slane %v4382_v28, 1  ;;  %v4396_v12 = vmax.f32 %v4394_v46, %v4395_v22 }
 0x54f   : > { %v4390_v24 = vrot.slane %v4389_v34, 1 }
 0x550   : > { %v4384_v35 = vmax.f32 %v4382_v28, %v4383_v51  ;;  %v4397_v44 = vrot.slane %v4396_v12, 1  ;;  %v5064_v41 = vpack.c.bf16 %v4377_v30, %v4377_v30 }
 0x551   : > { %v4391_v11 = vmax.f32 %v4389_v34, %v4390_v24 }
 0x552   : > { %v4398_v1 = vmax.f32 %v4396_v12, %v4397_v44  ;;  %v5065_v45 = vpack.c.bf16 %v4384_v35, %v4384_v35  ;;  %v4715_v0 = vunpack.c.l.b16 %v5064_v41 }
 0x553   : > { %v5066_v14 = vpack.c.bf16 %v4391_v11, %v4391_v11 }
 0x554   : > { %v5067_v21 = vpack.c.bf16 %v4398_v1, %v4398_v1  ;;  %v4716_v19 = vunpack.c.l.b16 %v5065_v45  ;;  %v4778_v31 = vsel %vm4725_vm1, %v4715_v0, %v4777_v2 }
 0x555   : > { %v4717_v58 = vunpack.c.l.b16 %v5066_v14 }
 0x556   : > { %v4718_v50 = vunpack.c.l.b16 %v5067_v21  ;;  %v4779_v8 = vsel %vm4727_vm11, %v4716_v19, %v4778_v31 }
 0x557   : > { %v4780_v63 = vsel %vm4729_vm12, %v4717_v58, %v4779_v8 }
 0x558   : > { %v4781_v59 = vsel %vm10761_vm7, %v4718_v50, %v4780_v63 }
 0x559   : > { %v4789_v20 = vpack.c.b16 %v4781_v59, %v4781_v59 }
 0x55b   : > { %4806 = vst.msk [vmem:[%s9635_s29 + $0x1c] sm:$0xf] %vm10762_vm13, %v4789_v20 }
 0x55c   : > { %6578 = shalt.err (!%p6575_p3)
}
 0x55d   : > { %s6579_s29 = scalar_lea.hbm %s10191_s16, 512  ;;  %s6583_s14 = scalar_lea.hbm %s10246_s7, 1024 }
 0x55e   : > { %p6580_p4 = scmp.ne.s32.totalorder %s10191_s16, %s6579_s29  ;;  %p6584_p9 = scmp.lt.s32.totalorder %s10191_s16, %s10246_s7 }
 0x55f   : > { %p6585_p10 = scmp.lt.s32.totalorder %s6583_s14, %s6579_s29 }
 0x560   : > { %p6581_p7 = pnand %p6580_p4, %p6720_p5 }
 0x561   : > { %p6586_p11 = por %p6585_p10, %p6584_p9 }
 0x562   : > { %p6582_p8 = pneg %p6581_p7 }
 0x564   : > { %p6587_p12 = pnand %p6586_p11, %p6582_p8 }
 0x566   : > { %6590 = shalt.err (!%p6587_p12)
}
 0x567   : > { %5270 = dma.vmem_to_hbm [thread:$0]  (%p6720_p5), %s10193_s19, 512, %s10191_s16, %s4808_s28, %s6639_s15, %s6639_s15, %s6627_s18  }
 0x568 PF: > { %p5276_p13 = scmp.ge.s32.totalorder %s6625_s27, 2  ;;  %s4836_s22 = sand.u32 1, %s6613_s24  }
 0x569   : > { %s4837_s23 = scalar_lea.sflag [#allocation3], %s4836_s22 }
 0x56a   : > { %p5273_p0 = pnand %p5276_p13, %p6724_p6 }
 0x56c   : > { %p5274_p1 = pneg %p5273_p0 }
 0x56e   : > { %6608 = dma.done.wait (%p5274_p1), %s4837_s23, 512  }
 0x56f   : > { %6610 = vsyncadd (%p5274_p1), %s4837_s23, 4294966784  ;;  %p17_p2 = scmp.ge.s32.totalorder %s6707_s30, 4   ;;  %s10763_s24 = smov %s6617_s25 }
 0x570   : > { %s10764_s25 = smov %s6621_s26  ;;  %s10765_s26 = smov %s6718_s10 }
 0x571   : > { %s10766_s27 = smov %s6707_s30  ;;  %19 = sbr.rel (!%p17_p2) target bundleno = 3 (0x3), region = 83 }
 0x576   :  { %4842 = vsyncpa [#allocation3], 1 }
 0x577   :  { %4844 = vsyncpa [#allocation3 + $0x1], 1 }

// kernel: tpu_custom_call.1
= control target key start
LH: loop header
LB: loop body
LE: loop exit
PB: predicated region body
PF: predicated region fallthrough
CT: control target
= control target key end

     0   :  { %12 = vsyncpa [#allocation5], 0  ;;  %s11648_s0 = inlined_call_operand.vmem [shape: bf16[2,16,16,4], index: 0, kind: input, shape index: {}]   ;;  %s11649_s1 = inlined_call_operand.vmem [shape: bf16[9,4,8], index: 1, kind: input, shape index: {}]   ;;  %s11650_s2 = inlined_call_operand.vmem [shape: f32[1,8], index: 2, kind: input, shape index: {}]   ;;  %s11651_s3 = inlined_call_operand.vmem [shape: f32[1,8], index: 3, kind: input, shape index: {}]   ;;  %s11652_s4 = inlined_call_operand.vmem [shape: bf16[9,8,8], index: 4, kind: input, shape index: {}]   ;;  %s11653_s5 = inlined_call_operand.vmem [shape: f32[1,8], index: 5, kind: input, shape index: {}]   ;;  %s11654_s6 = inlined_call_operand.vmem [shape: f32[1,8], index: 6, kind: input, shape index: {}]   ;;  %s11655_s7 = inlined_call_operand.hbm [shape: bf16[2,8,8,8], index: 7, kind: output, shape index: {}]  }
   0x1   :  { %14 = vsyncpa [#allocation5 + $0x1], 0  ;;  %s8823_s24 = smov 0   ;;  %s8825_s25 = smov 0  }
   0x2   :  { %s8827_s26 = smov 0   ;;  %s8829_s27 = smov 0  }
   0x3 LB: > { %s8844_s28 = sadd.s32 4294967295, %s8776_s27   ;;  %s7206_s29 = sadd.s32 4294967294, %s8776_s27   ;;  %s8776_s27 = sphi %s8829_s27, %s11843_s27   ;;  %s8772_s26 = sphi %s8827_s26, %s11842_s26   ;;  %s8768_s25 = sphi %s8825_s25, %s11841_s25   ;;  %s8764_s24 = sphi %s8823_s24, %s11840_s24  }
   0x4   : > { %s8848_s30 = sadd.s32 1, %s8776_s27   ;;  %s179_s8 = sadd.s32 1, %s8772_s26 }
   0x5   : > { %s176_s9 = ssub.s32 %s8776_s27, %s8848_s30  ;;  %p189_p0 = scmp.ne.s32.totalorder %s8772_s26, %s8768_s25 }
   0x6   : > { %p177_p1 = scmp.eq.s32.totalorder %s176_s9, 0  ;;  %p190_p2 = scmp.eq.s32.totalorder %s8844_s28, 1 }
   0x7   : > { %p195_p3 = scmp.ne.s32.totalorder %s8768_s25, %s8764_s24  ;;  %p196_p4 = scmp.eq.s32.totalorder %s7206_s29, 1 }
   0x8   : > { %s8859_s10 = scalar_select %p177_p1, %s8772_s26, %s179_s8  }
   0x9   : > { %p8861_p5 = por %p190_p2, %p189_p0  ;;  %p8865_p6 = por %p196_p4, %p195_p3 }
   0xa   : > { %p7209_p7 = scmp.ge.s32.totalorder %s8776_s27, 1  ;;  %p240_p8 = scmp.lt.s32.totalorder %s8776_s27, 3 }
   0xc   : > { %p241_p9 = pnand %p7209_p7, %p240_p8 }
   0xe   : > { %244 = sbr.rel (%p241_p9) target bundleno = 1235 (0x4d3), region = 48 }
  0x13   : > { %v7213_v0 = vld [vmem:[%s11649_s1 + $0x2] sm:$0x3]  ;;  %vm578_vm0 = vcmask 1041408   ;;  %v479_v1 = vld [vmem:[%s11649_s1] sm:$0x3]  ;;  %vm342_vm1 = vcmask 31744  }
  0x14   : > { %8653 = vmatprep.subr.msk.bf16.mxu0 %vm578_vm0, %v7213_v0  ;;  %v580_v2 = vsel %vm578_vm0, %v7213_v0, 0  ;;  %8654 = vmatprep.subr.msk.bf16.mxu1 %vm578_vm0, %v479_v1  ;;  %v792_v3 = vsel %vm578_vm0, %v479_v1, 0  ;;  %vm345_vm2 = vcmask 25600   ;;  %v8884_v4 = vld [vmem:[%s11649_s1 + $0x4] sm:$0x3]  ;;  %v8778_v5 = vmov 0.0  }
  0x15   : > { %8042 = vmatpush3.bf16.msra.mxu0 %v580_v2  ;;  %8076 = vmatpush3.bf16.msra.mxu1 %v792_v3  ;;  %343 = vst.msk [vmem:[#allocation2] sm:$0xff] %vm342_vm1, %v8778_v5  ;;  %344 = vst.msk [vmem:[#allocation2 + $0x8] sm:$0xff] %vm342_vm1, %v8778_v5  ;;  %p272_p10 = scmp.lt.s32.totalorder %s8844_s28, 1  ;;  %v8998_v6 = vld [vmem:[%s11649_s1 + $0x6] sm:$0x3]  ;;  %v1054_v2 = vsel %vm578_vm0, %v8884_v4, 0 }
  0x16   : > { %346 = vst.msk [vmem:[#allocation2 + $0x10] sm:$0x3] %vm345_vm2, %v8778_v5  ;;  %349 = vst.msk [vmem:[#allocation2 + $0x28] sm:$0x3] %vm345_vm2, %v8778_v5  ;;  %8655 = vmatprep.subr.msk.bf16.mxu0 %vm578_vm0, %v8884_v4  ;;  %8656 = vmatprep.subr.msk.bf16.mxu1 %vm578_vm0, %v8998_v6  ;;  %v1348_v4 = vsel %vm578_vm0, %v8998_v6, 0  ;;  %vm3360_vm3 = vcmask 1043456  }
  0x17   : > { %347 = vst.msk [vmem:[#allocation2 + $0x18] sm:$0xff] %vm342_vm1, %v8778_v5  ;;  %348 = vst.msk [vmem:[#allocation2 + $0x20] sm:$0xff] %vm342_vm1, %v8778_v5  ;;  %s273_s21 = scalar_select %p272_p10, %s8844_s28, 1  ;;  %vm3124_vm4 = vcmask 64512   ;;  %vm3127_vm5 = vcmask 58368   ;;  %vm7042_vm6 = vcmask 1041409  }
  0x18   : > { %350 = vst.msk [vmem:[#allocation2 + $0x30] sm:$0xff] %vm342_vm1, %v8778_v5  ;;  %351 = vst.msk [vmem:[#allocation2 + $0x38] sm:$0xff] %vm342_vm1, %v8778_v5  ;;  %vm7044_vm7 = vcmask 1042434   ;;  %vm7046_vm8 = vcmask 1043459   ;;  %vm7048_vm9 = vcmask 1044484   ;;  %vm7050_vm10 = vcmask 1045509  }
  0x19   : > { %352 = vst.msk [vmem:[#allocation2 + $0x40] sm:$0x3] %vm345_vm2, %v8778_v5  ;;  %355 = vst.msk [vmem:[#allocation2 + $0x58] sm:$0x3] %vm345_vm2, %v8778_v5  ;;  %s7590_s22 = sshll.u32 %s273_s21, 7  ;;  %vm7052_vm11 = vcmask 1046534  }
  0x1a   : > { %353 = vst.msk [vmem:[#allocation2 + $0x48] sm:$0xff] %vm342_vm1, %v8778_v5  ;;  %354 = vst.msk [vmem:[#allocation2 + $0x50] sm:$0xff] %vm342_vm1, %v8778_v5  ;;  %s9008_s8 = scalar_lea.vmem %s11648_s0, %s7590_s22  ;;  %vm7054_vm12 = vcmask 1047559   ;;  %vm7121_vm13 = vcmask 60416   ;;  %s269_s20 = sand.u32 1, %s8768_s25  }
  0x1b   : > { %356 = vst.msk [vmem:[#allocation2 + $0x60] sm:$0xff] %vm342_vm1, %v8778_v5  ;;  %357 = vst.msk [vmem:[#allocation2 + $0x68] sm:$0xff] %vm342_vm1, %v8778_v5  ;;  %v7657_v7 = vld [vmem:[%s9008_s8] sm:$0xff]   ;;  %v7720_v8 = vld [vmem:[%s9008_s8 + $0x8] sm:$0xff]   ;;  %s7210_s21 = sshll.u32 %s269_s20, 5  ;;  %s7655_s13 = sshll.u32 %s8844_s28, 9 }
  0x1c   : > { %358 = vst.msk [vmem:[#allocation2 + $0x70] sm:$0x3] %vm345_vm2, %v8778_v5  ;;  %361 = vst.msk [vmem:[#allocation2 + $0x88] sm:$0x3] %vm345_vm2, %v8778_v5  ;;  %v7721_v9 = vld [vmem:[%s9008_s8 + $0x10] sm:$0xff]   ;;  %v480_v10 = vld [vmem:[#allocation2 + $0x1] sm:$0xff]  ;;  %v7658_v13 = vunpack.c.l.bf16 %v7657_v7  ;;  %v7659_v14 = vunpack.c.h.bf16 %v7657_v7  ;;  %v7662_v15 = vunpack.c.l.bf16 %v7720_v8  ;;  %v7663_v16 = vunpack.c.h.bf16 %v7720_v8  ;;  %s11600_s17 = scalar_lea.hbm %s11655_s7, %s7655_s13 }
  0x1d   : > { %359 = vst.msk [vmem:[#allocation2 + $0x78] sm:$0xff] %vm342_vm1, %v8778_v5  ;;  %360 = vst.msk [vmem:[#allocation2 + $0x80] sm:$0xff] %vm342_vm1, %v8778_v5  ;;  %v481_v11 = vld [vmem:[#allocation2 + $0x9] sm:$0xff]  ;;  %v431_v12 = vld [vmem:[#allocation2] sm:$0xff]  ;;  %v7666_v19 = vunpack.c.l.bf16 %v7721_v9  ;;  %v7667_v20 = vunpack.c.h.bf16 %v7721_v9  ;;  %s11336_s22 = scalar_lea.vmem [#allocation4], %s7210_s21  ;;  %s11608_s28 = scalar_lea.sflag [#allocation5], %s269_s20 }
  0x1e   : > { %362 = vst.msk [vmem:[#allocation2 + $0x90] sm:$0xff] %vm342_vm1, %v8778_v5  ;;  %363 = vst.msk [vmem:[#allocation2 + $0x98] sm:$0xff] %vm342_vm1, %v8778_v5  ;;  %v512_v17 = vpack.c.bf16 %v481_v11, %v480_v10  ;;  %v432_v18 = vld [vmem:[#allocation2 + $0x8] sm:$0xff]  ;;  %v7722_v21 = vld [vmem:[%s9008_s8 + $0x18] sm:$0xff]   ;;  %s7144_s14 = sshll.u32 %s11336_s22, 4  ;;  %s8780_s19 = smov [#allocation4]   ;;  %s11602_s14 = int_to_ptr.vmem [resolvable:$true] %s7144_s14 }
  0x1f   : > { %364 = vst.msk [vmem:[#allocation2 + $0xa0] sm:$0x3] %vm345_vm2, %v8778_v5  ;;  %367 = vst.msk [vmem:[#allocation2 + $0xb8] sm:$0x3] %vm345_vm2, %v8778_v5  ;;  %v7723_v22 = vld [vmem:[%s9008_s8 + $0x20] sm:$0xff]   ;;  %v463_v23 = vpack.c.bf16 %v432_v18, %v431_v12  ;;  %v7670_v24 = vunpack.c.l.bf16 %v7722_v21  ;;  %v7671_v25 = vunpack.c.h.bf16 %v7722_v21  ;;  %v7724_v27 = vld [vmem:[%s9008_s8 + $0x28] sm:$0xff]  }
  0x20   : > { %365 = vst.msk [vmem:[#allocation2 + $0xa8] sm:$0xff] %vm342_vm1, %v8778_v5  ;;  %366 = vst.msk [vmem:[#allocation2 + $0xb0] sm:$0xff] %vm342_vm1, %v8778_v5  ;;  %v7674_v26 = vunpack.c.l.bf16 %v7723_v22  ;;  %v7725_v28 = vld [vmem:[%s9008_s8 + $0x30] sm:$0xff]   ;;  %v7726_v29 = vld [vmem:[%s9008_s8 + $0x38] sm:$0xff]   ;;  %8043 = vmatprep.mubr.msk.bf16.mxu0 %vm342_vm1, %v512_v17  ;;  %v7675_v30 = vunpack.c.h.bf16 %v7723_v22  ;;  %v7678_v31 = vunpack.c.l.bf16 %v7724_v27  ;;  %v7679_v32 = vunpack.c.h.bf16 %v7724_v27  ;;  %s8716_s18 = scalar_lea.vmem %s11602_s14, 512  ;;  %s8720_s21 = sshll.u32 %s8780_s19, 4  ;;  %s8721_s21 = int_to_ptr.vmem [resolvable:$false] %s8720_s21 }
  0x21   : > { %368 = vst.msk [vmem:[#allocation2 + $0xc0] sm:$0xff] %vm342_vm1, %v8778_v5  ;;  %369 = vst.msk [vmem:[#allocation2 + $0xc8] sm:$0xff] %vm342_vm1, %v8778_v5  ;;  %v7682_v33 = vunpack.c.l.bf16 %v7725_v28  ;;  %v7727_v34 = vld [vmem:[%s9008_s8 + $0x40] sm:$0xff]   ;;  %v7728_v35 = vld [vmem:[%s9008_s8 + $0x48] sm:$0xff]   ;;  %8077 = vmatprep.mubr.msk.bf16.mxu1 %vm342_vm1, %v463_v23  ;;  %v7683_v37 = vunpack.c.h.bf16 %v7725_v28  ;;  %v7686_v38 = vunpack.c.l.bf16 %v7726_v29  ;;  %v7687_v39 = vunpack.c.h.bf16 %v7726_v29  ;;  %p8717_p11 = scmp.ne.s32.totalorder %s11602_s14, %s8716_s18  ;;  %s8722_s23 = scalar_lea.vmem %s8721_s21, 1024 }
  0x22   : > { %370 = vst.msk [vmem:[#allocation2 + $0xd0] sm:$0x3] %vm345_vm2, %v8778_v5  ;;  %373 = vst.msk [vmem:[#allocation2 + $0xe8] sm:$0x3] %vm345_vm2, %v8778_v5  ;;  %v7729_v36 = vld [vmem:[%s9008_s8 + $0x50] sm:$0xff]   ;;  %v7690_v40 = vunpack.c.l.bf16 %v7727_v34  ;;  %v7730_v41 = vld [vmem:[%s9008_s8 + $0x58] sm:$0xff]   ;;  %v7691_v44 = vunpack.c.h.bf16 %v7727_v34  ;;  %v7694_v45 = vunpack.c.l.bf16 %v7728_v35  ;;  %v7695_v46 = vunpack.c.h.bf16 %v7728_v35  ;;  %p8723_p0 = scmp.lt.s32.totalorder %s11602_s14, %s8721_s21  ;;  %p8724_p1 = scmp.lt.s32.totalorder %s8722_s23, %s8716_s18 }
  0x23   : > { %371 = vst.msk [vmem:[#allocation2 + $0xd8] sm:$0xff] %vm342_vm1, %v8778_v5  ;;  %372 = vst.msk [vmem:[#allocation2 + $0xe0] sm:$0xff] %vm342_vm1, %v8778_v5  ;;  %v7731_v42 = vld [vmem:[%s9008_s8 + $0x60] sm:$0xff]   ;;  %v7732_v43 = vld [vmem:[%s9008_s8 + $0x68] sm:$0xff]   ;;  %v7698_v47 = vunpack.c.l.bf16 %v7729_v36  ;;  %v7699_v49 = vunpack.c.h.bf16 %v7729_v36  ;;  %v7702_v50 = vunpack.c.l.bf16 %v7730_v41  ;;  %v7703_v51 = vunpack.c.h.bf16 %v7730_v41  ;;  %p8718_p12 = pnand %p8717_p11, %p8861_p5 }
  0x24   : > { %374 = vst.msk [vmem:[#allocation2 + $0xf0] sm:$0xff] %vm342_vm1, %v8778_v5  ;;  %375 = vst.msk [vmem:[#allocation2 + $0xf8] sm:$0xff] %vm342_vm1, %v8778_v5  ;;  %v7733_v48 = vld [vmem:[%s9008_s8 + $0x70] sm:$0xff]   ;;  %v7706_v52 = vunpack.c.l.bf16 %v7731_v42  ;;  %v7734_v53 = vld [vmem:[%s9008_s8 + $0x78] sm:$0xff]   ;;  %v7707_v54 = vunpack.c.h.bf16 %v7731_v42  ;;  %v7710_v55 = vunpack.c.l.bf16 %v7732_v43  ;;  %v7711_v56 = vunpack.c.h.bf16 %v7732_v43  ;;  %p8725_p2 = por %p8724_p1, %p8723_p0 }
  0x25   : > { %376 = vst.msk [vmem:[#allocation2 + $0x100] sm:$0x3] %vm345_vm2, %v8778_v5  ;;  %379 = vst.msk [vmem:[#allocation2 + $0x118] sm:$0x3] %vm345_vm2, %v8778_v5  ;;  %v7714_v57 = vunpack.c.l.bf16 %v7733_v48  ;;  %v7715_v58 = vunpack.c.h.bf16 %v7733_v48  ;;  %v7718_v59 = vunpack.c.l.bf16 %v7734_v53  ;;  %v7719_v60 = vunpack.c.h.bf16 %v7734_v53  ;;  %p8719_p13 = pneg %p8718_p12 }
  0x26   : > { %377 = vst.msk [vmem:[#allocation2 + $0x108] sm:$0xff] %vm342_vm1, %v8778_v5  ;;  %378 = vst.msk [vmem:[#allocation2 + $0x110] sm:$0xff] %vm342_vm1, %v8778_v5 }
  0x27   : > { %380 = vst.msk [vmem:[#allocation2 + $0x120] sm:$0xff] %vm342_vm1, %v8778_v5  ;;  %381 = vst.msk [vmem:[#allocation2 + $0x128] sm:$0xff] %vm342_vm1, %v8778_v5  ;;  %p8726_p3 = pnand %p8725_p2, %p8719_p13 }
  0x28   : > { %382 = vst.msk [vmem:[#allocation2 + $0x130] sm:$0x3] %vm345_vm2, %v8778_v5  ;;  %385 = vst.msk [vmem:[#allocation2 + $0x148] sm:$0x3] %vm345_vm2, %v8778_v5 }
  0x29   : > { %383 = vst.msk [vmem:[#allocation2 + $0x138] sm:$0xff] %vm342_vm1, %v8778_v5  ;;  %384 = vst.msk [vmem:[#allocation2 + $0x140] sm:$0xff] %vm342_vm1, %v8778_v5 }
  0x2a   : > { %386 = vst.msk [vmem:[#allocation2 + $0x150] sm:$0xff] %vm342_vm1, %v8778_v5  ;;  %387 = vst.msk [vmem:[#allocation2 + $0x158] sm:$0xff] %vm342_vm1, %v8778_v5 }
  0x2b   : > { %388 = vst.msk [vmem:[#allocation2 + $0x160] sm:$0x3] %vm345_vm2, %v8778_v5  ;;  %391 = vst.msk [vmem:[#allocation2 + $0x178] sm:$0x3] %vm345_vm2, %v8778_v5 }
  0x2c   : > { %389 = vst.msk [vmem:[#allocation2 + $0x168] sm:$0xff] %vm342_vm1, %v8778_v5  ;;  %390 = vst.msk [vmem:[#allocation2 + $0x170] sm:$0xff] %vm342_vm1, %v8778_v5 }
  0x2d   : > { %392 = vst.msk [vmem:[#allocation2 + $0x180] sm:$0xff] %vm342_vm1, %v8778_v5  ;;  %393 = vst.msk [vmem:[#allocation2 + $0x188] sm:$0xff] %vm342_vm1, %v8778_v5 }
  0x2e   : > { %394 = vst.msk [vmem:[#allocation2 + $0x190] sm:$0x3] %vm345_vm2, %v8778_v5  ;;  %397 = vst.msk [vmem:[#allocation2 + $0x1a8] sm:$0x3] %vm345_vm2, %v8778_v5 }
  0x2f   : > { %395 = vst.msk [vmem:[#allocation2 + $0x198] sm:$0xff] %vm342_vm1, %v8778_v5  ;;  %396 = vst.msk [vmem:[#allocation2 + $0x1a0] sm:$0xff] %vm342_vm1, %v8778_v5 }
  0x30   : > { %399 = vst.msk [vmem:[#allocation2 + $0x19] sm:$0xff] %vm342_vm1, %v7658_v13  ;;  %400 = vst.msk [vmem:[#allocation2 + $0x21] sm:$0xff] %vm342_vm1, %v7659_v14  ;;  %v9077_v13 = vld [vmem:[%s11649_s1 + $0x8] sm:$0x3]  ;;  %v9082_v14 = vld [vmem:[%s11649_s1 + $0xa] sm:$0x3] }
  0x31   : > { %401 = vst.msk [vmem:[#allocation2 + $0x31] sm:$0xff] %vm342_vm1, %v7662_v15  ;;  %402 = vst.msk [vmem:[#allocation2 + $0x39] sm:$0xff] %vm342_vm1, %v7663_v16 }
  0x32   : > { %403 = vst.msk [vmem:[#allocation2 + $0x49] sm:$0xff] %vm342_vm1, %v7666_v19  ;;  %404 = vst.msk [vmem:[#allocation2 + $0x51] sm:$0xff] %vm342_vm1, %v7667_v20 }
  0x33   : > { %405 = vst.msk [vmem:[#allocation2 + $0x61] sm:$0xff] %vm342_vm1, %v7670_v24  ;;  %406 = vst.msk [vmem:[#allocation2 + $0x69] sm:$0xff] %vm342_vm1, %v7671_v25 }
  0x34   : > { %407 = vst.msk [vmem:[#allocation2 + $0x79] sm:$0xff] %vm342_vm1, %v7674_v26  ;;  %408 = vst.msk [vmem:[#allocation2 + $0x81] sm:$0xff] %vm342_vm1, %v7675_v30 }
  0x35   : > { %409 = vst.msk [vmem:[#allocation2 + $0x91] sm:$0xff] %vm342_vm1, %v7678_v31  ;;  %410 = vst.msk [vmem:[#allocation2 + $0x99] sm:$0xff] %vm342_vm1, %v7679_v32 }
  0x36   : > { %411 = vst.msk [vmem:[#allocation2 + $0xa9] sm:$0xff] %vm342_vm1, %v7682_v33  ;;  %412 = vst.msk [vmem:[#allocation2 + $0xb1] sm:$0xff] %vm342_vm1, %v7683_v37 }
  0x37   : > { %413 = vst.msk [vmem:[#allocation2 + $0xc1] sm:$0xff] %vm342_vm1, %v7686_v38  ;;  %414 = vst.msk [vmem:[#allocation2 + $0xc9] sm:$0xff] %vm342_vm1, %v7687_v39  ;;  %v482_v61 = vld [vmem:[#allocation2 + $0x19] sm:$0xff]  ;;  %v483_v62 = vld [vmem:[#allocation2 + $0x21] sm:$0xff] }
  0x38   : > { %415 = vst.msk [vmem:[#allocation2 + $0xd9] sm:$0xff] %vm342_vm1, %v7690_v40  ;;  %416 = vst.msk [vmem:[#allocation2 + $0xe1] sm:$0xff] %vm342_vm1, %v7691_v44  ;;  %v433_v63 = vld [vmem:[#allocation2 + $0x18] sm:$0xff]  ;;  %v9057_v0 = vpack.c.bf16 %v483_v62, %v482_v61  ;;  %v434_v1 = vld [vmem:[#allocation2 + $0x20] sm:$0xff] }
  0x39   : > { %417 = vst.msk [vmem:[#allocation2 + $0xf1] sm:$0xff] %vm342_vm1, %v7694_v45  ;;  %418 = vst.msk [vmem:[#allocation2 + $0xf9] sm:$0xff] %vm342_vm1, %v7695_v46  ;;  %v484_v3 = vld [vmem:[#allocation2 + $0x31] sm:$0xff]  ;;  %v485_v7 = vld [vmem:[#allocation2 + $0x39] sm:$0xff]  ;;  %v9064_v8 = vpack.c.bf16 %v434_v1, %v433_v63 }
  0x3a   : > { %419 = vst.msk [vmem:[#allocation2 + $0x109] sm:$0xff] %vm342_vm1, %v7698_v47  ;;  %420 = vst.msk [vmem:[#allocation2 + $0x111] sm:$0xff] %vm342_vm1, %v7699_v49  ;;  %v9066_v9 = vpack.c.bf16 %v485_v7, %v484_v3  ;;  %v435_v10 = vld [vmem:[#allocation2 + $0x30] sm:$0xff]  ;;  %v436_v11 = vld [vmem:[#allocation2 + $0x38] sm:$0xff]  ;;  %8044 = vmatmul.mubr.msk.bf16.vlgmr.msra.gmra.mxu0 %vm342_vm1, %v9057_v0 }
  0x3b   : > { %421 = vst.msk [vmem:[#allocation2 + $0x121] sm:$0xff] %vm342_vm1, %v7702_v50  ;;  %422 = vst.msk [vmem:[#allocation2 + $0x129] sm:$0xff] %vm342_vm1, %v7703_v51  ;;  %v9070_v12 = vpack.c.bf16 %v436_v11, %v435_v10  ;;  %8078 = vmatmul.mubr.msk.bf16.vlgmr.msra.gmra.mxu1 %vm342_vm1, %v9064_v8  ;;  %8110 = vmatpush3.bf16.msra.mxu0 %v1054_v2  ;;  %v486_v15 = vld [vmem:[#allocation2 + $0x49] sm:$0xff]  ;;  %v487_v16 = vld [vmem:[#allocation2 + $0x51] sm:$0xff] }
  0x3c   : > { %423 = vst.msk [vmem:[#allocation2 + $0x139] sm:$0xff] %vm342_vm1, %v7706_v52  ;;  %424 = vst.msk [vmem:[#allocation2 + $0x141] sm:$0xff] %vm342_vm1, %v7707_v54  ;;  %v437_v17 = vld [vmem:[#allocation2 + $0x48] sm:$0xff]  ;;  %8047 = vmatprep.mubr.msk.bf16.mxu0 %vm342_vm1, %v9066_v9  ;;  %v438_v6 = vld [vmem:[#allocation2 + $0x50] sm:$0xff]  ;;  %8144 = vmatpush3.bf16.msra.mxu1 %v1348_v4  ;;  %v9092_v22 = vpack.c.bf16 %v487_v16, %v486_v15 }
  0x3d   : > { %425 = vst.msk [vmem:[#allocation2 + $0x151] sm:$0xff] %vm342_vm1, %v7710_v55  ;;  %426 = vst.msk [vmem:[#allocation2 + $0x159] sm:$0xff] %vm342_vm1, %v7711_v56  ;;  %8081 = vmatprep.mubr.msk.bf16.mxu1 %vm342_vm1, %v9070_v12  ;;  %v488_v18 = vld [vmem:[#allocation2 + $0x61] sm:$0xff]  ;;  %v489_v19 = vld [vmem:[#allocation2 + $0x69] sm:$0xff]  ;;  %8657 = vmatprep.subr.msk.bf16.mxu0 %vm578_vm0, %v9077_v13  ;;  %v9096_v23 = vpack.c.bf16 %v438_v6, %v437_v17 }
  0x3e   : > { %427 = vst.msk [vmem:[#allocation2 + $0x169] sm:$0xff] %vm342_vm1, %v7714_v57  ;;  %428 = vst.msk [vmem:[#allocation2 + $0x171] sm:$0xff] %vm342_vm1, %v7715_v58  ;;  %v439_v20 = vld [vmem:[#allocation2 + $0x60] sm:$0xff]  ;;  %v440_v21 = vld [vmem:[#allocation2 + $0x68] sm:$0xff]  ;;  %8658 = vmatprep.subr.msk.bf16.mxu1 %vm578_vm0, %v9082_v14  ;;  %v9098_v24 = vpack.c.bf16 %v489_v19, %v488_v18 }
  0x3f   : > { %429 = vst.msk [vmem:[#allocation2 + $0x181] sm:$0xff] %vm342_vm1, %v7718_v59  ;;  %430 = vst.msk [vmem:[#allocation2 + $0x189] sm:$0xff] %vm342_vm1, %v7719_v60  ;;  %v9100_v25 = vpack.c.bf16 %v440_v21, %v439_v20  ;;  %v490_v26 = vld [vmem:[#allocation2 + $0x79] sm:$0xff]  ;;  %v491_v27 = vld [vmem:[#allocation2 + $0x81] sm:$0xff] }
  0x40   : > { %v441_v28 = vld [vmem:[#allocation2 + $0x78] sm:$0xff]  ;;  %v442_v29 = vld [vmem:[#allocation2 + $0x80] sm:$0xff]  ;;  %v443_v32 = vld [vmem:[#allocation2 + $0x90] sm:$0xff]  ;;  %v9110_v34 = vpack.c.bf16 %v491_v27, %v490_v26  ;;  %3132 = vst.msk [vmem:[#allocation3 + $0x30] sm:$0xff] %vm3124_vm4, %v8778_v5 }
  0x41   : > { %v492_v30 = vld [vmem:[#allocation2 + $0x91] sm:$0xff]  ;;  %v493_v31 = vld [vmem:[#allocation2 + $0x99] sm:$0xff]  ;;  %v9112_v35 = vpack.c.bf16 %v442_v29, %v441_v28  ;;  %v494_v38 = vld [vmem:[#allocation2 + $0xa9] sm:$0xff]  ;;  %3133 = vst.msk [vmem:[#allocation3 + $0x38] sm:$0xff] %vm3124_vm4, %v8778_v5 }
  0x42   : > { %8048 = vmatmul.mubr.msk.bf16.gmra.mxu0 %vm342_vm1, %v9092_v22  ;;  %v444_v33 = vld [vmem:[#allocation2 + $0x98] sm:$0xff]  ;;  %v9114_v36 = vpack.c.bf16 %v493_v31, %v492_v30  ;;  %v445_v40 = vld [vmem:[#allocation2 + $0xa8] sm:$0xff]  ;;  %v446_v41 = vld [vmem:[#allocation2 + $0xb0] sm:$0xff]  ;;  %3125 = vst.msk [vmem:[#allocation3] sm:$0xff] %vm3124_vm4, %v8778_v5 }
  0x43   : > { %8082 = vmatmul.mubr.msk.bf16.gmra.mxu1 %vm342_vm1, %v9096_v23  ;;  %8051 = vmatprep.mubr.msk.bf16.mxu0 %vm342_vm1, %v9098_v24  ;;  %v9116_v37 = vpack.c.bf16 %v444_v33, %v443_v32  ;;  %v495_v39 = vld [vmem:[#allocation2 + $0xb1] sm:$0xff]  ;;  %v496_v42 = vld [vmem:[#allocation2 + $0xc1] sm:$0xff]  ;;  %v497_v43 = vld [vmem:[#allocation2 + $0xc9] sm:$0xff]  ;;  %v9128_v47 = vpack.c.bf16 %v446_v41, %v445_v40  ;;  %3126 = vst.msk [vmem:[#allocation3 + $0x8] sm:$0xff] %vm3124_vm4, %v8778_v5 }
  0x44   : > { %8085 = vmatprep.mubr.msk.bf16.mxu1 %vm342_vm1, %v9100_v25  ;;  %v447_v44 = vld [vmem:[#allocation2 + $0xc0] sm:$0xff]  ;;  %v448_v45 = vld [vmem:[#allocation2 + $0xc8] sm:$0xff]  ;;  %v9126_v46 = vpack.c.bf16 %v495_v39, %v494_v38  ;;  %v9130_v48 = vpack.c.bf16 %v497_v43, %v496_v42  ;;  %v449_v52 = vld [vmem:[#allocation2 + $0xd8] sm:$0xff]  ;;  %3129 = vst.msk [vmem:[#allocation3 + $0x18] sm:$0xff] %vm3124_vm4, %v8778_v5 }
  0x45   : > { %v9132_v49 = vpack.c.bf16 %v448_v45, %v447_v44  ;;  %v498_v50 = vld [vmem:[#allocation2 + $0xd9] sm:$0xff]  ;;  %v499_v51 = vld [vmem:[#allocation2 + $0xe1] sm:$0xff]  ;;  %v500_v54 = vld [vmem:[#allocation2 + $0xf1] sm:$0xff]  ;;  %3130 = vst.msk [vmem:[#allocation3 + $0x20] sm:$0xff] %vm3124_vm4, %v8778_v5 }
  0x46   : > { %v450_v53 = vld [vmem:[#allocation2 + $0xe0] sm:$0xff]  ;;  %v451_v56 = vld [vmem:[#allocation2 + $0xf0] sm:$0xff]  ;;  %v452_v57 = vld [vmem:[#allocation2 + $0xf8] sm:$0xff]  ;;  %v9142_v58 = vpack.c.bf16 %v499_v51, %v498_v50  ;;  %3135 = vst.msk [vmem:[#allocation3 + $0x48] sm:$0xff] %vm3124_vm4, %v8778_v5 }
  0x47   : > { %v501_v55 = vld [vmem:[#allocation2 + $0xf9] sm:$0xff]  ;;  %v9144_v59 = vpack.c.bf16 %v450_v53, %v449_v52  ;;  %v9148_v61 = vpack.c.bf16 %v452_v57, %v451_v56  ;;  %v502_v62 = vld [vmem:[#allocation2 + $0x109] sm:$0xff]  ;;  %v503_v63 = vld [vmem:[#allocation2 + $0x111] sm:$0xff]  ;;  %v1936_v57 = vsel %vm578_vm0, %v9082_v14, 0  ;;  %3136 = vst.msk [vmem:[#allocation3 + $0x50] sm:$0xff] %vm3124_vm4, %v8778_v5 }
  0x48   : > { %v9146_v60 = vpack.c.bf16 %v501_v55, %v500_v54  ;;  %v453_v1 = vld [vmem:[#allocation2 + $0x108] sm:$0xff]  ;;  %v454_v2 = vld [vmem:[#allocation2 + $0x110] sm:$0xff]  ;;  %v455_v10 = vld [vmem:[#allocation2 + $0x120] sm:$0xff]  ;;  %v9158_v4 = vpack.c.bf16 %v503_v63, %v502_v62  ;;  %v1642_v55 = vsel %vm578_vm0, %v9077_v13, 0  ;;  %3138 = vst.msk [vmem:[#allocation3 + $0x60] sm:$0xff] %vm3124_vm4, %v8778_v5 }
  0x49   : > { %v504_v3 = vld [vmem:[#allocation2 + $0x121] sm:$0xff]  ;;  %v505_v7 = vld [vmem:[#allocation2 + $0x129] sm:$0xff]  ;;  %v9160_v15 = vpack.c.bf16 %v454_v2, %v453_v1  ;;  %v506_v6 = vld [vmem:[#allocation2 + $0x139] sm:$0xff]  ;;  %3139 = vst.msk [vmem:[#allocation3 + $0x68] sm:$0xff] %vm3124_vm4, %v8778_v5 }
  0x4a   : > { %8052 = vmatmul.mubr.msk.bf16.gmra.mxu0 %vm342_vm1, %v9110_v34  ;;  %v456_v11 = vld [vmem:[#allocation2 + $0x128] sm:$0xff]  ;;  %v9162_v16 = vpack.c.bf16 %v505_v7, %v504_v3  ;;  %v457_v19 = vld [vmem:[#allocation2 + $0x138] sm:$0xff]  ;;  %v458_v20 = vld [vmem:[#allocation2 + $0x140] sm:$0xff]  ;;  %3141 = vst.msk [vmem:[#allocation3 + $0x78] sm:$0xff] %vm3124_vm4, %v8778_v5 }
  0x4b   : > { %8086 = vmatmul.mubr.msk.bf16.gmra.mxu1 %vm342_vm1, %v9112_v35  ;;  %8055 = vmatprep.mubr.msk.bf16.mxu0 %vm342_vm1, %v9114_v36  ;;  %v9164_v17 = vpack.c.bf16 %v456_v11, %v455_v10  ;;  %v507_v18 = vld [vmem:[#allocation2 + $0x141] sm:$0xff]  ;;  %v508_v21 = vld [vmem:[#allocation2 + $0x151] sm:$0xff]  ;;  %v509_v26 = vld [vmem:[#allocation2 + $0x159] sm:$0xff]  ;;  %v9176_v30 = vpack.c.bf16 %v458_v20, %v457_v19  ;;  %3142 = vst.msk [vmem:[#allocation3 + $0x80] sm:$0xff] %vm3124_vm4, %v8778_v5 }
  0x4c   : > { %8089 = vmatprep.mubr.msk.bf16.mxu1 %vm342_vm1, %v9116_v37  ;;  %v459_v27 = vld [vmem:[#allocation2 + $0x150] sm:$0xff]  ;;  %v460_v28 = vld [vmem:[#allocation2 + $0x158] sm:$0xff]  ;;  %v9174_v29 = vpack.c.bf16 %v507_v18, %v506_v6  ;;  %v9178_v31 = vpack.c.bf16 %v509_v26, %v508_v21  ;;  %v955_v39 = vld [vmem:[#allocation2 + $0x2] sm:$0xff]  ;;  %3144 = vst.msk [vmem:[#allocation3 + $0x90] sm:$0xff] %vm3124_vm4, %v8778_v5 }
  0x4d   : > { %v9180_v32 = vpack.c.bf16 %v460_v28, %v459_v27  ;;  %v510_v33 = vld [vmem:[#allocation2 + $0x169] sm:$0xff]  ;;  %v511_v38 = vld [vmem:[#allocation2 + $0x171] sm:$0xff]  ;;  %v957_v50 = vld [vmem:[#allocation2 + $0x1a] sm:$0xff]  ;;  %3145 = vst.msk [vmem:[#allocation3 + $0x98] sm:$0xff] %vm3124_vm4, %v8778_v5 }
  0x4e   : > { %v461_v40 = vld [vmem:[#allocation2 + $0x168] sm:$0xff]  ;;  %v462_v41 = vld [vmem:[#allocation2 + $0x170] sm:$0xff]  ;;  %v9190_v43 = vpack.c.bf16 %v511_v38, %v510_v33  ;;  %v960_v53 = vld [vmem:[#allocation2 + $0x3a] sm:$0xff]  ;;  %3147 = vst.msk [vmem:[#allocation3 + $0xa8] sm:$0xff] %vm3124_vm4, %v8778_v5 }
  0x4f   : > { %v956_v42 = vld [vmem:[#allocation2 + $0xa] sm:$0xff]  ;;  %v9192_v44 = vpack.c.bf16 %v462_v41, %v461_v40  ;;  %v958_v51 = vld [vmem:[#allocation2 + $0x22] sm:$0xff]  ;;  %v959_v52 = vld [vmem:[#allocation2 + $0x32] sm:$0xff]  ;;  %3148 = vst.msk [vmem:[#allocation3 + $0xb0] sm:$0xff] %vm3124_vm4, %v8778_v5 }
  0x50   : > { %v987_v45 = vpack.c.bf16 %v956_v42, %v955_v39  ;;  %v9201_v54 = vpack.c.bf16 %v958_v51, %v957_v50  ;;  %v9205_v56 = vpack.c.bf16 %v960_v53, %v959_v52  ;;  %v9214_v62 = vld [vmem:[%s11649_s1 + $0xc] sm:$0x3]  ;;  %v962_v63 = vld [vmem:[#allocation2 + $0x52] sm:$0xff]  ;;  %v9221_v13 = vld [vmem:[%s11649_s1 + $0xe] sm:$0x3]  ;;  %3150 = vst.msk [vmem:[#allocation3 + $0xc0] sm:$0xff] %vm3124_vm4, %v8778_v5 }
  0x51   : > { %v963_v14 = vld [vmem:[#allocation2 + $0x62] sm:$0xff]  ;;  %v964_v1 = vld [vmem:[#allocation2 + $0x6a] sm:$0xff]  ;;  %v965_v7 = vld [vmem:[#allocation2 + $0x7a] sm:$0xff]  ;;  %3151 = vst.msk [vmem:[#allocation3 + $0xc8] sm:$0xff] %vm3124_vm4, %v8778_v5 }
  0x52   : > { %8056 = vmatmul.mubr.msk.bf16.gmra.mxu0 %vm342_vm1, %v9126_v46  ;;  %v9233_v3 = vpack.c.bf16 %v964_v1, %v963_v14  ;;  %v966_v10 = vld [vmem:[#allocation2 + $0x82] sm:$0xff]  ;;  %v967_v11 = vld [vmem:[#allocation2 + $0x92] sm:$0xff]  ;;  %v968_v6 = vld [vmem:[#allocation2 + $0x9a] sm:$0xff]  ;;  %3153 = vst.msk [vmem:[#allocation3 + $0xd8] sm:$0xff] %vm3124_vm4, %v8778_v5 }
  0x53   : > { %8090 = vmatmul.mubr.msk.bf16.gmra.mxu1 %vm342_vm1, %v9128_v47  ;;  %8059 = vmatprep.mubr.msk.bf16.mxu0 %vm342_vm1, %v9130_v48  ;;  %v9243_v18 = vpack.c.bf16 %v966_v10, %v965_v7  ;;  %v9245_v19 = vpack.c.bf16 %v968_v6, %v967_v11  ;;  %v969_v20 = vld [vmem:[#allocation2 + $0xaa] sm:$0xff]  ;;  %v970_v21 = vld [vmem:[#allocation2 + $0xb2] sm:$0xff]  ;;  %v971_v26 = vld [vmem:[#allocation2 + $0xc2] sm:$0xff]  ;;  %3154 = vst.msk [vmem:[#allocation3 + $0xe0] sm:$0xff] %vm3124_vm4, %v8778_v5 }
  0x54   : > { %8093 = vmatprep.mubr.msk.bf16.mxu1 %vm342_vm1, %v9132_v49  ;;  %v972_v27 = vld [vmem:[#allocation2 + $0xca] sm:$0xff]  ;;  %v9255_v28 = vpack.c.bf16 %v970_v21, %v969_v20  ;;  %v973_v38 = vld [vmem:[#allocation2 + $0xda] sm:$0xff]  ;;  %v974_v39 = vld [vmem:[#allocation2 + $0xe2] sm:$0xff]  ;;  %3156 = vst.msk [vmem:[#allocation3 + $0xf0] sm:$0xff] %vm3124_vm4, %v8778_v5 }
  0x55   : > { %v9257_v33 = vpack.c.bf16 %v972_v27, %v971_v26  ;;  %v975_v40 = vld [vmem:[#allocation2 + $0xf2] sm:$0xff]  ;;  %v976_v41 = vld [vmem:[#allocation2 + $0xfa] sm:$0xff]  ;;  %v9267_v42 = vpack.c.bf16 %v974_v39, %v973_v38  ;;  %v977_v50 = vld [vmem:[#allocation2 + $0x10a] sm:$0xff]  ;;  %v2231_v38 = vsel %vm578_vm0, %v9214_v62, 0  ;;  %v2525_v39 = vsel %vm578_vm0, %v9221_v13, 0  ;;  %3157 = vst.msk [vmem:[#allocation3 + $0xf8] sm:$0xff] %vm3124_vm4, %v8778_v5 }
  0x56   : > { %v978_v51 = vld [vmem:[#allocation2 + $0x112] sm:$0xff]  ;;  %v979_v52 = vld [vmem:[#allocation2 + $0x122] sm:$0xff]  ;;  %v980_v53 = vld [vmem:[#allocation2 + $0x12a] sm:$0xff]  ;;  %3159 = vst.msk [vmem:[#allocation3 + $0x108] sm:$0xff] %vm3124_vm4, %v8778_v5 }
  0x57   : > { %v983_v14 = vld [vmem:[#allocation2 + $0x152] sm:$0xff]  ;;  %v984_v1 = vld [vmem:[#allocation2 + $0x15a] sm:$0xff]  ;;  %v985_v11 = vld [vmem:[#allocation2 + $0x16a] sm:$0xff]  ;;  %3160 = vst.msk [vmem:[#allocation3 + $0x110] sm:$0xff] %vm3124_vm4, %v8778_v5 }
  0x58   : > { %v1001_v10 = vpack.c.bf16 %v984_v1, %v983_v14  ;;  %v986_v6 = vld [vmem:[#allocation2 + $0x172] sm:$0xff]  ;;  %v1279_v20 = vld [vmem:[#allocation2 + $0x180] sm:$0xff]  ;;  %v1280_v21 = vld [vmem:[#allocation2 + $0x188] sm:$0xff]  ;;  %3162 = vst.msk [vmem:[#allocation3 + $0x120] sm:$0xff] %vm3124_vm4, %v8778_v5 }
  0x59   : > { %v1002_v26 = vpack.c.bf16 %v986_v6, %v985_v11  ;;  %v9288_v27 = vpack.c.bf16 %v1280_v21, %v1279_v20  ;;  %3163 = vst.msk [vmem:[#allocation3 + $0x128] sm:$0xff] %vm3124_vm4, %v8778_v5  ;;  %3165 = vst.msk [vmem:[#allocation3 + $0x138] sm:$0xff] %vm3124_vm4, %v8778_v5 }
  0x5a   : > { %8060 = vmatmul.mubr.msk.bf16.gmra.mxu0 %vm342_vm1, %v9142_v58  ;;  %3166 = vst.msk [vmem:[#allocation3 + $0x140] sm:$0xff] %vm3124_vm4, %v8778_v5  ;;  %3168 = vst.msk [vmem:[#allocation3 + $0x150] sm:$0xff] %vm3124_vm4, %v8778_v5 }
  0x5b   : > { %8094 = vmatmul.mubr.msk.bf16.gmra.mxu1 %vm342_vm1, %v9144_v59  ;;  %8063 = vmatprep.mubr.msk.bf16.mxu0 %vm342_vm1, %v9146_v60  ;;  %3169 = vst.msk [vmem:[#allocation3 + $0x158] sm:$0xff] %vm3124_vm4, %v8778_v5  ;;  %3171 = vst.msk [vmem:[#allocation3 + $0x168] sm:$0xff] %vm3124_vm4, %v8778_v5 }
  0x5c   : > { %8097 = vmatprep.mubr.msk.bf16.mxu1 %vm342_vm1, %v9148_v61  ;;  %3172 = vst.msk [vmem:[#allocation3 + $0x170] sm:$0xff] %vm3124_vm4, %v8778_v5  ;;  %3174 = vst.msk [vmem:[#allocation3 + $0x180] sm:$0xff] %vm3124_vm4, %v8778_v5 }
  0x5d   : > { %3175 = vst.msk [vmem:[#allocation3 + $0x188] sm:$0xff] %vm3124_vm4, %v8778_v5  ;;  %3177 = vst.msk [vmem:[#allocation3 + $0x198] sm:$0xff] %vm3124_vm4, %v8778_v5 }
  0x5e   : > { %3178 = vst.msk [vmem:[#allocation3 + $0x1a0] sm:$0xff] %vm3124_vm4, %v8778_v5 }
  0x5f   : > { %3134 = vst.msk [vmem:[#allocation3 + $0x40] sm:$0x3] %vm3127_vm5, %v8778_v5  ;;  %3128 = vst.msk [vmem:[#allocation3 + $0x10] sm:$0x3] %vm3127_vm5, %v8778_v5 }
  0x60   : > { %3131 = vst.msk [vmem:[#allocation3 + $0x28] sm:$0x3] %vm3127_vm5, %v8778_v5  ;;  %3137 = vst.msk [vmem:[#allocation3 + $0x58] sm:$0x3] %vm3127_vm5, %v8778_v5 }
  0x61   : > { %3140 = vst.msk [vmem:[#allocation3 + $0x70] sm:$0x3] %vm3127_vm5, %v8778_v5  ;;  %3143 = vst.msk [vmem:[#allocation3 + $0x88] sm:$0x3] %vm3127_vm5, %v8778_v5 }
  0x62   : > { %8064 = vmatmul.mubr.msk.bf16.gmra.mxu0 %vm342_vm1, %v9158_v4  ;;  %3146 = vst.msk [vmem:[#allocation3 + $0xa0] sm:$0x3] %vm3127_vm5, %v8778_v5  ;;  %3149 = vst.msk [vmem:[#allocation3 + $0xb8] sm:$0x3] %vm3127_vm5, %v8778_v5 }
  0x63   : > { %8098 = vmatmul.mubr.msk.bf16.gmra.mxu1 %vm342_vm1, %v9160_v15  ;;  %8067 = vmatprep.mubr.msk.bf16.mxu0 %vm342_vm1, %v9162_v16  ;;  %3152 = vst.msk [vmem:[#allocation3 + $0xd0] sm:$0x3] %vm3127_vm5, %v8778_v5  ;;  %3155 = vst.msk [vmem:[#allocation3 + $0xe8] sm:$0x3] %vm3127_vm5, %v8778_v5 }
  0x64   : > { %8101 = vmatprep.mubr.msk.bf16.mxu1 %vm342_vm1, %v9164_v17  ;;  %3158 = vst.msk [vmem:[#allocation3 + $0x100] sm:$0x3] %vm3127_vm5, %v8778_v5  ;;  %3161 = vst.msk [vmem:[#allocation3 + $0x118] sm:$0x3] %vm3127_vm5, %v8778_v5 }
  0x65   : > { %3164 = vst.msk [vmem:[#allocation3 + $0x130] sm:$0x3] %vm3127_vm5, %v8778_v5  ;;  %3167 = vst.msk [vmem:[#allocation3 + $0x148] sm:$0x3] %vm3127_vm5, %v8778_v5 }
  0x66   : > { %3170 = vst.msk [vmem:[#allocation3 + $0x160] sm:$0x3] %vm3127_vm5, %v8778_v5  ;;  %3173 = vst.msk [vmem:[#allocation3 + $0x178] sm:$0x3] %vm3127_vm5, %v8778_v5 }
  0x67   : > { %3176 = vst.msk [vmem:[#allocation3 + $0x190] sm:$0x3] %vm3127_vm5, %v8778_v5  ;;  %3179 = vst.msk [vmem:[#allocation3 + $0x1a8] sm:$0x3] %vm3127_vm5, %v8778_v5 }
  0x6a   : > { %8068 = vmatmul.mubr.msk.bf16.gmra.mxu0 %vm342_vm1, %v9174_v29 }
  0x6b   : > { %8102 = vmatmul.mubr.msk.bf16.gmra.mxu1 %vm342_vm1, %v9176_v30  ;;  %8071 = vmatprep.mubr.msk.bf16.mxu0 %vm342_vm1, %v9178_v31 }
  0x6c   : > { %8105 = vmatprep.mubr.msk.bf16.mxu1 %vm342_vm1, %v9180_v32 }
  0x72   : > { %8072 = vmatmul.mubr.msk.bf16.gmra.mxu0 %vm342_vm1, %v9190_v43 }
  0x73   : > { %8106 = vmatmul.mubr.msk.bf16.gmra.mxu1 %vm342_vm1, %v9192_v44  ;;  %8111 = vmatprep.mubr.msk.bf16.mxu0 %vm342_vm1, %v987_v45  ;;  %v997_v45 = vpack.c.bf16 %v976_v41, %v975_v40  ;;  %v7348_v40 = vld [vmem:[%s11649_s1 + $0x10] sm:$0x3] }
  0x74   : > { %8145 = vmatprep.mubr.msk.bf16.mxu1 %vm342_vm1, %v9064_v8  ;;  %v961_v8 = vld [vmem:[#allocation2 + $0x4a] sm:$0xff] }
  0x75   : > { %v9229_v2 = vpack.c.bf16 %v962_v63, %v961_v8  ;;  %v981_v8 = vld [vmem:[#allocation2 + $0x13a] sm:$0xff]  ;;  %v982_v63 = vld [vmem:[#allocation2 + $0x142] sm:$0xff] }
  0x76   : > { %v1000_v7 = vpack.c.bf16 %v982_v63, %v981_v8 }
  0x7a   : > { %8112 = vmatmul.mubr.msk.bf16.vlgmr.msra.gmra.mxu0 %vm342_vm1, %v9201_v54 }
  0x7b   : > { %8178 = vmatpush3.bf16.msra.mxu0 %v1642_v55  ;;  %8146 = vmatmul.mubr.msk.bf16.vlgmr.msra.gmra.mxu1 %vm342_vm1, %v9070_v12  ;;  %v998_v55 = vpack.c.bf16 %v978_v51, %v977_v50  ;;  %v2819_v50 = vsel %vm578_vm0, %v7348_v40, 0 }
  0x7c   : > { %8115 = vmatprep.mubr.msk.bf16.mxu0 %vm342_vm1, %v9205_v56  ;;  %8149 = vmatprep.mubr.msk.bf16.mxu1 %vm342_vm1, %v9096_v23 }
  0x7d   : > { %8212 = vmatpush3.bf16.msra.mxu1 %v1936_v57  ;;  %8659 = vmatprep.subr.msk.bf16.mxu0 %vm578_vm0, %v9214_v62  ;;  %v999_v57 = vpack.c.bf16 %v980_v53, %v979_v52  ;;  %v1867_v62 = vld [vmem:[#allocation2 + $0x182] sm:$0xff] }
  0x7e   : > { %8660 = vmatprep.subr.msk.bf16.mxu1 %vm578_vm0, %v9221_v13  ;;  %v1868_v13 = vld [vmem:[#allocation2 + $0x18a] sm:$0xff] }
  0x82   : > { %8116 = vmatmul.mubr.msk.bf16.gmra.mxu0 %vm342_vm1, %v9229_v2 }
  0x83   : > { %8150 = vmatmul.mubr.msk.bf16.gmra.mxu1 %vm342_vm1, %v9100_v25  ;;  %8119 = vmatprep.mubr.msk.bf16.mxu0 %vm342_vm1, %v9233_v3 }
  0x84   : > { %8153 = vmatprep.mubr.msk.bf16.mxu1 %vm342_vm1, %v9112_v35 }
  0x8a   : > { %8120 = vmatmul.mubr.msk.bf16.gmra.mxu0 %vm342_vm1, %v9243_v18 }
  0x8b   : > { %8154 = vmatmul.mubr.msk.bf16.gmra.mxu1 %vm342_vm1, %v9116_v37  ;;  %8123 = vmatprep.mubr.msk.bf16.mxu0 %vm342_vm1, %v9245_v19 }
  0x8c   : > { %8157 = vmatprep.mubr.msk.bf16.mxu1 %vm342_vm1, %v9128_v47 }
  0x92   : > { %8124 = vmatmul.mubr.msk.bf16.gmra.mxu0 %vm342_vm1, %v9255_v28 }
  0x93   : > { %8158 = vmatmul.mubr.msk.bf16.gmra.mxu1 %vm342_vm1, %v9132_v49  ;;  %8127 = vmatprep.mubr.msk.bf16.mxu0 %vm342_vm1, %v9257_v33 }
  0x94   : > { %8161 = vmatprep.mubr.msk.bf16.mxu1 %vm342_vm1, %v9144_v59 }
  0x9a   : > { %8128 = vmatmul.mubr.msk.bf16.gmra.mxu0 %vm342_vm1, %v9267_v42 }
  0x9b   : > { %8162 = vmatmul.mubr.msk.bf16.gmra.mxu1 %vm342_vm1, %v9148_v61  ;;  %8131 = vmatprep.mubr.msk.bf16.mxu0 %vm342_vm1, %v997_v45 }
  0x9c   : > { %8165 = vmatprep.mubr.msk.bf16.mxu1 %vm342_vm1, %v9160_v15 }
  0xa2   : > { %8132 = vmatmul.mubr.msk.bf16.gmra.mxu0 %vm342_vm1, %v998_v55 }
  0xa3   : > { %8166 = vmatmul.mubr.msk.bf16.gmra.mxu1 %vm342_vm1, %v9164_v17  ;;  %8135 = vmatprep.mubr.msk.bf16.mxu0 %vm342_vm1, %v999_v57 }
  0xa4   : > { %8169 = vmatprep.mubr.msk.bf16.mxu1 %vm342_vm1, %v9176_v30 }
  0xaa   : > { %8136 = vmatmul.mubr.msk.bf16.gmra.mxu0 %vm342_vm1, %v1000_v7 }
  0xab   : > { %8170 = vmatmul.mubr.msk.bf16.gmra.mxu1 %vm342_vm1, %v9180_v32  ;;  %8139 = vmatprep.mubr.msk.bf16.mxu0 %vm342_vm1, %v1001_v10 }
  0xac   : > { %8173 = vmatprep.mubr.msk.bf16.mxu1 %vm342_vm1, %v9192_v44 }
  0xb2   : > { %8140 = vmatmul.mubr.msk.bf16.gmra.mxu0 %vm342_vm1, %v1002_v26 }
  0xb3   : > { %8174 = vmatmul.mubr.msk.bf16.gmra.mxu1 %vm342_vm1, %v9288_v27  ;;  %8179 = vmatprep.mubr.msk.bf16.mxu0 %vm342_vm1, %v9057_v0  ;;  %v1573_v0 = vld [vmem:[#allocation2 + $0x181] sm:$0xff] }
  0xb4   : > { %8213 = vmatprep.mubr.msk.bf16.mxu1 %vm342_vm1, %v9201_v54  ;;  %v1574_v54 = vld [vmem:[#allocation2 + $0x189] sm:$0xff] }
  0xb5   : > { %v9355_v41 = vpack.c.bf16 %v1574_v54, %v1573_v0 }
  0xba   : > { %8180 = vmatmul.mubr.msk.bf16.vlgmr.msra.gmra.mxu0 %vm342_vm1, %v9066_v9 }
  0xbb   : > { %8246 = vmatpush3.bf16.msra.mxu0 %v2231_v38  ;;  %8214 = vmatmul.mubr.msk.bf16.vlgmr.msra.gmra.mxu1 %vm342_vm1, %v9205_v56 }
  0xbc   : > { %8183 = vmatprep.mubr.msk.bf16.mxu0 %vm342_vm1, %v9092_v22  ;;  %8217 = vmatprep.mubr.msk.bf16.mxu1 %vm342_vm1, %v9229_v2 }
  0xbd   : > { %8280 = vmatpush3.bf16.msra.mxu1 %v2525_v39  ;;  %8661 = vmatprep.subr.msk.bf16.mxu0 %vm578_vm0, %v7348_v40 }
  0xc2   : > { %8184 = vmatmul.mubr.msk.bf16.gmra.mxu0 %vm342_vm1, %v9098_v24 }
  0xc3   : > { %8218 = vmatmul.mubr.msk.bf16.gmra.mxu1 %vm342_vm1, %v9233_v3  ;;  %8187 = vmatprep.mubr.msk.bf16.mxu0 %vm342_vm1, %v9110_v34 }
  0xc4   : > { %8221 = vmatprep.mubr.msk.bf16.mxu1 %vm342_vm1, %v9243_v18 }
  0xca   : > { %8188 = vmatmul.mubr.msk.bf16.gmra.mxu0 %vm342_vm1, %v9114_v36 }
  0xcb   : > { %8222 = vmatmul.mubr.msk.bf16.gmra.mxu1 %vm342_vm1, %v9245_v19  ;;  %8191 = vmatprep.mubr.msk.bf16.mxu0 %vm342_vm1, %v9126_v46 }
  0xcc   : > { %8225 = vmatprep.mubr.msk.bf16.mxu1 %vm342_vm1, %v9255_v28 }
  0xd2   : > { %8192 = vmatmul.mubr.msk.bf16.gmra.mxu0 %vm342_vm1, %v9130_v48 }
  0xd3   : > { %8226 = vmatmul.mubr.msk.bf16.gmra.mxu1 %vm342_vm1, %v9257_v33  ;;  %8195 = vmatprep.mubr.msk.bf16.mxu0 %vm342_vm1, %v9142_v58 }
  0xd4   : > { %8229 = vmatprep.mubr.msk.bf16.mxu1 %vm342_vm1, %v9267_v42 }
  0xda   : > { %8196 = vmatmul.mubr.msk.bf16.gmra.mxu0 %vm342_vm1, %v9146_v60 }
  0xdb   : > { %8230 = vmatmul.mubr.msk.bf16.gmra.mxu1 %vm342_vm1, %v997_v45  ;;  %8199 = vmatprep.mubr.msk.bf16.mxu0 %vm342_vm1, %v9158_v4  ;;  %v9357_v45 = vpack.c.bf16 %v1868_v13, %v1867_v62 }
  0xdc   : > { %8233 = vmatprep.mubr.msk.bf16.mxu1 %vm342_vm1, %v998_v55 }
  0xe2   : > { %8200 = vmatmul.mubr.msk.bf16.gmra.mxu0 %vm342_vm1, %v9162_v16 }
  0xe3   : > { %8234 = vmatmul.mubr.msk.bf16.gmra.mxu1 %vm342_vm1, %v999_v57  ;;  %8203 = vmatprep.mubr.msk.bf16.mxu0 %vm342_vm1, %v9174_v29 }
  0xe4   : > { %8237 = vmatprep.mubr.msk.bf16.mxu1 %vm342_vm1, %v1000_v7 }
  0xea   : > { %8204 = vmatmul.mubr.msk.bf16.gmra.mxu0 %vm342_vm1, %v9178_v31 }
  0xeb   : > { %8238 = vmatmul.mubr.msk.bf16.gmra.mxu1 %vm342_vm1, %v1001_v10  ;;  %8207 = vmatprep.mubr.msk.bf16.mxu0 %vm342_vm1, %v9190_v43 }
  0xec   : > { %8241 = vmatprep.mubr.msk.bf16.mxu1 %vm342_vm1, %v1002_v26 }
  0xf2   : > { %8208 = vmatmul.mubr.msk.bf16.gmra.mxu0 %vm342_vm1, %v9355_v41 }
  0xf3   : > { %8242 = vmatmul.mubr.msk.bf16.gmra.mxu1 %vm342_vm1, %v9357_v45  ;;  %8247 = vmatprep.mubr.msk.bf16.mxu0 %vm342_vm1, %v9070_v12 }
  0xf4   : > { %8281 = vmatprep.mubr.msk.bf16.mxu1 %vm342_vm1, %v9066_v9 }
  0xfa   : > { %v8045_v51 = vpop.f32.mrf.mxu0  ;;  %8248 = vmatmul.mubr.msk.bf16.vlgmr.msra.gmra.mxu0 %vm342_vm1, %v9096_v23 }
  0xfb   : > { %v8079_v52 = vpop.f32.mrf.mxu1  ;;  %8314 = vmatpush3.bf16.msra.mxu0 %v2819_v50  ;;  %8282 = vmatmul.mubr.msk.bf16.vlgmr.msra.gmra.mxu1 %vm342_vm1, %v9092_v22 }
  0xfc   : > { %v9372_v53 = vadd.f32 %v8079_v52, %v8045_v51  ;;  %v616_v55 = vpop.f32.mrf.mxu0  ;;  %8251 = vmatprep.mubr.msk.bf16.mxu0 %vm342_vm1, %v9100_v25  ;;  %8285 = vmatprep.mubr.msk.bf16.mxu1 %vm342_vm1, %v9098_v24 }
  0xfd   : > { %v828_v9 = vpop.f32.mrf.mxu1 }
  0xfe   : > { %v9378_v12 = vadd.f32 %v828_v9, %v616_v55  ;;  %v8046_v57 = vpop.f32.mrf.mxu0 }
  0xff   : > { %v8080_v8 = vpop.f32.mrf.mxu1 }
 0x100   : > { %v9380_v23 = vadd.f32 %v8080_v8, %v8046_v57  ;;  %v619_v63 = vpop.f32.mrf.mxu0 }
 0x101   : > { %v831_v14 = vpop.f32.mrf.mxu1 }
 0x102   : > { %v9382_v1 = vadd.f32 %v831_v14, %v619_v63  ;;  %v8049_v22 = vpop.f32.mrf.mxu0  ;;  %8252 = vmatmul.mubr.msk.bf16.gmra.mxu0 %vm342_vm1, %v9112_v35 }
 0x103   : > { %v8083_v7 = vpop.f32.mrf.mxu1  ;;  %8286 = vmatmul.mubr.msk.bf16.gmra.mxu1 %vm342_vm1, %v9110_v34  ;;  %8255 = vmatprep.mubr.msk.bf16.mxu0 %vm342_vm1, %v9116_v37 }
 0x104   : > { %v9390_v24 = vadd.f32 %v8083_v7, %v8049_v22  ;;  %v632_v25 = vpop.f32.mrf.mxu0  ;;  %8289 = vmatprep.mubr.msk.bf16.mxu1 %vm342_vm1, %v9114_v36 }
 0x105   : > { %v844_v10 = vpop.f32.mrf.mxu1 }
 0x106   : > { %v9394_v11 = vadd.f32 %v844_v10, %v632_v25  ;;  %v8050_v6 = vpop.f32.mrf.mxu0 }
 0x107   : > { %v8084_v20 = vpop.f32.mrf.mxu1 }
 0x108   : > { %v9396_v21 = vadd.f32 %v8084_v20, %v8050_v6  ;;  %v635_v35 = vpop.f32.mrf.mxu0 }
 0x109   : > { %v847_v26 = vpop.f32.mrf.mxu1 }
 0x10a   : > { %v9398_v38 = vadd.f32 %v847_v26, %v635_v35  ;;  %v8053_v34 = vpop.f32.mrf.mxu0  ;;  %8256 = vmatmul.mubr.msk.bf16.gmra.mxu0 %vm342_vm1, %v9128_v47 }
 0x10b   : > { %v8087_v37 = vpop.f32.mrf.mxu1  ;;  %8290 = vmatmul.mubr.msk.bf16.gmra.mxu1 %vm342_vm1, %v9126_v46  ;;  %8259 = vmatprep.mubr.msk.bf16.mxu0 %vm342_vm1, %v9132_v49 }
 0x10c   : > { %v9406_v36 = vadd.f32 %v8087_v37, %v8053_v34  ;;  %v648_v39 = vpop.f32.mrf.mxu0  ;;  %8293 = vmatprep.mubr.msk.bf16.mxu1 %vm342_vm1, %v9130_v48 }
 0x10d   : > { %v860_v40 = vpop.f32.mrf.mxu1 }
 0x10e   : > { %v9410_v0 = vadd.f32 %v860_v40, %v648_v39  ;;  %v8054_v54 = vpop.f32.mrf.mxu0 }
 0x10f   : > { %v8088_v62 = vpop.f32.mrf.mxu1 }
 0x110   : > { %v9412_v13 = vadd.f32 %v8088_v62, %v8054_v54  ;;  %v651_v47 = vpop.f32.mrf.mxu0 }
 0x111   : > { %v863_v50 = vpop.f32.mrf.mxu1 }
 0x112   : > { %v9414_v51 = vadd.f32 %v863_v50, %v651_v47  ;;  %v8057_v46 = vpop.f32.mrf.mxu0  ;;  %8260 = vmatmul.mubr.msk.bf16.gmra.mxu0 %vm342_vm1, %v9144_v59  ;;  %v2163_v50 = vld [vmem:[#allocation2 + $0x1a0] sm:$0xff] }
 0x113   : > { %v8091_v49 = vpop.f32.mrf.mxu1  ;;  %8294 = vmatmul.mubr.msk.bf16.gmra.mxu1 %vm342_vm1, %v9142_v58  ;;  %8263 = vmatprep.mubr.msk.bf16.mxu0 %vm342_vm1, %v9148_v61 }
 0x114   : > { %v9422_v48 = vadd.f32 %v8091_v49, %v8057_v46  ;;  %v664_v52 = vpop.f32.mrf.mxu0  ;;  %8297 = vmatprep.mubr.msk.bf16.mxu1 %vm342_vm1, %v9146_v60 }
 0x115   : > { %v876_v55 = vpop.f32.mrf.mxu1 }
 0x116   : > { %v9426_v9 = vadd.f32 %v876_v55, %v664_v52  ;;  %v8058_v57 = vpop.f32.mrf.mxu0  ;;  %v2456_v52 = vld [vmem:[#allocation2 + $0x199] sm:$0xff]  ;;  %v2457_v55 = vld [vmem:[#allocation2 + $0x1a1] sm:$0xff] }
 0x117   : > { %v8092_v8 = vpop.f32.mrf.mxu1 }
 0x118   : > { %v9428_v63 = vadd.f32 %v8092_v8, %v8058_v57  ;;  %v667_v59 = vpop.f32.mrf.mxu0 }
 0x119   : > { %v879_v14 = vpop.f32.mrf.mxu1 }
 0x11a   : > { %v9430_v22 = vadd.f32 %v879_v14, %v667_v59  ;;  %v8061_v58 = vpop.f32.mrf.mxu0  ;;  %8264 = vmatmul.mubr.msk.bf16.gmra.mxu0 %vm342_vm1, %v9160_v15 }
 0x11b   : > { %v8095_v61 = vpop.f32.mrf.mxu1  ;;  %8298 = vmatmul.mubr.msk.bf16.gmra.mxu1 %vm342_vm1, %v9158_v4  ;;  %8267 = vmatprep.mubr.msk.bf16.mxu0 %vm342_vm1, %v9164_v17 }
 0x11c   : > { %v9438_v60 = vadd.f32 %v8095_v61, %v8061_v58  ;;  %v680_v7 = vpop.f32.mrf.mxu0  ;;  %8301 = vmatprep.mubr.msk.bf16.mxu1 %vm342_vm1, %v9162_v16 }
 0x11d   : > { %v892_v25 = vpop.f32.mrf.mxu1 }
 0x11e   : > { %v9442_v10 = vadd.f32 %v892_v25, %v680_v7  ;;  %v8062_v6 = vpop.f32.mrf.mxu0 }
 0x11f   : > { %v8096_v20 = vpop.f32.mrf.mxu1 }
 0x120   : > { %v9444_v35 = vadd.f32 %v8096_v20, %v8062_v6  ;;  %v9446_v15 = vpop.f32.mrf.mxu0 }
 0x121   : > { %v9448_v26 = vpop.f32.mrf.mxu1 }
 0x122   : > { %v8065_v4 = vpop.f32.mrf.mxu0  ;;  %8268 = vmatmul.mubr.msk.bf16.gmra.mxu0 %vm342_vm1, %v9176_v30 }
 0x123   : > { %v8099_v17 = vpop.f32.mrf.mxu1  ;;  %8302 = vmatmul.mubr.msk.bf16.gmra.mxu1 %vm342_vm1, %v9174_v29  ;;  %8271 = vmatprep.mubr.msk.bf16.mxu0 %vm342_vm1, %v9180_v32 }
 0x124   : > { %v9456_v16 = vadd.f32 %v8099_v17, %v8065_v4  ;;  %v696_v34 = vpop.f32.mrf.mxu0  ;;  %8305 = vmatprep.mubr.msk.bf16.mxu1 %vm342_vm1, %v9178_v31  ;;  %v2162_v31 = vld [vmem:[#allocation2 + $0x198] sm:$0xff] }
 0x125   : > { %v908_v37 = vpop.f32.mrf.mxu1  ;;  %v2179_v59 = vpack.c.bf16 %v2163_v50, %v2162_v31 }
 0x126   : > { %v9460_v39 = vadd.f32 %v908_v37, %v696_v34  ;;  %v8066_v40 = vpop.f32.mrf.mxu0 }
 0x127   : > { %v8100_v54 = vpop.f32.mrf.mxu1 }
 0x128   : > { %v9462_v62 = vadd.f32 %v8100_v54, %v8066_v40  ;;  %v9464_v30 = vpop.f32.mrf.mxu0 }
 0x129   : > { %v9466_v47 = vpop.f32.mrf.mxu1 }
 0x12a   : > { %v8069_v29 = vpop.f32.mrf.mxu0  ;;  %8272 = vmatmul.mubr.msk.bf16.gmra.mxu0 %vm342_vm1, %v9192_v44 }
 0x12b   : > { %v8103_v32 = vpop.f32.mrf.mxu1  ;;  %8306 = vmatmul.mubr.msk.bf16.gmra.mxu1 %vm342_vm1, %v9190_v43  ;;  %8275 = vmatprep.mubr.msk.bf16.mxu0 %vm342_vm1, %v9288_v27  ;;  %v2473_v43 = vpack.c.bf16 %v2457_v55, %v2456_v52 }
 0x12c   : > { %v9474_v46 = vadd.f32 %v8103_v32, %v8069_v29  ;;  %v712_v49 = vpop.f32.mrf.mxu0  ;;  %8309 = vmatprep.mubr.msk.bf16.mxu1 %vm342_vm1, %v9355_v41 }
 0x12d   : > { %v924_v57 = vpop.f32.mrf.mxu1 }
 0x12e   : > { %v9478_v8 = vadd.f32 %v924_v57, %v712_v49  ;;  %v8070_v44 = vpop.f32.mrf.mxu0 }
 0x12f   : > { %v8104_v14 = vpop.f32.mrf.mxu1 }
 0x130   : > { %v9480_v58 = vadd.f32 %v8104_v14, %v8070_v44  ;;  %v9482_v27 = vpop.f32.mrf.mxu0 }
 0x131   : > { %v9484_v61 = vpop.f32.mrf.mxu1 }
 0x132   : > { %v8073_v7 = vpop.f32.mrf.mxu0  ;;  %8276 = vmatmul.mubr.msk.bf16.gmra.mxu0 %vm342_vm1, %v2179_v59 }
 0x133   : > { %v8107_v25 = vpop.f32.mrf.mxu1  ;;  %8310 = vmatmul.mubr.msk.bf16.gmra.mxu1 %vm342_vm1, %v2473_v43  ;;  %8315 = vmatprep.mubr.msk.bf16.mxu0 %vm342_vm1, %v9205_v56 }
 0x134   : > { %v9490_v41 = vadd.f32 %v8107_v25, %v8073_v7  ;;  %v728_v6 = vpop.f32.mrf.mxu0 }
 0x135   : > { %v940_v20 = vpop.f32.mrf.mxu1 }
 0x136   : > { %v9492_v4 = vadd.f32 %v940_v20, %v728_v6  ;;  %v8074_v17 = vpop.f32.mrf.mxu0 }
 0x137   : > { %v8108_v34 = vpop.f32.mrf.mxu1 }
 0x138   : > { %v9494_v37 = vadd.f32 %v8108_v34, %v8074_v17  ;;  %v9496_v40 = vpop.f32.mrf.mxu0 }
 0x139   : > { %v9498_v54 = vpop.f32.mrf.mxu1 }
 0x13a   : > { %v8113_v29 = vpop.f32.mrf.mxu0  ;;  %8316 = vmatmul.mubr.msk.bf16.vlgmr.msra.gmra.mxu0 %vm342_vm1, %v9229_v2 }
 0x13b   : > { %v1219_v56 = vadd.f32 %v8113_v29, %v9372_v53  ;;  %v8147_v32 = vpop.f32.mrf.mxu1  ;;  %8319 = vmatprep.mubr.msk.bf16.mxu0 %vm342_vm1, %v9233_v3 }
 0x13c   : > { %v1090_v31 = vpop.f32.mrf.mxu0 }
 0x13d   : > { %v1217_v50 = vadd.f32 %v1090_v31, %v9378_v12  ;;  %v9506_v49 = vadd.f32 %v8147_v32, %v1219_v56  ;;  %v1384_v52 = vpop.f32.mrf.mxu1 }
 0x13e   : > { %v8114_v55 = vpop.f32.mrf.mxu0 }
 0x13f   : > { %v1220_v57 = vadd.f32 %v8114_v55, %v9380_v23  ;;  %v9509_v44 = vadd.f32 %v1384_v52, %v1217_v50  ;;  %v8148_v59 = vpop.f32.mrf.mxu1  ;;  %v2736_v50 = vld [vmem:[#allocation2 + $0xf2] sm:$0xff]  ;;  %v2737_v52 = vld [vmem:[#allocation2 + $0xfa] sm:$0xff] }
 0x140   : > { %v1093_v14 = vpop.f32.mrf.mxu0 }
 0x141   : > { %v9512_v2 = vadd.f32 %v1093_v14, %v9382_v1  ;;  %v9514_v53 = vadd.f32 %v8148_v59, %v1220_v57  ;;  %v9516_v43 = vpop.f32.mrf.mxu1 }
 0x142   : > { %v8117_v3 = vpop.f32.mrf.mxu0  ;;  %8320 = vmatmul.mubr.msk.bf16.gmra.mxu0 %vm342_vm1, %v9243_v18 }
 0x143   : > { %v1223_v12 = vadd.f32 %v8117_v3, %v9390_v24  ;;  %v8151_v7 = vpop.f32.mrf.mxu1  ;;  %8323 = vmatprep.mubr.msk.bf16.mxu0 %vm342_vm1, %v9245_v19 }
 0x144   : > { %v1106_v23 = vpop.f32.mrf.mxu0 }
 0x145   : > { %v1221_v25 = vadd.f32 %v1106_v23, %v9394_v11  ;;  %v9524_v6 = vadd.f32 %v8151_v7, %v1223_v12  ;;  %v1400_v1 = vpop.f32.mrf.mxu1  ;;  %v2760_v12 = vpack.c.bf16 %v2737_v52, %v2736_v50 }
 0x146   : > { %v8118_v20 = vpop.f32.mrf.mxu0 }
 0x147   : > { %v1224_v17 = vadd.f32 %v8118_v20, %v9396_v21  ;;  %v9527_v34 = vadd.f32 %v1400_v1, %v1221_v25  ;;  %v8152_v29 = vpop.f32.mrf.mxu1  ;;  %v2739_v20 = vld [vmem:[#allocation2 + $0x112] sm:$0xff] }
 0x148   : > { %v1109_v56 = vpop.f32.mrf.mxu0 }
 0x149   : > { %v9530_v18 = vadd.f32 %v1109_v56, %v9398_v38  ;;  %v9532_v24 = vadd.f32 %v8152_v29, %v1224_v17  ;;  %v9534_v32 = vpop.f32.mrf.mxu1  ;;  %v2740_v29 = vld [vmem:[#allocation2 + $0x122] sm:$0xff]  ;;  %v2741_v56 = vld [vmem:[#allocation2 + $0x12a] sm:$0xff] }
 0x14a   : > { %v8121_v19 = vpop.f32.mrf.mxu0  ;;  %8324 = vmatmul.mubr.msk.bf16.gmra.mxu0 %vm342_vm1, %v9255_v28 }
 0x14b   : > { %v1227_v11 = vadd.f32 %v8121_v19, %v9406_v36  ;;  %v8155_v31 = vpop.f32.mrf.mxu1  ;;  %8327 = vmatprep.mubr.msk.bf16.mxu0 %vm342_vm1, %v9257_v33 }
 0x14c   : > { %v1122_v21 = vpop.f32.mrf.mxu0 }
 0x14d   : > { %v1225_v38 = vadd.f32 %v1122_v21, %v9410_v0  ;;  %v9542_v55 = vadd.f32 %v8155_v31, %v1227_v11  ;;  %v1416_v57 = vpop.f32.mrf.mxu1 }
 0x14e   : > { %v8122_v59 = vpop.f32.mrf.mxu0 }
 0x14f   : > { %v1228_v14 = vadd.f32 %v8122_v59, %v9412_v13  ;;  %v9545_v3 = vadd.f32 %v1416_v57, %v1225_v38  ;;  %v8156_v28 = vpop.f32.mrf.mxu1  ;;  %v2738_v13 = vld [vmem:[#allocation2 + $0x10a] sm:$0xff]  ;;  %v2762_v57 = vpack.c.bf16 %v2741_v56, %v2740_v29 }
 0x150   : > { %v1125_v36 = vpop.f32.mrf.mxu0  ;;  %v2761_v21 = vpack.c.bf16 %v2739_v20, %v2738_v13  ;;  %v2744_v13 = vld [vmem:[#allocation2 + $0x152] sm:$0xff]  ;;  %v2745_v20 = vld [vmem:[#allocation2 + $0x15a] sm:$0xff] }
 0x151   : > { %v9548_v7 = vadd.f32 %v1125_v36, %v9414_v51  ;;  %v9550_v33 = vadd.f32 %v8156_v28, %v1228_v14  ;;  %v9552_v23 = vpop.f32.mrf.mxu1  ;;  %v7367_v51 = vld [vmem:[%s11652_s4 + $0x4] sm:$0xf] }
 0x152   : > { %v8125_v25 = vpop.f32.mrf.mxu0  ;;  %8328 = vmatmul.mubr.msk.bf16.gmra.mxu0 %vm342_vm1, %v9267_v42  ;;  %8662 = vmatprep.subr.msk.bf16.mxu1 %vm3360_vm3, %v7367_v51  ;;  %v3362_v19 = vsel %vm3360_vm3, %v7367_v51, 0 }
 0x153   : > { %v1231_v0 = vadd.f32 %v8125_v25, %v9422_v48  ;;  %v8159_v1 = vpop.f32.mrf.mxu1  ;;  %8331 = vmatprep.mubr.msk.bf16.mxu0 %vm342_vm1, %v2760_v12  ;;  %8348 = vmatpush3.bf16.msra.mxu1 %v3362_v19 }
 0x154   : > { %v1138_v17 = vpop.f32.mrf.mxu0 }
 0x155   : > { %v1229_v42 = vadd.f32 %v1138_v17, %v9426_v9  ;;  %v9564_v48 = vadd.f32 %v8159_v1, %v1231_v0  ;;  %v1432_v11 = vpop.f32.mrf.mxu1  ;;  %v2743_v0 = vld [vmem:[#allocation2 + $0x142] sm:$0xff] }
 0x156   : > { %v8126_v31 = vpop.f32.mrf.mxu0 }
 0x157   : > { %v1232_v50 = vadd.f32 %v8126_v31, %v9428_v63  ;;  %v9567_v52 = vadd.f32 %v1432_v11, %v1229_v42  ;;  %v8160_v38 = vpop.f32.mrf.mxu1  ;;  %v2742_v63 = vld [vmem:[#allocation2 + $0x13a] sm:$0xff]  ;;  %v2764_v11 = vpack.c.bf16 %v2745_v20, %v2744_v13 }
 0x158   : > { %v1141_v59 = vpop.f32.mrf.mxu0  ;;  %v2763_v56 = vpack.c.bf16 %v2743_v0, %v2742_v63 }
 0x159   : > { %v9570_v14 = vadd.f32 %v1141_v59, %v9430_v22  ;;  %v9572_v28 = vadd.f32 %v8160_v38, %v1232_v50  ;;  %v9574_v12 = vpop.f32.mrf.mxu1  ;;  %v2746_v59 = vld [vmem:[#allocation2 + $0x16a] sm:$0xff] }
 0x15a   : > { %v8129_v9 = vpop.f32.mrf.mxu0  ;;  %8332 = vmatmul.mubr.msk.bf16.gmra.mxu0 %vm342_vm1, %v2761_v21 }
 0x15b   : > { %v1235_v36 = vadd.f32 %v8129_v9, %v9438_v60  ;;  %v8163_v25 = vpop.f32.mrf.mxu1  ;;  %8335 = vmatprep.mubr.msk.bf16.mxu0 %vm342_vm1, %v2762_v57 }
 0x15c   : > { %v1154_v1 = vpop.f32.mrf.mxu0 }
 0x15d   : > { %v1233_v22 = vadd.f32 %v1154_v1, %v9442_v10  ;;  %v9580_v51 = vadd.f32 %v8163_v25, %v1235_v36  ;;  %v1448_v17 = vpop.f32.mrf.mxu1 }
 0x15e   : > { %v8130_v29 = vpop.f32.mrf.mxu0 }
 0x15f   : > { %v1236_v19 = vadd.f32 %v8130_v29, %v9444_v35  ;;  %v9583_v42 = vadd.f32 %v1448_v17, %v1233_v22  ;;  %v8164_v60 = vpop.f32.mrf.mxu1  ;;  %v2747_v35 = vld [vmem:[#allocation2 + $0x172] sm:$0xff] }
 0x160   : > { %v9585_v31 = vpop.f32.mrf.mxu0  ;;  %v2765_v1 = vpack.c.bf16 %v2747_v35, %v2746_v59 }
 0x161   : > { %v9587_v21 = vadd.f32 %v8164_v60, %v1236_v19  ;;  %v9589_v50 = vpop.f32.mrf.mxu1  ;;  %v2750_v60 = vld [vmem:[#allocation2 + $0x19a] sm:$0xff] }
 0x162   : > { %v8133_v38 = vpop.f32.mrf.mxu0  ;;  %8336 = vmatmul.mubr.msk.bf16.gmra.mxu0 %vm342_vm1, %v2763_v56 }
 0x163   : > { %v1239_v10 = vadd.f32 %v8133_v38, %v9456_v16  ;;  %v8167_v57 = vpop.f32.mrf.mxu1  ;;  %8339 = vmatprep.mubr.msk.bf16.mxu0 %vm342_vm1, %v2764_v11 }
 0x164   : > { %v1170_v9 = vpop.f32.mrf.mxu0 }
 0x165   : > { %v1237_v36 = vadd.f32 %v1170_v9, %v9460_v39  ;;  %v9595_v25 = vadd.f32 %v8167_v57, %v1239_v10  ;;  %v1464_v63 = vpop.f32.mrf.mxu1 }
 0x166   : > { %v8134_v0 = vpop.f32.mrf.mxu0 }
 0x167   : > { %v1240_v13 = vadd.f32 %v8134_v0, %v9462_v62  ;;  %v9598_v20 = vadd.f32 %v1464_v63, %v1237_v36  ;;  %v8168_v22 = vpop.f32.mrf.mxu1  ;;  %v2751_v62 = vld [vmem:[#allocation2 + $0x1a2] sm:$0xff] }
 0x168   : > { %v9600_v17 = vpop.f32.mrf.mxu0  ;;  %v2767_v35 = vpack.c.bf16 %v2751_v62, %v2750_v60 }
 0x169   : > { %v9602_v16 = vadd.f32 %v8168_v22, %v1240_v13  ;;  %v9604_v29 = vpop.f32.mrf.mxu1 }
 0x16a   : > { %v8137_v56 = vpop.f32.mrf.mxu0  ;;  %8340 = vmatmul.mubr.msk.bf16.gmra.mxu0 %vm342_vm1, %v2765_v1 }
 0x16b   : > { %v1243_v39 = vadd.f32 %v8137_v56, %v9474_v46  ;;  %v8171_v19 = vpop.f32.mrf.mxu1  ;;  %8343 = vmatprep.mubr.msk.bf16.mxu0 %vm342_vm1, %v9357_v45 }
 0x16c   : > { %v1186_v11 = vpop.f32.mrf.mxu0 }
 0x16d   : > { %v1241_v38 = vadd.f32 %v1186_v11, %v9478_v8  ;;  %v9611_v10 = vadd.f32 %v8171_v19, %v1243_v39  ;;  %v1480_v57 = vpop.f32.mrf.mxu1 }
 0x16e   : > { %v8138_v59 = vpop.f32.mrf.mxu0 }
 0x16f   : > { %v1244_v9 = vadd.f32 %v8138_v59, %v9480_v58  ;;  %v9614_v36 = vadd.f32 %v1480_v57, %v1241_v38  ;;  %v8172_v63 = vpop.f32.mrf.mxu1 }
 0x170   : > { %v9616_v46 = vpop.f32.mrf.mxu0 }
 0x171   : > { %v9618_v0 = vadd.f32 %v8172_v63, %v1244_v9  ;;  %v9620_v45 = vpop.f32.mrf.mxu1 }
 0x172   : > { %v8141_v1 = vpop.f32.mrf.mxu0  ;;  %8344 = vmatmul.mubr.msk.bf16.gmra.mxu0 %vm342_vm1, %v2767_v35 }
 0x173   : > { %v1247_v8 = vadd.f32 %v8141_v1, %v9490_v41  ;;  %v8175_v13 = vpop.f32.mrf.mxu1 }
 0x174   : > { %v1202_v22 = vpop.f32.mrf.mxu0 }
 0x175   : > { %v1245_v56 = vadd.f32 %v1202_v22, %v9492_v4  ;;  %v9625_v39 = vadd.f32 %v8175_v13, %v1247_v8  ;;  %v1496_v58 = vpop.f32.mrf.mxu1 }
 0x176   : > { %v8142_v19 = vpop.f32.mrf.mxu0 }
 0x177   : > { %v1248_v60 = vadd.f32 %v8142_v19, %v9494_v37  ;;  %v9628_v62 = vadd.f32 %v1496_v58, %v1245_v56  ;;  %v8176_v11 = vpop.f32.mrf.mxu1 }
 0x178   : > { %v9630_v38 = vpop.f32.mrf.mxu0 }
 0x179   : > { %v9632_v57 = vadd.f32 %v8176_v11, %v1248_v60  ;;  %v9634_v59 = vpop.f32.mrf.mxu1 }
 0x17a   : > { %v8181_v41 = vpop.f32.mrf.mxu0 }
 0x17b   : > { %v9637_v35 = vadd.f32 %v8181_v41, %v9506_v49  ;;  %v9639_v4 = vpop.f32.mrf.mxu1 }
 0x17c   : > { %v1678_v9 = vpop.f32.mrf.mxu0 }
 0x17d   : > { %v9642_v63 = vadd.f32 %v1678_v9, %v9509_v44  ;;  %v9644_v37 = vpop.f32.mrf.mxu1 }
 0x17e   : > { %v8182_v1 = vpop.f32.mrf.mxu0 }
 0x17f   : > { %v9647_v8 = vadd.f32 %v8182_v1, %v9514_v53  ;;  %v9649_v13 = vpop.f32.mrf.mxu1 }
 0x180   : > { %v9651_v22 = vpop.f32.mrf.mxu0 }
 0x181   : > { %v9653_v56 = vpop.f32.mrf.mxu1 }
 0x182   : > { %v8185_v49 = vpop.f32.mrf.mxu0 }
 0x183   : > { %v9728_v44 = vadd.f32 %v8185_v49, %v9524_v6  ;;  %v9730_v53 = vpop.f32.mrf.mxu1 }
 0x184   : > { %v1694_v58 = vpop.f32.mrf.mxu0 }
 0x185   : > { %v9733_v19 = vadd.f32 %v1694_v58, %v9527_v34  ;;  %v9735_v60 = vpop.f32.mrf.mxu1 }
 0x186   : > { %11661 = vst [vmem:[#allocation8_spill] sm:$0xff] %v9735_v60  ;;  %v8186_v11 = vpop.f32.mrf.mxu0 }
 0x187   : > { %11660 = vst [vmem:[#allocation7_spill] sm:$0xff] %v9733_v19  ;;  %v9774_v6 = vadd.f32 %v8186_v11, %v9532_v24  ;;  %v9776_v34 = vpop.f32.mrf.mxu1 }
 0x188   : > { %11663 = vst [vmem:[#allocation10_spill] sm:$0xff] %v9776_v34  ;;  %v9778_v41 = vpop.f32.mrf.mxu0 }
 0x189   : > { %11662 = vst [vmem:[#allocation9_spill] sm:$0xff] %v9774_v6  ;;  %v9780_v9 = vpop.f32.mrf.mxu1 }
 0x18a   : > { %11664 = vst [vmem:[#allocation11_spill] sm:$0xff] %v9780_v9  ;;  %v8189_v1 = vpop.f32.mrf.mxu0  ;;  %v3261_v9 = vld [vmem:[%s11652_s4] sm:$0xf] }
 0x18b   : > { %v9783_v49 = vadd.f32 %v8189_v1, %v9542_v55  ;;  %v9785_v58 = vpop.f32.mrf.mxu1  ;;  %8663 = vmatprep.subr.msk.bf16.mxu0 %vm3360_vm3, %v3261_v9  ;;  %v3574_v1 = vsel %vm3360_vm3, %v3261_v9, 0 }
 0x18c   : > { %11666 = vst [vmem:[#allocation13_spill] sm:$0xff] %v9785_v58  ;;  %v1710_v60 = vpop.f32.mrf.mxu0  ;;  %8382 = vmatpush3.bf16.msra.mxu0 %v3574_v1 }
 0x18d   : > { %11665 = vst [vmem:[#allocation12_spill] sm:$0xff] %v9783_v49  ;;  %v9788_v19 = vadd.f32 %v1710_v60, %v9545_v3  ;;  %v9790_v5 = vpop.f32.mrf.mxu1  ;;  %v3262_v3 = vld [vmem:[#allocation3 + $0x1] sm:$0xff]  ;;  %v3263_v60 = vld [vmem:[#allocation3 + $0x9] sm:$0xff] }
 0x18e   : > { %11668 = vst [vmem:[#allocation15_spill] sm:$0xff] %v9790_v5  ;;  %v8190_v24 = vpop.f32.mrf.mxu0 }
 0x18f   : > { %11667 = vst [vmem:[#allocation14_spill] sm:$0xff] %v9788_v19  ;;  %v9793_v11 = vadd.f32 %v8190_v24, %v9550_v33  ;;  %v9795_v34 = vpop.f32.mrf.mxu1  ;;  %v3213_v19 = vld [vmem:[#allocation3] sm:$0xff]  ;;  %v3294_v33 = vpack.c.bf16 %v3263_v60, %v3262_v3  ;;  %v3214_v24 = vld [vmem:[#allocation3 + $0x8] sm:$0xff] }
 0x190   : > { %11670 = vst [vmem:[#allocation17_spill] sm:$0xff] %v9795_v34  ;;  %v9800_v55 = vpop.f32.mrf.mxu0  ;;  %v3245_v34 = vpack.c.bf16 %v3214_v24, %v3213_v19 }
 0x191   : > { %11669 = vst [vmem:[#allocation16_spill] sm:$0xff] %v9793_v11  ;;  %11671 = vst [vmem:[#allocation18_spill] sm:$0xff] %v9800_v55  ;;  %v9804_v5 = vpop.f32.mrf.mxu1  ;;  %8349 = vmatprep.mubr.msk.bf16.mxu1 %vm3124_vm4, %v3294_v33 }
 0x192   : > { %v8193_v11 = vpop.f32.mrf.mxu0  ;;  %8383 = vmatprep.mubr.msk.bf16.mxu0 %vm3124_vm4, %v3245_v34 }
 0x193   : > { %v9807_v58 = vadd.f32 %v8193_v11, %v9564_v48  ;;  %v9809_v49 = vpop.f32.mrf.mxu1 }
 0x194   : > { %v1726_v6 = vpop.f32.mrf.mxu0 }
 0x195   : > { %v9814_v9 = vadd.f32 %v1726_v6, %v9567_v52  ;;  %v9816_v55 = vpop.f32.mrf.mxu1  ;;  %v9835_v52 = vld [vmem:[%s11652_s4 + $0x8] sm:$0xf] }
 0x196   : > { %v8194_v1 = vpop.f32.mrf.mxu0  ;;  %11677 = vst [vmem:[#allocation24_spill] sm:$0xff] %v9835_v52  ;;  %8664 = vmatprep.subr.msk.bf16.mxu1 %vm3360_vm3, %v9835_v52 }
 0x197   : > { %v9819_v3 = vadd.f32 %v8194_v1, %v9572_v28  ;;  %v9821_v19 = vpop.f32.mrf.mxu1 }
 0x198   : > { %11673 = vst [vmem:[#allocation20_spill] sm:$0xff] %v9821_v19  ;;  %v9823_v48 = vpop.f32.mrf.mxu0 }
 0x199   : > { %11672 = vst [vmem:[#allocation19_spill] sm:$0xff] %v9819_v3  ;;  %v9825_v11 = vpop.f32.mrf.mxu1 }
 0x19a   : > { %11674 = vst [vmem:[#allocation21_spill] sm:$0xff] %v9825_v11  ;;  %v8197_v60 = vpop.f32.mrf.mxu0 }
 0x19b   : > { %v9828_v33 = vadd.f32 %v8197_v60, %v9580_v51  ;;  %v9830_v34 = vpop.f32.mrf.mxu1 }
 0x19c   : > { %11676 = vst [vmem:[#allocation23_spill] sm:$0xff] %v9830_v34  ;;  %v1742_v6 = vpop.f32.mrf.mxu0 }
 0x19d   : > { %11675 = vst [vmem:[#allocation22_spill] sm:$0xff] %v9828_v33  ;;  %v9840_v28 = vadd.f32 %v1742_v6, %v9583_v42  ;;  %v9842_v24 = vpop.f32.mrf.mxu1 }
 0x19e   : > { %11679 = vst [vmem:[#allocation26_spill] sm:$0xff] %v9842_v24  ;;  %v8198_v1 = vpop.f32.mrf.mxu0 }
 0x19f   : > { %11678 = vst [vmem:[#allocation25_spill] sm:$0xff] %v9840_v28  ;;  %v9845_v51 = vadd.f32 %v8198_v1, %v9587_v21  ;;  %v9847_v60 = vpop.f32.mrf.mxu1 }
 0x1a0   : > { %11681 = vst [vmem:[#allocation28_spill] sm:$0xff] %v9847_v60  ;;  %v9849_v34 = vpop.f32.mrf.mxu0 }
 0x1a1   : > { %11680 = vst [vmem:[#allocation27_spill] sm:$0xff] %v9845_v51  ;;  %11682 = vst [vmem:[#allocation29_spill] sm:$0xff] %v9849_v34  ;;  %v9851_v33 = vpop.f32.mrf.mxu1 }
 0x1a2   : > { %11683 = vst [vmem:[#allocation30_spill] sm:$0xff] %v9851_v33  ;;  %v8201_v11 = vpop.f32.mrf.mxu0 }
 0x1a3   : > { %v9854_v19 = vadd.f32 %v8201_v11, %v9595_v25  ;;  %v9856_v52 = vpop.f32.mrf.mxu1 }
 0x1a4   : > { %11685 = vst [vmem:[#allocation32_spill] sm:$0xff] %v9856_v52  ;;  %v1758_v42 = vpop.f32.mrf.mxu0 }
 0x1a5   : > { %11684 = vst [vmem:[#allocation31_spill] sm:$0xff] %v9854_v19  ;;  %v9859_v6 = vadd.f32 %v1758_v42, %v9598_v20  ;;  %v9861_v24 = vpop.f32.mrf.mxu1 }
 0x1a6   : > { %11687 = vst [vmem:[#allocation34_spill] sm:$0xff] %v9861_v24  ;;  %v8202_v21 = vpop.f32.mrf.mxu0 }
 0x1a7   : > { %11686 = vst [vmem:[#allocation33_spill] sm:$0xff] %v9859_v6  ;;  %v9864_v1 = vadd.f32 %v8202_v21, %v9602_v16  ;;  %v9866_v60 = vpop.f32.mrf.mxu1 }
 0x1a8   : > { %11689 = vst [vmem:[#allocation36_spill] sm:$0xff] %v9866_v60  ;;  %v9868_v51 = vpop.f32.mrf.mxu0 }
 0x1a9   : > { %11688 = vst [vmem:[#allocation35_spill] sm:$0xff] %v9864_v1  ;;  %11690 = vst [vmem:[#allocation37_spill] sm:$0xff] %v9868_v51  ;;  %v9870_v33 = vpop.f32.mrf.mxu1 }
 0x1aa   : > { %11691 = vst [vmem:[#allocation38_spill] sm:$0xff] %v9870_v33  ;;  %v8205_v25 = vpop.f32.mrf.mxu0 }
 0x1ab   : > { %v9873_v11 = vadd.f32 %v8205_v25, %v9611_v10  ;;  %v9875_v52 = vpop.f32.mrf.mxu1 }
 0x1ac   : > { %11693 = vst [vmem:[#allocation40_spill] sm:$0xff] %v9875_v52  ;;  %v1774_v20 = vpop.f32.mrf.mxu0 }
 0x1ad   : > { %11692 = vst [vmem:[#allocation39_spill] sm:$0xff] %v9873_v11  ;;  %v9878_v42 = vadd.f32 %v1774_v20, %v9614_v36  ;;  %v9880_v24 = vpop.f32.mrf.mxu1  ;;  %v9941_v11 = vld [vmem:[%s11652_s4 + $0xc] sm:$0xf] }
 0x1ae   : > { %11695 = vst [vmem:[#allocation42_spill] sm:$0xff] %v9880_v24  ;;  %v8206_v16 = vpop.f32.mrf.mxu0  ;;  %11712 = vst [vmem:[#allocation59_spill] sm:$0xff] %v9941_v11  ;;  %8665 = vmatprep.subr.msk.bf16.mxu0 %vm3360_vm3, %v9941_v11 }
 0x1af   : > { %11694 = vst [vmem:[#allocation41_spill] sm:$0xff] %v9878_v42  ;;  %v9883_v21 = vadd.f32 %v8206_v16, %v9618_v0  ;;  %v9885_v60 = vpop.f32.mrf.mxu1 }
 0x1b0   : > { %11697 = vst [vmem:[#allocation44_spill] sm:$0xff] %v9885_v60  ;;  %v9887_v1 = vpop.f32.mrf.mxu0 }
 0x1b1   : > { %11696 = vst [vmem:[#allocation43_spill] sm:$0xff] %v9883_v21  ;;  %11698 = vst [vmem:[#allocation45_spill] sm:$0xff] %v9887_v1  ;;  %v9889_v33 = vpop.f32.mrf.mxu1 }
 0x1b2   : > { %11699 = vst [vmem:[#allocation46_spill] sm:$0xff] %v9889_v33  ;;  %v8209_v10 = vpop.f32.mrf.mxu0 }
 0x1b3   : > { %v9892_v25 = vadd.f32 %v8209_v10, %v9625_v39  ;;  %v9894_v52 = vpop.f32.mrf.mxu1 }
 0x1b4   : > { %11701 = vst [vmem:[#allocation48_spill] sm:$0xff] %v9894_v52  ;;  %v1790_v36 = vpop.f32.mrf.mxu0 }
 0x1b5   : > { %11700 = vst [vmem:[#allocation47_spill] sm:$0xff] %v9892_v25  ;;  %v9897_v20 = vadd.f32 %v1790_v36, %v9628_v62  ;;  %v9899_v24 = vpop.f32.mrf.mxu1 }
 0x1b6   : > { %11703 = vst [vmem:[#allocation50_spill] sm:$0xff] %v9899_v24  ;;  %v8210_v0 = vpop.f32.mrf.mxu0 }
 0x1b7   : > { %11702 = vst [vmem:[#allocation49_spill] sm:$0xff] %v9897_v20  ;;  %v9902_v16 = vadd.f32 %v8210_v0, %v9632_v57  ;;  %v9904_v60 = vpop.f32.mrf.mxu1 }
 0x1b8   : > { %11705 = vst [vmem:[#allocation52_spill] sm:$0xff] %v9904_v60  ;;  %v9906_v21 = vpop.f32.mrf.mxu0 }
 0x1b9   : > { %11704 = vst [vmem:[#allocation51_spill] sm:$0xff] %v9902_v16  ;;  %11706 = vst [vmem:[#allocation53_spill] sm:$0xff] %v9906_v21  ;;  %v9908_v33 = vpop.f32.mrf.mxu1 }
 0x1ba   : > { %11707 = vst [vmem:[#allocation54_spill] sm:$0xff] %v9908_v33  ;;  %v8249_v39 = vpop.f32.mrf.mxu0 }
 0x1bb   : > { %v9910_v10 = vpop.f32.mrf.mxu1 }
 0x1bc   : > { %v2267_v52 = vpop.f32.mrf.mxu0 }
 0x1bd   : > { %v9912_v25 = vpop.f32.mrf.mxu1 }
 0x1be   : > { %v9914_v62 = vpop.f32.mrf.mxu0 }
 0x1bf   : > { %v9916_v36 = vpop.f32.mrf.mxu1 }
 0x1c0   : > { %v9918_v24 = vpop.f32.mrf.mxu0 }
 0x1c1   : > { %v9922_v0 = vpop.f32.mrf.mxu1 }
 0x1c2   : > { %v9920_v57 = vpop.f32.mrf.mxu0 }
 0x1c3   : > { %v9928_v33 = vpop.f32.mrf.mxu1 }
 0x1c4   : > { %v9924_v60 = vpop.f32.mrf.mxu0 }
 0x1c5   : > { %v9934_v42 = vpop.f32.mrf.mxu1 }
 0x1c6   : > { %v9926_v16 = vpop.f32.mrf.mxu0  ;;  %11710 = vst [vmem:[#allocation57_spill] sm:$0xff] %v9934_v42 }
 0x1c7   : > { %v9947_v51 = vpop.f32.mrf.mxu1 }
 0x1c8   : > { %v9930_v21 = vpop.f32.mrf.mxu0  ;;  %11714 = vst [vmem:[#allocation61_spill] sm:$0xff] %v9947_v51 }
 0x1c9   : > { %11708 = vst [vmem:[#allocation55_spill] sm:$0xff] %v9930_v21 }
 0x1ca   : > { %v9932_v20 = vpop.f32.mrf.mxu0 }
 0x1cb   : > { %11709 = vst [vmem:[#allocation56_spill] sm:$0xff] %v9932_v20  ;;  %v9953_v20 = vpop.f32.mrf.mxu1 }
 0x1cc   : > { %v9936_v1 = vpop.f32.mrf.mxu0  ;;  %11717 = vst [vmem:[#allocation64_spill] sm:$0xff] %v9953_v20 }
 0x1cd   : > { %11711 = vst [vmem:[#allocation58_spill] sm:$0xff] %v9936_v1  ;;  %v9959_v21 = vpop.f32.mrf.mxu1 }
 0x1ce   : > { %v9943_v6 = vpop.f32.mrf.mxu0  ;;  %11720 = vst [vmem:[#allocation67_spill] sm:$0xff] %v9959_v21 }
 0x1cf   : > { %11713 = vst [vmem:[#allocation60_spill] sm:$0xff] %v9943_v6  ;;  %v9965_v3 = vpop.f32.mrf.mxu1 }
 0x1d0   : > { %v9949_v19 = vpop.f32.mrf.mxu0  ;;  %11723 = vst [vmem:[#allocation70_spill] sm:$0xff] %v9965_v3 }
 0x1d1   : > { %11715 = vst [vmem:[#allocation62_spill] sm:$0xff] %v9949_v19  ;;  %v9971_v19 = vpop.f32.mrf.mxu1 }
 0x1d2   : > { %v9951_v28 = vpop.f32.mrf.mxu0  ;;  %11726 = vst [vmem:[#allocation73_spill] sm:$0xff] %v9971_v19 }
 0x1d3   : > { %11716 = vst [vmem:[#allocation63_spill] sm:$0xff] %v9951_v28 }
 0x1d4   : > { %v9955_v34 = vpop.f32.mrf.mxu0 }
 0x1d5   : > { %11718 = vst [vmem:[#allocation65_spill] sm:$0xff] %v9955_v34  ;;  %v9977_v34 = vpop.f32.mrf.mxu1 }
 0x1d6   : > { %v9957_v1 = vpop.f32.mrf.mxu0 }
 0x1d7   : > { %11719 = vst [vmem:[#allocation66_spill] sm:$0xff] %v9957_v1 }
 0x1d8   : > { %v9961_v42 = vpop.f32.mrf.mxu0 }
 0x1d9   : > { %11721 = vst [vmem:[#allocation68_spill] sm:$0xff] %v9961_v42  ;;  %v9983_v42 = vpop.f32.mrf.mxu1 }
 0x1da   : > { %v9963_v6 = vpop.f32.mrf.mxu0 }
 0x1db   : > { %11722 = vst [vmem:[#allocation69_spill] sm:$0xff] %v9963_v6 }
 0x1dc   : > { %v9967_v11 = vpop.f32.mrf.mxu0 }
 0x1dd   : > { %11724 = vst [vmem:[#allocation71_spill] sm:$0xff] %v9967_v11  ;;  %v9989_v11 = vpop.f32.mrf.mxu1 }
 0x1de   : > { %v9969_v51 = vpop.f32.mrf.mxu0  ;;  %11733 = vst [vmem:[#allocation80_spill] sm:$0xff] %v9989_v11 }
 0x1df   : > { %11725 = vst [vmem:[#allocation72_spill] sm:$0xff] %v9969_v51 }
 0x1e0   : > { %v9973_v28 = vpop.f32.mrf.mxu0 }
 0x1e1   : > { %11727 = vst [vmem:[#allocation74_spill] sm:$0xff] %v9973_v28  ;;  %v9995_v28 = vpop.f32.mrf.mxu1 }
 0x1e2   : > { %v9975_v20 = vpop.f32.mrf.mxu0 }
 0x1e3   : > { %11728 = vst [vmem:[#allocation75_spill] sm:$0xff] %v9975_v20  ;;  %v10009_v11 = vpop.f32.mrf.mxu1 }
 0x1e4   : > { %v9979_v1 = vpop.f32.mrf.mxu0 }
 0x1e5   : > { %11729 = vst [vmem:[#allocation76_spill] sm:$0xff] %v9979_v1  ;;  %v896_v1 = vadd.f32 %v9448_v26, %v9446_v15 }
 0x1e6   : > { %v9981_v21 = vpop.f32.mrf.mxu0 }
 0x1e7   : > { %11730 = vst [vmem:[#allocation77_spill] sm:$0xff] %v9981_v21  ;;  %v1234_v15 = vadd.f32 %v9585_v31, %v896_v1 }
 0x1e8   : > { %v9985_v6 = vpop.f32.mrf.mxu0 }
 0x1e9   : > { %11731 = vst [vmem:[#allocation78_spill] sm:$0xff] %v9985_v6  ;;  %v912_v6 = vadd.f32 %v9466_v47, %v9464_v30  ;;  %v2099_v47 = vadd.f32 %v9644_v37, %v9642_v63  ;;  %v1524_v63 = vadd.f32 %v9574_v12, %v9570_v14  ;;  %v2105_v14 = vadd.f32 %v9730_v53, %v9728_v44  ;;  %v11737_v12 = vld [vmem:[#allocation18_spill] sm:$0xff] }
 0x1ea   : > { %v9987_v3 = vpop.f32.mrf.mxu0  ;;  %v11741_v44 = vld [vmem:[#allocation10_spill] sm:$0xff] }
 0x1eb   : > { %11732 = vst [vmem:[#allocation79_spill] sm:$0xff] %v9987_v3  ;;  %v1512_v3 = vadd.f32 %v9516_v43, %v9512_v2  ;;  %v1238_v30 = vadd.f32 %v9600_v17, %v912_v6  ;;  %v2394_v31 = vadd.f32 %v2267_v52, %v2099_v47  ;;  %v10030_v17 = vpop.f32.mrf.mxu1  ;;  %v11742_v6 = vld [vmem:[#allocation11_spill] sm:$0xff] }
 0x1ec   : > { %v9991_v51 = vpop.f32.mrf.mxu0 }
 0x1ed   : > { %11734 = vst [vmem:[#allocation81_spill] sm:$0xff] %v9991_v51  ;;  %v2101_v51 = vadd.f32 %v9639_v4, %v9637_v35  ;;  %v1806_v2 = vadd.f32 %v9651_v22, %v1512_v3  ;;  %v1516_v35 = vadd.f32 %v9534_v32, %v9530_v18  ;;  %v1520_v4 = vadd.f32 %v9552_v23, %v9548_v7 }
 0x1ee   : > { %v9993_v19 = vpop.f32.mrf.mxu0  ;;  %v1528_v18 = vadd.f32 %v9589_v50, %v1234_v15  ;;  %v10075_v15 = vld [vmem:[%s11651_s3] ss:$0 sm:$0xff] }
 0x1ef   : > { %11735 = vst [vmem:[#allocation82_spill] sm:$0xff] %v9993_v19  ;;  %v928_v19 = vadd.f32 %v9484_v61, %v9482_v27  ;;  %v2396_v43 = vadd.f32 %v8249_v39, %v2101_v51  ;;  %v1810_v32 = vadd.f32 %v9778_v41, %v1516_v35  ;;  %v2100_v37 = vadd.f32 %v9653_v56, %v1806_v2  ;;  %v11738_v56 = vld [vmem:[#allocation7_spill] sm:$0xff]  ;;  %v11739_v41 = vld [vmem:[#allocation8_spill] sm:$0xff]  ;;  %v11740_v51 = vld [vmem:[#allocation9_spill] sm:$0xff] }
 0x1f0   : > { %v9997_v20 = vpop.f32.mrf.mxu0  ;;  %v1814_v50 = vadd.f32 %v11737_v12, %v1520_v4  ;;  %v2103_v3 = vadd.f32 %v11739_v41, %v11738_v56  ;;  %v2106_v53 = vadd.f32 %v11741_v44, %v11740_v51  ;;  %v11744_v39 = vld [vmem:[#allocation13_spill] sm:$0xff]  ;;  %v10095_v12 = vadd.f32 %v9809_v49, %v9807_v58  ;;  %v11749_v41 = vld [vmem:[#allocation19_spill] sm:$0xff] }
 0x1f1   : > { %11736 = vst [vmem:[#allocation83_spill] sm:$0xff] %v9997_v20  ;;  %v944_v20 = vadd.f32 %v9498_v54, %v9496_v40  ;;  %v1242_v27 = vadd.f32 %v9616_v46, %v928_v19  ;;  %v2102_v54 = vadd.f32 %v9649_v13, %v9647_v8  ;;  %v2690_v8 = vadd.f32 %v9910_v10, %v2396_v43  ;;  %v11751_v49 = vld [vmem:[#allocation21_spill] sm:$0xff] }
 0x1f2   : > { %v10001_v21 = vpop.f32.mrf.mxu0  ;;  %v2395_v19 = vadd.f32 %v9918_v24, %v2100_v37  ;;  %v2104_v1 = vadd.f32 %v11742_v6, %v1810_v32  ;;  %v11745_v24 = vld [vmem:[#allocation14_spill] sm:$0xff]  ;;  %v2398_v4 = vadd.f32 %v9924_v60, %v2103_v3  ;;  %v2401_v60 = vadd.f32 %v9926_v16, %v2106_v53  ;;  %v11750_v3 = vld [vmem:[#allocation20_spill] sm:$0xff] }
 0x1f3   : > { %v1246_v61 = vadd.f32 %v9630_v38, %v944_v20  ;;  %v10041_v38 = vadd.f32 %v9604_v29, %v1238_v30  ;;  %v2397_v13 = vadd.f32 %v9914_v62, %v2102_v54  ;;  %v10047_v7 = vadd.f32 %v9620_v45, %v1242_v27  ;;  %v10058_v29 = vld [vmem:[%s11650_s2] ss:$0 sm:$0xff]  ;;  %v11743_v20 = vld [vmem:[#allocation12_spill] sm:$0xff] }
 0x1f4   : > { %v10016_v26 = vpop.f32.mrf.mxu0  ;;  %v2688_v45 = vadd.f32 %v9912_v25, %v2394_v31  ;;  %v2109_v10 = vadd.f32 %v11744_v39, %v11743_v20  ;;  %v2400_v62 = vadd.f32 %v9920_v57, %v2105_v14  ;;  %v11746_v30 = vld [vmem:[#allocation15_spill] sm:$0xff]  ;;  %v11747_v27 = vld [vmem:[#allocation16_spill] sm:$0xff]  ;;  %v10084_v31 = vadd.f32 %v9804_v5, %v1814_v50  ;;  %v11754_v20 = vld [vmem:[#allocation29_spill] sm:$0xff] }
 0x1f5   : > { %v10050_v23 = vadd.f32 %v9634_v59, %v1246_v61  ;;  %v10064_v59 = vpop.f32.mrf.mxu1  ;;  %v2107_v47 = vadd.f32 %v11746_v30, %v11745_v24  ;;  %v2691_v2 = vadd.f32 %v9916_v36, %v2397_v13  ;;  %v11748_v61 = vld [vmem:[#allocation17_spill] sm:$0xff]  ;;  %v1818_v57 = vadd.f32 %v9823_v48, %v1524_v63  ;;  %v11756_v24 = vld [vmem:[#allocation56_spill] sm:$0xff] }
 0x1f6   : > { %v10026_v40 = vpop.f32.mrf.mxu0  ;;  %v2110_v54 = vadd.f32 %v11748_v61, %v11747_v27  ;;  %v2689_v37 = vadd.f32 %v9922_v0, %v2395_v19  ;;  %v10099_v5 = vadd.f32 %v9816_v55, %v9814_v9  ;;  %v2694_v48 = vadd.f32 %v9928_v33, %v2400_v62  ;;  %v11752_v55 = vld [vmem:[#allocation57_spill] sm:$0xff]  ;;  %v11753_v19 = vld [vmem:[#allocation55_spill] sm:$0xff] }
 0x1f7   : > { %v10110_v58 = vadd.f32 %v11751_v49, %v1818_v57  ;;  %v2692_v9 = vadd.f32 %v11752_v55, %v2398_v4  ;;  %v2399_v33 = vadd.f32 %v11753_v19, %v2104_v1  ;;  %v1822_v39 = vadd.f32 %v11754_v20, %v1528_v18  ;;  %v11755_v62 = vld [vmem:[#allocation61_spill] sm:$0xff]  ;;  %v11758_v4 = vld [vmem:[#allocation22_spill] sm:$0xff]  ;;  %v11765_v49 = vld [vmem:[#allocation28_spill] sm:$0xff] }
 0x1f8   : > { %v10038_v46 = vpop.f32.mrf.mxu0  ;;  %v2404_v30 = vadd.f32 %v11756_v24, %v2109_v10  ;;  %v11770_v24 = vld [vmem:[#allocation32_spill] sm:$0xff] }
 0x1fa   : > { %v8317_v22 = vpop.f32.mrf.mxu0 }
 0x1fb   : > { %v2984_v52 = vadd.f32 %v8317_v22, %v2690_v8  ;;  %v10089_v8 = vpop.f32.mrf.mxu1 }
 0x1fc   : > { %v2855_v25 = vpop.f32.mrf.mxu0 }
 0x1fd   : > { %v3023_v43 = vmul.f32 %v10058_v29, %v2984_v52  ;;  %v2982_v35 = vadd.f32 %v2855_v25, %v2688_v45  ;;  %v10107_v45 = vadd.f32 %v11750_v3, %v11749_v41  ;;  %v10114_v16 = vpop.f32.mrf.mxu1  ;;  %v2695_v25 = vadd.f32 %v11755_v62, %v2401_v60  ;;  %v11764_v3 = vld [vmem:[#allocation27_spill] sm:$0xff] }
 0x1fe   : > { %v8318_v32 = vpop.f32.mrf.mxu0  ;;  %v10146_v55 = vadd.f32 %v11765_v49, %v11764_v3 }
 0x1ff   : > { %v3062_v36 = vadd.f32 %v10075_v15, %v3023_v43  ;;  %v3021_v13 = vmul.f32 %v10058_v29, %v2982_v35  ;;  %v2985_v14 = vadd.f32 %v8318_v32, %v2691_v2  ;;  %v11757_v43 = vld [vmem:[#allocation24_spill] sm:$0xff]  ;;  %v11759_v32 = vld [vmem:[#allocation23_spill] sm:$0xff] }
 0x200   : > { %v2858_v0 = vpop.f32.mrf.mxu0  ;;  %v10124_v1 = vsel %vm3360_vm3, %v11757_v43, 0  ;;  %v10131_v18 = vadd.f32 %v11759_v32, %v11758_v4 }
 0x201   : > { %v3094_v63 = vmax.f32 %v3062_v36, 0.0  ;;  %v3060_v50 = vadd.f32 %v10075_v15, %v3021_v13  ;;  %v3024_v22 = vmul.f32 %v10058_v29, %v2985_v14  ;;  %v2983_v56 = vadd.f32 %v2858_v0, %v2689_v37  ;;  %v11760_v37 = vld [vmem:[#allocation25_spill] sm:$0xff]  ;;  %v11761_v36 = vld [vmem:[#allocation26_spill] sm:$0xff]  ;;  %v11762_v13 = vld [vmem:[#allocation64_spill] sm:$0xff] }
 0x202   : > { %v8321_v52 = vpop.f32.mrf.mxu0  ;;  %v10135_v10 = vadd.f32 %v11761_v36, %v11760_v37  ;;  %v2693_v14 = vadd.f32 %v11762_v13, %v2399_v33  ;;  %v11767_v33 = vld [vmem:[#allocation67_spill] sm:$0xff]  ;;  %v11774_v13 = vld [vmem:[#allocation33_spill] sm:$0xff] }
 0x203   : > { %3183 = vst.msk [vmem:[#allocation3 + $0x31] sm:$0xff] %vm3124_vm4, %v3094_v63  ;;  %v3092_v51 = vmax.f32 %v3060_v50, 0.0  ;;  %v3063_v44 = vadd.f32 %v10075_v15, %v3024_v22  ;;  %v3022_v53 = vmul.f32 %v10058_v29, %v2983_v56  ;;  %v2988_v6 = vadd.f32 %v8321_v52, %v2694_v48  ;;  %v11763_v48 = vld [vmem:[#allocation58_spill] sm:$0xff]  ;;  %v10139_v63 = vpop.f32.mrf.mxu1  ;;  %v11768_v52 = vld [vmem:[#allocation60_spill] sm:$0xff] }
 0x204   : > { %v2871_v2 = vpop.f32.mrf.mxu0  ;;  %v2402_v60 = vadd.f32 %v11763_v48, %v2107_v47  ;;  %v2698_v47 = vadd.f32 %v11767_v33, %v2404_v30  ;;  %v11779_v33 = vld [vmem:[#allocation35_spill] sm:$0xff] }
 0x205   : > { %3181 = vst.msk [vmem:[#allocation3 + $0x19] sm:$0xff] %vm3124_vm4, %v3092_v51  ;;  %v3095_v35 = vmax.f32 %v3063_v44, 0.0  ;;  %v3061_v27 = vadd.f32 %v10075_v15, %v3022_v53  ;;  %v3027_v61 = vmul.f32 %v10058_v29, %v2988_v6  ;;  %v2986_v57 = vadd.f32 %v2871_v2, %v2692_v9  ;;  %v11766_v9 = vld [vmem:[#allocation30_spill] sm:$0xff] }
 0x206   : > { %v8322_v0 = vpop.f32.mrf.mxu0  ;;  %v10149_v19 = vadd.f32 %v11766_v9, %v1822_v39  ;;  %v2405_v51 = vadd.f32 %v11768_v52, %v2110_v54  ;;  %v11771_v39 = vld [vmem:[#allocation37_spill] sm:$0xff]  ;;  %v11773_v54 = vld [vmem:[#allocation62_spill] sm:$0xff] }
 0x207   : > { %3184 = vst.msk [vmem:[#allocation3 + $0x39] sm:$0xff] %vm3124_vm4, %v3095_v35  ;;  %v3093_v50 = vmax.f32 %v3061_v27, 0.0  ;;  %v3066_v22 = vadd.f32 %v10075_v15, %v3027_v61  ;;  %v3025_v56 = vmul.f32 %v10058_v29, %v2986_v57  ;;  %v2989_v41 = vadd.f32 %v8322_v0, %v2695_v25  ;;  %v11769_v25 = vld [vmem:[#allocation31_spill] sm:$0xff]  ;;  %v11772_v35 = vld [vmem:[#allocation70_spill] sm:$0xff]  ;;  %v10165_v57 = vpop.f32.mrf.mxu1 }
 0x208   : > { %v2874_v44 = vpop.f32.mrf.mxu0  ;;  %v10158_v2 = vadd.f32 %v11770_v24, %v11769_v25  ;;  %v1826_v43 = vadd.f32 %v11771_v39, %v10041_v38  ;;  %v2696_v30 = vadd.f32 %v11772_v35, %v2402_v60  ;;  %v2403_v27 = vadd.f32 %v11773_v54, %v10084_v31  ;;  %v11776_v38 = vld [vmem:[#allocation73_spill] sm:$0xff]  ;;  %v11777_v0 = vld [vmem:[#allocation63_spill] sm:$0xff] }
 0x209   : > { %3182 = vst.msk [vmem:[#allocation3 + $0x21] sm:$0xff] %vm3124_vm4, %v3093_v50  ;;  %v3098_v53 = vmax.f32 %v3066_v22, 0.0  ;;  %v3064_v6 = vadd.f32 %v10075_v15, %v3025_v56  ;;  %v3028_v20 = vmul.f32 %v10058_v29, %v2989_v41  ;;  %v2987_v62 = vadd.f32 %v2874_v44, %v2693_v14  ;;  %v11775_v14 = vld [vmem:[#allocation34_spill] sm:$0xff]  ;;  %v11778_v50 = vld [vmem:[#allocation65_spill] sm:$0xff] }
 0x20a   : > { %v8325_v61 = vpop.f32.mrf.mxu0  ;;  %v10172_v48 = vadd.f32 %v11775_v14, %v11774_v13  ;;  %v2699_v60 = vadd.f32 %v11776_v38, %v2405_v51  ;;  %v2408_v31 = vadd.f32 %v11777_v0, %v10095_v12  ;;  %v2406_v22 = vadd.f32 %v11778_v50, %v10099_v5  ;;  %v11781_v51 = vld [vmem:[#allocation38_spill] sm:$0xff] }
 0x20b   : > { %3187 = vst.msk [vmem:[#allocation3 + $0x61] sm:$0xff] %vm3124_vm4, %v3098_v53  ;;  %v3096_v4 = vmax.f32 %v3064_v6, 0.0  ;;  %v3067_v32 = vadd.f32 %v10075_v15, %v3028_v20  ;;  %v3026_v37 = vmul.f32 %v10058_v29, %v2987_v62  ;;  %v2992_v36 = vadd.f32 %v8325_v61, %v2698_v47  ;;  %v11780_v47 = vld [vmem:[#allocation36_spill] sm:$0xff]  ;;  %v11782_v5 = vld [vmem:[#allocation66_spill] sm:$0xff]  ;;  %v10192_v20 = vpop.f32.mrf.mxu1 }
 0x20c   : > { %v2887_v56 = vpop.f32.mrf.mxu0  ;;  %v10184_v52 = vadd.f32 %v11780_v47, %v11779_v33  ;;  %v10187_v44 = vadd.f32 %v11781_v51, %v1826_v43  ;;  %v2697_v12 = vadd.f32 %v9977_v34, %v2403_v27  ;;  %v2409_v53 = vadd.f32 %v11782_v5, %v10107_v45  ;;  %v11784_v34 = vld [vmem:[#allocation68_spill] sm:$0xff]  ;;  %v3217_v51 = vld [vmem:[#allocation3 + $0x30] sm:$0xff] }
 0x20d   : > { %3185 = vst.msk [vmem:[#allocation3 + $0x49] sm:$0xff] %vm3124_vm4, %v3096_v4  ;;  %v3099_v41 = vmax.f32 %v3067_v32, 0.0  ;;  %v3065_v3 = vadd.f32 %v10075_v15, %v3026_v37  ;;  %v3031_v49 = vmul.f32 %v10058_v29, %v2992_v36  ;;  %v2990_v9 = vadd.f32 %v2887_v56, %v2696_v30  ;;  %v11783_v30 = vld [vmem:[#allocation80_spill] sm:$0xff]  ;;  %v11785_v37 = vld [vmem:[#allocation59_spill] sm:$0xff] }
 0x20e   : > { %v8326_v6 = vpop.f32.mrf.mxu0  ;;  %v3267_v35 = vld [vmem:[#allocation3 + $0x39] sm:$0xff]  ;;  %v2702_v43 = vadd.f32 %v9983_v42, %v2408_v31  ;;  %v2700_v54 = vadd.f32 %v11783_v30, %v2406_v22  ;;  %v2407_v27 = vadd.f32 %v11784_v34, %v10110_v58  ;;  %v3266_v32 = vld [vmem:[#allocation3 + $0x31] sm:$0xff]  ;;  %v4130_v36 = vsel %vm3360_vm3, %v11785_v37, 0 }
 0x20f   : > { %3188 = vst.msk [vmem:[#allocation3 + $0x69] sm:$0xff] %vm3124_vm4, %v3099_v41  ;;  %v3097_v62 = vmax.f32 %v3065_v3, 0.0  ;;  %v3070_v25 = vadd.f32 %v10075_v15, %v3031_v49  ;;  %v3029_v24 = vmul.f32 %v10058_v29, %v2990_v9  ;;  %v2993_v39 = vadd.f32 %v8326_v6, %v2699_v60  ;;  %v3264_v60 = vld [vmem:[#allocation3 + $0x19] sm:$0xff]  ;;  %v10213_v3 = vpop.f32.mrf.mxu1  ;;  %v11787_v5 = vld [vmem:[#allocation71_spill] sm:$0xff] }
 0x210   : > { %v2890_v45 = vpop.f32.mrf.mxu0  ;;  %v3265_v61 = vld [vmem:[#allocation3 + $0x21] sm:$0xff]  ;;  %v3215_v0 = vld [vmem:[#allocation3 + $0x18] sm:$0xff]  ;;  %v2703_v58 = vadd.f32 %v9995_v28, %v2409_v53  ;;  %v10211_v41 = vpack.c.bf16 %v3267_v35, %v3266_v32  ;;  %v2410_v53 = vadd.f32 %v11787_v5, %v10135_v10 }
 0x211   : > { %v3216_v4 = vld [vmem:[#allocation3 + $0x20] sm:$0xff]  ;;  %3186 = vst.msk [vmem:[#allocation3 + $0x51] sm:$0xff] %vm3124_vm4, %v3097_v62  ;;  %v3102_v13 = vmax.f32 %v3070_v25, 0.0  ;;  %v3068_v14 = vadd.f32 %v10075_v15, %v3029_v24  ;;  %v3032_v38 = vmul.f32 %v10058_v29, %v2993_v39  ;;  %v2991_v42 = vadd.f32 %v2890_v45, %v2697_v12  ;;  %v3218_v31 = vld [vmem:[#allocation3 + $0x38] sm:$0xff]  ;;  %v10253_v37 = vpop.f32.mrf.mxu1 }
 0x212   : > { %v8329_v50 = vpop.f32.mrf.mxu0  ;;  %v10207_v22 = vpack.c.bf16 %v3265_v61, %v3264_v60  ;;  %v10209_v56 = vpack.c.bf16 %v3216_v4, %v3215_v0  ;;  %v11786_v28 = vld [vmem:[#allocation69_spill] sm:$0xff]  ;;  %v10226_v62 = vpack.c.bf16 %v3218_v31, %v3217_v51  ;;  %v11789_v30 = vld [vmem:[#allocation40_spill] sm:$0xff]  ;;  %v2701_v4 = vadd.f32 %v10009_v11, %v2407_v27  ;;  %v11792_v60 = vld [vmem:[#allocation74_spill] sm:$0xff] }
 0x213   : > { %3191 = vst.msk [vmem:[#allocation3 + $0x91] sm:$0xff] %vm3124_vm4, %v3102_v13  ;;  %v3100_v49 = vmax.f32 %v3068_v14, 0.0  ;;  %v3071_v9 = vadd.f32 %v10075_v15, %v3032_v38  ;;  %v3030_v33 = vmul.f32 %v10058_v29, %v2991_v42  ;;  %v2996_v47 = vadd.f32 %v8329_v50, %v2702_v43  ;;  %v10231_v25 = vld [vmem:[%s11652_s4 + $0x10] sm:$0xf]  ;;  %v11788_v43 = vld [vmem:[#allocation39_spill] sm:$0xff] }
 0x214   : > { %v2412_v12 = vadd.f32 %v11786_v28, %v10131_v18  ;;  %8350 = vmatmul.mubr.msk.bf16.vlgmr.msra.gmra.mxu1 %vm3124_vm4, %v10207_v22  ;;  %8384 = vmatmul.mubr.msk.bf16.vlgmr.msra.gmra.mxu0 %vm3124_vm4, %v10209_v56  ;;  %v2903_v6 = vpop.f32.mrf.mxu0  ;;  %v10236_v18 = vld [vmem:[%s11652_s4 + $0x14] sm:$0xf]  ;;  %v10246_v34 = vadd.f32 %v11789_v30, %v11788_v43  ;;  %v2411_v0 = vadd.f32 %v11792_v60, %v10149_v19  ;;  %v3268_v51 = vld [vmem:[#allocation3 + $0x49] sm:$0xff] }
 0x215   : > { %3189 = vst.msk [vmem:[#allocation3 + $0x79] sm:$0xff] %vm3124_vm4, %v3100_v49  ;;  %v3103_v10 = vmax.f32 %v3071_v9, 0.0  ;;  %v3069_v24 = vadd.f32 %v10075_v15, %v3030_v33  ;;  %v3035_v39 = vmul.f32 %v10058_v29, %v2996_v47  ;;  %8416 = vmatpush3.bf16.msra.mxu1 %v10124_v1  ;;  %v2994_v35 = vadd.f32 %v2903_v6, %v2700_v54  ;;  %v11790_v45 = vld [vmem:[#allocation45_spill] sm:$0xff]  ;;  %v3219_v28 = vld [vmem:[#allocation3 + $0x48] sm:$0xff]  ;;  %v10279_v6 = vpop.f32.mrf.mxu1  ;;  %v11793_v30 = vld [vmem:[#allocation75_spill] sm:$0xff] }
 0x216   : > { %8353 = vmatprep.mubr.msk.bf16.mxu1 %vm3124_vm4, %v10211_v41  ;;  %v1830_v61 = vadd.f32 %v11790_v45, %v10047_v7  ;;  %8387 = vmatprep.mubr.msk.bf16.mxu0 %vm3124_vm4, %v10226_v62  ;;  %v8330_v32 = vpop.f32.mrf.mxu0  ;;  %v3271_v38 = vld [vmem:[#allocation3 + $0x69] sm:$0xff]  ;;  %v2706_v11 = vadd.f32 %v10030_v17, %v2412_v12  ;;  %v11791_v7 = vld [vmem:[#allocation72_spill] sm:$0xff]  ;;  %v3270_v49 = vld [vmem:[#allocation3 + $0x61] sm:$0xff]  ;;  %v2416_v45 = vadd.f32 %v11793_v30, %v10158_v2 }
 0x217   : > { %8450 = vmatpush3.bf16.msra.mxu0 %v4130_v36  ;;  %3192 = vst.msk [vmem:[#allocation3 + $0x99] sm:$0xff] %vm3124_vm4, %v3103_v10  ;;  %v3101_v1 = vmax.f32 %v3069_v24, 0.0  ;;  %v3074_v54 = vadd.f32 %v10075_v15, %v3035_v39  ;;  %v3033_v13 = vmul.f32 %v10058_v29, %v2994_v35  ;;  %v2997_v14 = vadd.f32 %v8330_v32, %v2703_v58  ;;  %v3222_v42 = vld [vmem:[#allocation3 + $0x68] sm:$0xff]  ;;  %v11795_v2 = vld [vmem:[#allocation41_spill] sm:$0xff] }
 0x218   : > { %8666 = vmatprep.subr.msk.bf16.mxu1 %vm3360_vm3, %v10231_v25  ;;  %8667 = vmatprep.subr.msk.bf16.mxu0 %vm3360_vm3, %v10236_v18  ;;  %v2413_v27 = vadd.f32 %v11791_v7, %v10146_v55  ;;  %v2704_v36 = vadd.f32 %v10064_v59, %v2410_v53  ;;  %v2906_v31 = vpop.f32.mrf.mxu0  ;;  %v3269_v58 = vld [vmem:[#allocation3 + $0x51] sm:$0xff]  ;;  %v3221_v55 = vld [vmem:[#allocation3 + $0x60] sm:$0xff]  ;;  %v10275_v19 = vpack.c.bf16 %v3271_v38, %v3270_v49 }
 0x219   : > { %v3220_v50 = vld [vmem:[#allocation3 + $0x50] sm:$0xff]  ;;  %3190 = vst.msk [vmem:[#allocation3 + $0x81] sm:$0xff] %vm3124_vm4, %v3101_v1  ;;  %v3106_v9 = vmax.f32 %v3074_v54, 0.0  ;;  %v3072_v33 = vadd.f32 %v10075_v15, %v3033_v13  ;;  %v3036_v47 = vmul.f32 %v10058_v29, %v2997_v14  ;;  %v2995_v17 = vadd.f32 %v2906_v31, %v2701_v4  ;;  %v11794_v4 = vld [vmem:[#allocation76_spill] sm:$0xff] }
 0x21a   : > { %v8333_v12 = vpop.f32.mrf.mxu0  ;;  %v10271_v59 = vpack.c.bf16 %v3269_v58, %v3268_v51  ;;  %v10273_v5 = vpack.c.bf16 %v3220_v50, %v3219_v28  ;;  %v10277_v53 = vpack.c.bf16 %v3222_v42, %v3221_v55  ;;  %v2707_v43 = vadd.f32 %v10089_v8, %v2413_v27  ;;  %v11797_v42 = vld [vmem:[#allocation43_spill] sm:$0xff]  ;;  %v11799_v27 = vld [vmem:[#allocation46_spill] sm:$0xff] }
 0x21b   : > { %3195 = vst.msk [vmem:[#allocation3 + $0xc1] sm:$0xff] %vm3124_vm4, %v3106_v9  ;;  %v3104_v10 = vmax.f32 %v3072_v33, 0.0  ;;  %v3075_v24 = vadd.f32 %v10075_v15, %v3036_v47  ;;  %v3034_v39 = vmul.f32 %v10058_v29, %v2995_v17  ;;  %v3000_v35 = vadd.f32 %v8333_v12, %v2706_v11  ;;  %v11798_v11 = vld [vmem:[#allocation44_spill] sm:$0xff] }
 0x21c   : > { %v2414_v32 = vadd.f32 %v11794_v4, %v10172_v48  ;;  %8354 = vmatmul.mubr.msk.bf16.gmra.mxu1 %vm3124_vm4, %v10271_v59  ;;  %8388 = vmatmul.mubr.msk.bf16.gmra.mxu0 %vm3124_vm4, %v10273_v5  ;;  %v2919_v1 = vpop.f32.mrf.mxu0  ;;  %v11796_v48 = vld [vmem:[#allocation42_spill] sm:$0xff]  ;;  %v10304_v7 = vadd.f32 %v11798_v11, %v11797_v42  ;;  %v10307_v60 = vadd.f32 %v11799_v27, %v1830_v61  ;;  %v11800_v61 = vld [vmem:[#allocation77_spill] sm:$0xff]  ;;  %v3223_v4 = vld [vmem:[#allocation3 + $0x78] sm:$0xff] }
 0x21d   : > { %3193 = vst.msk [vmem:[#allocation3 + $0xa9] sm:$0xff] %vm3124_vm4, %v3104_v10  ;;  %v3107_v54 = vmax.f32 %v3075_v24, 0.0  ;;  %v3073_v13 = vadd.f32 %v10075_v15, %v3034_v39  ;;  %v3039_v8 = vmul.f32 %v10058_v29, %v3000_v35  ;;  %v2998_v14 = vadd.f32 %v2919_v1, %v2704_v36  ;;  %8357 = vmatprep.mubr.msk.bf16.mxu1 %vm3124_vm4, %v10275_v19  ;;  %v10310_v36 = vpop.f32.mrf.mxu1  ;;  %v3274_v39 = vld [vmem:[#allocation3 + $0x91] sm:$0xff] }
 0x21e   : > { %8391 = vmatprep.mubr.msk.bf16.mxu0 %vm3124_vm4, %v10277_v53  ;;  %v2123_v38 = vadd.f32 %v11796_v48, %v11795_v2  ;;  %v2705_v31 = vadd.f32 %v10114_v16, %v2411_v0  ;;  %v8334_v58 = vpop.f32.mrf.mxu0  ;;  %v3275_v47 = vld [vmem:[#allocation3 + $0x99] sm:$0xff]  ;;  %v2710_v51 = vadd.f32 %v10139_v63, %v2416_v45  ;;  %v2417_v28 = vadd.f32 %v11800_v61, %v10184_v52  ;;  %v11801_v0 = vld [vmem:[#allocation78_spill] sm:$0xff]  ;;  %v3225_v52 = vld [vmem:[#allocation3 + $0x90] sm:$0xff] }
 0x21f   : > { %3196 = vst.msk [vmem:[#allocation3 + $0xc9] sm:$0xff] %vm3124_vm4, %v3107_v54  ;;  %v3105_v50 = vmax.f32 %v3073_v13, 0.0  ;;  %v3078_v49 = vadd.f32 %v10075_v15, %v3039_v8  ;;  %v3037_v9 = vmul.f32 %v10058_v29, %v2998_v14  ;;  %v3001_v33 = vadd.f32 %v8334_v58, %v2707_v43  ;;  %v3226_v17 = vld [vmem:[#allocation3 + $0x98] sm:$0xff]  ;;  %v10332_v13 = vpop.f32.mrf.mxu1  ;;  %v11802_v11 = vld [vmem:[#allocation79_spill] sm:$0xff] }
 0x220   : > { %v2708_v16 = vadd.f32 %v10165_v57, %v2414_v32  ;;  %v2415_v55 = vadd.f32 %v11801_v0, %v10187_v44  ;;  %v2922_v12 = vpop.f32.mrf.mxu0  ;;  %v3273_v10 = vld [vmem:[#allocation3 + $0x81] sm:$0xff]  ;;  %v3272_v45 = vld [vmem:[#allocation3 + $0x79] sm:$0xff]  ;;  %v10328_v44 = vpack.c.bf16 %v3275_v47, %v3274_v39  ;;  %v10330_v54 = vpack.c.bf16 %v3226_v17, %v3225_v52 }
 0x221   : > { %v3224_v24 = vld [vmem:[#allocation3 + $0x80] sm:$0xff]  ;;  %3194 = vst.msk [vmem:[#allocation3 + $0xb1] sm:$0xff] %vm3124_vm4, %v3105_v50  ;;  %v3110_v35 = vmax.f32 %v3078_v49, 0.0  ;;  %v3076_v43 = vadd.f32 %v10075_v15, %v3037_v9  ;;  %v3040_v30 = vmul.f32 %v10058_v29, %v3001_v33  ;;  %v2999_v63 = vadd.f32 %v2922_v12, %v2705_v31 }
 0x222   : > { %v8337_v1 = vpop.f32.mrf.mxu0  ;;  %v10324_v57 = vpack.c.bf16 %v3273_v10, %v3272_v45  ;;  %v10326_v32 = vpack.c.bf16 %v3224_v24, %v3223_v4  ;;  %v2711_v42 = vadd.f32 %v10192_v20, %v2417_v28  ;;  %v2420_v27 = vadd.f32 %v11802_v11, %v10246_v34  ;;  %v11803_v31 = vld [vmem:[#allocation81_spill] sm:$0xff]  ;;  %v11804_v34 = vld [vmem:[#allocation47_spill] sm:$0xff]  ;;  %v8311_v24 = vpop.f32.mrf.mxu1  ;;  %v11809_v4 = vld [vmem:[#allocation82_spill] sm:$0xff] }
 0x223   : > { %3199 = vst.msk [vmem:[#allocation3 + $0xf1] sm:$0xff] %vm3124_vm4, %v3110_v35  ;;  %v3108_v8 = vmax.f32 %v3076_v43, 0.0  ;;  %v3079_v14 = vadd.f32 %v10075_v15, %v3040_v30  ;;  %v3038_v2 = vmul.f32 %v10058_v29, %v2999_v63  ;;  %v3004_v48 = vadd.f32 %v8337_v1, %v2710_v51  ;;  %v11806_v17 = vld [vmem:[#allocation49_spill] sm:$0xff]  ;;  %v11807_v51 = vld [vmem:[#allocation50_spill] sm:$0xff] }
 0x224   : > { %v2418_v58 = vadd.f32 %v11803_v31, %v2123_v38  ;;  %8358 = vmatmul.mubr.msk.bf16.gmra.mxu1 %vm3124_vm4, %v10324_v57  ;;  %8392 = vmatmul.mubr.msk.bf16.gmra.mxu0 %vm3124_vm4, %v10326_v32  ;;  %v2935_v50 = vpop.f32.mrf.mxu0  ;;  %v11805_v38 = vld [vmem:[#allocation48_spill] sm:$0xff]  ;;  %v2127_v61 = vadd.f32 %v11807_v51, %v11806_v17  ;;  %v11808_v28 = vld [vmem:[#allocation53_spill] sm:$0xff]  ;;  %v2709_v12 = vadd.f32 %v10213_v3, %v2415_v55  ;;  %v11810_v3 = vld [vmem:[#allocation83_spill] sm:$0xff] }
 0x225   : > { %3197 = vst.msk [vmem:[#allocation3 + $0xd9] sm:$0xff] %vm3124_vm4, %v3108_v8  ;;  %v3111_v49 = vmax.f32 %v3079_v14, 0.0  ;;  %v3077_v9 = vadd.f32 %v10075_v15, %v3038_v2  ;;  %v3043_v33 = vmul.f32 %v10058_v29, %v3004_v48  ;;  %v3002_v20 = vadd.f32 %v2935_v50, %v2708_v16  ;;  %8361 = vmatprep.mubr.msk.bf16.mxu1 %vm3124_vm4, %v10328_v44  ;;  %v3278_v2 = vld [vmem:[#allocation3 + $0xc1] sm:$0xff] }
 0x226   : > { %8395 = vmatprep.mubr.msk.bf16.mxu0 %vm3124_vm4, %v10330_v54  ;;  %v2129_v47 = vadd.f32 %v11805_v38, %v11804_v34  ;;  %v1834_v0 = vadd.f32 %v11808_v28, %v10050_v23  ;;  %v8338_v10 = vpop.f32.mrf.mxu0  ;;  %v3279_v30 = vld [vmem:[#allocation3 + $0xc9] sm:$0xff]  ;;  %v2714_v45 = vadd.f32 %v10253_v37, %v2420_v27  ;;  %v2421_v52 = vadd.f32 %v11809_v4, %v10304_v7  ;;  %v3229_v7 = vld [vmem:[#allocation3 + $0xc0] sm:$0xff] }
 0x227   : > { %3200 = vst.msk [vmem:[#allocation3 + $0xf9] sm:$0xff] %vm3124_vm4, %v3111_v49  ;;  %v3109_v16 = vmax.f32 %v3077_v9, 0.0  ;;  %v3082_v39 = vadd.f32 %v10075_v15, %v3043_v33  ;;  %v3041_v35 = vmul.f32 %v10058_v29, %v3002_v20  ;;  %v3005_v43 = vadd.f32 %v8338_v10, %v2711_v42  ;;  %v3230_v63 = vld [vmem:[#allocation3 + $0xc8] sm:$0xff]  ;;  %v2673_v9 = vpop.f32.mrf.mxu1 }
 0x228   : > { %v2712_v23 = vadd.f32 %v10279_v6, %v2418_v58  ;;  %v2419_v55 = vadd.f32 %v11810_v3, %v10307_v60  ;;  %v2938_v1 = vpop.f32.mrf.mxu0  ;;  %v3277_v8 = vld [vmem:[#allocation3 + $0xb1] sm:$0xff]  ;;  %v3276_v27 = vld [vmem:[#allocation3 + $0xa9] sm:$0xff]  ;;  %v10375_v60 = vpack.c.bf16 %v3279_v30, %v3278_v2  ;;  %v10377_v49 = vpack.c.bf16 %v3230_v63, %v3229_v7 }
 0x229   : > { %v3228_v14 = vld [vmem:[#allocation3 + $0xb0] sm:$0xff]  ;;  %3198 = vst.msk [vmem:[#allocation3 + $0xe1] sm:$0xff] %vm3124_vm4, %v3109_v16  ;;  %v3114_v48 = vmax.f32 %v3082_v39, 0.0  ;;  %v3080_v42 = vadd.f32 %v10075_v15, %v3041_v35  ;;  %v3044_v11 = vmul.f32 %v10058_v29, %v3005_v43  ;;  %v3003_v37 = vadd.f32 %v2938_v1, %v2709_v12  ;;  %v3227_v31 = vld [vmem:[#allocation3 + $0xa8] sm:$0xff]  ;;  %v8312_v63 = vpop.f32.mrf.mxu1 }
 0x22a   : > { %v8341_v50 = vpop.f32.mrf.mxu0  ;;  %v10371_v6 = vpack.c.bf16 %v3277_v8, %v3276_v27  ;;  %v10373_v58 = vpack.c.bf16 %v3228_v14, %v3227_v31  ;;  %v2715_v17 = vadd.f32 %v10310_v36, %v2421_v52  ;;  %v2424_v51 = vadd.f32 %v10001_v21, %v2129_v47  ;;  %v11811_v21 = vld [vmem:[#allocation51_spill] sm:$0xff]  ;;  %v11813_v47 = vld [vmem:[#allocation54_spill] sm:$0xff] }
 0x22b   : > { %3203 = vst.msk [vmem:[#allocation3 + $0x121] sm:$0xff] %vm3124_vm4, %v3114_v48  ;;  %v3112_v33 = vmax.f32 %v3080_v42, 0.0  ;;  %v3083_v20 = vadd.f32 %v10075_v15, %v3044_v11  ;;  %v3042_v34 = vmul.f32 %v10058_v29, %v3003_v37  ;;  %v3008_v38 = vadd.f32 %v8341_v50, %v2714_v45  ;;  %v3282_v42 = vld [vmem:[#allocation3 + $0xf1] sm:$0xff] }
 0x22c   : > { %v2422_v28 = vadd.f32 %v10016_v26, %v2127_v61  ;;  %8362 = vmatmul.mubr.msk.bf16.gmra.mxu1 %vm3124_vm4, %v10371_v6  ;;  %8396 = vmatmul.mubr.msk.bf16.gmra.mxu0 %vm3124_vm4, %v10373_v58  ;;  %v2951_v12 = vpop.f32.mrf.mxu0  ;;  %v11812_v26 = vld [vmem:[#allocation52_spill] sm:$0xff]  ;;  %v2128_v61 = vadd.f32 %v11813_v47, %v1834_v0  ;;  %v2713_v43 = vadd.f32 %v10332_v13, %v2419_v55 }
 0x22d   : > { %3201 = vst.msk [vmem:[#allocation3 + $0x109] sm:$0xff] %vm3124_vm4, %v3112_v33  ;;  %v3115_v10 = vmax.f32 %v3083_v20, 0.0  ;;  %v3081_v16 = vadd.f32 %v10075_v15, %v3042_v34  ;;  %v3047_v39 = vmul.f32 %v10058_v29, %v3008_v38  ;;  %v3006_v35 = vadd.f32 %v2951_v12, %v2712_v23  ;;  %8365 = vmatprep.mubr.msk.bf16.mxu1 %vm3124_vm4, %v10375_v60  ;;  %v3280_v7 = vld [vmem:[#allocation3 + $0xd9] sm:$0xff]  ;;  %v2676_v34 = vpop.f32.mrf.mxu1 }
 0x22e   : > { %8399 = vmatprep.mubr.msk.bf16.mxu0 %vm3124_vm4, %v10377_v49  ;;  %v2130_v36 = vadd.f32 %v11812_v26, %v11811_v21  ;;  %v8342_v30 = vpop.f32.mrf.mxu0  ;;  %v3283_v3 = vld [vmem:[#allocation3 + $0xf9] sm:$0xff]  ;;  %v2718_v8 = vadd.f32 %v8311_v24, %v2424_v51  ;;  %v2716_v2 = vadd.f32 %v2673_v9, %v2422_v28  ;;  %v2423_v0 = vadd.f32 %v10038_v46, %v2128_v61  ;;  %v3233_v24 = vld [vmem:[#allocation3 + $0xf0] sm:$0xff] }
 0x22f   : > { %3204 = vst.msk [vmem:[#allocation3 + $0x129] sm:$0xff] %vm3124_vm4, %v3115_v10  ;;  %v3113_v45 = vmax.f32 %v3081_v16, 0.0  ;;  %v3086_v4 = vadd.f32 %v10075_v15, %v3047_v39  ;;  %v3045_v52 = vmul.f32 %v10058_v29, %v3006_v35  ;;  %v3009_v23 = vadd.f32 %v8342_v30, %v2715_v17  ;;  %v3234_v1 = vld [vmem:[#allocation3 + $0xf8] sm:$0xff] }
 0x230   : > { %v2425_v14 = vadd.f32 %v10026_v40, %v2130_v36  ;;  %v2954_v48 = vpop.f32.mrf.mxu0  ;;  %v3281_v13 = vld [vmem:[#allocation3 + $0xe1] sm:$0xff]  ;;  %v3231_v50 = vld [vmem:[#allocation3 + $0xd8] sm:$0xff]  ;;  %v10412_v46 = vpack.c.bf16 %v3283_v3, %v3282_v42  ;;  %v10414_v20 = vpack.c.bf16 %v3234_v1, %v3233_v24  ;;  %v2717_v26 = vadd.f32 %v2676_v34, %v2423_v0 }
 0x231   : > { %v3232_v55 = vld [vmem:[#allocation3 + $0xe0] sm:$0xff]  ;;  %3202 = vst.msk [vmem:[#allocation3 + $0x111] sm:$0xff] %vm3124_vm4, %v3113_v45  ;;  %v3118_v11 = vmax.f32 %v3086_v4, 0.0  ;;  %v3084_v37 = vadd.f32 %v10075_v15, %v3045_v52  ;;  %v3048_v27 = vmul.f32 %v10058_v29, %v3009_v23  ;;  %v3007_v31 = vadd.f32 %v2954_v48, %v2713_v43 }
 0x232   : > { %v8345_v33 = vpop.f32.mrf.mxu0  ;;  %v10408_v40 = vpack.c.bf16 %v3281_v13, %v3280_v7  ;;  %v10410_v9 = vpack.c.bf16 %v3232_v55, %v3231_v50  ;;  %v2719_v12 = vadd.f32 %v8312_v63, %v2425_v14  ;;  %v3286_v48 = vld [vmem:[#allocation3 + $0x121] sm:$0xff] }
 0x233   : > { %3207 = vst.msk [vmem:[#allocation3 + $0x151] sm:$0xff] %vm3124_vm4, %v3118_v11  ;;  %v3116_v38 = vmax.f32 %v3084_v37, 0.0  ;;  %v3087_v17 = vadd.f32 %v10075_v15, %v3048_v27  ;;  %v3046_v51 = vmul.f32 %v10058_v29, %v3007_v31  ;;  %v3012_v28 = vadd.f32 %v8345_v33, %v2718_v8  ;;  %v3237_v11 = vld [vmem:[#allocation3 + $0x120] sm:$0xff] }
 0x234   : > { %8366 = vmatmul.mubr.msk.bf16.gmra.mxu1 %vm3124_vm4, %v10408_v40  ;;  %8400 = vmatmul.mubr.msk.bf16.gmra.mxu0 %vm3124_vm4, %v10410_v9  ;;  %v2967_v10 = vpop.f32.mrf.mxu0  ;;  %v3235_v0 = vld [vmem:[#allocation3 + $0x108] sm:$0xff] }
 0x235   : > { %3205 = vst.msk [vmem:[#allocation3 + $0x139] sm:$0xff] %vm3124_vm4, %v3116_v38  ;;  %v3119_v16 = vmax.f32 %v3087_v17, 0.0  ;;  %v3085_v39 = vadd.f32 %v10075_v15, %v3046_v51  ;;  %v3051_v35 = vmul.f32 %v10058_v29, %v3012_v28  ;;  %v3010_v21 = vadd.f32 %v2967_v10, %v2716_v2  ;;  %8369 = vmatprep.mubr.msk.bf16.mxu1 %vm3124_vm4, %v10412_v46  ;;  %v3284_v2 = vld [vmem:[#allocation3 + $0x109] sm:$0xff] }
 0x236   : > { %8403 = vmatprep.mubr.msk.bf16.mxu0 %vm3124_vm4, %v10414_v20  ;;  %v8346_v36 = vpop.f32.mrf.mxu0  ;;  %v3287_v63 = vld [vmem:[#allocation3 + $0x129] sm:$0xff] }
 0x237   : > { %3208 = vst.msk [vmem:[#allocation3 + $0x159] sm:$0xff] %vm3124_vm4, %v3119_v16  ;;  %v3117_v47 = vmax.f32 %v3085_v39, 0.0  ;;  %v3090_v61 = vadd.f32 %v10075_v15, %v3051_v35  ;;  %v3049_v43 = vmul.f32 %v10058_v29, %v3010_v21  ;;  %v3013_v30 = vadd.f32 %v8346_v36, %v2719_v12  ;;  %v3238_v23 = vld [vmem:[#allocation3 + $0x128] sm:$0xff] }
 0x238   : > { %v2970_v45 = vpop.f32.mrf.mxu0  ;;  %v3285_v4 = vld [vmem:[#allocation3 + $0x111] sm:$0xff]  ;;  %v10440_v42 = vpack.c.bf16 %v3287_v63, %v3286_v48  ;;  %v10445_v7 = vpack.c.bf16 %v3238_v23, %v3237_v11  ;;  %v3737_v21 = vld [vmem:[#allocation3 + $0x2] sm:$0xff] }
 0x239   : > { %v3236_v52 = vld [vmem:[#allocation3 + $0x110] sm:$0xff]  ;;  %3206 = vst.msk [vmem:[#allocation3 + $0x141] sm:$0xff] %vm3124_vm4, %v3117_v47  ;;  %v3122_v3 = vmax.f32 %v3090_v61, 0.0  ;;  %v3088_v1 = vadd.f32 %v10075_v15, %v3049_v43  ;;  %v3052_v8 = vmul.f32 %v10058_v29, %v3013_v30  ;;  %v3011_v14 = vadd.f32 %v2970_v45, %v2717_v26  ;;  %v3745_v48 = vld [vmem:[#allocation3 + $0x62] sm:$0xff] }
 0x23a   : > { %v10436_v13 = vpack.c.bf16 %v3285_v4, %v3284_v2  ;;  %v10438_v55 = vpack.c.bf16 %v3236_v52, %v3235_v0  ;;  %v3290_v10 = vld [vmem:[#allocation3 + $0x151] sm:$0xff]  ;;  %v3739_v4 = vld [vmem:[#allocation3 + $0x1a] sm:$0xff]  ;;  %v3740_v52 = vld [vmem:[#allocation3 + $0x22] sm:$0xff]  ;;  %v4718_v2 = vsel %vm3360_vm3, %v10236_v18, 0 }
 0x23b   : > { %3211 = vst.msk [vmem:[#allocation3 + $0x181] sm:$0xff] %vm3124_vm4, %v3122_v3  ;;  %v3120_v37 = vmax.f32 %v3088_v1, 0.0  ;;  %v3091_v27 = vadd.f32 %v10075_v15, %v3052_v8  ;;  %v3050_v31 = vmul.f32 %v10058_v29, %v3011_v14  ;;  %v3241_v16 = vld [vmem:[#allocation3 + $0x150] sm:$0xff]  ;;  %v3742_v3 = vld [vmem:[#allocation3 + $0x3a] sm:$0xff]  ;;  %v10486_v1 = vpack.c.bf16 %v3740_v52, %v3739_v4  ;;  %v3761_v52 = vld [vmem:[#allocation3 + $0x122] sm:$0xff] }
 0x23c   : > { %8370 = vmatmul.mubr.msk.bf16.gmra.mxu1 %vm3124_vm4, %v10436_v13  ;;  %8404 = vmatmul.mubr.msk.bf16.gmra.mxu0 %vm3124_vm4, %v10438_v55  ;;  %v3288_v33 = vld [vmem:[#allocation3 + $0x139] sm:$0xff]  ;;  %v3738_v26 = vld [vmem:[#allocation3 + $0xa] sm:$0xff]  ;;  %v4424_v8 = vsel %vm3360_vm3, %v10231_v25, 0 }
 0x23d   : > { %3209 = vst.msk [vmem:[#allocation3 + $0x169] sm:$0xff] %vm3124_vm4, %v3120_v37  ;;  %v3123_v50 = vmax.f32 %v3091_v27, 0.0  ;;  %v3089_v24 = vadd.f32 %v10075_v15, %v3050_v31  ;;  %8373 = vmatprep.mubr.msk.bf16.mxu1 %vm3124_vm4, %v10440_v42  ;;  %8407 = vmatprep.mubr.msk.bf16.mxu0 %vm3124_vm4, %v10445_v7  ;;  %v3239_v34 = vld [vmem:[#allocation3 + $0x138] sm:$0xff]  ;;  %v3769_v45 = vpack.c.bf16 %v3738_v26, %v3737_v21  ;;  %v10506_v25 = vld [vmem:[%s11652_s4 + $0x1c] sm:$0xf]  ;;  %v3756_v26 = vld [vmem:[#allocation3 + $0xe2] sm:$0xff] }
 0x23e   : > { %v3291_v38 = vld [vmem:[#allocation3 + $0x159] sm:$0xff]  ;;  %v3743_v18 = vld [vmem:[#allocation3 + $0x4a] sm:$0xff] }
 0x23f   : > { %3212 = vst.msk [vmem:[#allocation3 + $0x189] sm:$0xff] %vm3124_vm4, %v3123_v50  ;;  %v3121_v29 = vmax.f32 %v3089_v24, 0.0  ;;  %v3242_v28 = vld [vmem:[#allocation3 + $0x158] sm:$0xff]  ;;  %v10463_v39 = vpack.c.bf16 %v3291_v38, %v3290_v10  ;;  %v3746_v11 = vld [vmem:[#allocation3 + $0x6a] sm:$0xff]  ;;  %v3748_v50 = vld [vmem:[#allocation3 + $0x82] sm:$0xff] }
 0x240   : > { %v3289_v17 = vld [vmem:[#allocation3 + $0x141] sm:$0xff]  ;;  %v10465_v35 = vpack.c.bf16 %v3242_v28, %v3241_v16  ;;  %v3741_v23 = vld [vmem:[#allocation3 + $0x32] sm:$0xff]  ;;  %v10518_v27 = vpack.c.bf16 %v3746_v11, %v3745_v48  ;;  %v3751_v38 = vld [vmem:[#allocation3 + $0xaa] sm:$0xff] }
 0x241   : > { %v3240_v51 = vld [vmem:[#allocation3 + $0x140] sm:$0xff]  ;;  %3210 = vst.msk [vmem:[#allocation3 + $0x171] sm:$0xff] %vm3124_vm4, %v3121_v29  ;;  %v10459_v12 = vpack.c.bf16 %v3289_v17, %v3288_v33  ;;  %v10490_v14 = vpack.c.bf16 %v3742_v3, %v3741_v23  ;;  %v3744_v0 = vld [vmem:[#allocation3 + $0x52] sm:$0xff]  ;;  %v3754_v28 = vld [vmem:[#allocation3 + $0xca] sm:$0xff] }
 0x242   : > { %v10461_v15 = vpack.c.bf16 %v3240_v51, %v3239_v34  ;;  %v10516_v37 = vpack.c.bf16 %v3744_v0, %v3743_v18  ;;  %v3747_v31 = vld [vmem:[#allocation3 + $0x7a] sm:$0xff]  ;;  %v3749_v24 = vld [vmem:[#allocation3 + $0x92] sm:$0xff]  ;;  %v3753_v51 = vld [vmem:[#allocation3 + $0xc2] sm:$0xff] }
 0x243   : > { %v3750_v29 = vld [vmem:[#allocation3 + $0x9a] sm:$0xff]  ;;  %v10528_v33 = vpack.c.bf16 %v3748_v50, %v3747_v31  ;;  %v3752_v17 = vld [vmem:[#allocation3 + $0xb2] sm:$0xff]  ;;  %v10542_v16 = vpack.c.bf16 %v3754_v28, %v3753_v51  ;;  %v3762_v23 = vld [vmem:[#allocation3 + $0x12a] sm:$0xff] }
 0x244   : > { %8374 = vmatmul.mubr.msk.bf16.gmra.mxu1 %vm3124_vm4, %v10459_v12  ;;  %8408 = vmatmul.mubr.msk.bf16.gmra.mxu0 %vm3124_vm4, %v10461_v15  ;;  %v3292_v36 = vld [vmem:[#allocation3 + $0x169] sm:$0xff]  ;;  %v10530_v34 = vpack.c.bf16 %v3750_v29, %v3749_v24  ;;  %v10540_v10 = vpack.c.bf16 %v3752_v17, %v3751_v38  ;;  %v3755_v21 = vld [vmem:[#allocation3 + $0xda] sm:$0xff]  ;;  %v3760_v4 = vld [vmem:[#allocation3 + $0x112] sm:$0xff] }
 0x245   : > { %8377 = vmatprep.mubr.msk.bf16.mxu1 %vm3124_vm4, %v10463_v39  ;;  %8411 = vmatprep.mubr.msk.bf16.mxu0 %vm3124_vm4, %v10465_v35  ;;  %v3243_v61 = vld [vmem:[#allocation3 + $0x168] sm:$0xff]  ;;  %v3765_v0 = vld [vmem:[#allocation3 + $0x152] sm:$0xff]  ;;  %v3766_v48 = vld [vmem:[#allocation3 + $0x15a] sm:$0xff] }
 0x246   : > { %v3764_v18 = vld [vmem:[#allocation3 + $0x142] sm:$0xff]  ;;  %v3783_v31 = vpack.c.bf16 %v3766_v48, %v3765_v0 }
 0x247   : > { %v4062_v29 = vld [vmem:[#allocation3 + $0x188] sm:$0xff]  ;;  %v4061_v38 = vld [vmem:[#allocation3 + $0x180] sm:$0xff] }
 0x248   : > { %v3293_v47 = vld [vmem:[#allocation3 + $0x171] sm:$0xff]  ;;  %v10582_v51 = vpack.c.bf16 %v4062_v29, %v4061_v38 }
 0x249   : > { %v3244_v43 = vld [vmem:[#allocation3 + $0x170] sm:$0xff]  ;;  %v10475_v30 = vpack.c.bf16 %v3293_v47, %v3292_v36  ;;  %v3758_v47 = vld [vmem:[#allocation3 + $0xfa] sm:$0xff] }
 0x24a   : > { %v10477_v63 = vpack.c.bf16 %v3244_v43, %v3243_v61  ;;  %v3757_v36 = vld [vmem:[#allocation3 + $0xf2] sm:$0xff]  ;;  %v10552_v61 = vpack.c.bf16 %v3756_v26, %v3755_v21  ;;  %v3767_v50 = vld [vmem:[#allocation3 + $0x16a] sm:$0xff]  ;;  %v5307_v21 = vsel %vm3360_vm3, %v10506_v25, 0 }
 0x24b   : > { %v10554_v43 = vpack.c.bf16 %v3758_v47, %v3757_v36  ;;  %v3768_v24 = vld [vmem:[#allocation3 + $0x172] sm:$0xff] }
 0x24c   : > { %8378 = vmatmul.mubr.msk.bf16.gmra.mxu1 %vm3124_vm4, %v10475_v30  ;;  %8412 = vmatmul.mubr.msk.bf16.gmra.mxu0 %vm3124_vm4, %v10477_v63  ;;  %v3784_v17 = vpack.c.bf16 %v3768_v24, %v3767_v50  ;;  %v7502_v26 = vld [vmem:[%s11652_s4 + $0x20] sm:$0xf] }
 0x24d   : > { %8451 = vmatprep.mubr.msk.bf16.mxu0 %vm3124_vm4, %v10209_v56  ;;  %8417 = vmatprep.mubr.msk.bf16.mxu1 %vm3124_vm4, %v3769_v45  ;;  %v10501_v56 = vld [vmem:[%s11652_s4 + $0x18] sm:$0xf] }
 0x24e   : > { %v3759_v45 = vld [vmem:[#allocation3 + $0x10a] sm:$0xff]  ;;  %v5013_v28 = vsel %vm3360_vm3, %v10501_v56, 0 }
 0x24f   : > { %v10564_v3 = vpack.c.bf16 %v3760_v4, %v3759_v45  ;;  %v5601_v45 = vsel %vm3360_vm3, %v7502_v26, 0 }
 0x254   : > { %8418 = vmatmul.mubr.msk.bf16.vlgmr.msra.gmra.mxu1 %vm3124_vm4, %v10486_v1  ;;  %8452 = vmatmul.mubr.msk.bf16.vlgmr.msra.gmra.mxu0 %vm3124_vm4, %v10226_v62 }
 0x255   : > { %8484 = vmatpush3.bf16.msra.mxu1 %v4424_v8  ;;  %8421 = vmatprep.mubr.msk.bf16.mxu1 %vm3124_vm4, %v10490_v14  ;;  %v10566_v8 = vpack.c.bf16 %v3762_v23, %v3761_v52 }
 0x256   : > { %8455 = vmatprep.mubr.msk.bf16.mxu0 %vm3124_vm4, %v10273_v5  ;;  %8518 = vmatpush3.bf16.msra.mxu0 %v4718_v2  ;;  %v3763_v2 = vld [vmem:[#allocation3 + $0x13a] sm:$0xff] }
 0x257   : > { %8668 = vmatprep.subr.msk.bf16.mxu1 %vm3360_vm3, %v10501_v56  ;;  %8669 = vmatprep.subr.msk.bf16.mxu0 %vm3360_vm3, %v10506_v25  ;;  %v3782_v11 = vpack.c.bf16 %v3764_v18, %v3763_v2  ;;  %v4650_v56 = vld [vmem:[#allocation3 + $0x18a] sm:$0xff]  ;;  %v4355_v25 = vld [vmem:[#allocation3 + $0x181] sm:$0xff] }
 0x25c   : > { %8422 = vmatmul.mubr.msk.bf16.gmra.mxu1 %vm3124_vm4, %v10516_v37  ;;  %8456 = vmatmul.mubr.msk.bf16.gmra.mxu0 %vm3124_vm4, %v10277_v53 }
 0x25d   : > { %8425 = vmatprep.mubr.msk.bf16.mxu1 %vm3124_vm4, %v10518_v27  ;;  %8459 = vmatprep.mubr.msk.bf16.mxu0 %vm3124_vm4, %v10326_v32 }
 0x264   : > { %8426 = vmatmul.mubr.msk.bf16.gmra.mxu1 %vm3124_vm4, %v10528_v33  ;;  %8460 = vmatmul.mubr.msk.bf16.gmra.mxu0 %vm3124_vm4, %v10330_v54 }
 0x265   : > { %8429 = vmatprep.mubr.msk.bf16.mxu1 %vm3124_vm4, %v10530_v34  ;;  %8463 = vmatprep.mubr.msk.bf16.mxu0 %vm3124_vm4, %v10373_v58 }
 0x26c   : > { %8430 = vmatmul.mubr.msk.bf16.gmra.mxu1 %vm3124_vm4, %v10540_v10  ;;  %8464 = vmatmul.mubr.msk.bf16.gmra.mxu0 %vm3124_vm4, %v10377_v49 }
 0x26d   : > { %8433 = vmatprep.mubr.msk.bf16.mxu1 %vm3124_vm4, %v10542_v16  ;;  %8467 = vmatprep.mubr.msk.bf16.mxu0 %vm3124_vm4, %v10410_v9 }
 0x274   : > { %8434 = vmatmul.mubr.msk.bf16.gmra.mxu1 %vm3124_vm4, %v10552_v61  ;;  %8468 = vmatmul.mubr.msk.bf16.gmra.mxu0 %vm3124_vm4, %v10414_v20 }
 0x275   : > { %8437 = vmatprep.mubr.msk.bf16.mxu1 %vm3124_vm4, %v10554_v43  ;;  %8471 = vmatprep.mubr.msk.bf16.mxu0 %vm3124_vm4, %v10438_v55 }
 0x27c   : > { %8438 = vmatmul.mubr.msk.bf16.gmra.mxu1 %vm3124_vm4, %v10564_v3  ;;  %8472 = vmatmul.mubr.msk.bf16.gmra.mxu0 %vm3124_vm4, %v10445_v7 }
 0x27d   : > { %8441 = vmatprep.mubr.msk.bf16.mxu1 %vm3124_vm4, %v10566_v8  ;;  %8475 = vmatprep.mubr.msk.bf16.mxu0 %vm3124_vm4, %v10461_v15 }
 0x284   : > { %8442 = vmatmul.mubr.msk.bf16.gmra.mxu1 %vm3124_vm4, %v3782_v11  ;;  %8476 = vmatmul.mubr.msk.bf16.gmra.mxu0 %vm3124_vm4, %v10465_v35 }
 0x285   : > { %8445 = vmatprep.mubr.msk.bf16.mxu1 %vm3124_vm4, %v3783_v31  ;;  %8479 = vmatprep.mubr.msk.bf16.mxu0 %vm3124_vm4, %v10477_v63 }
 0x28c   : > { %8446 = vmatmul.mubr.msk.bf16.gmra.mxu1 %vm3124_vm4, %v3784_v17  ;;  %8480 = vmatmul.mubr.msk.bf16.gmra.mxu0 %vm3124_vm4, %v10582_v51 }
 0x28d   : > { %8485 = vmatprep.mubr.msk.bf16.mxu1 %vm3124_vm4, %v10207_v22  ;;  %8519 = vmatprep.mubr.msk.bf16.mxu0 %vm3124_vm4, %v10486_v1  ;;  %v4356_v22 = vld [vmem:[#allocation3 + $0x189] sm:$0xff] }
 0x28e   : > { %v4649_v1 = vld [vmem:[#allocation3 + $0x182] sm:$0xff]  ;;  %v10652_v36 = vpack.c.bf16 %v4356_v22, %v4355_v25 }
 0x28f   : > { %v10654_v47 = vpack.c.bf16 %v4650_v56, %v4649_v1 }
 0x294   : > { %8486 = vmatmul.mubr.msk.bf16.vlgmr.msra.gmra.mxu1 %vm3124_vm4, %v10211_v41  ;;  %8520 = vmatmul.mubr.msk.bf16.vlgmr.msra.gmra.mxu0 %vm3124_vm4, %v10490_v14 }
 0x295   : > { %8552 = vmatpush3.bf16.msra.mxu1 %v5013_v28  ;;  %8489 = vmatprep.mubr.msk.bf16.mxu1 %vm3124_vm4, %v10271_v59 }
 0x296   : > { %8523 = vmatprep.mubr.msk.bf16.mxu0 %vm3124_vm4, %v10516_v37  ;;  %8586 = vmatpush3.bf16.msra.mxu0 %v5307_v21 }
 0x297   : > { %8670 = vmatprep.subr.msk.bf16.mxu1 %vm3360_vm3, %v7502_v26 }
 0x29c   : > { %8490 = vmatmul.mubr.msk.bf16.gmra.mxu1 %vm3124_vm4, %v10275_v19  ;;  %8524 = vmatmul.mubr.msk.bf16.gmra.mxu0 %vm3124_vm4, %v10518_v27 }
 0x29d   : > { %8493 = vmatprep.mubr.msk.bf16.mxu1 %vm3124_vm4, %v10324_v57  ;;  %8527 = vmatprep.mubr.msk.bf16.mxu0 %vm3124_vm4, %v10528_v33 }
 0x2a4   : > { %8494 = vmatmul.mubr.msk.bf16.gmra.mxu1 %vm3124_vm4, %v10328_v44  ;;  %8528 = vmatmul.mubr.msk.bf16.gmra.mxu0 %vm3124_vm4, %v10530_v34 }
 0x2a5   : > { %8497 = vmatprep.mubr.msk.bf16.mxu1 %vm3124_vm4, %v10371_v6  ;;  %8531 = vmatprep.mubr.msk.bf16.mxu0 %vm3124_vm4, %v10540_v10 }
 0x2ac   : > { %8498 = vmatmul.mubr.msk.bf16.gmra.mxu1 %vm3124_vm4, %v10375_v60  ;;  %8532 = vmatmul.mubr.msk.bf16.gmra.mxu0 %vm3124_vm4, %v10542_v16 }
 0x2ad   : > { %8501 = vmatprep.mubr.msk.bf16.mxu1 %vm3124_vm4, %v10408_v40  ;;  %8535 = vmatprep.mubr.msk.bf16.mxu0 %vm3124_vm4, %v10552_v61 }
 0x2b4   : > { %8502 = vmatmul.mubr.msk.bf16.gmra.mxu1 %vm3124_vm4, %v10412_v46  ;;  %8536 = vmatmul.mubr.msk.bf16.gmra.mxu0 %vm3124_vm4, %v10554_v43 }
 0x2b5   : > { %8505 = vmatprep.mubr.msk.bf16.mxu1 %vm3124_vm4, %v10436_v13  ;;  %8539 = vmatprep.mubr.msk.bf16.mxu0 %vm3124_vm4, %v10564_v3 }
 0x2bc   : > { %8506 = vmatmul.mubr.msk.bf16.gmra.mxu1 %vm3124_vm4, %v10440_v42  ;;  %8540 = vmatmul.mubr.msk.bf16.gmra.mxu0 %vm3124_vm4, %v10566_v8 }
 0x2bd   : > { %8509 = vmatprep.mubr.msk.bf16.mxu1 %vm3124_vm4, %v10459_v12  ;;  %8543 = vmatprep.mubr.msk.bf16.mxu0 %vm3124_vm4, %v3782_v11 }
 0x2c4   : > { %8510 = vmatmul.mubr.msk.bf16.gmra.mxu1 %vm3124_vm4, %v10463_v39  ;;  %8544 = vmatmul.mubr.msk.bf16.gmra.mxu0 %vm3124_vm4, %v3783_v31 }
 0x2c5   : > { %8513 = vmatprep.mubr.msk.bf16.mxu1 %vm3124_vm4, %v10475_v30  ;;  %8547 = vmatprep.mubr.msk.bf16.mxu0 %vm3124_vm4, %v3784_v17 }
 0x2cc   : > { %8514 = vmatmul.mubr.msk.bf16.gmra.mxu1 %vm3124_vm4, %v10652_v36  ;;  %8548 = vmatmul.mubr.msk.bf16.gmra.mxu0 %vm3124_vm4, %v10654_v47 }
 0x2cd   : > { %8553 = vmatprep.mubr.msk.bf16.mxu1 %vm3124_vm4, %v10226_v62  ;;  %8587 = vmatprep.mubr.msk.bf16.mxu0 %vm3124_vm4, %v10211_v41 }
 0x2d4   : > { %v8351_v4 = vpop.f32.mrf.mxu1  ;;  %v8385_v52 = vpop.f32.mrf.mxu0  ;;  %8554 = vmatmul.mubr.msk.bf16.vlgmr.msra.gmra.mxu1 %vm3124_vm4, %v10273_v5  ;;  %8588 = vmatmul.mubr.msk.bf16.vlgmr.msra.gmra.mxu0 %vm3124_vm4, %v10271_v59 }
 0x2d5   : > { %v10669_v23 = vadd.f32 %v8385_v52, %v8351_v4  ;;  %8620 = vmatpush3.bf16.msra.mxu1 %v5601_v45  ;;  %8557 = vmatprep.mubr.msk.bf16.mxu1 %vm3124_vm4, %v10277_v53 }
 0x2d6   : > { %8591 = vmatprep.mubr.msk.bf16.mxu0 %vm3124_vm4, %v10275_v19  ;;  %v3398_v41 = vpop.f32.mrf.mxu1  ;;  %v3610_v62 = vpop.f32.mrf.mxu0 }
 0x2d7   : > { %v10675_v2 = vadd.f32 %v3610_v62, %v3398_v41 }
 0x2d8   : > { %v8352_v18 = vpop.f32.mrf.mxu1  ;;  %v8386_v0 = vpop.f32.mrf.mxu0 }
 0x2d9   : > { %v10677_v48 = vadd.f32 %v8386_v0, %v8352_v18 }
 0x2da   : > { %v3401_v5 = vpop.f32.mrf.mxu1  ;;  %v3613_v11 = vpop.f32.mrf.mxu0 }
 0x2db   : > { %v10679_v59 = vadd.f32 %v3613_v11, %v3401_v5 }
 0x2dc   : > { %v8355_v31 = vpop.f32.mrf.mxu1  ;;  %v8389_v50 = vpop.f32.mrf.mxu0  ;;  %8558 = vmatmul.mubr.msk.bf16.gmra.mxu1 %vm3124_vm4, %v10326_v32  ;;  %8592 = vmatmul.mubr.msk.bf16.gmra.mxu0 %vm3124_vm4, %v10324_v57 }
 0x2dd   : > { %v10685_v19 = vadd.f32 %v8389_v50, %v8355_v31  ;;  %8561 = vmatprep.mubr.msk.bf16.mxu1 %vm3124_vm4, %v10330_v54  ;;  %8595 = vmatprep.mubr.msk.bf16.mxu0 %vm3124_vm4, %v10328_v44 }
 0x2de   : > { %v3414_v53 = vpop.f32.mrf.mxu1  ;;  %v3626_v24 = vpop.f32.mrf.mxu0 }
 0x2df   : > { %v10691_v29 = vadd.f32 %v3626_v24, %v3414_v53 }
 0x2e0   : > { %v8356_v38 = vpop.f32.mrf.mxu1  ;;  %v8390_v17 = vpop.f32.mrf.mxu0 }
 0x2e1   : > { %v10693_v28 = vadd.f32 %v8390_v17, %v8356_v38 }
 0x2e2   : > { %v3417_v32 = vpop.f32.mrf.mxu1  ;;  %v3629_v21 = vpop.f32.mrf.mxu0 }
 0x2e3   : > { %v10695_v26 = vadd.f32 %v3629_v21, %v3417_v32 }
 0x2e4   : > { %v8359_v57 = vpop.f32.mrf.mxu1  ;;  %v8393_v22 = vpop.f32.mrf.mxu0  ;;  %8562 = vmatmul.mubr.msk.bf16.gmra.mxu1 %vm3124_vm4, %v10373_v58  ;;  %8596 = vmatmul.mubr.msk.bf16.gmra.mxu0 %vm3124_vm4, %v10371_v6 }
 0x2e5   : > { %v10701_v44 = vadd.f32 %v8393_v22, %v8359_v57  ;;  %8565 = vmatprep.mubr.msk.bf16.mxu1 %vm3124_vm4, %v10377_v49  ;;  %8599 = vmatprep.mubr.msk.bf16.mxu0 %vm3124_vm4, %v10375_v60 }
 0x2e6   : > { %v3430_v54 = vpop.f32.mrf.mxu1  ;;  %v3642_v1 = vpop.f32.mrf.mxu0 }
 0x2e7   : > { %v10707_v56 = vadd.f32 %v3642_v1, %v3430_v54 }
 0x2e8   : > { %v8360_v25 = vpop.f32.mrf.mxu1  ;;  %v8394_v45 = vpop.f32.mrf.mxu0 }
 0x2e9   : > { %v10709_v4 = vadd.f32 %v8394_v45, %v8360_v25 }
 0x2ea   : > { %v3433_v58 = vpop.f32.mrf.mxu1  ;;  %v3645_v52 = vpop.f32.mrf.mxu0 }
 0x2eb   : > { %v10711_v41 = vadd.f32 %v3645_v52, %v3433_v58 }
 0x2ec   : > { %v8363_v6 = vpop.f32.mrf.mxu1  ;;  %v8397_v62 = vpop.f32.mrf.mxu0  ;;  %8566 = vmatmul.mubr.msk.bf16.gmra.mxu1 %vm3124_vm4, %v10410_v9  ;;  %8600 = vmatmul.mubr.msk.bf16.gmra.mxu0 %vm3124_vm4, %v10408_v40 }
 0x2ed   : > { %v10717_v60 = vadd.f32 %v8397_v62, %v8363_v6  ;;  %8569 = vmatprep.mubr.msk.bf16.mxu1 %vm3124_vm4, %v10414_v20  ;;  %8603 = vmatprep.mubr.msk.bf16.mxu0 %vm3124_vm4, %v10412_v46 }
 0x2ee   : > { %v3446_v49 = vpop.f32.mrf.mxu1  ;;  %v3658_v18 = vpop.f32.mrf.mxu0 }
 0x2ef   : > { %v10723_v0 = vadd.f32 %v3658_v18, %v3446_v49 }
 0x2f0   : > { %v8364_v5 = vpop.f32.mrf.mxu1  ;;  %v8398_v11 = vpop.f32.mrf.mxu0 }
 0x2f1   : > { %v10725_v31 = vadd.f32 %v8398_v11, %v8364_v5  ;;  %v4945_v5 = vld [vmem:[#allocation3 + $0x1a0] sm:$0xff] }
 0x2f2   : > { %v3449_v9 = vpop.f32.mrf.mxu1  ;;  %v3661_v50 = vpop.f32.mrf.mxu0  ;;  %v5238_v11 = vld [vmem:[#allocation3 + $0x199] sm:$0xff] }
 0x2f3   : > { %v10727_v53 = vadd.f32 %v3661_v50, %v3449_v9  ;;  %v5239_v9 = vld [vmem:[#allocation3 + $0x1a1] sm:$0xff] }
 0x2f4   : > { %v8367_v40 = vpop.f32.mrf.mxu1  ;;  %v8401_v24 = vpop.f32.mrf.mxu0  ;;  %8570 = vmatmul.mubr.msk.bf16.gmra.mxu1 %vm3124_vm4, %v10438_v55  ;;  %8604 = vmatmul.mubr.msk.bf16.gmra.mxu0 %vm3124_vm4, %v10436_v13 }
 0x2f5   : > { %v10733_v46 = vadd.f32 %v8401_v24, %v8367_v40  ;;  %8573 = vmatprep.mubr.msk.bf16.mxu1 %vm3124_vm4, %v10445_v7  ;;  %8607 = vmatprep.mubr.msk.bf16.mxu0 %vm3124_vm4, %v10440_v42 }
 0x2f6   : > { %v3462_v20 = vpop.f32.mrf.mxu1  ;;  %v3674_v38 = vpop.f32.mrf.mxu0 }
 0x2f7   : > { %v10739_v17 = vadd.f32 %v3674_v38, %v3462_v20 }
 0x2f8   : > { %v8368_v32 = vpop.f32.mrf.mxu1  ;;  %v8402_v21 = vpop.f32.mrf.mxu0 }
 0x2f9   : > { %v10741_v57 = vadd.f32 %v8402_v21, %v8368_v32 }
 0x2fa   : > { %v3465_v55 = vpop.f32.mrf.mxu1  ;;  %v3677_v22 = vpop.f32.mrf.mxu0 }
 0x2fb   : > { %v10743_v54 = vadd.f32 %v3677_v22, %v3465_v55 }
 0x2fc   : > { %v8371_v13 = vpop.f32.mrf.mxu1  ;;  %v8405_v1 = vpop.f32.mrf.mxu0  ;;  %8574 = vmatmul.mubr.msk.bf16.gmra.mxu1 %vm3124_vm4, %v10461_v15  ;;  %8608 = vmatmul.mubr.msk.bf16.gmra.mxu0 %vm3124_vm4, %v10459_v12 }
 0x2fd   : > { %v10749_v42 = vadd.f32 %v8405_v1, %v8371_v13  ;;  %8577 = vmatprep.mubr.msk.bf16.mxu1 %vm3124_vm4, %v10465_v35  ;;  %8611 = vmatprep.mubr.msk.bf16.mxu0 %vm3124_vm4, %v10463_v39  ;;  %v4944_v39 = vld [vmem:[#allocation3 + $0x198] sm:$0xff] }
 0x2fe   : > { %v3478_v7 = vpop.f32.mrf.mxu1  ;;  %v3690_v25 = vpop.f32.mrf.mxu0  ;;  %v4961_v38 = vpack.c.bf16 %v4945_v5, %v4944_v39 }
 0x2ff   : > { %v10755_v45 = vadd.f32 %v3690_v25, %v3478_v7 }
 0x300   : > { %v8372_v58 = vpop.f32.mrf.mxu1  ;;  %v8406_v52 = vpop.f32.mrf.mxu0 }
 0x301   : > { %v10757_v6 = vadd.f32 %v8406_v52, %v8372_v58 }
 0x302   : > { %v3481_v15 = vpop.f32.mrf.mxu1  ;;  %v3693_v62 = vpop.f32.mrf.mxu0 }
 0x303   : > { %v10759_v49 = vadd.f32 %v3693_v62, %v3481_v15 }
 0x304   : > { %v8375_v12 = vpop.f32.mrf.mxu1  ;;  %v8409_v18 = vpop.f32.mrf.mxu0  ;;  %8578 = vmatmul.mubr.msk.bf16.gmra.mxu1 %vm3124_vm4, %v10477_v63  ;;  %8612 = vmatmul.mubr.msk.bf16.gmra.mxu0 %vm3124_vm4, %v10475_v30  ;;  %v5255_v30 = vpack.c.bf16 %v5239_v9, %v5238_v11 }
 0x305   : > { %v10765_v35 = vadd.f32 %v8409_v18, %v8375_v12  ;;  %8581 = vmatprep.mubr.msk.bf16.mxu1 %vm3124_vm4, %v10582_v51  ;;  %8615 = vmatprep.mubr.msk.bf16.mxu0 %vm3124_vm4, %v10652_v36 }
 0x306   : > { %v3494_v50 = vpop.f32.mrf.mxu1  ;;  %v3706_v40 = vpop.f32.mrf.mxu0 }
 0x307   : > { %v10771_v24 = vadd.f32 %v3706_v40, %v3494_v50 }
 0x308   : > { %v8376_v63 = vpop.f32.mrf.mxu1  ;;  %v8410_v20 = vpop.f32.mrf.mxu0 }
 0x309   : > { %v10773_v32 = vadd.f32 %v8410_v20, %v8376_v63 }
 0x30a   : > { %v3497_v21 = vpop.f32.mrf.mxu1  ;;  %v3709_v55 = vpop.f32.mrf.mxu0 }
 0x30b   : > { %v10775_v22 = vadd.f32 %v3709_v55, %v3497_v21 }
 0x30c   : > { %v8379_v51 = vpop.f32.mrf.mxu1  ;;  %v8413_v13 = vpop.f32.mrf.mxu0  ;;  %8582 = vmatmul.mubr.msk.bf16.gmra.mxu1 %vm3124_vm4, %v4961_v38  ;;  %8616 = vmatmul.mubr.msk.bf16.gmra.mxu0 %vm3124_vm4, %v5255_v30 }
 0x30d   : > { %v10779_v36 = vadd.f32 %v8413_v13, %v8379_v51  ;;  %8621 = vmatprep.mubr.msk.bf16.mxu1 %vm3124_vm4, %v10490_v14 }
 0x30e   : > { %v3510_v1 = vpop.f32.mrf.mxu1  ;;  %v3722_v7 = vpop.f32.mrf.mxu0 }
 0x30f   : > { %v10783_v25 = vadd.f32 %v3722_v7, %v3510_v1 }
 0x310   : > { %v8380_v58 = vpop.f32.mrf.mxu1  ;;  %v8414_v52 = vpop.f32.mrf.mxu0 }
 0x311   : > { %v10785_v15 = vadd.f32 %v8414_v52, %v8380_v58 }
 0x312   : > { %v3513_v62 = vpop.f32.mrf.mxu1  ;;  %v3725_v12 = vpop.f32.mrf.mxu0 }
 0x313   : > { %v10787_v18 = vadd.f32 %v3725_v12, %v3513_v62 }
 0x314   : > { %v8419_v39 = vpop.f32.mrf.mxu1  ;;  %v8453_v5 = vpop.f32.mrf.mxu0  ;;  %8622 = vmatmul.mubr.msk.bf16.vlgmr.msra.gmra.mxu1 %vm3124_vm4, %v10516_v37 }
 0x315   : > { %v4001_v11 = vadd.f32 %v8419_v39, %v10669_v23  ;;  %8625 = vmatprep.mubr.msk.bf16.mxu1 %vm3124_vm4, %v10518_v27 }
 0x316   : > { %v3872_v14 = vpop.f32.mrf.mxu1  ;;  %v4166_v9 = vpop.f32.mrf.mxu0 }
 0x317   : > { %v10794_v50 = vadd.f32 %v8453_v5, %v4001_v11  ;;  %v3999_v40 = vadd.f32 %v3872_v14, %v10675_v2 }
 0x318   : > { %v8420_v63 = vpop.f32.mrf.mxu1  ;;  %v8454_v20 = vpop.f32.mrf.mxu0 }
 0x319   : > { %v10797_v38 = vadd.f32 %v4166_v9, %v3999_v40  ;;  %v4002_v30 = vadd.f32 %v8420_v63, %v10677_v48 }
 0x31a   : > { %v3875_v21 = vpop.f32.mrf.mxu1  ;;  %v4169_v55 = vpop.f32.mrf.mxu0 }
 0x31b   : > { %v10800_v37 = vadd.f32 %v8454_v20, %v4002_v30  ;;  %v4000_v23 = vadd.f32 %v3875_v21, %v10679_v59 }
 0x31c   : > { %v8423_v51 = vpop.f32.mrf.mxu1  ;;  %v8457_v27 = vpop.f32.mrf.mxu0  ;;  %8626 = vmatmul.mubr.msk.bf16.gmra.mxu1 %vm3124_vm4, %v10528_v33 }
 0x31d   : > { %v10805_v13 = vadd.f32 %v4169_v55, %v4000_v23  ;;  %v4005_v2 = vadd.f32 %v8423_v51, %v10685_v19  ;;  %8629 = vmatprep.mubr.msk.bf16.mxu1 %vm3124_vm4, %v10530_v34 }
 0x31e   : > { %v3888_v1 = vpop.f32.mrf.mxu1  ;;  %v4182_v48 = vpop.f32.mrf.mxu0 }
 0x31f   : > { %v10810_v7 = vadd.f32 %v8457_v27, %v4005_v2  ;;  %v4003_v58 = vadd.f32 %v3888_v1, %v10691_v29 }
 0x320   : > { %v8424_v52 = vpop.f32.mrf.mxu1  ;;  %v8458_v59 = vpop.f32.mrf.mxu0 }
 0x321   : > { %v10813_v62 = vadd.f32 %v4182_v48, %v4003_v58  ;;  %v4006_v12 = vadd.f32 %v8424_v52, %v10693_v28 }
 0x322   : > { %v3891_v33 = vpop.f32.mrf.mxu1  ;;  %v4185_v39 = vpop.f32.mrf.mxu0 }
 0x323   : > { %v10816_v5 = vadd.f32 %v8458_v59, %v4006_v12  ;;  %v4004_v19 = vadd.f32 %v3891_v33, %v10695_v26 }
 0x324   : > { %v8427_v11 = vpop.f32.mrf.mxu1  ;;  %v8461_v34 = vpop.f32.mrf.mxu0  ;;  %8630 = vmatmul.mubr.msk.bf16.gmra.mxu1 %vm3124_vm4, %v10540_v10 }
 0x325   : > { %v10821_v14 = vadd.f32 %v4185_v39, %v4004_v19  ;;  %v4009_v29 = vadd.f32 %v8427_v11, %v10701_v44  ;;  %8633 = vmatprep.mubr.msk.bf16.mxu1 %vm3124_vm4, %v10542_v16 }
 0x326   : > { %v3904_v9 = vpop.f32.mrf.mxu1  ;;  %v4198_v28 = vpop.f32.mrf.mxu0 }
 0x327   : > { %v10826_v40 = vadd.f32 %v8461_v34, %v4009_v29  ;;  %v4007_v63 = vadd.f32 %v3904_v9, %v10707_v56  ;;  %v5524_v9 = vld [vmem:[#allocation3 + $0x13a] sm:$0xff] }
 0x328   : > { %v8428_v20 = vpop.f32.mrf.mxu1  ;;  %v8462_v26 = vpop.f32.mrf.mxu0 }
 0x329   : > { %v10829_v30 = vadd.f32 %v4198_v28, %v4007_v63  ;;  %v4010_v21 = vadd.f32 %v8428_v20, %v10709_v4  ;;  %v5526_v20 = vld [vmem:[#allocation3 + $0x152] sm:$0xff] }
 0x32a   : > { %v3907_v10 = vpop.f32.mrf.mxu1  ;;  %v4201_v55 = vpop.f32.mrf.mxu0 }
 0x32b   : > { %v10832_v23 = vadd.f32 %v8462_v26, %v4010_v21  ;;  %v4008_v44 = vadd.f32 %v3907_v10, %v10711_v41  ;;  %v5527_v26 = vld [vmem:[#allocation3 + $0x15a] sm:$0xff] }
 0x32c   : > { %v8431_v51 = vpop.f32.mrf.mxu1  ;;  %v8465_v16 = vpop.f32.mrf.mxu0  ;;  %8634 = vmatmul.mubr.msk.bf16.gmra.mxu1 %vm3124_vm4, %v10552_v61 }
 0x32d   : > { %v10837_v27 = vadd.f32 %v4201_v55, %v4008_v44  ;;  %v4013_v56 = vadd.f32 %v8431_v51, %v10717_v60  ;;  %8637 = vmatprep.mubr.msk.bf16.mxu1 %vm3124_vm4, %v10554_v43  ;;  %v5546_v51 = vpack.c.bf16 %v5527_v26, %v5526_v20 }
 0x32e   : > { %v3920_v2 = vpop.f32.mrf.mxu1  ;;  %v4214_v4 = vpop.f32.mrf.mxu0 }
 0x32f   : > { %v10842_v1 = vadd.f32 %v8465_v16, %v4013_v56  ;;  %v4011_v48 = vadd.f32 %v3920_v2, %v10723_v0 }
 0x330   : > { %v8432_v58 = vpop.f32.mrf.mxu1  ;;  %v8466_v41 = vpop.f32.mrf.mxu0 }
 0x331   : > { %v10845_v52 = vadd.f32 %v4214_v4, %v4011_v48  ;;  %v4014_v59 = vadd.f32 %v8432_v58, %v10725_v31 }
 0x332   : > { %v3923_v61 = vpop.f32.mrf.mxu1  ;;  %v4217_v12 = vpop.f32.mrf.mxu0 }
 0x333   : > { %v10848_v33 = vadd.f32 %v8466_v41, %v4014_v59  ;;  %v4012_v60 = vadd.f32 %v3923_v61, %v10727_v53  ;;  %v5525_v53 = vld [vmem:[#allocation3 + $0x142] sm:$0xff]  ;;  %v5528_v41 = vld [vmem:[#allocation3 + $0x16a] sm:$0xff]  ;;  %v5529_v59 = vld [vmem:[#allocation3 + $0x172] sm:$0xff] }
 0x334   : > { %v8435_v39 = vpop.f32.mrf.mxu1  ;;  %v8469_v43 = vpop.f32.mrf.mxu0  ;;  %8638 = vmatmul.mubr.msk.bf16.gmra.mxu1 %vm3124_vm4, %v10564_v3  ;;  %v5545_v55 = vpack.c.bf16 %v5525_v53, %v5524_v9  ;;  %v5532_v53 = vld [vmem:[#allocation3 + $0x19a] sm:$0xff] }
 0x335   : > { %v10853_v19 = vadd.f32 %v4217_v12, %v4012_v60  ;;  %v4017_v0 = vadd.f32 %v8435_v39, %v10733_v46  ;;  %8641 = vmatprep.mubr.msk.bf16.mxu1 %vm3124_vm4, %v10566_v8 }
 0x336   : > { %v3936_v11 = vpop.f32.mrf.mxu1  ;;  %v4230_v31 = vpop.f32.mrf.mxu0 }
 0x337   : > { %v10858_v34 = vadd.f32 %v8469_v43, %v4017_v0  ;;  %v4015_v29 = vadd.f32 %v3936_v11, %v10739_v17  ;;  %v5547_v0 = vpack.c.bf16 %v5529_v59, %v5528_v41 }
 0x338   : > { %v8436_v28 = vpop.f32.mrf.mxu1  ;;  %v8470_v63 = vpop.f32.mrf.mxu0 }
 0x339   : > { %v10861_v3 = vadd.f32 %v4230_v31, %v4015_v29  ;;  %v4018_v21 = vadd.f32 %v8436_v28, %v10741_v57 }
 0x33a   : > { %v3939_v46 = vpop.f32.mrf.mxu1  ;;  %v4233_v10 = vpop.f32.mrf.mxu0 }
 0x33b   : > { %v10864_v8 = vadd.f32 %v8470_v63, %v4018_v21  ;;  %v4016_v44 = vadd.f32 %v3939_v46, %v10743_v54 }
 0x33c   : > { %v8439_v16 = vpop.f32.mrf.mxu1  ;;  %v8473_v17 = vpop.f32.mrf.mxu0  ;;  %8642 = vmatmul.mubr.msk.bf16.gmra.mxu1 %vm3124_vm4, %v5545_v55 }
 0x33d   : > { %v10868_v56 = vadd.f32 %v4233_v10, %v4016_v44  ;;  %v4021_v2 = vadd.f32 %v8439_v16, %v10749_v42  ;;  %8645 = vmatprep.mubr.msk.bf16.mxu1 %vm3124_vm4, %v5546_v51 }
 0x33e   : > { %v3952_v4 = vpop.f32.mrf.mxu1  ;;  %v4246_v57 = vpop.f32.mrf.mxu0 }
 0x33f   : > { %v10872_v48 = vadd.f32 %v8473_v17, %v4021_v2  ;;  %v4019_v58 = vadd.f32 %v3952_v4, %v10755_v45 }
 0x340   : > { %v8440_v54 = vpop.f32.mrf.mxu1  ;;  %v8474_v61 = vpop.f32.mrf.mxu0 }
 0x341   : > { %v10875_v12 = vadd.f32 %v4246_v57, %v4019_v58  ;;  %v4022_v60 = vadd.f32 %v8440_v54, %v10757_v6  ;;  %v5533_v6 = vld [vmem:[#allocation3 + $0x1a2] sm:$0xff] }
 0x342   : > { %v3955_v39 = vpop.f32.mrf.mxu1  ;;  %v4249_v43 = vpop.f32.mrf.mxu0  ;;  %v5549_v46 = vpack.c.bf16 %v5533_v6, %v5532_v53 }
 0x343   : > { %v10878_v42 = vadd.f32 %v8474_v61, %v4022_v60  ;;  %v4020_v11 = vadd.f32 %v3955_v39, %v10759_v49 }
 0x344   : > { %v8443_v31 = vpop.f32.mrf.mxu1  ;;  %v8477_v29 = vpop.f32.mrf.mxu0  ;;  %8646 = vmatmul.mubr.msk.bf16.gmra.mxu1 %vm3124_vm4, %v5547_v0 }
 0x345   : > { %v10882_v45 = vadd.f32 %v4249_v43, %v4020_v11  ;;  %v4025_v9 = vadd.f32 %v8443_v31, %v10765_v35  ;;  %8649 = vmatprep.mubr.msk.bf16.mxu1 %vm3124_vm4, %v10654_v47 }
 0x346   : > { %v3968_v28 = vpop.f32.mrf.mxu1  ;;  %v4262_v63 = vpop.f32.mrf.mxu0 }
 0x347   : > { %v10887_v20 = vadd.f32 %v8477_v29, %v4025_v9  ;;  %v4023_v26 = vadd.f32 %v3968_v28, %v10771_v24 }
 0x348   : > { %v8444_v49 = vpop.f32.mrf.mxu1  ;;  %v8478_v21 = vpop.f32.mrf.mxu0 }
 0x349   : > { %v10890_v10 = vadd.f32 %v4262_v63, %v4023_v26  ;;  %v4026_v55 = vadd.f32 %v8444_v49, %v10773_v32 }
 0x34a   : > { %v3971_v44 = vpop.f32.mrf.mxu1  ;;  %v4265_v35 = vpop.f32.mrf.mxu0 }
 0x34b   : > { %v10893_v51 = vadd.f32 %v8478_v21, %v4026_v55  ;;  %v4024_v47 = vadd.f32 %v3971_v44, %v10775_v22 }
 0x34c   : > { %v8447_v16 = vpop.f32.mrf.mxu1  ;;  %v8481_v17 = vpop.f32.mrf.mxu0  ;;  %8650 = vmatmul.mubr.msk.bf16.gmra.mxu1 %vm3124_vm4, %v5549_v46 }
 0x34d   : > { %v10897_v2 = vadd.f32 %v4265_v35, %v4024_v47  ;;  %v4029_v24 = vadd.f32 %v8447_v16, %v10779_v36 }
 0x34e   : > { %v3984_v4 = vpop.f32.mrf.mxu1  ;;  %v4278_v57 = vpop.f32.mrf.mxu0 }
 0x34f   : > { %v10900_v58 = vadd.f32 %v8481_v17, %v4029_v24  ;;  %v4027_v32 = vadd.f32 %v3984_v4, %v10783_v25 }
 0x350   : > { %v8448_v41 = vpop.f32.mrf.mxu1  ;;  %v8482_v59 = vpop.f32.mrf.mxu0 }
 0x351   : > { %v10903_v54 = vadd.f32 %v4278_v57, %v4027_v32  ;;  %v4030_v22 = vadd.f32 %v8448_v41, %v10785_v15 }
 0x352   : > { %v3987_v61 = vpop.f32.mrf.mxu1  ;;  %v4281_v60 = vpop.f32.mrf.mxu0 }
 0x353   : > { %v10906_v39 = vadd.f32 %v8482_v59, %v4030_v22  ;;  %v4028_v43 = vadd.f32 %v3987_v61, %v10787_v18 }
 0x354   : > { %v8487_v0 = vpop.f32.mrf.mxu1  ;;  %v10909_v36 = vpop.f32.mrf.mxu0 }
 0x355   : > { %v10911_v11 = vadd.f32 %v4281_v60, %v4028_v43  ;;  %v10914_v31 = vadd.f32 %v8487_v0, %v10794_v50 }
 0x356   : > { %v4460_v25 = vpop.f32.mrf.mxu1  ;;  %v10916_v29 = vpop.f32.mrf.mxu0 }
 0x357   : > { %v10919_v9 = vadd.f32 %v4460_v25, %v10797_v38 }
 0x358   : > { %v8488_v15 = vpop.f32.mrf.mxu1  ;;  %v10921_v53 = vpop.f32.mrf.mxu0 }
 0x359   : > { %v10924_v6 = vadd.f32 %v8488_v15, %v10800_v37 }
 0x35a   : > { %v4463_v18 = vpop.f32.mrf.mxu1  ;;  %v10926_v28 = vpop.f32.mrf.mxu0 }
 0x35b   : > { %v10929_v63 = vadd.f32 %v4463_v18, %v10805_v13 }
 0x35c   : > { %v8491_v50 = vpop.f32.mrf.mxu1  ;;  %v8525_v26 = vpop.f32.mrf.mxu0 }
 0x35d   : > { %v4593_v49 = vadd.f32 %v8491_v50, %v10810_v7 }
 0x35e   : > { %v4476_v21 = vpop.f32.mrf.mxu1  ;;  %v4770_v46 = vpop.f32.mrf.mxu0 }
 0x35f   : > { %v10932_v38 = vadd.f32 %v8525_v26, %v4593_v49  ;;  %v4591_v55 = vadd.f32 %v4476_v21, %v10813_v62 }
 0x360   : > { %v8492_v44 = vpop.f32.mrf.mxu1  ;;  %v8526_v35 = vpop.f32.mrf.mxu0 }
 0x361   : > { %v10935_v37 = vadd.f32 %v4770_v46, %v4591_v55  ;;  %v4594_v47 = vadd.f32 %v8492_v44, %v10816_v5 }
 0x362   : > { %v4479_v16 = vpop.f32.mrf.mxu1  ;;  %v4773_v17 = vpop.f32.mrf.mxu0 }
 0x363   : > { %v10938_v13 = vadd.f32 %v8526_v35, %v4594_v47  ;;  %v4592_v24 = vadd.f32 %v4479_v16, %v10821_v14 }
 0x364   : > { %v8495_v4 = vpop.f32.mrf.mxu1  ;;  %v8529_v7 = vpop.f32.mrf.mxu0 }
 0x365   : > { %v10941_v57 = vadd.f32 %v4773_v17, %v4592_v24  ;;  %v4597_v32 = vadd.f32 %v8495_v4, %v10826_v40 }
 0x366   : > { %v4492_v41 = vpop.f32.mrf.mxu1  ;;  %v4786_v62 = vpop.f32.mrf.mxu0 }
 0x367   : > { %v10944_v59 = vadd.f32 %v8529_v7, %v4597_v32  ;;  %v4595_v22 = vadd.f32 %v4492_v41, %v10829_v30 }
 0x368   : > { %v8496_v61 = vpop.f32.mrf.mxu1  ;;  %v8530_v5 = vpop.f32.mrf.mxu0 }
 0x369   : > { %v10947_v60 = vadd.f32 %v4786_v62, %v4595_v22  ;;  %v4598_v43 = vadd.f32 %v8496_v61, %v10832_v23 }
 0x36a   : > { %v4495_v0 = vpop.f32.mrf.mxu1  ;;  %v4789_v14 = vpop.f32.mrf.mxu0 }
 0x36b   : > { %v10950_v25 = vadd.f32 %v8530_v5, %v4598_v43  ;;  %v4596_v15 = vadd.f32 %v4495_v0, %v10837_v27 }
 0x36c   : > { %v8499_v18 = vpop.f32.mrf.mxu1  ;;  %v8533_v40 = vpop.f32.mrf.mxu0 }
 0x36d   : > { %v10953_v50 = vadd.f32 %v4789_v14, %v4596_v15  ;;  %v4601_v26 = vadd.f32 %v8499_v18, %v10842_v1 }
 0x36e   : > { %v4508_v49 = vpop.f32.mrf.mxu1  ;;  %v4802_v30 = vpop.f32.mrf.mxu0 }
 0x36f   : > { %v10956_v21 = vadd.f32 %v8533_v40, %v4601_v26  ;;  %v4599_v46 = vadd.f32 %v4508_v49, %v10845_v52 }
 0x370   : > { %v8500_v55 = vpop.f32.mrf.mxu1  ;;  %v8534_v23 = vpop.f32.mrf.mxu0 }
 0x371   : > { %v10959_v44 = vadd.f32 %v4802_v30, %v4599_v46  ;;  %v4602_v35 = vadd.f32 %v8500_v55, %v10848_v33 }
 0x372   : > { %v4511_v47 = vpop.f32.mrf.mxu1  ;;  %v4805_v27 = vpop.f32.mrf.mxu0 }
 0x373   : > { %v10962_v16 = vadd.f32 %v8534_v23, %v4602_v35  ;;  %v4600_v17 = vadd.f32 %v4511_v47, %v10853_v19 }
 0x374   : > { %v8503_v24 = vpop.f32.mrf.mxu1  ;;  %v8537_v1 = vpop.f32.mrf.mxu0 }
 0x375   : > { %v10965_v4 = vadd.f32 %v4805_v27, %v4600_v17  ;;  %v4605_v7 = vadd.f32 %v8503_v24, %v10858_v34 }
 0x376   : > { %v4524_v32 = vpop.f32.mrf.mxu1  ;;  %v4818_v52 = vpop.f32.mrf.mxu0 }
 0x377   : > { %v10968_v41 = vadd.f32 %v8537_v1, %v4605_v7  ;;  %v4603_v62 = vadd.f32 %v4524_v32, %v10861_v3 }
 0x378   : > { %v8504_v22 = vpop.f32.mrf.mxu1  ;;  %v8538_v33 = vpop.f32.mrf.mxu0 }
 0x379   : > { %v10971_v61 = vadd.f32 %v4818_v52, %v4603_v62  ;;  %v4606_v5 = vadd.f32 %v8504_v22, %v10864_v8 }
 0x37a   : > { %v4527_v43 = vpop.f32.mrf.mxu1  ;;  %v4821_v19 = vpop.f32.mrf.mxu0 }
 0x37b   : > { %v10974_v0 = vadd.f32 %v8538_v33, %v4606_v5  ;;  %v4604_v14 = vadd.f32 %v4527_v43, %v10868_v56 }
 0x37c   : > { %v8507_v15 = vpop.f32.mrf.mxu1  ;;  %v8541_v34 = vpop.f32.mrf.mxu0 }
 0x37d   : > { %v10977_v18 = vadd.f32 %v4821_v19, %v4604_v14  ;;  %v4609_v40 = vadd.f32 %v8507_v15, %v10872_v48 }
 0x37e   : > { %v4540_v26 = vpop.f32.mrf.mxu1  ;;  %v4834_v3 = vpop.f32.mrf.mxu0 }
 0x37f   : > { %v10980_v49 = vadd.f32 %v8541_v34, %v4609_v40  ;;  %v4607_v30 = vadd.f32 %v4540_v26, %v10875_v12 }
 0x380   : > { %v8508_v46 = vpop.f32.mrf.mxu1  ;;  %v8542_v8 = vpop.f32.mrf.mxu0 }
 0x381   : > { %v10983_v55 = vadd.f32 %v4834_v3, %v4607_v30  ;;  %v4610_v23 = vadd.f32 %v8508_v46, %v10878_v42 }
 0x382   : > { %v4543_v35 = vpop.f32.mrf.mxu1  ;;  %v4837_v56 = vpop.f32.mrf.mxu0 }
 0x383   : > { %v10986_v47 = vadd.f32 %v8542_v8, %v4610_v23  ;;  %v4608_v27 = vadd.f32 %v4543_v35, %v10882_v45 }
 0x384   : > { %v8511_v17 = vpop.f32.mrf.mxu1  ;;  %v8545_v48 = vpop.f32.mrf.mxu0 }
 0x385   : > { %v10989_v24 = vadd.f32 %v4837_v56, %v4608_v27  ;;  %v4613_v1 = vadd.f32 %v8511_v17, %v10887_v20 }
 0x386   : > { %v4556_v7 = vpop.f32.mrf.mxu1  ;;  %v4850_v12 = vpop.f32.mrf.mxu0 }
 0x387   : > { %v10992_v32 = vadd.f32 %v8545_v48, %v4613_v1  ;;  %v4611_v52 = vadd.f32 %v4556_v7, %v10890_v10 }
 0x388   : > { %v8512_v62 = vpop.f32.mrf.mxu1  ;;  %v8546_v42 = vpop.f32.mrf.mxu0 }
 0x389   : > { %v10995_v22 = vadd.f32 %v4850_v12, %v4611_v52  ;;  %v4614_v33 = vadd.f32 %v8512_v62, %v10893_v51 }
 0x38a   : > { %v4559_v5 = vpop.f32.mrf.mxu1  ;;  %v4853_v45 = vpop.f32.mrf.mxu0 }
 0x38b   : > { %v10998_v43 = vadd.f32 %v8546_v42, %v4614_v33  ;;  %v4612_v19 = vadd.f32 %v4559_v5, %v10897_v2 }
 0x38c   : > { %v8515_v14 = vpop.f32.mrf.mxu1  ;;  %v8549_v20 = vpop.f32.mrf.mxu0 }
 0x38d   : > { %v11001_v15 = vadd.f32 %v4853_v45, %v4612_v19  ;;  %v4617_v34 = vadd.f32 %v8515_v14, %v10900_v58 }
 0x38e   : > { %v4572_v40 = vpop.f32.mrf.mxu1  ;;  %v4866_v10 = vpop.f32.mrf.mxu0 }
 0x38f   : > { %v11004_v26 = vadd.f32 %v8549_v20, %v4617_v34  ;;  %v4615_v3 = vadd.f32 %v4572_v40, %v10903_v54 }
 0x390   : > { %v8516_v30 = vpop.f32.mrf.mxu1  ;;  %v8550_v51 = vpop.f32.mrf.mxu0 }
 0x391   : > { %v11007_v46 = vadd.f32 %v4866_v10, %v4615_v3  ;;  %v4618_v8 = vadd.f32 %v8516_v30, %v10906_v39 }
 0x392   : > { %v4575_v23 = vpop.f32.mrf.mxu1  ;;  %v4869_v2 = vpop.f32.mrf.mxu0 }
 0x393   : > { %v11010_v35 = vadd.f32 %v8550_v51, %v4618_v8  ;;  %v4616_v56 = vadd.f32 %v4575_v23, %v10911_v11 }
 0x394   : > { %v11013_v27 = vpop.f32.mrf.mxu1  ;;  %v11015_v58 = vpop.f32.mrf.mxu0 }
 0x395   : > { %v11017_v17 = vadd.f32 %v4869_v2, %v4616_v56 }
 0x396   : > { %v11019_v48 = vpop.f32.mrf.mxu1  ;;  %v11021_v54 = vpop.f32.mrf.mxu0 }
 0x398   : > { %v11023_v1 = vpop.f32.mrf.mxu1  ;;  %v11025_v7 = vpop.f32.mrf.mxu0 }
 0x39a   : > { %v11027_v39 = vpop.f32.mrf.mxu1  ;;  %v11029_v12 = vpop.f32.mrf.mxu0 }
 0x39c   : > { %v8559_v52 = vpop.f32.mrf.mxu1  ;;  %v11031_v11 = vpop.f32.mrf.mxu0 }
 0x39d   : > { %v11034_v62 = vadd.f32 %v8559_v52, %v10932_v38 }
 0x39e   : > { %v5065_v42 = vpop.f32.mrf.mxu1  ;;  %v11036_v33 = vpop.f32.mrf.mxu0 }
 0x39f   : > { %v11039_v5 = vadd.f32 %v5065_v42, %v10935_v37 }
 0x3a0   : > { %v8560_v45 = vpop.f32.mrf.mxu1  ;;  %v11041_v19 = vpop.f32.mrf.mxu0 }
 0x3a1   : > { %v11044_v14 = vadd.f32 %v8560_v45, %v10938_v13 }
 0x3a2   : > { %v5068_v20 = vpop.f32.mrf.mxu1  ;;  %v11046_v34 = vpop.f32.mrf.mxu0 }
 0x3a3   : > { %v11049_v40 = vadd.f32 %v5068_v20, %v10941_v57 }
 0x3a4   : > { %v8563_v38 = vpop.f32.mrf.mxu1  ;;  %v11051_v10 = vpop.f32.mrf.mxu0 }
 0x3a5   : > { %v11054_v3 = vadd.f32 %v8563_v38, %v10944_v59 }
 0x3a6   : > { %v5081_v37 = vpop.f32.mrf.mxu1  ;;  %v11056_v30 = vpop.f32.mrf.mxu0 }
 0x3a7   : > { %v11059_v51 = vadd.f32 %v5081_v37, %v10947_v60 }
 0x3a8   : > { %v8564_v13 = vpop.f32.mrf.mxu1  ;;  %v11061_v8 = vpop.f32.mrf.mxu0 }
 0x3a9   : > { %v11064_v23 = vadd.f32 %v8564_v13, %v10950_v25 }
 0x3aa   : > { %v5084_v57 = vpop.f32.mrf.mxu1  ;;  %v11066_v2 = vpop.f32.mrf.mxu0 }
 0x3ab   : > { %v11069_v56 = vadd.f32 %v5084_v57, %v10953_v50 }
 0x3ac   : > { %v8567_v59 = vpop.f32.mrf.mxu1  ;;  %v11071_v52 = vpop.f32.mrf.mxu0 }
 0x3ad   : > { %v11074_v42 = vadd.f32 %v8567_v59, %v10956_v21 }
 0x3ae   : > { %v5097_v60 = vpop.f32.mrf.mxu1  ;;  %v11076_v45 = vpop.f32.mrf.mxu0 }
 0x3af   : > { %11814 = vst [vmem:[#allocation18_spill] sm:$0xff] %v11076_v45  ;;  %v11079_v20 = vadd.f32 %v5097_v60, %v10959_v44 }
 0x3b0   : > { %v8568_v25 = vpop.f32.mrf.mxu1  ;;  %v11081_v38 = vpop.f32.mrf.mxu0 }
 0x3b1   : > { %11815 = vst [vmem:[#allocation7_spill] sm:$0xff] %v11081_v38  ;;  %v11084_v37 = vadd.f32 %v8568_v25, %v10962_v16 }
 0x3b2   : > { %v5100_v50 = vpop.f32.mrf.mxu1  ;;  %v11086_v13 = vpop.f32.mrf.mxu0 }
 0x3b3   : > { %11816 = vst [vmem:[#allocation8_spill] sm:$0xff] %v11086_v13  ;;  %v11089_v57 = vadd.f32 %v5100_v50, %v10965_v4 }
 0x3b4   : > { %v8571_v21 = vpop.f32.mrf.mxu1  ;;  %v11091_v59 = vpop.f32.mrf.mxu0 }
 0x3b5   : > { %11817 = vst [vmem:[#allocation9_spill] sm:$0xff] %v11091_v59  ;;  %v11094_v45 = vadd.f32 %v8571_v21, %v10968_v41 }
 0x3b6   : > { %v5113_v44 = vpop.f32.mrf.mxu1  ;;  %v11096_v60 = vpop.f32.mrf.mxu0 }
 0x3b7   : > { %11818 = vst [vmem:[#allocation10_spill] sm:$0xff] %v11096_v60  ;;  %v11099_v38 = vadd.f32 %v5113_v44, %v10971_v61 }
 0x3b8   : > { %v8572_v16 = vpop.f32.mrf.mxu1  ;;  %v11101_v25 = vpop.f32.mrf.mxu0 }
 0x3b9   : > { %11819 = vst [vmem:[#allocation11_spill] sm:$0xff] %v11099_v38  ;;  %11820 = vst [vmem:[#allocation12_spill] sm:$0xff] %v11101_v25  ;;  %v11104_v13 = vadd.f32 %v8572_v16, %v10974_v0 }
 0x3ba   : > { %v5116_v4 = vpop.f32.mrf.mxu1  ;;  %v11106_v50 = vpop.f32.mrf.mxu0 }
 0x3bb   : > { %11821 = vst [vmem:[#allocation13_spill] sm:$0xff] %v11106_v50  ;;  %v11109_v59 = vadd.f32 %v5116_v4, %v10977_v18 }
 0x3bc   : > { %v8575_v41 = vpop.f32.mrf.mxu1  ;;  %v11114_v60 = vpop.f32.mrf.mxu0 }
 0x3bd   : > { %v11112_v21 = vadd.f32 %v8575_v41, %v10980_v49 }
 0x3be   : > { %v5129_v61 = vpop.f32.mrf.mxu1  ;;  %v11119_v38 = vpop.f32.mrf.mxu0 }
 0x3bf   : > { %v11117_v44 = vadd.f32 %v5129_v61, %v10983_v55 }
 0x3c0   : > { %v8576_v25 = vpop.f32.mrf.mxu1  ;;  %v11127_v50 = vpop.f32.mrf.mxu0 }
 0x3c1   : > { %11822 = vst [vmem:[#allocation14_spill] sm:$0xff] %v11117_v44  ;;  %v11122_v0 = vadd.f32 %v8576_v25, %v10986_v47 }
 0x3c2   : > { %v5132_v16 = vpop.f32.mrf.mxu1  ;;  %v11135_v44 = vpop.f32.mrf.mxu0 }
 0x3c3   : > { %v11125_v18 = vadd.f32 %v5132_v16, %v10989_v24 }
 0x3c4   : > { %v8579_v4 = vpop.f32.mrf.mxu1 }
 0x3c5   : > { %11823 = vst [vmem:[#allocation15_spill] sm:$0xff] %v11125_v18  ;;  %v11130_v49 = vadd.f32 %v8579_v4, %v10992_v32  ;;  %v4883_v18 = vadd.f32 %v10909_v36, %v10914_v31  ;;  %v11145_v32 = vpop.f32.mrf.mxu0  ;;  %v4884_v36 = vadd.f32 %v10921_v53, %v10924_v6  ;;  %v4882_v31 = vadd.f32 %v10926_v28, %v10929_v63  ;;  %v11173_v28 = vld [vmem:[%s11653_s5] ss:$0 sm:$0xff] }
 0x3c6   : > { %v5145_v41 = vpop.f32.mrf.mxu1 }
 0x3c7   : > { %11824 = vst [vmem:[#allocation16_spill] sm:$0xff] %v11130_v49  ;;  %v11133_v55 = vadd.f32 %v5145_v41, %v10995_v22  ;;  %v8779_v22 = vmov 1983009808  }
 0x3c8   : > { %v8580_v61 = vpop.f32.mrf.mxu1  ;;  %v5940_v41 = vunpack.c.l.s4 %v8779_v22 }
 0x3c9   : > { %11825 = vst [vmem:[#allocation17_spill] sm:$0xff] %v11133_v55  ;;  %v11138_v47 = vadd.f32 %v8580_v61, %v10998_v43  ;;  %v5942_v55 = vlaneseq  ;;  %v4881_v43 = vadd.f32 %v10916_v29, %v10919_v9  ;;  %v5178_v61 = vadd.f32 %v11013_v27, %v4883_v18 }
 0x3ca   : > { %v5148_v25 = vpop.f32.mrf.mxu1  ;;  %v5179_v9 = vadd.f32 %v11023_v1, %v4884_v36  ;;  %v11832_v36 = vld [vmem:[#allocation10_spill] sm:$0xff] }
 0x3cb   : > { %v11141_v24 = vadd.f32 %v5148_v25, %v11001_v15  ;;  %v5176_v25 = vadd.f32 %v11019_v48, %v4881_v43  ;;  %v5943_v29 = vshrl.u32 %v5942_v55, 7  ;;  %v5472_v18 = vadd.f32 %v11015_v58, %v5178_v61  ;;  %v11187_v55 = vld [vmem:[%s11654_s6] ss:$0 sm:$0xff] }
 0x3cc   : > { %v8583_v16 = vpop.f32.mrf.mxu1  ;;  %v5473_v1 = vadd.f32 %v11025_v7, %v5179_v9  ;;  %v5476_v58 = vadd.f32 %v11031_v11, %v11034_v62  ;;  %v11193_v7 = vadd.f32 %v11046_v34, %v11049_v40  ;;  %v11198_v11 = vadd.f32 %v11051_v10, %v11054_v3  ;;  %v11831_v61 = vld [vmem:[#allocation11_spill] sm:$0xff] }
 0x3cd   : > { %v11148_v4 = vadd.f32 %v8583_v16, %v11004_v26  ;;  %v5439_v16 = vpop.f32.mrf.mxu0  ;;  %v5470_v63 = vadd.f32 %v11021_v54, %v5176_v25  ;;  %v11202_v62 = vadd.f32 %v11056_v30, %v11059_v51  ;;  %v11827_v30 = vld [vmem:[#allocation18_spill] sm:$0xff] }
 0x3ce   : > { %v5161_v49 = vpop.f32.mrf.mxu1  ;;  %v11220_v51 = vadd.f32 %v11827_v30, %v11079_v20 }
 0x3cf   : > { %11826 = vst [vmem:[#allocation19_spill] sm:$0xff] %v11148_v4  ;;  %v11154_v15 = vadd.f32 %v5161_v49, %v11007_v46  ;;  %v5941_v4 = vunpack.c.0.s8 %v5940_v41  ;;  %v5177_v46 = vadd.f32 %v11027_v39, %v4882_v31  ;;  %v11236_v31 = vadd.f32 %v11832_v36, %v11831_v61 }
 0x3d0   : > { %v8584_v26 = vpop.f32.mrf.mxu1 }
 0x3d1   : > { %v11162_v22 = vadd.f32 %v8584_v26, %v11010_v35  ;;  %v8614_v35 = vpop.f32.mrf.mxu0  ;;  %v11176_v49 = vsub.s32 %v5941_v4, %v5943_v29  ;;  %v5471_v39 = vadd.f32 %v11029_v12, %v5177_v46  ;;  %v5477_v4 = vadd.f32 %v11041_v19, %v11044_v14  ;;  %v11833_v29 = vld [vmem:[#allocation12_spill] sm:$0xff] }
 0x3d2   : > { %v5164_v27 = vpop.f32.mrf.mxu1  ;;  %v11214_v14 = vadd.f32 %v11071_v52, %v11074_v42  ;;  %v11830_v52 = vld [vmem:[#allocation9_spill] sm:$0xff]  ;;  %v11242_v9 = vadd.f32 %v11833_v29, %v11104_v13 }
 0x3d3   : > { %v11168_v53 = vadd.f32 %v5164_v27, %v11017_v17  ;;  %v5474_v17 = vadd.f32 %v11036_v33, %v11039_v5  ;;  %v11206_v33 = vadd.f32 %v11061_v8, %v11064_v23  ;;  %v11210_v5 = vadd.f32 %v11066_v2, %v11069_v56  ;;  %v5442_v34 = vpop.f32.mrf.mxu0  ;;  %v11828_v8 = vld [vmem:[#allocation7_spill] sm:$0xff]  ;;  %v11829_v2 = vld [vmem:[#allocation8_spill] sm:$0xff] }
 0x3d4   : > { %v8623_v6 = vpop.f32.mrf.mxu1  ;;  %v11224_v23 = vadd.f32 %v11828_v8, %v11084_v37  ;;  %v11228_v56 = vadd.f32 %v11829_v2, %v11089_v57  ;;  %v11232_v42 = vadd.f32 %v11830_v52, %v11094_v45  ;;  %v11834_v57 = vld [vmem:[#allocation13_spill] sm:$0xff]  ;;  %v11250_v45 = vadd.f32 %v11114_v60, %v11112_v21  ;;  %v11837_v21 = vld [vmem:[#allocation16_spill] sm:$0xff] }
 0x3d5   : > { %v5766_v48 = vadd.f32 %v8623_v6, %v5472_v18  ;;  %v8617_v26 = vpop.f32.mrf.mxu0  ;;  %v11246_v46 = vadd.f32 %v11834_v57, %v11109_v59  ;;  %v11260_v59 = vadd.f32 %v11127_v50, %v11122_v0  ;;  %v11276_v50 = vadd.f32 %v8614_v35, %v11138_v47 }
 0x3d6   : > { %v5637_v54 = vpop.f32.mrf.mxu1 }
 0x3d7   : > { %v5805_v12 = vmul.f32 %v11173_v28, %v5766_v48  ;;  %v5764_v41 = vadd.f32 %v5637_v54, %v5470_v63  ;;  %v11836_v54 = vld [vmem:[#allocation15_spill] sm:$0xff] }
 0x3d8   : > { %v8624_v19 = vpop.f32.mrf.mxu1  ;;  %v11264_v60 = vadd.f32 %v11135_v44, %v11836_v54  ;;  %v11279_v44 = vadd.f32 %v5442_v34, %v11141_v24 }
 0x3d9   : > { %v5844_v40 = vadd.f32 %v11187_v55, %v5805_v12  ;;  %v5803_v10 = vmul.f32 %v11173_v28, %v5764_v41  ;;  %v5767_v3 = vadd.f32 %v8624_v19, %v5473_v1  ;;  %v11268_v12 = vadd.f32 %v11145_v32, %v11837_v21  ;;  %v11838_v19 = vld [vmem:[#allocation17_spill] sm:$0xff] }
 0x3da   : > { %v5640_v43 = vpop.f32.mrf.mxu1 }
 0x3db   : > { %v5842_v20 = vadd.f32 %v11187_v55, %v5803_v10  ;;  %v5806_v25 = vmul.f32 %v11173_v28, %v5767_v3  ;;  %v5765_v37 = vadd.f32 %v5640_v43, %v5471_v39  ;;  %v5876_v27 = vmax.f32 %v5844_v40, 0.0  ;;  %v11835_v39 = vld [vmem:[#allocation14_spill] sm:$0xff]  ;;  %v11839_v43 = vld [vmem:[#allocation19_spill] sm:$0xff] }
 0x3dc   : > { %v8627_v18 = vpop.f32.mrf.mxu1  ;;  %v11256_v13 = vadd.f32 %v11119_v38, %v11835_v39  ;;  %v11271_v40 = vadd.f32 %v5439_v16, %v11838_v19  ;;  %v11286_v61 = vadd.f32 %v8617_v26, %v11839_v43 }
 0x3dd   : > { %v5874_v6 = vmax.f32 %v5842_v20, 0.0  ;;  %v5845_v63 = vadd.f32 %v11187_v55, %v5806_v25  ;;  %v5804_v48 = vmul.f32 %v11173_v28, %v5765_v37  ;;  %v5770_v1 = vadd.f32 %v8627_v18, %v5476_v58  ;;  %v5455_v58 = vpop.f32.mrf.mxu0 }
 0x3de   : > { %v5653_v41 = vpop.f32.mrf.mxu1  ;;  %v11289_v36 = vadd.f32 %v5455_v58, %v11154_v15 }
 0x3df   : > { %v5906_v10 = vmax.f32 %v5874_v6, %v5876_v27  ;;  %v5843_v38 = vadd.f32 %v11187_v55, %v5804_v48  ;;  %v5809_v3 = vmul.f32 %v11173_v28, %v5770_v1  ;;  %v5877_v0 = vmax.f32 %v5845_v63, 0.0 }
 0x3e0   : > { %v5768_v30 = vadd.f32 %v5653_v41, %v5474_v17  ;;  %v8628_v32 = vpop.f32.mrf.mxu1 }
 0x3e1   : > { %v5938_v8 = vcombine.high %v5906_v10, %v5906_v10  ;;  %v5945_v2 = vrot.slane %v5906_v10, %v11176_v49  ;;  %v5875_v16 = vmax.f32 %v5843_v38, 0.0  ;;  %v11283_v52 = vadd.f32 %v11187_v55, %v5809_v3 }
 0x3e2   : > { %v5807_v47 = vmul.f32 %v11173_v28, %v5768_v30  ;;  %v5771_v24 = vadd.f32 %v8628_v32, %v5477_v4 }
 0x3e3   : > { %v5952_v35 = vrot.slane %v5938_v8, %v11176_v49  ;;  %v5953_v17 = vcombine.high %v5945_v2, %v5945_v2  ;;  %v6274_v34 = vsel %vm3127_vm5, %v5945_v2, -inf  ;;  %v5907_v20 = vmax.f32 %v5875_v16, %v5877_v0 }
 0x3e4   : > { %v6275_v25 = vrot.slane %v6274_v34, 4  ;;  %v5880_v37 = vmax.f32 %v11283_v52, 0.0  ;;  %v11296_v29 = vadd.f32 %v11187_v55, %v5807_v47  ;;  %v5810_v26 = vmul.f32 %v11173_v28, %v5771_v24 }
 0x3e5   : > { %v5954_v57 = vcombine.high %v5952_v35, %v5952_v35  ;;  %v6281_v15 = vsel %vm3127_vm5, %v5953_v17, -inf  ;;  %v6288_v27 = vsel %vm3127_vm5, %v5952_v35, -inf  ;;  %v5955_v4 = vcombine.high %v5907_v20, %v5907_v20 }
 0x3e6   : > { %v6276_v18 = vmax.f32 %v6274_v34, %v6275_v25  ;;  %v6282_v6 = vrot.slane %v6281_v15, 4  ;;  %v6289_v63 = vrot.slane %v6288_v27, 4  ;;  %v5962_v48 = vrot.slane %v5907_v20, %v11176_v49 }
 0x3e7   : > { %v6295_v1 = vsel %vm3127_vm5, %v5954_v57, -inf  ;;  %v5969_v39 = vrot.slane %v5955_v4, %v11176_v49  ;;  %v5878_v54 = vmax.f32 %v11296_v29, 0.0  ;;  %v11306_v21 = vadd.f32 %v11187_v55, %v5810_v26 }
 0x3e8   : > { %v6277_v41 = vrot.slane %v6276_v18, 2  ;;  %v6283_v19 = vmax.f32 %v6281_v15, %v6282_v6  ;;  %v6290_v58 = vmax.f32 %v6288_v27, %v6289_v63  ;;  %v6296_v10 = vrot.slane %v6295_v1, 4 }
 0x3e9   : > { %v5970_v38 = vcombine.high %v5962_v48, %v5962_v48  ;;  %v5971_v3 = vcombine.high %v5969_v39, %v5969_v39  ;;  %v6302_v0 = vsel %vm3127_vm5, %v5962_v48, -inf  ;;  %v6316_v30 = vsel %vm3127_vm5, %v5969_v39, -inf }
 0x3ea   : > { %v6278_v32 = vmax.f32 %v6276_v18, %v6277_v41  ;;  %v6284_v8 = vrot.slane %v6283_v19, 2  ;;  %v6291_v2 = vrot.slane %v6290_v58, 2  ;;  %v6297_v16 = vmax.f32 %v6295_v1, %v6296_v10 }
 0x3eb   : > { %v6303_v43 = vrot.slane %v6302_v0, 4  ;;  %v6309_v47 = vsel %vm3127_vm5, %v5970_v38, -inf  ;;  %v6317_v24 = vrot.slane %v6316_v30, 4  ;;  %v6323_v35 = vsel %vm3127_vm5, %v5971_v3, -inf }
 0x3ec   : > { %v6279_v17 = vrot.slane %v6278_v32, 1  ;;  %v6285_v34 = vmax.f32 %v6283_v19, %v6284_v8  ;;  %v6292_v20 = vmax.f32 %v6290_v58, %v6291_v2  ;;  %v6298_v25 = vrot.slane %v6297_v16, 2 }
 0x3ed   : > { %v6304_v29 = vmax.f32 %v6302_v0, %v6303_v43  ;;  %v6310_v26 = vrot.slane %v6309_v47, 4  ;;  %v6318_v57 = vmax.f32 %v6316_v30, %v6317_v24  ;;  %v6324_v15 = vrot.slane %v6323_v35, 4 }
 0x3ee   : > { %v6280_v27 = vmax.f32 %v6278_v32, %v6279_v17  ;;  %v6286_v4 = vrot.slane %v6285_v34, 1  ;;  %v6293_v18 = vrot.slane %v6292_v20, 1  ;;  %v6299_v6 = vmax.f32 %v6297_v16, %v6298_v25 }
 0x3ef   : > { %v6305_v63 = vrot.slane %v6304_v29, 2  ;;  %v6311_v48 = vmax.f32 %v6309_v47, %v6310_v26  ;;  %v6319_v1 = vrot.slane %v6318_v57, 2  ;;  %v6325_v39 = vmax.f32 %v6323_v35, %v6324_v15  ;;  %v5656_v35 = vpop.f32.mrf.mxu1 }
 0x3f0   : > { %v6287_v41 = vmax.f32 %v6285_v34, %v6286_v4  ;;  %v6294_v10 = vmax.f32 %v6292_v20, %v6293_v18  ;;  %v6300_v38 = vrot.slane %v6299_v6, 1  ;;  %v7591_v19 = vpack.c.bf16 %v6280_v27, %v6280_v27 }
 0x3f1   : > { %v6306_v58 = vmax.f32 %v6304_v29, %v6305_v63  ;;  %v6312_v3 = vrot.slane %v6311_v48, 2  ;;  %v6320_v0 = vmax.f32 %v6318_v57, %v6319_v1  ;;  %v6326_v8 = vrot.slane %v6325_v39, 2 }
 0x3f2   : > { %v6301_v30 = vmax.f32 %v6299_v6, %v6300_v38  ;;  %v7592_v2 = vpack.c.bf16 %v6287_v41, %v6287_v41  ;;  %v7593_v43 = vpack.c.bf16 %v6294_v10, %v6294_v10  ;;  %v6978_v32 = vunpack.c.l.b16 %v7591_v19  ;;  %v8631_v10 = vpop.f32.mrf.mxu1 }
 0x3f3   : > { %v6307_v24 = vrot.slane %v6306_v58, 1  ;;  %v6313_v16 = vmax.f32 %v6311_v48, %v6312_v3  ;;  %v6321_v17 = vrot.slane %v6320_v0, 1  ;;  %v6327_v47 = vmax.f32 %v6325_v39, %v6326_v8 }
 0x3f4   : > { %v7594_v34 = vpack.c.bf16 %v6301_v30, %v6301_v30  ;;  %v6979_v20 = vunpack.c.l.b16 %v7592_v2  ;;  %v6980_v25 = vunpack.c.l.b16 %v7593_v43  ;;  %v5908_v29 = vmax.f32 %v5878_v54, %v5880_v37 }
 0x3f5   : > { %v6308_v26 = vmax.f32 %v6306_v58, %v6307_v24  ;;  %v6314_v57 = vrot.slane %v6313_v16, 1  ;;  %v6322_v15 = vmax.f32 %v6320_v0, %v6321_v17  ;;  %v6328_v27 = vrot.slane %v6327_v47, 1 }
 0x3f6   : > { %v6981_v4 = vunpack.c.l.b16 %v7594_v34  ;;  %v7043_v18 = vsel %vm7042_vm6, %v6979_v20, %v6978_v32  ;;  %v5972_v6 = vcombine.high %v5908_v29, %v5908_v29  ;;  %v5979_v63 = vrot.slane %v5908_v29, %v11176_v49 }
 0x3f7   : > { %v7045_v48 = vsel %vm7044_vm7, %v6980_v25, %v7043_v18  ;;  %v6315_v1 = vmax.f32 %v6313_v16, %v6314_v57  ;;  %v6329_v39 = vmax.f32 %v6327_v47, %v6328_v27  ;;  %v7595_v41 = vpack.c.bf16 %v6308_v26, %v6308_v26  ;;  %v5669_v47 = vpop.f32.mrf.mxu1 }
 0x3f8   : > { %v7597_v52 = vpack.c.bf16 %v6322_v15, %v6322_v15  ;;  %v7047_v37 = vsel %vm7046_vm8, %v6981_v4, %v7045_v48  ;;  %v5986_v54 = vrot.slane %v5972_v6, %v11176_v49  ;;  %v5987_v38 = vcombine.high %v5979_v63, %v5979_v63 }
 0x3f9   : > { %v7596_v19 = vpack.c.bf16 %v6315_v1, %v6315_v1  ;;  %v7598_v58 = vpack.c.bf16 %v6329_v39, %v6329_v39  ;;  %v6982_v3 = vunpack.c.l.b16 %v7595_v41  ;;  %v6330_v0 = vsel %vm3127_vm5, %v5979_v63, -inf }
 0x3fa   : > { %v6984_v8 = vunpack.c.l.b16 %v7597_v52  ;;  %v5988_v30 = vcombine.high %v5986_v54, %v5986_v54  ;;  %v6331_v2 = vrot.slane %v6330_v0, 4  ;;  %v6337_v43 = vsel %vm3127_vm5, %v5987_v38, -inf  ;;  %v8632_v52 = vpop.f32.mrf.mxu1 }
 0x3fb   : > { %v6983_v32 = vunpack.c.l.b16 %v7596_v19  ;;  %v6985_v24 = vunpack.c.l.b16 %v7598_v58  ;;  %v7049_v16 = vsel %vm7048_vm9, %v6982_v3, %v7047_v37  ;;  %v6338_v17 = vrot.slane %v6337_v43, 4 }
 0x3fc   : > { %v6332_v34 = vmax.f32 %v6330_v0, %v6331_v2  ;;  %v6344_v20 = vsel %vm3127_vm5, %v5986_v54, -inf  ;;  %v6351_v25 = vsel %vm3127_vm5, %v5988_v30, -inf  ;;  %v5881_v29 = vmax.f32 %v11306_v21, 0.0 }
 0x3fd   : > { %v7051_v26 = vsel %vm7050_vm10, %v6983_v32, %v7049_v16  ;;  %v6339_v57 = vmax.f32 %v6337_v43, %v6338_v17  ;;  %v6345_v15 = vrot.slane %v6344_v20, 4  ;;  %v6352_v27 = vrot.slane %v6351_v25, 4  ;;  %v5672_v32 = vpop.f32.mrf.mxu1 }
 0x3fe   : > { %v7053_v4 = vsel %vm7052_vm11, %v6984_v8, %v7051_v26  ;;  %v6333_v18 = vrot.slane %v6332_v34, 2  ;;  %v5769_v6 = vadd.f32 %v5656_v35, %v11193_v7  ;;  %v5774_v63 = vadd.f32 %v8631_v10, %v11198_v11 }
 0x3ff   : > { %v7055_v48 = vsel %vm7054_vm12, %v6985_v24, %v7053_v4  ;;  %v6340_v1 = vrot.slane %v6339_v57, 2  ;;  %v6346_v39 = vmax.f32 %v6344_v20, %v6345_v15  ;;  %v6353_v41 = vmax.f32 %v6351_v25, %v6352_v27 }
 0x400   : > { %v7105_v37 = vpack.c.b16 %v7055_v48, %v7055_v48  ;;  %v6334_v21 = vmax.f32 %v6332_v34, %v6333_v18  ;;  %v5808_v54 = vmul.f32 %v11173_v28, %v5769_v6  ;;  %v5813_v38 = vmul.f32 %v11173_v28, %v5774_v63 }
 0x401   : > { %v6341_v19 = vmax.f32 %v6339_v57, %v6340_v1  ;;  %v6347_v58 = vrot.slane %v6346_v39, 2  ;;  %v6354_v3 = vrot.slane %v6353_v41, 2  ;;  %v5772_v0 = vadd.f32 %v5669_v47, %v11202_v62 }
 0x402   : > { %7122 = vst.msk [vmem:[%s11336_s22] sm:$0xf] %vm7121_vm13, %v7105_v37  ;;  %v6335_v7 = vrot.slane %v6334_v21, 1  ;;  %v5847_v11 = vadd.f32 %v11187_v55, %v5808_v54  ;;  %v5852_v35 = vadd.f32 %v11187_v55, %v5813_v38  ;;  %v5775_v10 = vadd.f32 %v8632_v52, %v11206_v33 }
 0x403   : > { %v6342_v8 = vrot.slane %v6341_v19, 1  ;;  %v6348_v30 = vmax.f32 %v6346_v39, %v6347_v58  ;;  %v6355_v2 = vmax.f32 %v6353_v41, %v6354_v3  ;;  %v5811_v43 = vmul.f32 %v11173_v28, %v5772_v0 }
 0x404   : > { %v6336_v24 = vmax.f32 %v6334_v21, %v6335_v7  ;;  %v5879_v62 = vmax.f32 %v5847_v11, 0.0  ;;  %v5884_v16 = vmax.f32 %v5852_v35, 0.0  ;;  %v5814_v17 = vmul.f32 %v11173_v28, %v5775_v10 }
 0x405   : > { %v6343_v47 = vmax.f32 %v6341_v19, %v6342_v8  ;;  %v6349_v34 = vrot.slane %v6348_v30, 1  ;;  %v6356_v20 = vrot.slane %v6355_v2, 1  ;;  %v5850_v25 = vadd.f32 %v11187_v55, %v5811_v43 }
 0x406   : > { %v7599_v26 = vpack.c.bf16 %v6336_v24, %v6336_v24  ;;  %v5909_v57 = vmax.f32 %v5879_v62, %v5881_v29  ;;  %v11347_v33 = vadd.f32 %v11187_v55, %v5814_v17  ;;  %v5773_v15 = vadd.f32 %v5672_v32, %v11210_v5 }
 0x407   : > { %v6350_v27 = vmax.f32 %v6348_v30, %v6349_v34  ;;  %v6357_v4 = vmax.f32 %v6355_v2, %v6356_v20  ;;  %v7600_v18 = vpack.c.bf16 %v6343_v47, %v6343_v47  ;;  %v5882_v6 = vmax.f32 %v5850_v25, 0.0 }
 0x408   : > { %v6986_v63 = vunpack.c.l.b16 %v7599_v26  ;;  %v5989_v48 = vcombine.high %v5909_v57, %v5909_v57  ;;  %v5996_v1 = vrot.slane %v5909_v57, %v11176_v49  ;;  %v5885_v39 = vmax.f32 %v11347_v33, 0.0 }
 0x409   : > { %v7601_v41 = vpack.c.bf16 %v6350_v27, %v6350_v27  ;;  %v7602_v52 = vpack.c.bf16 %v6357_v4, %v6357_v4  ;;  %v6987_v37 = vunpack.c.l.b16 %v7600_v18  ;;  %v5910_v21 = vmax.f32 %v5882_v6, %v5884_v16 }
 0x40a   : > { %v6003_v29 = vrot.slane %v5989_v48, %v11176_v49  ;;  %v6004_v54 = vcombine.high %v5996_v1, %v5996_v1  ;;  %v6358_v38 = vsel %vm3127_vm5, %v5996_v1, -inf  ;;  %v11355_v5 = vmul.f32 %v11173_v28, %v5773_v15 }
 0x40b   : > { %v6988_v19 = vunpack.c.l.b16 %v7601_v41  ;;  %v6989_v58 = vunpack.c.l.b16 %v7602_v52  ;;  %v7056_v3 = vsel %vm7042_vm6, %v6987_v37, %v6986_v63  ;;  %v6359_v0 = vrot.slane %v6358_v38, 4  ;;  %v8635_v63 = vpop.f32.mrf.mxu1 }
 0x40c   : > { %v6005_v7 = vcombine.high %v6003_v29, %v6003_v29  ;;  %v6365_v11 = vsel %vm3127_vm5, %v6004_v54, -inf  ;;  %v6372_v35 = vsel %vm3127_vm5, %v6003_v29, -inf  ;;  %v6006_v10 = vcombine.high %v5910_v21, %v5910_v21 }
 0x40d   : > { %v7057_v8 = vsel %vm7044_vm7, %v6988_v19, %v7056_v3  ;;  %v6360_v30 = vmax.f32 %v6358_v38, %v6359_v0  ;;  %v6366_v2 = vrot.slane %v6365_v11, 4  ;;  %v6373_v43 = vrot.slane %v6372_v35, 4 }
 0x40e   : > { %v6379_v32 = vsel %vm3127_vm5, %v6005_v7, -inf  ;;  %v7058_v24 = vsel %vm7046_vm8, %v6989_v58, %v7057_v8  ;;  %v6013_v62 = vrot.slane %v5910_v21, %v11176_v49  ;;  %v6020_v16 = vrot.slane %v6006_v10, %v11176_v49  ;;  %v5685_v10 = vpop.f32.mrf.mxu1 }
 0x40f   : > { %v6361_v17 = vrot.slane %v6360_v30, 2  ;;  %v6367_v47 = vmax.f32 %v6365_v11, %v6366_v2  ;;  %v6374_v34 = vmax.f32 %v6372_v35, %v6373_v43  ;;  %v6380_v20 = vrot.slane %v6379_v32, 4 }
 0x410   : > { %v6021_v25 = vcombine.high %v6013_v62, %v6013_v62  ;;  %v6022_v26 = vcombine.high %v6020_v16, %v6020_v16  ;;  %v6386_v57 = vsel %vm3127_vm5, %v6013_v62, -inf  ;;  %v6400_v15 = vsel %vm3127_vm5, %v6020_v16, -inf }
 0x411   : > { %v6362_v27 = vmax.f32 %v6360_v30, %v6361_v17  ;;  %v6368_v4 = vrot.slane %v6367_v47, 2  ;;  %v6375_v18 = vrot.slane %v6374_v34, 2  ;;  %v6381_v6 = vmax.f32 %v6379_v32, %v6380_v20 }
 0x412   : > { %v6387_v48 = vrot.slane %v6386_v57, 4  ;;  %v6393_v1 = vsel %vm3127_vm5, %v6021_v25, -inf  ;;  %v6401_v41 = vrot.slane %v6400_v15, 4  ;;  %v6407_v52 = vsel %vm3127_vm5, %v6022_v26, -inf }
 0x413   : > { %v6363_v37 = vrot.slane %v6362_v27, 1  ;;  %v6369_v21 = vmax.f32 %v6367_v47, %v6368_v4  ;;  %v6376_v29 = vmax.f32 %v6374_v34, %v6375_v18  ;;  %v6382_v54 = vrot.slane %v6381_v6, 2  ;;  %v8636_v4 = vpop.f32.mrf.mxu1 }
 0x414   : > { %v6388_v38 = vmax.f32 %v6386_v57, %v6387_v48  ;;  %v6394_v19 = vrot.slane %v6393_v1, 4  ;;  %v6402_v58 = vmax.f32 %v6400_v15, %v6401_v41  ;;  %v6408_v3 = vrot.slane %v6407_v52, 4 }
 0x415   : > { %v6364_v0 = vmax.f32 %v6362_v27, %v6363_v37  ;;  %v6370_v7 = vrot.slane %v6369_v21, 1  ;;  %v6377_v11 = vrot.slane %v6376_v29, 1  ;;  %v6383_v35 = vmax.f32 %v6381_v6, %v6382_v54 }
 0x416   : > { %v6389_v8 = vrot.slane %v6388_v38, 2  ;;  %v6395_v30 = vmax.f32 %v6393_v1, %v6394_v19  ;;  %v6403_v2 = vrot.slane %v6402_v58, 2  ;;  %v6409_v43 = vmax.f32 %v6407_v52, %v6408_v3 }
 0x417   : > { %v6371_v32 = vmax.f32 %v6369_v21, %v6370_v7  ;;  %v6378_v62 = vmax.f32 %v6376_v29, %v6377_v11  ;;  %v6384_v16 = vrot.slane %v6383_v35, 1  ;;  %v7603_v17 = vpack.c.bf16 %v6364_v0, %v6364_v0  ;;  %v5688_v11 = vpop.f32.mrf.mxu1 }
 0x418   : > { %v6390_v47 = vmax.f32 %v6388_v38, %v6389_v8  ;;  %v6396_v34 = vrot.slane %v6395_v30, 2  ;;  %v6404_v20 = vmax.f32 %v6402_v58, %v6403_v2  ;;  %v6410_v25 = vrot.slane %v6409_v43, 2 }
 0x419   : > { %v6385_v26 = vmax.f32 %v6383_v35, %v6384_v16  ;;  %v7604_v57 = vpack.c.bf16 %v6371_v32, %v6371_v32  ;;  %v7605_v15 = vpack.c.bf16 %v6378_v62, %v6378_v62  ;;  %v6990_v27 = vunpack.c.l.b16 %v7603_v17 }
 0x41a   : > { %v6391_v18 = vrot.slane %v6390_v47, 1  ;;  %v6397_v6 = vmax.f32 %v6395_v30, %v6396_v34  ;;  %v6405_v48 = vrot.slane %v6404_v20, 1  ;;  %v6411_v41 = vmax.f32 %v6409_v43, %v6410_v25  ;;  %v8639_v25 = vpop.f32.mrf.mxu1 }
 0x41b   : > { %v7606_v1 = vpack.c.bf16 %v6385_v26, %v6385_v26  ;;  %v6991_v37 = vunpack.c.l.b16 %v7604_v57  ;;  %v6992_v52 = vunpack.c.l.b16 %v7605_v15  ;;  %v7059_v21 = vsel %vm7048_vm9, %v6990_v27, %v7058_v24 }
 0x41c   : > { %v6392_v29 = vmax.f32 %v6390_v47, %v6391_v18  ;;  %v6398_v54 = vrot.slane %v6397_v6, 1  ;;  %v6406_v38 = vmax.f32 %v6404_v20, %v6405_v48  ;;  %v6412_v19 = vrot.slane %v6411_v41, 1 }
 0x41d   : > { %v6993_v58 = vunpack.c.l.b16 %v7606_v1  ;;  %v7060_v3 = vsel %vm7050_vm10, %v6991_v37, %v7059_v21  ;;  %v5851_v0 = vadd.f32 %v11187_v55, %v11355_v5  ;;  %v5778_v7 = vadd.f32 %v8635_v63, %v11214_v14 }
 0x41e   : > { %v7061_v35 = vsel %vm7052_vm11, %v6992_v52, %v7060_v3  ;;  %v6399_v8 = vmax.f32 %v6397_v6, %v6398_v54  ;;  %v6413_v30 = vmax.f32 %v6411_v41, %v6412_v19  ;;  %v7607_v2 = vpack.c.bf16 %v6392_v29, %v6392_v29 }
 0x41f   : > { %v7062_v24 = vsel %vm7054_vm12, %v6993_v58, %v7061_v35  ;;  %v7609_v43 = vpack.c.bf16 %v6406_v38, %v6406_v38  ;;  %v5883_v32 = vmax.f32 %v5851_v0, 0.0  ;;  %v5817_v62 = vmul.f32 %v11173_v28, %v5778_v7 }
 0x420   : > { %v7106_v16 = vpack.c.b16 %v7062_v24, %v7062_v24  ;;  %v7608_v17 = vpack.c.bf16 %v6399_v8, %v6399_v8  ;;  %v7610_v47 = vpack.c.bf16 %v6413_v30, %v6413_v30  ;;  %v6994_v34 = vunpack.c.l.b16 %v7607_v2 }
 0x421   : > { %v6996_v5 = vunpack.c.l.b16 %v7609_v43  ;;  %v5911_v14 = vmax.f32 %v5883_v32, %v5885_v39  ;;  %v5856_v63 = vadd.f32 %v11187_v55, %v5817_v62  ;;  %v5776_v20 = vadd.f32 %v5685_v10, %v11220_v51 }
 0x422   : > { %7123 = vst.msk [vmem:[%s11336_s22 + $0x4] sm:$0xf] %vm7121_vm13, %v7106_v16  ;;  %v6995_v26 = vunpack.c.l.b16 %v7608_v17  ;;  %v6997_v57 = vunpack.c.l.b16 %v7610_v47  ;;  %v5779_v15 = vadd.f32 %v8636_v4, %v11224_v23  ;;  %v5777_v27 = vadd.f32 %v5688_v11, %v11228_v56  ;;  %v5701_v11 = vpop.f32.mrf.mxu1 }
 0x423   : > { %v6023_v18 = vcombine.high %v5911_v14, %v5911_v14  ;;  %v6030_v6 = vrot.slane %v5911_v14, %v11176_v49  ;;  %v5888_v48 = vmax.f32 %v5856_v63, 0.0  ;;  %v5815_v33 = vmul.f32 %v11173_v28, %v5776_v20 }
 0x424   : > { %v7063_v39 = vsel %vm7042_vm6, %v6995_v26, %v6994_v34  ;;  %v5818_v41 = vmul.f32 %v11173_v28, %v5779_v15  ;;  %v5816_v51 = vmul.f32 %v11173_v28, %v5777_v27  ;;  %v5782_v10 = vadd.f32 %v8639_v25, %v11232_v42 }
 0x425   : > { %v7064_v1 = vsel %vm7044_vm7, %v6996_v5, %v7063_v39  ;;  %v6037_v23 = vrot.slane %v6023_v18, %v11176_v49  ;;  %v6038_v4 = vcombine.high %v6030_v6, %v6030_v6  ;;  %v6414_v56 = vsel %vm3127_vm5, %v6030_v6, -inf }
 0x426   : > { %v6415_v37 = vrot.slane %v6414_v56, 4  ;;  %v11395_v52 = vsel %vm7046_vm8, %v6997_v57, %v7064_v1  ;;  %v5854_v21 = vadd.f32 %v11187_v55, %v5815_v33  ;;  %v5857_v29 = vadd.f32 %v11187_v55, %v5818_v41 }
 0x427   : > { %v6039_v54 = vcombine.high %v6037_v23, %v6037_v23  ;;  %v6421_v38 = vsel %vm3127_vm5, %v6038_v4, -inf  ;;  %v6428_v42 = vsel %vm3127_vm5, %v6037_v23, -inf  ;;  %v5855_v19 = vadd.f32 %v11187_v55, %v5816_v51 }
 0x428   : > { %v6416_v58 = vmax.f32 %v6414_v56, %v6415_v37  ;;  %v6422_v3 = vrot.slane %v6421_v38, 4  ;;  %v6429_v0 = vrot.slane %v6428_v42, 4  ;;  %v5886_v7 = vmax.f32 %v5854_v21, 0.0 }
 0x429   : > { %v6435_v35 = vsel %vm3127_vm5, %v6039_v54, -inf  ;;  %v5889_v8 = vmax.f32 %v5857_v29, 0.0  ;;  %v5887_v30 = vmax.f32 %v5855_v19, 0.0  ;;  %v5821_v2 = vmul.f32 %v11173_v28, %v5782_v10 }
 0x42a   : > { %v6417_v24 = vrot.slane %v6416_v58, 2  ;;  %v6423_v43 = vmax.f32 %v6421_v38, %v6422_v3  ;;  %v6430_v32 = vmax.f32 %v6428_v42, %v6429_v0  ;;  %v6436_v62 = vrot.slane %v6435_v35, 4 }
 0x42b   : > { %v5912_v16 = vmax.f32 %v5886_v7, %v5888_v48  ;;  %v5913_v17 = vmax.f32 %v5887_v30, %v5889_v8  ;;  %v11405_v47 = vadd.f32 %v11187_v55, %v5821_v2  ;;  %v11408_v34 = vadd.f32 %v5701_v11, %v11236_v31 }
 0x42c   : > { %v6418_v5 = vmax.f32 %v6416_v58, %v6417_v24  ;;  %v6424_v14 = vrot.slane %v6423_v43, 2  ;;  %v6431_v63 = vrot.slane %v6430_v32, 2  ;;  %v6437_v20 = vmax.f32 %v6435_v35, %v6436_v62 }
 0x42d   : > { %v6040_v25 = vcombine.high %v5912_v16, %v5912_v16  ;;  %v6047_v26 = vrot.slane %v5912_v16, %v11176_v49  ;;  %v6057_v57 = vcombine.high %v5913_v17, %v5913_v17  ;;  %v6064_v15 = vrot.slane %v5913_v17, %v11176_v49 }
 0x42e   : > { %v6419_v27 = vrot.slane %v6418_v5, 1  ;;  %v6425_v18 = vmax.f32 %v6423_v43, %v6424_v14  ;;  %v6432_v6 = vmax.f32 %v6430_v32, %v6431_v63  ;;  %v6438_v48 = vrot.slane %v6437_v20, 2 }
 0x42f   : > { %v6054_v33 = vrot.slane %v6040_v25, %v11176_v49  ;;  %v6055_v39 = vcombine.high %v6047_v26, %v6047_v26  ;;  %v6442_v31 = vsel %vm3127_vm5, %v6047_v26, -inf  ;;  %v11415_v41 = vrot.slane %v6057_v57, %v11176_v49 }
 0x430   : > { %v6420_v51 = vmax.f32 %v6418_v5, %v6419_v27  ;;  %v6426_v10 = vrot.slane %v6425_v18, 1  ;;  %v6433_v1 = vrot.slane %v6432_v6, 1  ;;  %v6439_v23 = vmax.f32 %v6437_v20, %v6438_v48 }
 0x431   : > { %v6056_v4 = vcombine.high %v6054_v33, %v6054_v33  ;;  %v6443_v56 = vrot.slane %v6442_v31, 4  ;;  %v6449_v37 = vsel %vm3127_vm5, %v6055_v39, -inf  ;;  %v6456_v21 = vsel %vm3127_vm5, %v6054_v33, -inf }
 0x432   : > { %v6427_v29 = vmax.f32 %v6425_v18, %v6426_v10  ;;  %v6434_v54 = vmax.f32 %v6432_v6, %v6433_v1  ;;  %v6440_v38 = vrot.slane %v6439_v23, 1  ;;  %v7611_v42 = vpack.c.bf16 %v6420_v51, %v6420_v51 }
 0x433   : > { %v6444_v19 = vmax.f32 %v6442_v31, %v6443_v56  ;;  %v6450_v58 = vrot.slane %v6449_v37, 4  ;;  %v6457_v3 = vrot.slane %v6456_v21, 4  ;;  %v6463_v0 = vsel %vm3127_vm5, %v6056_v4, -inf }
 0x434   : > { %v6441_v7 = vmax.f32 %v6439_v23, %v6440_v38  ;;  %v7612_v11 = vpack.c.bf16 %v6427_v29, %v6427_v29  ;;  %v7613_v35 = vpack.c.bf16 %v6434_v54, %v6434_v54  ;;  %v6998_v8 = vunpack.c.l.b16 %v7611_v42 }
 0x435   : > { %v6445_v30 = vrot.slane %v6444_v19, 2  ;;  %v6451_v2 = vmax.f32 %v6449_v37, %v6450_v58  ;;  %v6458_v24 = vmax.f32 %v6456_v21, %v6457_v3  ;;  %v6464_v43 = vrot.slane %v6463_v0, 4  ;;  %v8640_v58 = vpop.f32.mrf.mxu1 }
 0x436   : > { %v7614_v32 = vpack.c.bf16 %v6441_v7, %v6441_v7  ;;  %v6999_v62 = vunpack.c.l.b16 %v7612_v11  ;;  %v7000_v16 = vunpack.c.l.b16 %v7613_v35  ;;  %v7066_v17 = vsel %vm7048_vm9, %v6998_v8, %v11395_v52 }
 0x437   : > { %v6446_v5 = vmax.f32 %v6444_v19, %v6445_v30  ;;  %v6452_v14 = vrot.slane %v6451_v2, 2  ;;  %v6459_v63 = vrot.slane %v6458_v24, 2  ;;  %v6465_v20 = vmax.f32 %v6463_v0, %v6464_v43 }
 0x438   : > { %v7001_v25 = vunpack.c.l.b16 %v7614_v32  ;;  %v7067_v26 = vsel %vm7050_vm10, %v6999_v62, %v7066_v17  ;;  %v6072_v57 = vcombine.high %v6064_v15, %v6064_v15  ;;  %v6073_v27 = vcombine.high %v11415_v41, %v11415_v41 }
 0x439   : > { %v7068_v18 = vsel %vm7052_vm11, %v7000_v16, %v7067_v26  ;;  %v6447_v6 = vrot.slane %v6446_v5, 1  ;;  %v6453_v48 = vmax.f32 %v6451_v2, %v6452_v14  ;;  %v6460_v33 = vmax.f32 %v6458_v24, %v6459_v63 }
 0x43a   : > { %v7069_v39 = vsel %vm7054_vm12, %v7001_v25, %v7068_v18  ;;  %v6466_v52 = vrot.slane %v6465_v20, 2  ;;  %v6470_v31 = vsel %vm3127_vm5, %v6064_v15, -inf  ;;  %v6477_v51 = vsel %vm3127_vm5, %v6072_v57, -inf }
 0x43b   : > { %v7107_v10 = vpack.c.b16 %v7069_v39, %v7069_v39  ;;  %v6448_v1 = vmax.f32 %v6446_v5, %v6447_v6  ;;  %v6454_v23 = vrot.slane %v6453_v48, 1  ;;  %v6461_v4 = vrot.slane %v6460_v33, 1  ;;  %v5704_v5 = vpop.f32.mrf.mxu1 }
 0x43c   : > { %v6467_v56 = vmax.f32 %v6465_v20, %v6466_v52  ;;  %v6471_v37 = vrot.slane %v6470_v31, 4  ;;  %v6478_v21 = vrot.slane %v6477_v51, 4  ;;  %v6484_v29 = vsel %vm3127_vm5, %v11415_v41, -inf }
 0x43d   : > { %7124 = vst.msk [vmem:[%s11336_s22 + $0x8] sm:$0xf] %vm7121_vm13, %v7107_v10  ;;  %v6455_v54 = vmax.f32 %v6453_v48, %v6454_v23  ;;  %v6462_v38 = vmax.f32 %v6460_v33, %v6461_v4  ;;  %v7615_v42 = vpack.c.bf16 %v6448_v1, %v6448_v1  ;;  %v6485_v19 = vrot.slane %v6484_v29, 4  ;;  %v8643_v10 = vpop.f32.mrf.mxu1 }
 0x43e   : > { %v6468_v15 = vrot.slane %v6467_v56, 1  ;;  %v6472_v3 = vmax.f32 %v6470_v31, %v6471_v37  ;;  %v6479_v0 = vmax.f32 %v6477_v51, %v6478_v21  ;;  %v6491_v7 = vsel %vm3127_vm5, %v6073_v27, -inf }
 0x43f   : > { %v7616_v11 = vpack.c.bf16 %v6455_v54, %v6455_v54  ;;  %v7617_v35 = vpack.c.bf16 %v6462_v38, %v6462_v38  ;;  %v7002_v8 = vunpack.c.l.b16 %v7615_v42  ;;  %v6486_v30 = vmax.f32 %v6484_v29, %v6485_v19 }
 0x440   : > { %v6469_v2 = vmax.f32 %v6467_v56, %v6468_v15  ;;  %v6473_v24 = vrot.slane %v6472_v3, 2  ;;  %v6480_v43 = vrot.slane %v6479_v0, 2  ;;  %v6492_v41 = vrot.slane %v6491_v7, 4 }
 0x441   : > { %v7003_v32 = vunpack.c.l.b16 %v7616_v11  ;;  %v7004_v62 = vunpack.c.l.b16 %v7617_v35  ;;  %v6487_v16 = vrot.slane %v6486_v30, 2  ;;  %v5892_v17 = vmax.f32 %v11405_v47, 0.0 }
 0x442   : > { %v7618_v14 = vpack.c.bf16 %v6469_v2, %v6469_v2  ;;  %v6474_v63 = vmax.f32 %v6472_v3, %v6473_v24  ;;  %v6481_v20 = vmax.f32 %v6479_v0, %v6480_v43  ;;  %v6493_v25 = vmax.f32 %v6491_v7, %v6492_v41  ;;  %v5717_v0 = vpop.f32.mrf.mxu1 }
 0x443   : > { %v7070_v26 = vsel %vm7042_vm6, %v7003_v32, %v7002_v8  ;;  %v6488_v57 = vmax.f32 %v6486_v30, %v6487_v16  ;;  %v5819_v27 = vmul.f32 %v11173_v28, %v11408_v34  ;;  %v5783_v18 = vadd.f32 %v8640_v58, %v11242_v9 }
 0x444   : > { %v7005_v6 = vunpack.c.l.b16 %v7618_v14  ;;  %v7071_v48 = vsel %vm7044_vm7, %v7004_v62, %v7070_v26  ;;  %v6475_v33 = vrot.slane %v6474_v63, 1  ;;  %v6482_v39 = vrot.slane %v6481_v20, 1 }
 0x445   : > { %v6489_v52 = vrot.slane %v6488_v57, 1  ;;  %v6494_v47 = vrot.slane %v6493_v25, 2  ;;  %v5858_v31 = vadd.f32 %v11187_v55, %v5819_v27  ;;  %v5822_v51 = vmul.f32 %v11173_v28, %v5783_v18 }
 0x446   : > { %v6476_v1 = vmax.f32 %v6474_v63, %v6475_v33  ;;  %v6483_v23 = vmax.f32 %v6481_v20, %v6482_v39  ;;  %v7072_v4 = vsel %vm7046_vm8, %v7005_v6, %v7071_v48  ;;  %v5781_v34 = vadd.f32 %v5704_v5, %v11246_v46 }
 0x447   : > { %v6490_v56 = vmax.f32 %v6488_v57, %v6489_v52  ;;  %v6495_v9 = vmax.f32 %v6493_v25, %v6494_v47  ;;  %v5890_v37 = vmax.f32 %v5858_v31, 0.0  ;;  %v5861_v21 = vadd.f32 %v11187_v55, %v5822_v51 }
 0x448   : > { %v7619_v29 = vpack.c.bf16 %v6476_v1, %v6476_v1  ;;  %v7620_v54 = vpack.c.bf16 %v6483_v23, %v6483_v23  ;;  %v5820_v38 = vmul.f32 %v11173_v28, %v5781_v34  ;;  %v5786_v42 = vadd.f32 %v8643_v10, %v11250_v45 }
 0x449   : > { %v6496_v19 = vrot.slane %v6495_v9, 1  ;;  %v7621_v58 = vpack.c.bf16 %v6490_v56, %v6490_v56  ;;  %v5914_v15 = vmax.f32 %v5890_v37, %v5892_v17  ;;  %v5893_v3 = vmax.f32 %v5861_v21, 0.0 }
 0x44a   : > { %v7006_v7 = vunpack.c.l.b16 %v7619_v29  ;;  %v7007_v11 = vunpack.c.l.b16 %v7620_v54  ;;  %v5859_v46 = vadd.f32 %v11187_v55, %v5820_v38  ;;  %v5825_v35 = vmul.f32 %v11173_v28, %v5786_v42 }
 0x44b   : > { %v6497_v8 = vmax.f32 %v6495_v9, %v6496_v19  ;;  %v7008_v30 = vunpack.c.l.b16 %v7621_v58  ;;  %v6074_v2 = vcombine.high %v5914_v15, %v5914_v15  ;;  %v6081_v24 = vrot.slane %v5914_v15, %v11176_v49 }
 0x44c   : > { %v7073_v43 = vsel %vm7048_vm9, %v7006_v7, %v7072_v4  ;;  %v5891_v41 = vmax.f32 %v5859_v46, 0.0  ;;  %v11452_v45 = vadd.f32 %v11187_v55, %v5825_v35  ;;  %v11455_v32 = vadd.f32 %v5717_v0, %v11256_v13  ;;  %v8644_v0 = vpop.f32.mrf.mxu1 }
 0x44d   : > { %v7622_v62 = vpack.c.bf16 %v6497_v8, %v6497_v8  ;;  %v7074_v16 = vsel %vm7050_vm10, %v7007_v11, %v7073_v43  ;;  %v6088_v17 = vrot.slane %v6074_v2, %v11176_v49  ;;  %v6089_v28 = vcombine.high %v6081_v24, %v6081_v24 }
 0x44e   : > { %v7075_v5 = vsel %vm7052_vm11, %v7008_v30, %v7074_v16  ;;  %v6498_v14 = vsel %vm3127_vm5, %v6081_v24, -inf  ;;  %v5915_v63 = vmax.f32 %v5891_v41, %v5893_v3  ;;  %v5896_v20 = vmax.f32 %v11452_v45, 0.0 }
 0x44f   : > { %v7009_v25 = vunpack.c.l.b16 %v7622_v62  ;;  %v6090_v26 = vcombine.high %v6088_v17, %v6088_v17  ;;  %v6499_v55 = vrot.slane %v6498_v14, 4  ;;  %v6505_v57 = vsel %vm3127_vm5, %v6089_v28, -inf }
 0x450   : > { %v6506_v13 = vrot.slane %v6505_v57, 4  ;;  %v6512_v27 = vsel %vm3127_vm5, %v6088_v17, -inf  ;;  %v6091_v18 = vcombine.high %v5915_v63, %v5915_v63  ;;  %v6098_v6 = vrot.slane %v5915_v63, %v11176_v49  ;;  %v5720_v63 = vpop.f32.mrf.mxu1 }
 0x451   : > { %v7076_v48 = vsel %vm7054_vm12, %v7009_v25, %v7075_v5  ;;  %v6500_v33 = vmax.f32 %v6498_v14, %v6499_v55  ;;  %v6513_v39 = vrot.slane %v6512_v27, 4  ;;  %v6519_v52 = vsel %vm3127_vm5, %v6090_v26, -inf }
 0x452   : > { %v7108_v47 = vpack.c.b16 %v7076_v48, %v7076_v48  ;;  %v6507_v31 = vmax.f32 %v6505_v57, %v6506_v13  ;;  %v6520_v51 = vrot.slane %v6519_v52, 4  ;;  %v6105_v10 = vrot.slane %v6091_v18, %v11176_v49 }
 0x453   : > { %v6501_v1 = vrot.slane %v6500_v33, 2  ;;  %v6514_v23 = vmax.f32 %v6512_v27, %v6513_v39  ;;  %v6106_v4 = vcombine.high %v6098_v6, %v6098_v6  ;;  %v6526_v34 = vsel %vm3127_vm5, %v6098_v6, -inf }
 0x454   : > { %7125 = vst.msk [vmem:[%s11336_s22 + $0xc] sm:$0xf] %vm7121_vm13, %v7108_v47  ;;  %v6508_v56 = vrot.slane %v6507_v31, 2  ;;  %v6521_v9 = vmax.f32 %v6519_v52, %v6520_v51  ;;  %v6107_v37 = vcombine.high %v6105_v10, %v6105_v10  ;;  %v6527_v21 = vrot.slane %v6526_v34, 4 }
 0x455   : > { %v6502_v29 = vmax.f32 %v6500_v33, %v6501_v1  ;;  %v6515_v54 = vrot.slane %v6514_v23, 2  ;;  %v6533_v38 = vsel %vm3127_vm5, %v6106_v4, -inf  ;;  %v6540_v42 = vsel %vm3127_vm5, %v6105_v10, -inf  ;;  %v8647_v1 = vpop.f32.mrf.mxu1 }
 0x456   : > { %v6509_v19 = vmax.f32 %v6507_v31, %v6508_v56  ;;  %v6522_v58 = vrot.slane %v6521_v9, 2  ;;  %v6528_v15 = vmax.f32 %v6526_v34, %v6527_v21  ;;  %v6534_v3 = vrot.slane %v6533_v38, 4  ;;  %v11477_v56 = vld [vmem:[%s11653_s5] ss:$0 sm:$0xff] }
 0x457   : > { %v6503_v7 = vrot.slane %v6502_v29, 1  ;;  %v6516_v11 = vmax.f32 %v6514_v23, %v6515_v54  ;;  %v6541_v46 = vrot.slane %v6540_v42, 4  ;;  %v6547_v35 = vsel %vm3127_vm5, %v6107_v37, -inf }
 0x458   : > { %v6510_v8 = vrot.slane %v6509_v19, 1  ;;  %v6523_v30 = vmax.f32 %v6521_v9, %v6522_v58  ;;  %v6529_v2 = vrot.slane %v6528_v15, 2  ;;  %v6535_v24 = vmax.f32 %v6533_v38, %v6534_v3  ;;  %v11486_v58 = vld [vmem:[%s11654_s6] ss:$0 sm:$0xff] }
 0x459   : > { %v6504_v43 = vmax.f32 %v6502_v29, %v6503_v7  ;;  %v6517_v41 = vrot.slane %v6516_v11, 1  ;;  %v6542_v62 = vmax.f32 %v6540_v42, %v6541_v46  ;;  %v6548_v16 = vrot.slane %v6547_v35, 4  ;;  %v5733_v46 = vpop.f32.mrf.mxu1 }
 0x45a   : > { %v6511_v17 = vmax.f32 %v6509_v19, %v6510_v8  ;;  %v6524_v28 = vrot.slane %v6523_v30, 1  ;;  %v6530_v5 = vmax.f32 %v6528_v15, %v6529_v2  ;;  %v6536_v14 = vrot.slane %v6535_v24, 2 }
 0x45b   : > { %v6518_v25 = vmax.f32 %v6516_v11, %v6517_v41  ;;  %v7623_v26 = vpack.c.bf16 %v6504_v43, %v6504_v43  ;;  %v6543_v55 = vrot.slane %v6542_v62, 2  ;;  %v6549_v57 = vmax.f32 %v6547_v35, %v6548_v16 }
 0x45c   : > { %v6525_v13 = vmax.f32 %v6523_v30, %v6524_v28  ;;  %v7624_v27 = vpack.c.bf16 %v6511_v17, %v6511_v17  ;;  %v6531_v18 = vrot.slane %v6530_v5, 1  ;;  %v6537_v6 = vmax.f32 %v6535_v24, %v6536_v14 }
 0x45d   : > { %v7625_v48 = vpack.c.bf16 %v6518_v25, %v6518_v25  ;;  %v7010_v33 = vunpack.c.l.b16 %v7623_v26  ;;  %v6544_v39 = vmax.f32 %v6542_v62, %v6543_v55  ;;  %v6550_v52 = vrot.slane %v6549_v57, 2 }
 0x45e   : > { %v7626_v47 = vpack.c.bf16 %v6525_v13, %v6525_v13  ;;  %v7011_v31 = vunpack.c.l.b16 %v7624_v27  ;;  %v6532_v51 = vmax.f32 %v6530_v5, %v6531_v18  ;;  %v6538_v10 = vrot.slane %v6537_v6, 1 }
 0x45f   : > { %v7012_v23 = vunpack.c.l.b16 %v7625_v48  ;;  %v6545_v4 = vrot.slane %v6544_v39, 1  ;;  %v6551_v34 = vmax.f32 %v6549_v57, %v6550_v52  ;;  %v5823_v9 = vmul.f32 %v11477_v56, %v11455_v32 }
 0x460   : > { %v7013_v37 = vunpack.c.l.b16 %v7626_v47  ;;  %v7077_v21 = vsel %vm7042_vm6, %v7011_v31, %v7010_v33  ;;  %v6539_v29 = vmax.f32 %v6537_v6, %v6538_v10  ;;  %v7627_v54 = vpack.c.bf16 %v6532_v51, %v6532_v51 }
 0x461   : > { %v7078_v38 = vsel %vm7044_vm7, %v7012_v23, %v7077_v21  ;;  %v6546_v42 = vmax.f32 %v6544_v39, %v6545_v4  ;;  %v6552_v19 = vrot.slane %v6551_v34, 1  ;;  %v5862_v15 = vadd.f32 %v11486_v58, %v5823_v9 }
 0x462   : > { %v7628_v3 = vpack.c.bf16 %v6539_v29, %v6539_v29  ;;  %v7014_v7 = vunpack.c.l.b16 %v7627_v54  ;;  %v7079_v32 = vsel %vm7046_vm8, %v7013_v37, %v7078_v38  ;;  %v5787_v11 = vadd.f32 %v8644_v0, %v11260_v59 }
 0x463   : > { %v6553_v35 = vmax.f32 %v6551_v34, %v6552_v19  ;;  %v7629_v8 = vpack.c.bf16 %v6546_v42, %v6546_v42  ;;  %v5894_v30 = vmax.f32 %v5862_v15, 0.0  ;;  %v5785_v2 = vadd.f32 %v5720_v63, %v11264_v60  ;;  %v8648_v63 = vpop.f32.mrf.mxu1 }
 0x464   : > { %v7015_v24 = vunpack.c.l.b16 %v7628_v3  ;;  %v7080_v43 = vsel %vm7048_vm9, %v7014_v7, %v7079_v32  ;;  %v5826_v41 = vmul.f32 %v11477_v56, %v5787_v11  ;;  %v5790_v62 = vadd.f32 %v8647_v1, %v11268_v12 }
 0x465   : > { %v7630_v16 = vpack.c.bf16 %v6553_v35, %v6553_v35  ;;  %v7016_v17 = vunpack.c.l.b16 %v7629_v8  ;;  %v5916_v28 = vmax.f32 %v5894_v30, %v5896_v20  ;;  %v5824_v59 = vmul.f32 %v11477_v56, %v5785_v2  ;;  %v5736_v47 = vpop.f32.mrf.mxu1 }
 0x466   : > { %v7081_v0 = vsel %vm7050_vm10, %v7015_v24, %v7080_v43  ;;  %v5865_v5 = vadd.f32 %v11486_v58, %v5826_v41  ;;  %v5829_v60 = vmul.f32 %v11477_v56, %v5790_v62  ;;  %v5788_v14 = vadd.f32 %v5733_v46, %v11271_v40 }
 0x467   : > { %v7017_v25 = vunpack.c.l.b16 %v7630_v16  ;;  %v7082_v26 = vsel %vm7052_vm11, %v7016_v17, %v7081_v0  ;;  %v6108_v12 = vcombine.high %v5916_v28, %v5916_v28  ;;  %v6115_v55 = vrot.slane %v5916_v28, %v11176_v49 }
 0x468   : > { %v5897_v57 = vmax.f32 %v5865_v5, 0.0  ;;  %v5863_v45 = vadd.f32 %v11486_v58, %v5824_v59  ;;  %v5868_v20 = vadd.f32 %v11486_v58, %v5829_v60  ;;  %v5827_v13 = vmul.f32 %v11477_v56, %v5788_v14 }
 0x469   : > { %v7083_v27 = vsel %vm7054_vm12, %v7017_v25, %v7082_v26  ;;  %v6122_v18 = vrot.slane %v6108_v12, %v11176_v49  ;;  %v6123_v40 = vcombine.high %v6115_v55, %v6115_v55  ;;  %v6554_v6 = vsel %vm3127_vm5, %v6115_v55, -inf }
 0x46a   : > { %v7109_v48 = vpack.c.b16 %v7083_v27, %v7083_v27  ;;  %v6555_v33 = vrot.slane %v6554_v6, 4  ;;  %v5895_v39 = vmax.f32 %v5863_v45, 0.0  ;;  %v5900_v52 = vmax.f32 %v5868_v20, 0.0 }
 0x46b   : > { %v6124_v31 = vcombine.high %v6122_v18, %v6122_v18  ;;  %v6561_v51 = vsel %vm3127_vm5, %v6123_v40, -inf  ;;  %v6568_v10 = vsel %vm3127_vm5, %v6122_v18, -inf  ;;  %v5866_v1 = vadd.f32 %v11486_v58, %v5827_v13 }
 0x46c   : > { %7126 = vst.msk [vmem:[%s11336_s22 + $0x10] sm:$0xf] %vm7121_vm13, %v7109_v48  ;;  %v6556_v23 = vmax.f32 %v6554_v6, %v6555_v33  ;;  %v6562_v4 = vrot.slane %v6561_v51, 4  ;;  %v6569_v34 = vrot.slane %v6568_v10, 4  ;;  %v5917_v9 = vmax.f32 %v5895_v39, %v5897_v57 }
 0x46d   : > { %v6575_v37 = vsel %vm3127_vm5, %v6124_v31, -inf  ;;  %v5898_v21 = vmax.f32 %v5866_v1, 0.0  ;;  %v5791_v29 = vadd.f32 %v8648_v63, %v11276_v50  ;;  %v11518_v54 = vadd.f32 %v5736_v47, %v11279_v44 }
 0x46e   : > { %v6557_v38 = vrot.slane %v6556_v23, 2  ;;  %v6563_v42 = vmax.f32 %v6561_v51, %v6562_v4  ;;  %v6570_v19 = vmax.f32 %v6568_v10, %v6569_v34  ;;  %v6576_v15 = vrot.slane %v6575_v37, 4 }
 0x46f   : > { %v6125_v3 = vcombine.high %v5917_v9, %v5917_v9  ;;  %v6132_v7 = vrot.slane %v5917_v9, %v11176_v49  ;;  %v5918_v32 = vmax.f32 %v5898_v21, %v5900_v52  ;;  %v11522_v11 = vmul.f32 %v11477_v56, %v5791_v29 }
 0x470   : > { %v6558_v46 = vmax.f32 %v6556_v23, %v6557_v38  ;;  %v6564_v35 = vrot.slane %v6563_v42, 2  ;;  %v6571_v8 = vrot.slane %v6570_v19, 2  ;;  %v6577_v30 = vmax.f32 %v6575_v37, %v6576_v15 }
 0x471   : > { %v6139_v50 = vrot.slane %v6125_v3, %v11176_v49  ;;  %v6140_v2 = vcombine.high %v6132_v7, %v6132_v7  ;;  %v6582_v44 = vsel %vm3127_vm5, %v6132_v7, -inf  ;;  %v6142_v24 = vcombine.high %v5918_v32, %v5918_v32 }
 0x472   : > { %v6559_v43 = vrot.slane %v6558_v46, 1  ;;  %v6565_v41 = vmax.f32 %v6563_v42, %v6564_v35  ;;  %v6572_v62 = vmax.f32 %v6570_v19, %v6571_v8  ;;  %v6578_v16 = vrot.slane %v6577_v30, 2 }
 0x473   : > { %v6141_v17 = vcombine.high %v6139_v50, %v6139_v50  ;;  %v6583_v28 = vrot.slane %v6582_v44, 4  ;;  %v6589_v59 = vsel %vm3127_vm5, %v6140_v2, -inf  ;;  %v6596_v0 = vsel %vm3127_vm5, %v6139_v50, -inf }
 0x474   : > { %v6560_v5 = vmax.f32 %v6558_v46, %v6559_v43  ;;  %v6566_v60 = vrot.slane %v6565_v41, 1  ;;  %v6573_v14 = vrot.slane %v6572_v62, 1  ;;  %v6579_v63 = vmax.f32 %v6577_v30, %v6578_v16 }
 0x475   : > { %v6584_v25 = vmax.f32 %v6582_v44, %v6583_v28  ;;  %v6590_v26 = vrot.slane %v6589_v59, 4  ;;  %v6597_v12 = vrot.slane %v6596_v0, 4  ;;  %v6603_v55 = vsel %vm3127_vm5, %v6141_v17, -inf }
 0x476   : > { %v6567_v57 = vmax.f32 %v6565_v41, %v6566_v60  ;;  %v6574_v45 = vmax.f32 %v6572_v62, %v6573_v14  ;;  %v6580_v20 = vrot.slane %v6579_v63, 1  ;;  %v7631_v13 = vpack.c.bf16 %v6560_v5, %v6560_v5 }
 0x477   : > { %v6585_v27 = vrot.slane %v6584_v25, 2  ;;  %v6591_v18 = vmax.f32 %v6589_v59, %v6590_v26  ;;  %v6598_v40 = vmax.f32 %v6596_v0, %v6597_v12  ;;  %v6604_v6 = vrot.slane %v6603_v55, 4 }
 0x478   : > { %v6581_v48 = vmax.f32 %v6579_v63, %v6580_v20  ;;  %v7632_v33 = vpack.c.bf16 %v6567_v57, %v6567_v57  ;;  %v7633_v39 = vpack.c.bf16 %v6574_v45, %v6574_v45  ;;  %v7018_v52 = vunpack.c.l.b16 %v7631_v13  ;;  %v8651_v45 = vpop.f32.mrf.mxu1 }
 0x479   : > { %v6586_v47 = vmax.f32 %v6584_v25, %v6585_v27  ;;  %v6592_v31 = vrot.slane %v6591_v18, 2  ;;  %v6599_v51 = vrot.slane %v6598_v40, 2  ;;  %v6605_v10 = vmax.f32 %v6603_v55, %v6604_v6 }
 0x47a   : > { %v7634_v1 = vpack.c.bf16 %v6581_v48, %v6581_v48  ;;  %v7019_v23 = vunpack.c.l.b16 %v7632_v33  ;;  %v7020_v4 = vunpack.c.l.b16 %v7633_v39  ;;  %v6149_v34 = vrot.slane %v5918_v32, %v11176_v49 }
 0x47b   : > { %v6587_v9 = vrot.slane %v6586_v47, 1  ;;  %v6593_v37 = vmax.f32 %v6591_v18, %v6592_v31  ;;  %v6600_v21 = vmax.f32 %v6598_v40, %v6599_v51  ;;  %v6606_v29 = vrot.slane %v6605_v10, 2 }
 0x47c   : > { %v7021_v38 = vunpack.c.l.b16 %v7634_v1  ;;  %v7084_v42 = vsel %vm7042_vm6, %v7019_v23, %v7018_v52  ;;  %v6156_v19 = vrot.slane %v6142_v24, %v11176_v49  ;;  %v6157_v15 = vcombine.high %v6149_v34, %v6149_v34 }
 0x47d   : > { %v7085_v3 = vsel %vm7044_vm7, %v7020_v4, %v7084_v42  ;;  %v6588_v7 = vmax.f32 %v6586_v47, %v6587_v9  ;;  %v6594_v46 = vrot.slane %v6593_v37, 1  ;;  %v6601_v35 = vrot.slane %v6600_v21, 1  ;;  %v5749_v4 = vpop.f32.mrf.mxu1 }
 0x47e   : > { %v6607_v8 = vmax.f32 %v6605_v10, %v6606_v29  ;;  %v7086_v30 = vsel %vm7046_vm8, %v7021_v38, %v7085_v3  ;;  %v6158_v50 = vcombine.high %v6156_v19, %v6156_v19  ;;  %v6610_v32 = vsel %vm3127_vm5, %v6149_v34, -inf }
 0x47f   : > { %v6595_v2 = vmax.f32 %v6593_v37, %v6594_v46  ;;  %v6602_v44 = vmax.f32 %v6600_v21, %v6601_v35  ;;  %v7635_v43 = vpack.c.bf16 %v6588_v7, %v6588_v7  ;;  %v6611_v41 = vrot.slane %v6610_v32, 4  ;;  %v8618_v21 = vpop.f32.mrf.mxu0 }
 0x480   : > { %v6608_v62 = vrot.slane %v6607_v8, 1  ;;  %v6617_v16 = vsel %vm3127_vm5, %v6157_v15, -inf  ;;  %v6624_v24 = vsel %vm3127_vm5, %v6156_v19, -inf  ;;  %v6631_v17 = vsel %vm3127_vm5, %v6158_v50, -inf }
 0x481   : > { %v7636_v28 = vpack.c.bf16 %v6595_v2, %v6595_v2  ;;  %v7637_v59 = vpack.c.bf16 %v6602_v44, %v6602_v44  ;;  %v7022_v0 = vunpack.c.l.b16 %v7635_v43  ;;  %v6612_v5 = vmax.f32 %v6610_v32, %v6611_v41 }
 0x482   : > { %v6609_v60 = vmax.f32 %v6607_v8, %v6608_v62  ;;  %v6618_v14 = vrot.slane %v6617_v16, 4  ;;  %v6625_v63 = vrot.slane %v6624_v24, 4  ;;  %v6632_v25 = vrot.slane %v6631_v17, 4 }
 0x483   : > { %v7023_v26 = vunpack.c.l.b16 %v7636_v28  ;;  %v7024_v12 = vunpack.c.l.b16 %v7637_v59  ;;  %v7087_v55 = vsel %vm7048_vm9, %v7022_v0, %v7086_v30  ;;  %v6613_v57 = vrot.slane %v6612_v5, 2 }
 0x484   : > { %v7638_v20 = vpack.c.bf16 %v6609_v60, %v6609_v60  ;;  %v6619_v13 = vmax.f32 %v6617_v16, %v6618_v14  ;;  %v6626_v27 = vmax.f32 %v6624_v24, %v6625_v63  ;;  %v6633_v18 = vmax.f32 %v6631_v17, %v6632_v25 }
 0x485   : > { %v7088_v40 = vsel %vm7050_vm10, %v7023_v26, %v7087_v55  ;;  %v6614_v6 = vmax.f32 %v6612_v5, %v6613_v57  ;;  %v5869_v48 = vadd.f32 %v11486_v58, %v11522_v11  ;;  %v5828_v33 = vmul.f32 %v11477_v56, %v11518_v54  ;;  %v5458_v55 = vpop.f32.mrf.mxu0 }
 0x486   : > { %v7025_v39 = vunpack.c.l.b16 %v7638_v20  ;;  %v7089_v52 = vsel %vm7052_vm11, %v7024_v12, %v7088_v40  ;;  %v6620_v47 = vrot.slane %v6619_v13, 2  ;;  %v6627_v31 = vrot.slane %v6626_v27, 2 }
 0x487   : > { %v6615_v51 = vrot.slane %v6614_v6, 1  ;;  %v6634_v10 = vrot.slane %v6633_v18, 2  ;;  %v5901_v1 = vmax.f32 %v5869_v48, 0.0  ;;  %v5867_v23 = vadd.f32 %v11486_v58, %v5828_v33 }
 0x488   : > { %v7090_v34 = vsel %vm7054_vm12, %v7025_v39, %v7089_v52  ;;  %v6621_v9 = vmax.f32 %v6619_v13, %v6620_v47  ;;  %v6628_v37 = vmax.f32 %v6626_v27, %v6627_v31  ;;  %v5794_v11 = vadd.f32 %v8651_v45, %v11286_v61  ;;  %v8652_v27 = vpop.f32.mrf.mxu1 }
 0x489   : > { %v7110_v54 = vpack.c.b16 %v7090_v34, %v7090_v34  ;;  %v6616_v29 = vmax.f32 %v6614_v6, %v6615_v51  ;;  %v6635_v38 = vmax.f32 %v6633_v18, %v6634_v10  ;;  %v5899_v42 = vmax.f32 %v5867_v23, 0.0 }
 0x48a   : > { %v6622_v19 = vrot.slane %v6621_v9, 1  ;;  %v6629_v15 = vrot.slane %v6628_v37, 1  ;;  %v5833_v3 = vmul.f32 %v11477_v56, %v5794_v11  ;;  %v5792_v7 = vadd.f32 %v5749_v4, %v11289_v36 }
 0x48b   : > { %7127 = vst.msk [vmem:[%s11336_s22 + $0x14] sm:$0xf] %vm7121_vm13, %v7110_v54  ;;  %v6636_v46 = vrot.slane %v6635_v38, 1  ;;  %v7639_v35 = vpack.c.bf16 %v6616_v29, %v6616_v29  ;;  %v5919_v8 = vmax.f32 %v5899_v42, %v5901_v1  ;;  %v5501_v30 = vadd.f32 %v8618_v21, %v11162_v22 }
 0x48c   : > { %v6623_v50 = vmax.f32 %v6621_v9, %v6622_v19  ;;  %v6630_v61 = vmax.f32 %v6628_v37, %v6629_v15  ;;  %v5831_v32 = vmul.f32 %v11477_v56, %v5792_v7  ;;  %v5872_v41 = vadd.f32 %v11486_v58, %v5833_v3 }
 0x48d   : > { %v6637_v2 = vmax.f32 %v6635_v38, %v6636_v46  ;;  %v6159_v44 = vcombine.high %v5919_v8, %v5919_v8  ;;  %v6166_v43 = vrot.slane %v5919_v8, %v11176_v49  ;;  %v7026_v36 = vunpack.c.l.b16 %v7639_v35 }
 0x48e   : > { %v7640_v62 = vpack.c.bf16 %v6623_v50, %v6623_v50  ;;  %v7641_v16 = vpack.c.bf16 %v6630_v61, %v6630_v61  ;;  %v5870_v24 = vadd.f32 %v11486_v58, %v5831_v32  ;;  %v5904_v12 = vmax.f32 %v5872_v41, 0.0 }
 0x48f   : > { %v7642_v17 = vpack.c.bf16 %v6637_v2, %v6637_v2  ;;  %v6173_v28 = vrot.slane %v6159_v44, %v11176_v49  ;;  %v6174_v59 = vcombine.high %v6166_v43, %v6166_v43  ;;  %v6638_v22 = vsel %vm3127_vm5, %v6166_v43, -inf }
 0x490   : > { %v7027_v0 = vunpack.c.l.b16 %v7640_v62  ;;  %v7028_v5 = vunpack.c.l.b16 %v7641_v16  ;;  %v6639_v60 = vrot.slane %v6638_v22, 4  ;;  %v5902_v14 = vmax.f32 %v5870_v24, 0.0 }
 0x491   : > { %v6175_v63 = vcombine.high %v6173_v28, %v6173_v28  ;;  %v6645_v25 = vsel %vm3127_vm5, %v6174_v59, -inf  ;;  %v6652_v26 = vsel %vm3127_vm5, %v6173_v28, -inf  ;;  %v7029_v18 = vunpack.c.l.b16 %v7642_v17 }
 0x492   : > { %v7091_v57 = vsel %vm7042_vm6, %v7027_v0, %v7026_v36  ;;  %v6640_v45 = vmax.f32 %v6638_v22, %v6639_v60  ;;  %v6646_v20 = vrot.slane %v6645_v25, 4  ;;  %v6653_v13 = vrot.slane %v6652_v26, 4 }
 0x493   : > { %v7092_v40 = vsel %vm7044_vm7, %v7028_v5, %v7091_v57  ;;  %v6659_v6 = vsel %vm3127_vm5, %v6175_v63, -inf  ;;  %v5920_v48 = vmax.f32 %v5902_v14, %v5904_v12  ;;  %v5499_v31 = vadd.f32 %v5458_v55, %v11168_v53 }
 0x494   : > { %v6641_v33 = vrot.slane %v6640_v45, 2  ;;  %v6647_v39 = vmax.f32 %v6645_v25, %v6646_v20  ;;  %v6654_v52 = vmax.f32 %v6652_v26, %v6653_v13  ;;  %v6660_v47 = vrot.slane %v6659_v6, 4  ;;  %v5752_v25 = vpop.f32.mrf.mxu1 }
 0x495   : > { %v6176_v51 = vcombine.high %v5920_v48, %v5920_v48  ;;  %v6183_v10 = vrot.slane %v5920_v48, %v11176_v49  ;;  %v5795_v1 = vadd.f32 %v8652_v27, %v5501_v30  ;;  %v7093_v37 = vsel %vm7046_vm8, %v7029_v18, %v7092_v40 }
 0x496   : > { %v6642_v23 = vmax.f32 %v6640_v45, %v6641_v33  ;;  %v6648_v4 = vrot.slane %v6647_v39, 2  ;;  %v6655_v34 = vrot.slane %v6654_v52, 2  ;;  %v6661_v9 = vmax.f32 %v6659_v6, %v6660_v47 }
 0x497   : > { %v6190_v11 = vrot.slane %v6176_v51, %v11176_v49  ;;  %v6191_v21 = vcombine.high %v6183_v10, %v6183_v10  ;;  %v6666_v54 = vsel %vm3127_vm5, %v6183_v10, -inf  ;;  %v5834_v63 = vmul.f32 %v11477_v56, %v5795_v1 }
 0x498   : > { %v6643_v29 = vrot.slane %v6642_v23, 1  ;;  %v6649_v38 = vmax.f32 %v6647_v39, %v6648_v4  ;;  %v6656_v42 = vmax.f32 %v6654_v52, %v6655_v34  ;;  %v6662_v19 = vrot.slane %v6661_v9, 2 }
 0x499   : > { %v6192_v53 = vcombine.high %v6190_v11, %v6190_v11  ;;  %v6667_v15 = vrot.slane %v6666_v54, 4  ;;  %v6673_v3 = vsel %vm3127_vm5, %v6191_v21, -inf  ;;  %v6680_v7 = vsel %vm3127_vm5, %v6190_v11, -inf }
 0x49a   : > { %v6644_v46 = vmax.f32 %v6642_v23, %v6643_v29  ;;  %v6650_v35 = vrot.slane %v6649_v38, 1  ;;  %v6657_v8 = vrot.slane %v6656_v42, 1  ;;  %v6663_v30 = vmax.f32 %v6661_v9, %v6662_v19 }
 0x49b   : > { %v6668_v50 = vmax.f32 %v6666_v54, %v6667_v15  ;;  %v6674_v61 = vrot.slane %v6673_v3, 4  ;;  %v6681_v32 = vrot.slane %v6680_v7, 4  ;;  %v6687_v2 = vsel %vm3127_vm5, %v6192_v53, -inf }
 0x49c   : > { %v6651_v44 = vmax.f32 %v6649_v38, %v6650_v35  ;;  %v6658_v43 = vmax.f32 %v6656_v42, %v6657_v8  ;;  %v6664_v41 = vrot.slane %v6663_v30, 1  ;;  %v7643_v62 = vpack.c.bf16 %v6644_v46, %v6644_v46 }
 0x49d   : > { %v6669_v16 = vrot.slane %v6668_v50, 2  ;;  %v6675_v36 = vmax.f32 %v6673_v3, %v6674_v61  ;;  %v6682_v24 = vmax.f32 %v6680_v7, %v6681_v32  ;;  %v6688_v17 = vrot.slane %v6687_v2, 4 }
 0x49e   : > { %v6665_v28 = vmax.f32 %v6663_v30, %v6664_v41  ;;  %v7644_v59 = vpack.c.bf16 %v6651_v44, %v6651_v44  ;;  %v7645_v22 = vpack.c.bf16 %v6658_v43, %v6658_v43  ;;  %v7030_v0 = vunpack.c.l.b16 %v7643_v62 }
 0x49f   : > { %v6676_v5 = vrot.slane %v6675_v36, 2  ;;  %v6683_v60 = vrot.slane %v6682_v24, 2  ;;  %v6689_v14 = vmax.f32 %v6687_v2, %v6688_v17  ;;  %v6670_v27 = vmax.f32 %v6668_v50, %v6669_v16 }
 0x4a0   : > { %v7646_v26 = vpack.c.bf16 %v6665_v28, %v6665_v28  ;;  %v7031_v12 = vunpack.c.l.b16 %v7644_v59  ;;  %v7032_v55 = vunpack.c.l.b16 %v7645_v22  ;;  %v7094_v57 = vsel %vm7048_vm9, %v7030_v0, %v7093_v37 }
 0x4a1   : > { %v6677_v45 = vmax.f32 %v6675_v36, %v6676_v5  ;;  %v5793_v18 = vadd.f32 %v5752_v25, %v5499_v31  ;;  %v6684_v6 = vmax.f32 %v6682_v24, %v6683_v60  ;;  %v6690_v48 = vrot.slane %v6689_v14, 2 }
 0x4a2   : > { %v7033_v20 = vunpack.c.l.b16 %v7646_v26  ;;  %v7095_v13 = vsel %vm7050_vm10, %v7031_v12, %v7094_v57  ;;  %v5873_v52 = vadd.f32 %v11486_v58, %v5834_v63  ;;  %v6671_v10 = vrot.slane %v6670_v27, 1 }
 0x4a3   : > { %v7096_v40 = vsel %vm7052_vm11, %v7032_v55, %v7095_v13  ;;  %v6678_v39 = vrot.slane %v6677_v45, 1  ;;  %v5832_v47 = vmul.f32 %v11477_v56, %v5793_v18  ;;  %v6685_v23 = vrot.slane %v6684_v6, 1 }
 0x4a4   : > { %v7097_v33 = vsel %vm7054_vm12, %v7033_v20, %v7096_v40  ;;  %v6691_v4 = vmax.f32 %v6689_v14, %v6690_v48  ;;  %v5905_v34 = vmax.f32 %v5873_v52, 0.0  ;;  %v6672_v37 = vmax.f32 %v6670_v27, %v6671_v10 }
 0x4a5   : > { %v7111_v51 = vpack.c.b16 %v7097_v33, %v7097_v33  ;;  %v5871_v1 = vadd.f32 %v11486_v58, %v5832_v47  ;;  %v6679_v31 = vmax.f32 %v6677_v45, %v6678_v39  ;;  %v6686_v21 = vmax.f32 %v6684_v6, %v6685_v23 }
 0x4a6   : > { %v6692_v54 = vrot.slane %v6691_v4, 1  ;;  %v7647_v56 = vpack.c.bf16 %v6672_v37, %v6672_v37 }
 0x4a7   : > { %7128 = vst.msk [vmem:[%s11336_s22 + $0x18] sm:$0xf] %vm7121_vm13, %v7111_v51  ;;  %v5903_v9 = vmax.f32 %v5871_v1, 0.0  ;;  %v7648_v29 = vpack.c.bf16 %v6679_v31, %v6679_v31  ;;  %v7649_v3 = vpack.c.bf16 %v6686_v21, %v6686_v21 }
 0x4a8   : > { %v6693_v15 = vmax.f32 %v6691_v4, %v6692_v54  ;;  %v7034_v2 = vunpack.c.l.b16 %v7647_v56 }
 0x4a9   : > { %v5921_v11 = vmax.f32 %v5903_v9, %v5905_v34  ;;  %v7035_v46 = vunpack.c.l.b16 %v7648_v29  ;;  %v7036_v36 = vunpack.c.l.b16 %v7649_v3 }
 0x4aa   : > { %v7650_v16 = vpack.c.bf16 %v6693_v15, %v6693_v15 }
 0x4ab   : > { %v6193_v38 = vcombine.high %v5921_v11, %v5921_v11  ;;  %v6200_v42 = vrot.slane %v5921_v11, %v11176_v49  ;;  %v7098_v24 = vsel %vm7042_vm6, %v7035_v46, %v7034_v2 }
 0x4ac   : > { %v7037_v63 = vunpack.c.l.b16 %v7650_v16  ;;  %v7099_v25 = vsel %vm7044_vm7, %v7036_v36, %v7098_v24 }
 0x4ad   : > { %v6207_v19 = vrot.slane %v6193_v38, %v11176_v49  ;;  %v6208_v53 = vcombine.high %v6200_v42, %v6200_v42  ;;  %v6694_v58 = vsel %vm3127_vm5, %v6200_v42, -inf }
 0x4ae   : > { %v6695_v7 = vrot.slane %v6694_v58, 4  ;;  %v7100_v18 = vsel %vm7046_vm8, %v7037_v63, %v7099_v25 }
 0x4af   : > { %v6209_v35 = vcombine.high %v6207_v19, %v6207_v19  ;;  %v6701_v8 = vsel %vm3127_vm5, %v6208_v53, -inf  ;;  %v6708_v30 = vsel %vm3127_vm5, %v6207_v19, -inf }
 0x4b0   : > { %v6696_v50 = vmax.f32 %v6694_v58, %v6695_v7  ;;  %v6702_v61 = vrot.slane %v6701_v8, 4  ;;  %v6709_v32 = vrot.slane %v6708_v30, 4 }
 0x4b1   : > { %v6715_v44 = vsel %vm3127_vm5, %v6209_v35, -inf }
 0x4b2   : > { %v6697_v43 = vrot.slane %v6696_v50, 2  ;;  %v6703_v49 = vmax.f32 %v6701_v8, %v6702_v61  ;;  %v6710_v41 = vmax.f32 %v6708_v30, %v6709_v32  ;;  %v6716_v62 = vrot.slane %v6715_v44, 4 }
 0x4b4   : > { %v6698_v17 = vmax.f32 %v6696_v50, %v6697_v43  ;;  %v6704_v28 = vrot.slane %v6703_v49, 2  ;;  %v6711_v59 = vrot.slane %v6710_v41, 2  ;;  %v6717_v22 = vmax.f32 %v6715_v44, %v6716_v62 }
 0x4b6   : > { %v6699_v0 = vrot.slane %v6698_v17, 1  ;;  %v6705_v5 = vmax.f32 %v6703_v49, %v6704_v28  ;;  %v6712_v60 = vmax.f32 %v6710_v41, %v6711_v59  ;;  %v6718_v14 = vrot.slane %v6717_v22, 2 }
 0x4b8   : > { %v6700_v26 = vmax.f32 %v6698_v17, %v6699_v0  ;;  %v6706_v12 = vrot.slane %v6705_v5, 1  ;;  %v6713_v55 = vrot.slane %v6712_v60, 1  ;;  %v6719_v57 = vmax.f32 %v6717_v22, %v6718_v14 }
 0x4ba   : > { %v6707_v45 = vmax.f32 %v6705_v5, %v6706_v12  ;;  %v6714_v20 = vmax.f32 %v6712_v60, %v6713_v55  ;;  %v6720_v13 = vrot.slane %v6719_v57, 1  ;;  %v7651_v27 = vpack.c.bf16 %v6700_v26, %v6700_v26 }
 0x4bc   : > { %v6721_v40 = vmax.f32 %v6719_v57, %v6720_v13  ;;  %v7652_v6 = vpack.c.bf16 %v6707_v45, %v6707_v45  ;;  %v7653_v48 = vpack.c.bf16 %v6714_v20, %v6714_v20  ;;  %v7038_v33 = vunpack.c.l.b16 %v7651_v27 }
 0x4be   : > { %v7654_v39 = vpack.c.bf16 %v6721_v40, %v6721_v40  ;;  %v7039_v52 = vunpack.c.l.b16 %v7652_v6  ;;  %v7040_v47 = vunpack.c.l.b16 %v7653_v48  ;;  %v7101_v51 = vsel %vm7048_vm9, %v7038_v33, %v7100_v18 }
 0x4c0   : > { %v7041_v10 = vunpack.c.l.b16 %v7654_v39  ;;  %v7102_v1 = vsel %vm7050_vm10, %v7039_v52, %v7101_v51 }
 0x4c1   : > { %v7103_v23 = vsel %vm7052_vm11, %v7040_v47, %v7102_v1 }
 0x4c2   : > { %v7104_v4 = vsel %vm7054_vm12, %v7041_v10, %v7103_v23 }
 0x4c3   : > { %v7112_v31 = vpack.c.b16 %v7104_v4, %v7104_v4 }
 0x4c5   : > { %7129 = vst.msk [vmem:[%s11336_s22 + $0x1c] sm:$0xf] %vm7121_vm13, %v7112_v31 }
 0x4c6   : > { %8729 = shalt.err (!%p8726_p3)
}
 0x4c7   : > { %s8730_s20 = scalar_lea.hbm %s11600_s17, 512  ;;  %s8734_s8 = scalar_lea.hbm %s11655_s7, 1024 }
 0x4c8   : > { %p8731_p4 = scmp.ne.s32.totalorder %s11600_s17, %s8730_s20  ;;  %p8735_p9 = scmp.lt.s32.totalorder %s11600_s17, %s11655_s7 }
 0x4c9   : > { %p8736_p10 = scmp.lt.s32.totalorder %s8734_s8, %s8730_s20 }
 0x4ca   : > { %p8732_p7 = pnand %p8731_p4, %p8861_p5 }
 0x4cb   : > { %p8737_p11 = por %p8736_p10, %p8735_p9 }
 0x4cc   : > { %p8733_p8 = pneg %p8732_p7 }
 0x4ce   : > { %p8738_p12 = pnand %p8737_p11, %p8733_p8 }
 0x4d0   : > { %8741 = shalt.err (!%p8738_p12)
}
 0x4d1   : > { %s8781_s15 = smov 64   ;;  %s8782_s16 = smov 4  }
 0x4d2   : > { %8671 = dma.vmem_to_hbm [thread:$0]  (%p8861_p5), %s11602_s14, 512, %s11600_s17, %s11608_s28, %s8781_s15, %s8781_s15, %s8782_s16  }
 0x4d3 PF: > { %p8677_p13 = scmp.ge.s32.totalorder %s8776_s27, 2  ;;  %s7159_s18 = sand.u32 1, %s8764_s24  }
 0x4d4   : > { %s7160_s19 = scalar_lea.sflag [#allocation5], %s7159_s18 }
 0x4d5   : > { %p8674_p0 = pnand %p8677_p13, %p8865_p6 }
 0x4d7   : > { %p8675_p1 = pneg %p8674_p0 }
 0x4d9   : > { %8759 = dma.done.wait (%p8675_p1), %s7160_s19, 512  }
 0x4da   : > { %8761 = vsyncadd (%p8675_p1), %s7160_s19, 4294966784  ;;  %p17_p2 = scmp.ge.s32.totalorder %s8848_s30, 4   ;;  %s11840_s24 = smov %s8768_s25 }
 0x4db   : > { %s11841_s25 = smov %s8772_s26  ;;  %s11842_s26 = smov %s8859_s10 }
 0x4dc   : > { %s11843_s27 = smov %s8848_s30  ;;  %19 = sbr.rel (!%p17_p2) target bundleno = 3 (0x3), region = 103 }
 0x4e1   :  { %7165 = vsyncpa [#allocation5], 1 }
 0x4e2   :  { %7167 = vsyncpa [#allocation5 + $0x1], 1 }

</bundles_post_ra>
